<compile_context>
chip_gen: v7x
topology: tpu7x:2x2x1
jax: 0.10.0
libtpu: 0.0.40
codegen_flags: <defaults>
</compile_context>

<pallas_src>
import math

import numpy as np
import jax
import jax.numpy as jnp
from jax.experimental import pallas as pl
from jax.experimental.pallas import tpu as pltpu

C_IN = 3
C_OUT = 12                       # channels after conv5 / attention
KMAX_LANES = (7 * 7 + 1) * 8     # widest packed weight row (conv4 group, K = 400)


# ----------------------------- host-side weight packing ------------------------------ #
def _group_mat(wg, bias, k, cout_pad):
    """(Cout, 3, k, k) conv-group weight -> (cout_pad, (k*k+1)*8) matmul matrix.

    Columns match the in-kernel slab layout: tap t = kh*k+kw occupies columns [t*8, t*8+3)
    (channel-minor); the bias sits in column k*k*8 (the slab's 'ones' row); everything else is
    zero so the 8-row padding of the feature slabs is inert."""
    cout = wg.shape[0]
    taps = jnp.transpose(wg.astype(jnp.float32), (0, 2, 3, 1)).reshape(cout, k * k, 3)
    taps = jnp.pad(taps, ((0, 0), (0, 0), (0, 5)))                   # (cout, k*k, 8)
    flat = taps.reshape(cout, k * k * 8)
    bias_blk = jnp.zeros((cout, 8), jnp.float32)
    if bias is not None:
        bias_blk = bias_blk.at[:, 0].set(bias.astype(jnp.float32))
    m = jnp.concatenate([flat, bias_blk], axis=1)                    # (cout, (k*k+1)*8)
    return jnp.pad(m, ((0, cout_pad - cout), (0, 0)))


def pack_weights(p):
    """Pack every weight/bias into ONE (rows, KMAX_LANES) f32 slab (single input, single DMA,
    static row offsets in-kernel)."""
    mats, rows = [], {}

    def add(name, m):
        rows[name] = sum(x.shape[0] for x in mats)
        mats.append(jnp.pad(m, ((0, 0), (0, KMAX_LANES - m.shape[1]))))

    add("w1", _group_mat(p["w1"], p["b1"], 1, 8))
    add("w2", _group_mat(p["w2"], p["b2"], 3, 8))
    add("w3a", _group_mat(p["w3"][:, 0:3], p["b3"], 5, 8))
    add("w3b", _group_mat(p["w3"][:, 3:6], None, 5, 8))
    add("w4a", _group_mat(p["w4"][:, 0:3], p["b4"], 7, 8))
    add("w4b", _group_mat(p["w4"][:, 3:6], None, 7, 8))
    add("w5a", _group_mat(p["w5"][:, 0:3], p["b5"], 3, 16))
    add("w5b", _group_mat(p["w5"][:, 3:6], None, 3, 16))
    add("w5c", _group_mat(p["w5"][:, 6:9], None, 3, 16))
    add("w5d", _group_mat(p["w5"][:, 9:12], None, 3, 16))

    # fused value+key projection on x5aug = [x5(16 rows); ones-piece(8 rows)]:
    # rows 0..11 -> value, row 12 -> key; biases in column 16 (the ones row).
    wv = p["wv"].reshape(C_OUT, C_OUT).astype(jnp.float32)
    wk = p["wk"].reshape(1, C_OUT).astype(jnp.float32)
    vk = jnp.zeros((16, 24), jnp.float32)
    vk = vk.at[0:C_OUT, 0:C_OUT].set(wv).at[C_OUT, 0:C_OUT].set(wk[0])
    vk = vk.at[0:C_OUT, 16].set(p["bv"].astype(jnp.float32))
    vk = vk.at[C_OUT, 16].set(p["bk"].astype(jnp.float32)[0])
    add("wvk", vk)

    wq = jnp.zeros((8, 24), jnp.float32)
    wq = wq.at[0, 0:C_OUT].set(p["wq"].reshape(1, C_OUT).astype(jnp.float32)[0])
    wq = wq.at[0, 16].set(p["bq"].astype(jnp.float32)[0])
    add("wq", wq)

    return jnp.concatenate(mats, axis=0), rows


# ----------------------------- fused conv + attention kernel ------------------------------ #
def make_fused_kernel(H, W, rows):
    HW = H * W

    def kernel(x_ref, widx_ref, wpack_ref, att_ref, x5_ref):
        f32 = jnp.float32
        pos = jax.lax.broadcasted_iota(jnp.int32, (1, HW), 1)        # flat spatial index
        w_idx = widx_ref[...]                                        # (1, HW) column index
        row_id = jax.lax.broadcasted_iota(jnp.int32, (8, HW), 0)
        ones_piece = jnp.where(row_id == 0, 1.0, 0.0).astype(f32)    # bias row for every slab

        # ---- per-offset validity masks, shared by every conv / source ----
        mask_cache = {}

        def mask_for(oh, ow):
            if (oh, ow) not in mask_cache:
                conds = []
                if oh > 0:
                    conds.append(pos < (H - oh) * W)     # h < H - oh
                elif oh < 0:
                    conds.append(pos >= (-oh) * W)       # h >= -oh
                if ow > 0:
                    conds.append(w_idx < (W - ow))
                elif ow < 0:
                    conds.append(w_idx >= (-ow))
                m = None
                for c in conds:
                    m = c if m is None else (m & c)
                mask_cache[(oh, ow)] = m
            return mask_cache[(oh, ow)]

        # ---- rolled + masked feature pieces, cached per (source, offset) ----
        piece_cache = {}

        def piece(name, feat, oh, ow):
            key = (name, oh, ow)
            if key not in piece_cache:
                d = oh * W + ow
                s = feat if d == 0 else pltpu.roll(feat, shift=(-d) % HW, axis=1)
                m = mask_for(oh, ow)
                piece_cache[key] = s if m is None else jnp.where(m, s, 0.0)
            return piece_cache[key]

        # ---- tap-stacked contraction slabs, cached per (source, kernel size) ----
        slab_cache = {}

        def slab(name, feat, k):
            key = (name, k)
            if key not in slab_cache:
                pad = (k - 1) // 2
                pieces = [piece(name, feat, kh - pad, kw - pad)
                          for kh in range(k) for kw in range(k)]
                slab_cache[key] = jnp.concatenate(pieces + [ones_piece], axis=0)
            return slab_cache[key]

        def conv(groups, cout_pad):
            """ONE stacked matmul per (conv, input group); bias folded via the ones row."""
            acc = None
            for name, feat, k, wname in groups:
                kdim = (k * k + 1) * 8
                r0 = rows[wname]
                w = wpack_ref[r0:r0 + cout_pad, 0:kdim]
                part = jnp.dot(w, slab(name, feat, k), preferred_element_type=f32)
                acc = part if acc is None else acc + part
            return jnp.maximum(acc, 0.0)

        # ---------------- conv chain, all intermediates stay in VMEM ----------------
        x = x_ref[0]                                                  # (3, HW)
        x8 = jnp.concatenate([x, jnp.zeros((5, HW), f32)], axis=0)    # pad channels to 8
        x1 = conv([("x", x8, 1, "w1")], 8)                            # 1x1
        x2 = conv([("x1", x1, 3, "w2")], 8)                           # 3x3
        x3 = conv([("x1", x1, 5, "w3a"), ("x2", x2, 5, "w3b")], 8)    # 5x5 on cat(x1,x2)
        x4 = conv([("x2", x2, 7, "w4a"), ("x3", x3, 7, "w4b")], 8)    # 7x7 on cat(x2,x3)
        x5 = conv([("x1", x1, 3, "w5a"), ("x2", x2, 3, "w5b"),
                   ("x3", x3, 3, "w5c"), ("x4", x4, 3, "w5d")], 16)   # (16, HW), rows 12..15 = 0

        # ---------------- SelfAttention(12): Cq = 12 // 8 = 1 ----------------
        x5aug = jnp.concatenate([x5, ones_piece], axis=0)             # (24, HW)
        r_vk = rows["wvk"]
        vk = jnp.dot(wpack_ref[r_vk:r_vk + 16, 0:24], x5aug,
                     preferred_element_type=f32)                      # (16, HW)
        v = vk[0:C_OUT, :]                                            # (12, HW)
        k_row = vk[C_OUT:C_OUT + 1, :]                                # (1, HW)
        r_q = rows["wq"]
        q_col = jax.lax.dot_general(x5aug, wpack_ref[r_q:r_q + 1, 0:24],
                                     (((0,), (1,)), ((), ())),
                                     preferred_element_type=f32)      # (HW, 1)

        # rank-1 closed-form row max (exact): max_j q_i*k_j = q_i*kmax if q_i>=0 else q_i*kmin
        k_max = jnp.max(k_row, axis=1, keepdims=True)                 # (1, 1)
        k_min = jnp.min(k_row, axis=1, keepdims=True)
        m_col = jnp.where(q_col >= 0.0, q_col * k_max, q_col * k_min) # (HW, 1)

        # TODO(synk): for large images (HW >~ 2k) this (HW, HW) slab should be tiled flash-style
        # (mandatory on v7x's 64 MiB VMEM); untiled it fits comfortably at the sizes used here.
        e = jnp.exp(q_col * k_row - m_col)                            # (HW, HW)
        z = jnp.sum(e, axis=-1, keepdims=True)                        # (HW, 1)
        probs = e * pl.reciprocal(z, approx=True)

        # bmm(softmax(scores), value^T) -> (HW, C): keep torch's (HW, C)-contiguous bmm layout so
        # the subsequent raw `.view(B, C, H, W)` is a metadata-only reshape in the wrapper.
        att = jax.lax.dot_general(probs, v, (((1,), (1,)), ((), ())),
                                  preferred_element_type=f32)         # (HW, 12)

        att_ref[0] = att
        x5_ref[0] = x5[0:C_OUT, :]

    return kernel


# ----------------------------- elementwise epilogue kernel ------------------------------ #
def make_epilogue_kernel(reps):
    def kernel(gamma_ref, att_ref, x5_ref, x_ref, o_ref):
        g = gamma_ref[0, 0]                                # SMEM scalar
        y = g * att_ref[...] + x5_ref[...]                 # gamma*attention + x5 (flat mem order)
        xb = x_ref[...]                                    # (N, 3*HW)
        xt = jnp.concatenate([xb] * reps, axis=-1)         # in-VMEM channel tiling of x (4x)
        o_ref[...] = jnp.maximum(y * xt - y + 1.0, 0.0)    # relu(x5*x - x5 + 1)
    return kernel


# ------------------------------------ Parameters ------------------------------------ #
def _uinit(key, shape, fan_in):
    bound = 1.0 / math.sqrt(fan_in)
    return jax.random.uniform(key, shape, jnp.float32, -bound, bound)


def init_params(key):
    ks = jax.random.split(key, 16)
    p = {}
    p["w1"] = _uinit(ks[0], (3, 3, 1, 1), 3 * 1 * 1);    p["b1"] = _uinit(ks[1], (3,), 3 * 1 * 1)
    p["w2"] = _uinit(ks[2], (3, 3, 3, 3), 3 * 3 * 3);    p["b2"] = _uinit(ks[3], (3,), 3 * 3 * 3)
    p["w3"] = _uinit(ks[4], (3, 6, 5, 5), 6 * 5 * 5);    p["b3"] = _uinit(ks[5], (3,), 6 * 5 * 5)
    p["w4"] = _uinit(ks[6], (3, 6, 7, 7), 6 * 7 * 7);    p["b4"] = _uinit(ks[7], (3,), 6 * 7 * 7)
    p["w5"] = _uinit(ks[8], (12, 12, 3, 3), 12 * 3 * 3); p["b5"] = _uinit(ks[9], (12,), 12 * 3 * 3)
    # SelfAttention(12): query/key 12 -> 1, value 12 -> 12, gamma init 0
    p["wq"] = _uinit(ks[10], (1, 12, 1, 1), 12);  p["bq"] = _uinit(ks[11], (1,), 12)
    p["wk"] = _uinit(ks[12], (1, 12, 1, 1), 12);  p["bk"] = _uinit(ks[13], (1,), 12)
    p["wv"] = _uinit(ks[14], (12, 12, 1, 1), 12); p["bv"] = _uinit(ks[15], (12,), 12)
    p["gamma"] = jnp.zeros((1, 1), jnp.float32)
    return p


# --------------------------------------- Forward --------------------------------------- #
def dehaze_net_forward(p, x):
    x = x.astype(jnp.float32)
    N, Cin, H, W = x.shape
    assert Cin == C_IN and C_OUT % Cin == 0
    HW = H * W

    wpack, rows = pack_weights(p)
    x2d = x.reshape(N, Cin, HW)
    w_idx = jnp.asarray((np.arange(HW, dtype=np.int32) % W).reshape(1, HW))

    vmem_limit = int(min(100 * 1024 * 1024, max(32 * 1024 * 1024, 8 * HW * HW * 4)))

    att, x5o = pl.pallas_call(
        make_fused_kernel(H, W, rows),
        out_shape=(jax.ShapeDtypeStruct((N, HW, C_OUT), jnp.float32),   # torch bmm layout (HW, C)
                   jax.ShapeDtypeStruct((N, C_OUT, HW), jnp.float32)),  # x5 in NCHW-flat order
        grid=(N,),
        in_specs=[pl.BlockSpec((1, Cin, HW), lambda b: (b, 0, 0)),
                  pl.BlockSpec((1, HW), lambda b: (0, 0)),
                  pl.BlockSpec(wpack.shape, lambda b: (0, 0))],
        out_specs=(pl.BlockSpec((1, HW, C_OUT), lambda b: (b, 0, 0)),
                   pl.BlockSpec((1, C_OUT, HW), lambda b: (b, 0, 0))),
        compiler_params=pltpu.CompilerParams(
            dimension_semantics=("parallel",),
            vmem_limit_bytes=vmem_limit),
    )(x2d, w_idx, wpack)

    # PyTorch's `out.view(B, C, H, W)` raw-reinterprets the contiguous (B, HW, C) bmm buffer;
    # reproduced with metadata-only reshapes (no transpose / extra HBM traffic).
    att_flat = att.reshape(N, C_OUT * HW)
    x5_flat = x5o.reshape(N, C_OUT * HW)
    x_flat = x2d.reshape(N, Cin * HW)

    # TODO(synk): the reference's `x5 * x` multiplies a 12-channel tensor by the 3-channel input,
    # which does not broadcast in PyTorch; x is channel-tiled (4x) here so the epilogue is
    # well defined (same interpretation as the previous revision).
    clean = pl.pallas_call(
        make_epilogue_kernel(C_OUT // Cin),
        out_shape=jax.ShapeDtypeStruct((N, C_OUT * HW), jnp.float32),
        in_specs=[pl.BlockSpec(memory_space=pltpu.MemorySpace.SMEM),
                  pl.BlockSpec(memory_space=pltpu.MemorySpace.VMEM),
                  pl.BlockSpec(memory_space=pltpu.MemorySpace.VMEM),
                  pl.BlockSpec(memory_space=pltpu.MemorySpace.VMEM)],
        out_specs=pl.BlockSpec(memory_space=pltpu.MemorySpace.VMEM),
    )(p["gamma"], att_flat, x5_flat, x_flat)

    return clean.reshape(N, C_OUT, H, W)


if __name__ == "__main__":
    key = jax.random.PRNGKey(0)
    k_x, k_p = jax.random.split(key)
    N, H, W = 2, 16, 16
    x = jax.random.uniform(k_x, (N, 3, H, W), jnp.float32)
    params = init_params(k_p)

    out = jax.jit(dehaze_net_forward)(params, x)
    jax.block_until_ready(out)
    assert out.shape == (N, 12, H, W) and out.dtype == jnp.float32
    assert bool(jnp.all(jnp.isfinite(out)))
    print("KERNEL_OK")
</pallas_src>

<mosaic_0001>
module attributes {stable_mosaic.version = 11 : i64} {
  func.func @kernel(%arg0: memref<1x1xf32, #tpu.memory_space<smem>>, %arg1: memref<2x3072xf32, #tpu.memory_space<vmem>>, %arg2: memref<2x3072xf32, #tpu.memory_space<vmem>>, %arg3: memref<2x768xf32, #tpu.memory_space<vmem>>, %arg4: memref<2x3072xf32, #tpu.memory_space<vmem>>) attributes {dimension_semantics = [], scalar_prefetch = 0 : i64, scratch_operands = 0 : i64, tpu.core_type = #tpu.core_type<tc>} {
    %c0 = arith.constant 0 : index
    %c0_0 = arith.constant 0 : index
    %0 = memref.load %arg0[%c0, %c0_0] : memref<1x1xf32, #tpu.memory_space<smem>>
    %c0_1 = arith.constant 0 : index
    %c0_2 = arith.constant 0 : index
    %1 = vector.load %arg1[%c0_1, %c0_2] : memref<2x3072xf32, #tpu.memory_space<vmem>>, vector<2x3072xf32>
    %2 = vector.broadcast %0 : f32 to vector<2x3072xf32>
    %3 = arith.mulf %2, %1 : vector<2x3072xf32>
    %c0_3 = arith.constant 0 : index
    %c0_4 = arith.constant 0 : index
    %4 = vector.load %arg2[%c0_3, %c0_4] : memref<2x3072xf32, #tpu.memory_space<vmem>>, vector<2x3072xf32>
    %5 = arith.addf %3, %4 : vector<2x3072xf32>
    %c0_5 = arith.constant 0 : index
    %c0_6 = arith.constant 0 : index
    %6 = vector.load %arg3[%c0_5, %c0_6] : memref<2x768xf32, #tpu.memory_space<vmem>>, vector<2x768xf32>
    %7 = tpu.concatenate %6, %6, %6, %6 in 1 : vector<2x768xf32>, vector<2x768xf32>, vector<2x768xf32>, vector<2x768xf32> -> vector<2x3072xf32>
    %8 = arith.mulf %5, %7 : vector<2x3072xf32>
    %9 = arith.subf %8, %5 : vector<2x3072xf32>
    %cst = arith.constant 1.000000e+00 : f32
    %10 = vector.broadcast %cst : f32 to vector<2x3072xf32>
    %11 = arith.addf %9, %10 : vector<2x3072xf32>
    %cst_7 = arith.constant 0.000000e+00 : f32
    %12 = vector.broadcast %cst_7 : f32 to vector<2x3072xf32>
    %13 = arith.maximumf %11, %12 : vector<2x3072xf32>
    %c0_8 = arith.constant 0 : index
    %c0_9 = arith.constant 0 : index
    %14 = vector.load %arg4[%c0_8, %c0_9] : memref<2x3072xf32, #tpu.memory_space<vmem>>, vector<2x3072xf32>
    tpu.vector_store %arg4[%c0_8, %c0_9], %13 {strides = array<i32>} : memref<2x3072xf32, #tpu.memory_space<vmem>>, vector<2x3072xf32>,
    return
  }
}

module attributes {stable_mosaic.version = 11 : i64} {
  func.func @kernel(%arg0: i32, %arg1: memref<1x3x256xf32, #tpu.memory_space<vmem>>, %arg2: memref<1x256xi32, #tpu.memory_space<vmem>>, %arg3: memref<136x400xf32, #tpu.memory_space<vmem>>, %arg4: memref<1x256x12xf32, #tpu.memory_space<vmem>>, %arg5: memref<1x12x256xf32, #tpu.memory_space<vmem>>) attributes {dimension_semantics = [#tpu.dimension_semantics<parallel>], iteration_bounds = array<i64: 2>, scalar_prefetch = 0 : i64, scratch_operands = 0 : i64, tpu.core_type = #tpu.core_type<tc>, window_params = [{transform_indices = @transform_0, window_bounds = array<i64: 1, 3, 256>}, {pipeline_mode = #tpu.pipeline_mode<synchronous>, transform_indices = @transform_1, window_bounds = array<i64: 1, 256>}, {pipeline_mode = #tpu.pipeline_mode<synchronous>, transform_indices = @transform_2, window_bounds = array<i64: 136, 400>}, {transform_indices = @transform_3, window_bounds = array<i64: 1, 256, 12>}, {transform_indices = @transform_4, window_bounds = array<i64: 1, 12, 256>}]} {
    %0 = tpu.iota {dimensions = array<i32: 1>} : vector<1x256xi32>
    %c0 = arith.constant 0 : index
    %c0_0 = arith.constant 0 : index
    %1 = vector.load %arg2[%c0, %c0_0] : memref<1x256xi32, #tpu.memory_space<vmem>>, vector<1x256xi32>
    %2 = tpu.iota {dimensions = array<i32: 0>} : vector<8x256xi32>
    %c0_i32 = arith.constant 0 : i32
    %3 = vector.broadcast %c0_i32 : i32 to vector<8x256xi32>
    %4 = arith.cmpi eq, %2, %3 : vector<8x256xi32>
    %cst = arith.constant 1.000000e+00 : f32
    %cst_1 = arith.constant 0.000000e+00 : f32
    %5 = vector.broadcast %cst : f32 to vector<8x256xf32>
    %6 = vector.broadcast %cst_1 : f32 to vector<8x256xf32>
    %7 = arith.select %4, %5, %6 : vector<8x256xi1>, vector<8x256xf32>
    %c0_2 = arith.constant 0 : index
    %c0_3 = arith.constant 0 : index
    %c0_4 = arith.constant 0 : index
    %8 = vector.load %arg1[%c0_2, %c0_3, %c0_4] : memref<1x3x256xf32, #tpu.memory_space<vmem>>, vector<1x3x256xf32>
    %9 = vector.shape_cast %8 : vector<1x3x256xf32> to vector<3x256xf32>
    %cst_5 = arith.constant 0.000000e+00 : f32
    %10 = vector.broadcast %cst_5 : f32 to vector<5x256xf32>
    %11 = tpu.concatenate %9, %10 in 0 : vector<3x256xf32>, vector<5x256xf32> -> vector<8x256xf32>
    %c0_6 = arith.constant 0 : index
    %c0_7 = arith.constant 0 : index
    %12 = vector.load %arg3[%c0_6, %c0_7] : memref<136x400xf32, #tpu.memory_space<vmem>>, vector<8x16xf32>
    %13 = tpu.concatenate %11, %7 in 0 : vector<8x256xf32>, vector<8x256xf32> -> vector<16x256xf32>
    %cst_8 = arith.constant dense<0.000000e+00> : vector<8x256xf32>
    %14 = tpu.matmul %12, %13, %cst_8 {dimension_numbers = #tpu.dot_dimension_numbers<[1], [0], [0], [1], [0, 0, 1, 1], [], []>} : vector<8x16xf32>, vector<16x256xf32>, vector<8x256xf32> -> vector<8x256xf32>
    %cst_9 = arith.constant 0.000000e+00 : f32
    %15 = vector.broadcast %cst_9 : f32 to vector<8x256xf32>
    %16 = arith.maximumf %14, %15 : vector<8x256xf32>
    %c8 = arith.constant 8 : index
    %c0_10 = arith.constant 0 : index
    %17 = vector.load %arg3[%c8, %c0_10] : memref<136x400xf32, #tpu.memory_space<vmem>>, vector<8x80xf32>
    %c17_i32 = arith.constant 17 : i32
    %18 = tpu.dynamic_rotate %16 by %c17_i32 dim 1 : vector<8x256xf32>, i32 -> vector<8x256xf32>
    %c16_i32 = arith.constant 16 : i32
    %19 = vector.broadcast %c16_i32 : i32 to vector<1x256xi32>
    %20 = arith.cmpi sge, %0, %19 : vector<1x256xi32>
    %c1_i32 = arith.constant 1 : i32
    %21 = vector.broadcast %c1_i32 : i32 to vector<1x256xi32>
    %22 = arith.cmpi sge, %1, %21 : vector<1x256xi32>
    %23 = arith.andi %20, %22 : vector<1x256xi1>
    %cst_11 = arith.constant 0.000000e+00 : f32
    %24 = vector.shape_cast %23 : vector<1x256xi1> to vector<1x256xi1>
    %25 = vector.broadcast %24 : vector<1x256xi1> to vector<8x256xi1>
    %26 = vector.broadcast %cst_11 : f32 to vector<8x256xf32>
    %27 = arith.select %25, %18, %26 : vector<8x256xi1>, vector<8x256xf32>
    %c16_i32_12 = arith.constant 16 : i32
    %28 = tpu.dynamic_rotate %16 by %c16_i32_12 dim 1 : vector<8x256xf32>, i32 -> vector<8x256xf32>
    %c16_i32_13 = arith.constant 16 : i32
    %29 = vector.broadcast %c16_i32_13 : i32 to vector<1x256xi32>
    %30 = arith.cmpi sge, %0, %29 : vector<1x256xi32>
    %cst_14 = arith.constant 0.000000e+00 : f32
    %31 = vector.shape_cast %30 : vector<1x256xi1> to vector<1x256xi1>
    %32 = vector.broadcast %31 : vector<1x256xi1> to vector<8x256xi1>
    %33 = vector.broadcast %cst_14 : f32 to vector<8x256xf32>
    %34 = arith.select %32, %28, %33 : vector<8x256xi1>, vector<8x256xf32>
    %c15_i32 = arith.constant 15 : i32
    %35 = tpu.dynamic_rotate %16 by %c15_i32 dim 1 : vector<8x256xf32>, i32 -> vector<8x256xf32>
    %c16_i32_15 = arith.constant 16 : i32
    %36 = vector.broadcast %c16_i32_15 : i32 to vector<1x256xi32>
    %37 = arith.cmpi sge, %0, %36 : vector<1x256xi32>
    %c15_i32_16 = arith.constant 15 : i32
    %38 = vector.broadcast %c15_i32_16 : i32 to vector<1x256xi32>
    %39 = arith.cmpi slt, %1, %38 : vector<1x256xi32>
    %40 = arith.andi %37, %39 : vector<1x256xi1>
    %cst_17 = arith.constant 0.000000e+00 : f32
    %41 = vector.shape_cast %40 : vector<1x256xi1> to vector<1x256xi1>
    %42 = vector.broadcast %41 : vector<1x256xi1> to vector<8x256xi1>
    %43 = vector.broadcast %cst_17 : f32 to vector<8x256xf32>
    %44 = arith.select %42, %35, %43 : vector<8x256xi1>, vector<8x256xf32>
    %c1_i32_18 = arith.constant 1 : i32
    %45 = tpu.dynamic_rotate %16 by %c1_i32_18 dim 1 : vector<8x256xf32>, i32 -> vector<8x256xf32>
    %c1_i32_19 = arith.constant 1 : i32
    %46 = vector.broadcast %c1_i32_19 : i32 to vector<1x256xi32>
    %47 = arith.cmpi sge, %1, %46 : vector<1x256xi32>
    %cst_20 = arith.constant 0.000000e+00 : f32
    %48 = vector.shape_cast %47 : vector<1x256xi1> to vector<1x256xi1>
    %49 = vector.broadcast %48 : vector<1x256xi1> to vector<8x256xi1>
    %50 = vector.broadcast %cst_20 : f32 to vector<8x256xf32>
    %51 = arith.select %49, %45, %50 : vector<8x256xi1>, vector<8x256xf32>
    %c255_i32 = arith.constant 255 : i32
    %52 = tpu.dynamic_rotate %16 by %c255_i32 dim 1 : vector<8x256xf32>, i32 -> vector<8x256xf32>
    %c15_i32_21 = arith.constant 15 : i32
    %53 = vector.broadcast %c15_i32_21 : i32 to vector<1x256xi32>
    %54 = arith.cmpi slt, %1, %53 : vector<1x256xi32>
    %cst_22 = arith.constant 0.000000e+00 : f32
    %55 = vector.shape_cast %54 : vector<1x256xi1> to vector<1x256xi1>
    %56 = vector.broadcast %55 : vector<1x256xi1> to vector<8x256xi1>
    %57 = vector.broadcast %cst_22 : f32 to vector<8x256xf32>
    %58 = arith.select %56, %52, %57 : vector<8x256xi1>, vector<8x256xf32>
    %c241_i32 = arith.constant 241 : i32
    %59 = tpu.dynamic_rotate %16 by %c241_i32 dim 1 : vector<8x256xf32>, i32 -> vector<8x256xf32>
    %c240_i32 = arith.constant 240 : i32
    %60 = vector.broadcast %c240_i32 : i32 to vector<1x256xi32>
    %61 = arith.cmpi slt, %0, %60 : vector<1x256xi32>
    %c1_i32_23 = arith.constant 1 : i32
    %62 = vector.broadcast %c1_i32_23 : i32 to vector<1x256xi32>
    %63 = arith.cmpi sge, %1, %62 : vector<1x256xi32>
    %64 = arith.andi %61, %63 : vector<1x256xi1>
    %cst_24 = arith.constant 0.000000e+00 : f32
    %65 = vector.shape_cast %64 : vector<1x256xi1> to vector<1x256xi1>
    %66 = vector.broadcast %65 : vector<1x256xi1> to vector<8x256xi1>
    %67 = vector.broadcast %cst_24 : f32 to vector<8x256xf32>
    %68 = arith.select %66, %59, %67 : vector<8x256xi1>, vector<8x256xf32>
    %c240_i32_25 = arith.constant 240 : i32
    %69 = tpu.dynamic_rotate %16 by %c240_i32_25 dim 1 : vector<8x256xf32>, i32 -> vector<8x256xf32>
    %c240_i32_26 = arith.constant 240 : i32
    %70 = vector.broadcast %c240_i32_26 : i32 to vector<1x256xi32>
    %71 = arith.cmpi slt, %0, %70 : vector<1x256xi32>
    %cst_27 = arith.constant 0.000000e+00 : f32
    %72 = vector.shape_cast %71 : vector<1x256xi1> to vector<1x256xi1>
    %73 = vector.broadcast %72 : vector<1x256xi1> to vector<8x256xi1>
    %74 = vector.broadcast %cst_27 : f32 to vector<8x256xf32>
    %75 = arith.select %73, %69, %74 : vector<8x256xi1>, vector<8x256xf32>
    %c239_i32 = arith.constant 239 : i32
    %76 = tpu.dynamic_rotate %16 by %c239_i32 dim 1 : vector<8x256xf32>, i32 -> vector<8x256xf32>
    %c240_i32_28 = arith.constant 240 : i32
    %77 = vector.broadcast %c240_i32_28 : i32 to vector<1x256xi32>
    %78 = arith.cmpi slt, %0, %77 : vector<1x256xi32>
    %c15_i32_29 = arith.constant 15 : i32
    %79 = vector.broadcast %c15_i32_29 : i32 to vector<1x256xi32>
    %80 = arith.cmpi slt, %1, %79 : vector<1x256xi32>
    %81 = arith.andi %78, %80 : vector<1x256xi1>
    %cst_30 = arith.constant 0.000000e+00 : f32
    %82 = vector.shape_cast %81 : vector<1x256xi1> to vector<1x256xi1>
    %83 = vector.broadcast %82 : vector<1x256xi1> to vector<8x256xi1>
    %84 = vector.broadcast %cst_30 : f32 to vector<8x256xf32>
    %85 = arith.select %83, %76, %84 : vector<8x256xi1>, vector<8x256xf32>
    %86 = tpu.concatenate %27, %34, %44, %51, %16, %58, %68, %75, %85, %7 in 0 : vector<8x256xf32>, vector<8x256xf32>, vector<8x256xf32>, vector<8x256xf32>, vector<8x256xf32>, vector<8x256xf32>, vector<8x256xf32>, vector<8x256xf32>, vector<8x256xf32>, vector<8x256xf32> -> vector<80x256xf32>
    %cst_31 = arith.constant dense<0.000000e+00> : vector<8x256xf32>
    %87 = tpu.matmul %17, %86, %cst_31 {dimension_numbers = #tpu.dot_dimension_numbers<[1], [0], [0], [1], [0, 0, 1, 1], [], []>} : vector<8x80xf32>, vector<80x256xf32>, vector<8x256xf32> -> vector<8x256xf32>
    %cst_32 = arith.constant 0.000000e+00 : f32
    %88 = vector.broadcast %cst_32 : f32 to vector<8x256xf32>
    %89 = arith.maximumf %87, %88 : vector<8x256xf32>
    %c16 = arith.constant 16 : index
    %c0_33 = arith.constant 0 : index
    %90 = vector.load %arg3[%c16, %c0_33] : memref<136x400xf32, #tpu.memory_space<vmem>>, vector<8x208xf32>
    %c34_i32 = arith.constant 34 : i32
    %91 = tpu.dynamic_rotate %16 by %c34_i32 dim 1 : vector<8x256xf32>, i32 -> vector<8x256xf32>
    %c32_i32 = arith.constant 32 : i32
    %92 = vector.broadcast %c32_i32 : i32 to vector<1x256xi32>
    %93 = arith.cmpi sge, %0, %92 : vector<1x256xi32>
    %c2_i32 = arith.constant 2 : i32
    %94 = vector.broadcast %c2_i32 : i32 to vector<1x256xi32>
    %95 = arith.cmpi sge, %1, %94 : vector<1x256xi32>
    %96 = arith.andi %93, %95 : vector<1x256xi1>
    %cst_34 = arith.constant 0.000000e+00 : f32
    %97 = vector.shape_cast %96 : vector<1x256xi1> to vector<1x256xi1>
    %98 = vector.broadcast %97 : vector<1x256xi1> to vector<8x256xi1>
    %99 = vector.broadcast %cst_34 : f32 to vector<8x256xf32>
    %100 = arith.select %98, %91, %99 : vector<8x256xi1>, vector<8x256xf32>
    %c33_i32 = arith.constant 33 : i32
    %101 = tpu.dynamic_rotate %16 by %c33_i32 dim 1 : vector<8x256xf32>, i32 -> vector<8x256xf32>
    %c32_i32_35 = arith.constant 32 : i32
    %102 = vector.broadcast %c32_i32_35 : i32 to vector<1x256xi32>
    %103 = arith.cmpi sge, %0, %102 : vector<1x256xi32>
    %c1_i32_36 = arith.constant 1 : i32
    %104 = vector.broadcast %c1_i32_36 : i32 to vector<1x256xi32>
    %105 = arith.cmpi sge, %1, %104 : vector<1x256xi32>
    %106 = arith.andi %103, %105 : vector<1x256xi1>
    %cst_37 = arith.constant 0.000000e+00 : f32
    %107 = vector.shape_cast %106 : vector<1x256xi1> to vector<1x256xi1>
    %108 = vector.broadcast %107 : vector<1x256xi1> to vector<8x256xi1>
    %109 = vector.broadcast %cst_37 : f32 to vector<8x256xf32>
    %110 = arith.select %108, %101, %109 : vector<8x256xi1>, vector<8x256xf32>
    %c32_i32_38 = arith.constant 32 : i32
    %111 = tpu.dynamic_rotate %16 by %c32_i32_38 dim 1 : vector<8x256xf32>, i32 -> vector<8x256xf32>
    %c32_i32_39 = arith.constant 32 : i32
    %112 = vector.broadcast %c32_i32_39 : i32 to vector<1x256xi32>
    %113 = arith.cmpi sge, %0, %112 : vector<1x256xi32>
    %cst_40 = arith.constant 0.000000e+00 : f32
    %114 = vector.shape_cast %113 : vector<1x256xi1> to vector<1x256xi1>
    %115 = vector.broadcast %114 : vector<1x256xi1> to vector<8x256xi1>
    %116 = vector.broadcast %cst_40 : f32 to vector<8x256xf32>
    %117 = arith.select %115, %111, %116 : vector<8x256xi1>, vector<8x256xf32>
    %c31_i32 = arith.constant 31 : i32
    %118 = tpu.dynamic_rotate %16 by %c31_i32 dim 1 : vector<8x256xf32>, i32 -> vector<8x256xf32>
    %c32_i32_41 = arith.constant 32 : i32
    %119 = vector.broadcast %c32_i32_41 : i32 to vector<1x256xi32>
    %120 = arith.cmpi sge, %0, %119 : vector<1x256xi32>
    %c15_i32_42 = arith.constant 15 : i32
    %121 = vector.broadcast %c15_i32_42 : i32 to vector<1x256xi32>
    %122 = arith.cmpi slt, %1, %121 : vector<1x256xi32>
    %123 = arith.andi %120, %122 : vector<1x256xi1>
    %cst_43 = arith.constant 0.000000e+00 : f32
    %124 = vector.shape_cast %123 : vector<1x256xi1> to vector<1x256xi1>
    %125 = vector.broadcast %124 : vector<1x256xi1> to vector<8x256xi1>
    %126 = vector.broadcast %cst_43 : f32 to vector<8x256xf32>
    %127 = arith.select %125, %118, %126 : vector<8x256xi1>, vector<8x256xf32>
    %c30_i32 = arith.constant 30 : i32
    %128 = tpu.dynamic_rotate %16 by %c30_i32 dim 1 : vector<8x256xf32>, i32 -> vector<8x256xf32>
    %c32_i32_44 = arith.constant 32 : i32
    %129 = vector.broadcast %c32_i32_44 : i32 to vector<1x256xi32>
    %130 = arith.cmpi sge, %0, %129 : vector<1x256xi32>
    %c14_i32 = arith.constant 14 : i32
    %131 = vector.broadcast %c14_i32 : i32 to vector<1x256xi32>
    %132 = arith.cmpi slt, %1, %131 : vector<1x256xi32>
    %133 = arith.andi %130, %132 : vector<1x256xi1>
    %cst_45 = arith.constant 0.000000e+00 : f32
    %134 = vector.shape_cast %133 : vector<1x256xi1> to vector<1x256xi1>
    %135 = vector.broadcast %134 : vector<1x256xi1> to vector<8x256xi1>
    %136 = vector.broadcast %cst_45 : f32 to vector<8x256xf32>
    %137 = arith.select %135, %128, %136 : vector<8x256xi1>, vector<8x256xf32>
    %c18_i32 = arith.constant 18 : i32
    %138 = tpu.dynamic_rotate %16 by %c18_i32 dim 1 : vector<8x256xf32>, i32 -> vector<8x256xf32>
    %c16_i32_46 = arith.constant 16 : i32
    %139 = vector.broadcast %c16_i32_46 : i32 to vector<1x256xi32>
    %140 = arith.cmpi sge, %0, %139 : vector<1x256xi32>
    %c2_i32_47 = arith.constant 2 : i32
    %141 = vector.broadcast %c2_i32_47 : i32 to vector<1x256xi32>
    %142 = arith.cmpi sge, %1, %141 : vector<1x256xi32>
    %143 = arith.andi %140, %142 : vector<1x256xi1>
    %cst_48 = arith.constant 0.000000e+00 : f32
    %144 = vector.shape_cast %143 : vector<1x256xi1> to vector<1x256xi1>
    %145 = vector.broadcast %144 : vector<1x256xi1> to vector<8x256xi1>
    %146 = vector.broadcast %cst_48 : f32 to vector<8x256xf32>
    %147 = arith.select %145, %138, %146 : vector<8x256xi1>, vector<8x256xf32>
    %c14_i32_49 = arith.constant 14 : i32
    %148 = tpu.dynamic_rotate %16 by %c14_i32_49 dim 1 : vector<8x256xf32>, i32 -> vector<8x256xf32>
    %c16_i32_50 = arith.constant 16 : i32
    %149 = vector.broadcast %c16_i32_50 : i32 to vector<1x256xi32>
    %150 = arith.cmpi sge, %0, %149 : vector<1x256xi32>
    %c14_i32_51 = arith.constant 14 : i32
    %151 = vector.broadcast %c14_i32_51 : i32 to vector<1x256xi32>
    %152 = arith.cmpi slt, %1, %151 : vector<1x256xi32>
    %153 = arith.andi %150, %152 : vector<1x256xi1>
    %cst_52 = arith.constant 0.000000e+00 : f32
    %154 = vector.shape_cast %153 : vector<1x256xi1> to vector<1x256xi1>
    %155 = vector.broadcast %154 : vector<1x256xi1> to vector<8x256xi1>
    %156 = vector.broadcast %cst_52 : f32 to vector<8x256xf32>
    %157 = arith.select %155, %148, %156 : vector<8x256xi1>, vector<8x256xf32>
    %c2_i32_53 = arith.constant 2 : i32
    %158 = tpu.dynamic_rotate %16 by %c2_i32_53 dim 1 : vector<8x256xf32>, i32 -> vector<8x256xf32>
    %c2_i32_54 = arith.constant 2 : i32
    %159 = vector.broadcast %c2_i32_54 : i32 to vector<1x256xi32>
    %160 = arith.cmpi sge, %1, %159 : vector<1x256xi32>
    %cst_55 = arith.constant 0.000000e+00 : f32
    %161 = vector.shape_cast %160 : vector<1x256xi1> to vector<1x256xi1>
    %162 = vector.broadcast %161 : vector<1x256xi1> to vector<8x256xi1>
    %163 = vector.broadcast %cst_55 : f32 to vector<8x256xf32>
    %164 = arith.select %162, %158, %163 : vector<8x256xi1>, vector<8x256xf32>
    %c254_i32 = arith.constant 254 : i32
    %165 = tpu.dynamic_rotate %16 by %c254_i32 dim 1 : vector<8x256xf32>, i32 -> vector<8x256xf32>
    %c14_i32_56 = arith.constant 14 : i32
    %166 = vector.broadcast %c14_i32_56 : i32 to vector<1x256xi32>
    %167 = arith.cmpi slt, %1, %166 : vector<1x256xi32>
    %cst_57 = arith.constant 0.000000e+00 : f32
    %168 = vector.shape_cast %167 : vector<1x256xi1> to vector<1x256xi1>
    %169 = vector.broadcast %168 : vector<1x256xi1> to vector<8x256xi1>
    %170 = vector.broadcast %cst_57 : f32 to vector<8x256xf32>
    %171 = arith.select %169, %165, %170 : vector<8x256xi1>, vector<8x256xf32>
    %c242_i32 = arith.constant 242 : i32
    %172 = tpu.dynamic_rotate %16 by %c242_i32 dim 1 : vector<8x256xf32>, i32 -> vector<8x256xf32>
    %c240_i32_58 = arith.constant 240 : i32
    %173 = vector.broadcast %c240_i32_58 : i32 to vector<1x256xi32>
    %174 = arith.cmpi slt, %0, %173 : vector<1x256xi32>
    %c2_i32_59 = arith.constant 2 : i32
    %175 = vector.broadcast %c2_i32_59 : i32 to vector<1x256xi32>
    %176 = arith.cmpi sge, %1, %175 : vector<1x256xi32>
    %177 = arith.andi %174, %176 : vector<1x256xi1>
    %cst_60 = arith.constant 0.000000e+00 : f32
    %178 = vector.shape_cast %177 : vector<1x256xi1> to vector<1x256xi1>
    %179 = vector.broadcast %178 : vector<1x256xi1> to vector<8x256xi1>
    %180 = vector.broadcast %cst_60 : f32 to vector<8x256xf32>
    %181 = arith.select %179, %172, %180 : vector<8x256xi1>, vector<8x256xf32>
    %c238_i32 = arith.constant 238 : i32
    %182 = tpu.dynamic_rotate %16 by %c238_i32 dim 1 : vector<8x256xf32>, i32 -> vector<8x256xf32>
    %c240_i32_61 = arith.constant 240 : i32
    %183 = vector.broadcast %c240_i32_61 : i32 to vector<1x256xi32>
    %184 = arith.cmpi slt, %0, %183 : vector<1x256xi32>
    %c14_i32_62 = arith.constant 14 : i32
    %185 = vector.broadcast %c14_i32_62 : i32 to vector<1x256xi32>
    %186 = arith.cmpi slt, %1, %185 : vector<1x256xi32>
    %187 = arith.andi %184, %186 : vector<1x256xi1>
    %cst_63 = arith.constant 0.000000e+00 : f32
    %188 = vector.shape_cast %187 : vector<1x256xi1> to vector<1x256xi1>
    %189 = vector.broadcast %188 : vector<1x256xi1> to vector<8x256xi1>
    %190 = vector.broadcast %cst_63 : f32 to vector<8x256xf32>
    %191 = arith.select %189, %182, %190 : vector<8x256xi1>, vector<8x256xf32>
    %c226_i32 = arith.constant 226 : i32
    %192 = tpu.dynamic_rotate %16 by %c226_i32 dim 1 : vector<8x256xf32>, i32 -> vector<8x256xf32>
    %c224_i32 = arith.constant 224 : i32
    %193 = vector.broadcast %c224_i32 : i32 to vector<1x256xi32>
    %194 = arith.cmpi slt, %0, %193 : vector<1x256xi32>
    %c2_i32_64 = arith.constant 2 : i32
    %195 = vector.broadcast %c2_i32_64 : i32 to vector<1x256xi32>
    %196 = arith.cmpi sge, %1, %195 : vector<1x256xi32>
    %197 = arith.andi %194, %196 : vector<1x256xi1>
    %cst_65 = arith.constant 0.000000e+00 : f32
    %198 = vector.shape_cast %197 : vector<1x256xi1> to vector<1x256xi1>
    %199 = vector.broadcast %198 : vector<1x256xi1> to vector<8x256xi1>
    %200 = vector.broadcast %cst_65 : f32 to vector<8x256xf32>
    %201 = arith.select %199, %192, %200 : vector<8x256xi1>, vector<8x256xf32>
    %c225_i32 = arith.constant 225 : i32
    %202 = tpu.dynamic_rotate %16 by %c225_i32 dim 1 : vector<8x256xf32>, i32 -> vector<8x256xf32>
    %c224_i32_66 = arith.constant 224 : i32
    %203 = vector.broadcast %c224_i32_66 : i32 to vector<1x256xi32>
    %204 = arith.cmpi slt, %0, %203 : vector<1x256xi32>
    %c1_i32_67 = arith.constant 1 : i32
    %205 = vector.broadcast %c1_i32_67 : i32 to vector<1x256xi32>
    %206 = arith.cmpi sge, %1, %205 : vector<1x256xi32>
    %207 = arith.andi %204, %206 : vector<1x256xi1>
    %cst_68 = arith.constant 0.000000e+00 : f32
    %208 = vector.shape_cast %207 : vector<1x256xi1> to vector<1x256xi1>
    %209 = vector.broadcast %208 : vector<1x256xi1> to vector<8x256xi1>
    %210 = vector.broadcast %cst_68 : f32 to vector<8x256xf32>
    %211 = arith.select %209, %202, %210 : vector<8x256xi1>, vector<8x256xf32>
    %c224_i32_69 = arith.constant 224 : i32
    %212 = tpu.dynamic_rotate %16 by %c224_i32_69 dim 1 : vector<8x256xf32>, i32 -> vector<8x256xf32>
    %c224_i32_70 = arith.constant 224 : i32
    %213 = vector.broadcast %c224_i32_70 : i32 to vector<1x256xi32>
    %214 = arith.cmpi slt, %0, %213 : vector<1x256xi32>
    %cst_71 = arith.constant 0.000000e+00 : f32
    %215 = vector.shape_cast %214 : vector<1x256xi1> to vector<1x256xi1>
    %216 = vector.broadcast %215 : vector<1x256xi1> to vector<8x256xi1>
    %217 = vector.broadcast %cst_71 : f32 to vector<8x256xf32>
    %218 = arith.select %216, %212, %217 : vector<8x256xi1>, vector<8x256xf32>
    %c223_i32 = arith.constant 223 : i32
    %219 = tpu.dynamic_rotate %16 by %c223_i32 dim 1 : vector<8x256xf32>, i32 -> vector<8x256xf32>
    %c224_i32_72 = arith.constant 224 : i32
    %220 = vector.broadcast %c224_i32_72 : i32 to vector<1x256xi32>
    %221 = arith.cmpi slt, %0, %220 : vector<1x256xi32>
    %c15_i32_73 = arith.constant 15 : i32
    %222 = vector.broadcast %c15_i32_73 : i32 to vector<1x256xi32>
    %223 = arith.cmpi slt, %1, %222 : vector<1x256xi32>
    %224 = arith.andi %221, %223 : vector<1x256xi1>
    %cst_74 = arith.constant 0.000000e+00 : f32
    %225 = vector.shape_cast %224 : vector<1x256xi1> to vector<1x256xi1>
    %226 = vector.broadcast %225 : vector<1x256xi1> to vector<8x256xi1>
    %227 = vector.broadcast %cst_74 : f32 to vector<8x256xf32>
    %228 = arith.select %226, %219, %227 : vector<8x256xi1>, vector<8x256xf32>
    %c222_i32 = arith.constant 222 : i32
    %229 = tpu.dynamic_rotate %16 by %c222_i32 dim 1 : vector<8x256xf32>, i32 -> vector<8x256xf32>
    %c224_i32_75 = arith.constant 224 : i32
    %230 = vector.broadcast %c224_i32_75 : i32 to vector<1x256xi32>
    %231 = arith.cmpi slt, %0, %230 : vector<1x256xi32>
    %c14_i32_76 = arith.constant 14 : i32
    %232 = vector.broadcast %c14_i32_76 : i32 to vector<1x256xi32>
    %233 = arith.cmpi slt, %1, %232 : vector<1x256xi32>
    %234 = arith.andi %231, %233 : vector<1x256xi1>
    %cst_77 = arith.constant 0.000000e+00 : f32
    %235 = vector.shape_cast %234 : vector<1x256xi1> to vector<1x256xi1>
    %236 = vector.broadcast %235 : vector<1x256xi1> to vector<8x256xi1>
    %237 = vector.broadcast %cst_77 : f32 to vector<8x256xf32>
    %238 = arith.select %236, %229, %237 : vector<8x256xi1>, vector<8x256xf32>
    %239 = tpu.concatenate %100, %110, %117, %127, %137, %147, %27, %34, %44, %157, %164, %51, %16, %58, %171, %181 in 0 : vector<8x256xf32>, vector<8x256xf32>, vector<8x256xf32>, vector<8x256xf32>, vector<8x256xf32>, vector<8x256xf32>, vector<8x256xf32>, vector<8x256xf32>, vector<8x256xf32>, vector<8x256xf32>, vector<8x256xf32>, vector<8x256xf32>, vector<8x256xf32>, vector<8x256xf32>, vector<8x256xf32>, vector<8x256xf32> -> vector<128x256xf32>
    %240 = tpu.concatenate %68, %75, %85, %191, %201, %211, %218, %228, %238, %7 in 0 : vector<8x256xf32>, vector<8x256xf32>, vector<8x256xf32>, vector<8x256xf32>, vector<8x256xf32>, vector<8x256xf32>, vector<8x256xf32>, vector<8x256xf32>, vector<8x256xf32>, vector<8x256xf32> -> vector<80x256xf32>
    %241 = tpu.concatenate %239, %240 in 0 : vector<128x256xf32>, vector<80x256xf32> -> vector<208x256xf32>
    %cst_78 = arith.constant dense<0.000000e+00> : vector<8x256xf32>
    %242 = tpu.matmul %90, %241, %cst_78 {dimension_numbers = #tpu.dot_dimension_numbers<[1], [0], [0], [1], [0, 0, 1, 1], [], []>} : vector<8x208xf32>, vector<208x256xf32>, vector<8x256xf32> -> vector<8x256xf32>
    %c24 = arith.constant 24 : index
    %c0_79 = arith.constant 0 : index
    %243 = vector.load %arg3[%c24, %c0_79] : memref<136x400xf32, #tpu.memory_space<vmem>>, vector<8x208xf32>
    %c34_i32_80 = arith.constant 34 : i32
    %244 = tpu.dynamic_rotate %89 by %c34_i32_80 dim 1 : vector<8x256xf32>, i32 -> vector<8x256xf32>
    %cst_81 = arith.constant 0.000000e+00 : f32
    %245 = vector.shape_cast %96 : vector<1x256xi1> to vector<1x256xi1>
    %246 = vector.broadcast %245 : vector<1x256xi1> to vector<8x256xi1>
    %247 = vector.broadcast %cst_81 : f32 to vector<8x256xf32>
    %248 = arith.select %246, %244, %247 : vector<8x256xi1>, vector<8x256xf32>
    %c33_i32_82 = arith.constant 33 : i32
    %249 = tpu.dynamic_rotate %89 by %c33_i32_82 dim 1 : vector<8x256xf32>, i32 -> vector<8x256xf32>
    %cst_83 = arith.constant 0.000000e+00 : f32
    %250 = vector.shape_cast %106 : vector<1x256xi1> to vector<1x256xi1>
    %251 = vector.broadcast %250 : vector<1x256xi1> to vector<8x256xi1>
    %252 = vector.broadcast %cst_83 : f32 to vector<8x256xf32>
    %253 = arith.select %251, %249, %252 : vector<8x256xi1>, vector<8x256xf32>
    %c32_i32_84 = arith.constant 32 : i32
    %254 = tpu.dynamic_rotate %89 by %c32_i32_84 dim 1 : vector<8x256xf32>, i32 -> vector<8x256xf32>
    %cst_85 = arith.constant 0.000000e+00 : f32
    %255 = vector.shape_cast %113 : vector<1x256xi1> to vector<1x256xi1>
    %256 = vector.broadcast %255 : vector<1x256xi1> to vector<8x256xi1>
    %257 = vector.broadcast %cst_85 : f32 to vector<8x256xf32>
    %258 = arith.select %256, %254, %257 : vector<8x256xi1>, vector<8x256xf32>
    %c31_i32_86 = arith.constant 31 : i32
    %259 = tpu.dynamic_rotate %89 by %c31_i32_86 dim 1 : vector<8x256xf32>, i32 -> vector<8x256xf32>
    %cst_87 = arith.constant 0.000000e+00 : f32
    %260 = vector.shape_cast %123 : vector<1x256xi1> to vector<1x256xi1>
    %261 = vector.broadcast %260 : vector<1x256xi1> to vector<8x256xi1>
    %262 = vector.broadcast %cst_87 : f32 to vector<8x256xf32>
    %263 = arith.select %261, %259, %262 : vector<8x256xi1>, vector<8x256xf32>
    %c30_i32_88 = arith.constant 30 : i32
    %264 = tpu.dynamic_rotate %89 by %c30_i32_88 dim 1 : vector<8x256xf32>, i32 -> vector<8x256xf32>
    %cst_89 = arith.constant 0.000000e+00 : f32
    %265 = vector.shape_cast %133 : vector<1x256xi1> to vector<1x256xi1>
    %266 = vector.broadcast %265 : vector<1x256xi1> to vector<8x256xi1>
    %267 = vector.broadcast %cst_89 : f32 to vector<8x256xf32>
    %268 = arith.select %266, %264, %267 : vector<8x256xi1>, vector<8x256xf32>
    %c18_i32_90 = arith.constant 18 : i32
    %269 = tpu.dynamic_rotate %89 by %c18_i32_90 dim 1 : vector<8x256xf32>, i32 -> vector<8x256xf32>
    %cst_91 = arith.constant 0.000000e+00 : f32
    %270 = vector.shape_cast %143 : vector<1x256xi1> to vector<1x256xi1>
    %271 = vector.broadcast %270 : vector<1x256xi1> to vector<8x256xi1>
    %272 = vector.broadcast %cst_91 : f32 to vector<8x256xf32>
    %273 = arith.select %271, %269, %272 : vector<8x256xi1>, vector<8x256xf32>
    %c17_i32_92 = arith.constant 17 : i32
    %274 = tpu.dynamic_rotate %89 by %c17_i32_92 dim 1 : vector<8x256xf32>, i32 -> vector<8x256xf32>
    %cst_93 = arith.constant 0.000000e+00 : f32
    %275 = vector.shape_cast %23 : vector<1x256xi1> to vector<1x256xi1>
    %276 = vector.broadcast %275 : vector<1x256xi1> to vector<8x256xi1>
    %277 = vector.broadcast %cst_93 : f32 to vector<8x256xf32>
    %278 = arith.select %276, %274, %277 : vector<8x256xi1>, vector<8x256xf32>
    %c16_i32_94 = arith.constant 16 : i32
    %279 = tpu.dynamic_rotate %89 by %c16_i32_94 dim 1 : vector<8x256xf32>, i32 -> vector<8x256xf32>
    %cst_95 = arith.constant 0.000000e+00 : f32
    %280 = vector.shape_cast %30 : vector<1x256xi1> to vector<1x256xi1>
    %281 = vector.broadcast %280 : vector<1x256xi1> to vector<8x256xi1>
    %282 = vector.broadcast %cst_95 : f32 to vector<8x256xf32>
    %283 = arith.select %281, %279, %282 : vector<8x256xi1>, vector<8x256xf32>
    %c15_i32_96 = arith.constant 15 : i32
    %284 = tpu.dynamic_rotate %89 by %c15_i32_96 dim 1 : vector<8x256xf32>, i32 -> vector<8x256xf32>
    %cst_97 = arith.constant 0.000000e+00 : f32
    %285 = vector.shape_cast %40 : vector<1x256xi1> to vector<1x256xi1>
    %286 = vector.broadcast %285 : vector<1x256xi1> to vector<8x256xi1>
    %287 = vector.broadcast %cst_97 : f32 to vector<8x256xf32>
    %288 = arith.select %286, %284, %287 : vector<8x256xi1>, vector<8x256xf32>
    %c14_i32_98 = arith.constant 14 : i32
    %289 = tpu.dynamic_rotate %89 by %c14_i32_98 dim 1 : vector<8x256xf32>, i32 -> vector<8x256xf32>
    %cst_99 = arith.constant 0.000000e+00 : f32
    %290 = vector.shape_cast %153 : vector<1x256xi1> to vector<1x256xi1>
    %291 = vector.broadcast %290 : vector<1x256xi1> to vector<8x256xi1>
    %292 = vector.broadcast %cst_99 : f32 to vector<8x256xf32>
    %293 = arith.select %291, %289, %292 : vector<8x256xi1>, vector<8x256xf32>
    %c2_i32_100 = arith.constant 2 : i32
    %294 = tpu.dynamic_rotate %89 by %c2_i32_100 dim 1 : vector<8x256xf32>, i32 -> vector<8x256xf32>
    %cst_101 = arith.constant 0.000000e+00 : f32
    %295 = vector.shape_cast %160 : vector<1x256xi1> to vector<1x256xi1>
    %296 = vector.broadcast %295 : vector<1x256xi1> to vector<8x256xi1>
    %297 = vector.broadcast %cst_101 : f32 to vector<8x256xf32>
    %298 = arith.select %296, %294, %297 : vector<8x256xi1>, vector<8x256xf32>
    %c1_i32_102 = arith.constant 1 : i32
    %299 = tpu.dynamic_rotate %89 by %c1_i32_102 dim 1 : vector<8x256xf32>, i32 -> vector<8x256xf32>
    %cst_103 = arith.constant 0.000000e+00 : f32
    %300 = vector.shape_cast %47 : vector<1x256xi1> to vector<1x256xi1>
    %301 = vector.broadcast %300 : vector<1x256xi1> to vector<8x256xi1>
    %302 = vector.broadcast %cst_103 : f32 to vector<8x256xf32>
    %303 = arith.select %301, %299, %302 : vector<8x256xi1>, vector<8x256xf32>
    %c255_i32_104 = arith.constant 255 : i32
    %304 = tpu.dynamic_rotate %89 by %c255_i32_104 dim 1 : vector<8x256xf32>, i32 -> vector<8x256xf32>
    %cst_105 = arith.constant 0.000000e+00 : f32
    %305 = vector.shape_cast %54 : vector<1x256xi1> to vector<1x256xi1>
    %306 = vector.broadcast %305 : vector<1x256xi1> to vector<8x256xi1>
    %307 = vector.broadcast %cst_105 : f32 to vector<8x256xf32>
    %308 = arith.select %306, %304, %307 : vector<8x256xi1>, vector<8x256xf32>
    %c254_i32_106 = arith.constant 254 : i32
    %309 = tpu.dynamic_rotate %89 by %c254_i32_106 dim 1 : vector<8x256xf32>, i32 -> vector<8x256xf32>
    %cst_107 = arith.constant 0.000000e+00 : f32
    %310 = vector.shape_cast %167 : vector<1x256xi1> to vector<1x256xi1>
    %311 = vector.broadcast %310 : vector<1x256xi1> to vector<8x256xi1>
    %312 = vector.broadcast %cst_107 : f32 to vector<8x256xf32>
    %313 = arith.select %311, %309, %312 : vector<8x256xi1>, vector<8x256xf32>
    %c242_i32_108 = arith.constant 242 : i32
    %314 = tpu.dynamic_rotate %89 by %c242_i32_108 dim 1 : vector<8x256xf32>, i32 -> vector<8x256xf32>
    %cst_109 = arith.constant 0.000000e+00 : f32
    %315 = vector.shape_cast %177 : vector<1x256xi1> to vector<1x256xi1>
    %316 = vector.broadcast %315 : vector<1x256xi1> to vector<8x256xi1>
    %317 = vector.broadcast %cst_109 : f32 to vector<8x256xf32>
    %318 = arith.select %316, %314, %317 : vector<8x256xi1>, vector<8x256xf32>
    %c241_i32_110 = arith.constant 241 : i32
    %319 = tpu.dynamic_rotate %89 by %c241_i32_110 dim 1 : vector<8x256xf32>, i32 -> vector<8x256xf32>
    %cst_111 = arith.constant 0.000000e+00 : f32
    %320 = vector.shape_cast %64 : vector<1x256xi1> to vector<1x256xi1>
    %321 = vector.broadcast %320 : vector<1x256xi1> to vector<8x256xi1>
    %322 = vector.broadcast %cst_111 : f32 to vector<8x256xf32>
    %323 = arith.select %321, %319, %322 : vector<8x256xi1>, vector<8x256xf32>
    %c240_i32_112 = arith.constant 240 : i32
    %324 = tpu.dynamic_rotate %89 by %c240_i32_112 dim 1 : vector<8x256xf32>, i32 -> vector<8x256xf32>
    %cst_113 = arith.constant 0.000000e+00 : f32
    %325 = vector.shape_cast %71 : vector<1x256xi1> to vector<1x256xi1>
    %326 = vector.broadcast %325 : vector<1x256xi1> to vector<8x256xi1>
    %327 = vector.broadcast %cst_113 : f32 to vector<8x256xf32>
    %328 = arith.select %326, %324, %327 : vector<8x256xi1>, vector<8x256xf32>
    %c239_i32_114 = arith.constant 239 : i32
    %329 = tpu.dynamic_rotate %89 by %c239_i32_114 dim 1 : vector<8x256xf32>, i32 -> vector<8x256xf32>
    %cst_115 = arith.constant 0.000000e+00 : f32
    %330 = vector.shape_cast %81 : vector<1x256xi1> to vector<1x256xi1>
    %331 = vector.broadcast %330 : vector<1x256xi1> to vector<8x256xi1>
    %332 = vector.broadcast %cst_115 : f32 to vector<8x256xf32>
    %333 = arith.select %331, %329, %332 : vector<8x256xi1>, vector<8x256xf32>
    %c238_i32_116 = arith.constant 238 : i32
    %334 = tpu.dynamic_rotate %89 by %c238_i32_116 dim 1 : vector<8x256xf32>, i32 -> vector<8x256xf32>
    %cst_117 = arith.constant 0.000000e+00 : f32
    %335 = vector.shape_cast %187 : vector<1x256xi1> to vector<1x256xi1>
    %336 = vector.broadcast %335 : vector<1x256xi1> to vector<8x256xi1>
    %337 = vector.broadcast %cst_117 : f32 to vector<8x256xf32>
    %338 = arith.select %336, %334, %337 : vector<8x256xi1>, vector<8x256xf32>
    %c226_i32_118 = arith.constant 226 : i32
    %339 = tpu.dynamic_rotate %89 by %c226_i32_118 dim 1 : vector<8x256xf32>, i32 -> vector<8x256xf32>
    %cst_119 = arith.constant 0.000000e+00 : f32
    %340 = vector.shape_cast %197 : vector<1x256xi1> to vector<1x256xi1>
    %341 = vector.broadcast %340 : vector<1x256xi1> to vector<8x256xi1>
    %342 = vector.broadcast %cst_119 : f32 to vector<8x256xf32>
    %343 = arith.select %341, %339, %342 : vector<8x256xi1>, vector<8x256xf32>
    %c225_i32_120 = arith.constant 225 : i32
    %344 = tpu.dynamic_rotate %89 by %c225_i32_120 dim 1 : vector<8x256xf32>, i32 -> vector<8x256xf32>
    %cst_121 = arith.constant 0.000000e+00 : f32
    %345 = vector.shape_cast %207 : vector<1x256xi1> to vector<1x256xi1>
    %346 = vector.broadcast %345 : vector<1x256xi1> to vector<8x256xi1>
    %347 = vector.broadcast %cst_121 : f32 to vector<8x256xf32>
    %348 = arith.select %346, %344, %347 : vector<8x256xi1>, vector<8x256xf32>
    %c224_i32_122 = arith.constant 224 : i32
    %349 = tpu.dynamic_rotate %89 by %c224_i32_122 dim 1 : vector<8x256xf32>, i32 -> vector<8x256xf32>
    %cst_123 = arith.constant 0.000000e+00 : f32
    %350 = vector.shape_cast %214 : vector<1x256xi1> to vector<1x256xi1>
    %351 = vector.broadcast %350 : vector<1x256xi1> to vector<8x256xi1>
    %352 = vector.broadcast %cst_123 : f32 to vector<8x256xf32>
    %353 = arith.select %351, %349, %352 : vector<8x256xi1>, vector<8x256xf32>
    %c223_i32_124 = arith.constant 223 : i32
    %354 = tpu.dynamic_rotate %89 by %c223_i32_124 dim 1 : vector<8x256xf32>, i32 -> vector<8x256xf32>
    %cst_125 = arith.constant 0.000000e+00 : f32
    %355 = vector.shape_cast %224 : vector<1x256xi1> to vector<1x256xi1>
    %356 = vector.broadcast %355 : vector<1x256xi1> to vector<8x256xi1>
    %357 = vector.broadcast %cst_125 : f32 to vector<8x256xf32>
    %358 = arith.select %356, %354, %357 : vector<8x256xi1>, vector<8x256xf32>
    %c222_i32_126 = arith.constant 222 : i32
    %359 = tpu.dynamic_rotate %89 by %c222_i32_126 dim 1 : vector<8x256xf32>, i32 -> vector<8x256xf32>
    %cst_127 = arith.constant 0.000000e+00 : f32
    %360 = vector.shape_cast %234 : vector<1x256xi1> to vector<1x256xi1>
    %361 = vector.broadcast %360 : vector<1x256xi1> to vector<8x256xi1>
    %362 = vector.broadcast %cst_127 : f32 to vector<8x256xf32>
    %363 = arith.select %361, %359, %362 : vector<8x256xi1>, vector<8x256xf32>
    %364 = tpu.concatenate %248, %253, %258, %263, %268, %273, %278, %283, %288, %293, %298, %303, %89, %308, %313, %318 in 0 : vector<8x256xf32>, vector<8x256xf32>, vector<8x256xf32>, vector<8x256xf32>, vector<8x256xf32>, vector<8x256xf32>, vector<8x256xf32>, vector<8x256xf32>, vector<8x256xf32>, vector<8x256xf32>, vector<8x256xf32>, vector<8x256xf32>, vector<8x256xf32>, vector<8x256xf32>, vector<8x256xf32>, vector<8x256xf32> -> vector<128x256xf32>
    %365 = tpu.concatenate %323, %328, %333, %338, %343, %348, %353, %358, %363, %7 in 0 : vector<8x256xf32>, vector<8x256xf32>, vector<8x256xf32>, vector<8x256xf32>, vector<8x256xf32>, vector<8x256xf32>, vector<8x256xf32>, vector<8x256xf32>, vector<8x256xf32>, vector<8x256xf32> -> vector<80x256xf32>
    %366 = tpu.concatenate %364, %365 in 0 : vector<128x256xf32>, vector<80x256xf32> -> vector<208x256xf32>
    %cst_128 = arith.constant dense<0.000000e+00> : vector<8x256xf32>
    %367 = tpu.matmul %243, %366, %cst_128 {dimension_numbers = #tpu.dot_dimension_numbers<[1], [0], [0], [1], [0, 0, 1, 1], [], []>} : vector<8x208xf32>, vector<208x256xf32>, vector<8x256xf32> -> vector<8x256xf32>
    %368 = arith.addf %242, %367 : vector<8x256xf32>
    %cst_129 = arith.constant 0.000000e+00 : f32
    %369 = vector.broadcast %cst_129 : f32 to vector<8x256xf32>
    %370 = arith.maximumf %368, %369 : vector<8x256xf32>
    %c32 = arith.constant 32 : index
    %c0_130 = arith.constant 0 : index
    %371 = vector.load %arg3[%c32, %c0_130] : memref<136x400xf32, #tpu.memory_space<vmem>>, vector<8x400xf32>
    %c51_i32 = arith.constant 51 : i32
    %372 = tpu.dynamic_rotate %89 by %c51_i32 dim 1 : vector<8x256xf32>, i32 -> vector<8x256xf32>
    %c48_i32 = arith.constant 48 : i32
    %373 = vector.broadcast %c48_i32 : i32 to vector<1x256xi32>
    %374 = arith.cmpi sge, %0, %373 : vector<1x256xi32>
    %c3_i32 = arith.constant 3 : i32
    %375 = vector.broadcast %c3_i32 : i32 to vector<1x256xi32>
    %376 = arith.cmpi sge, %1, %375 : vector<1x256xi32>
    %377 = arith.andi %374, %376 : vector<1x256xi1>
    %cst_131 = arith.constant 0.000000e+00 : f32
    %378 = vector.shape_cast %377 : vector<1x256xi1> to vector<1x256xi1>
    %379 = vector.broadcast %378 : vector<1x256xi1> to vector<8x256xi1>
    %380 = vector.broadcast %cst_131 : f32 to vector<8x256xf32>
    %381 = arith.select %379, %372, %380 : vector<8x256xi1>, vector<8x256xf32>
    %c50_i32 = arith.constant 50 : i32
    %382 = tpu.dynamic_rotate %89 by %c50_i32 dim 1 : vector<8x256xf32>, i32 -> vector<8x256xf32>
    %c48_i32_132 = arith.constant 48 : i32
    %383 = vector.broadcast %c48_i32_132 : i32 to vector<1x256xi32>
    %384 = arith.cmpi sge, %0, %383 : vector<1x256xi32>
    %c2_i32_133 = arith.constant 2 : i32
    %385 = vector.broadcast %c2_i32_133 : i32 to vector<1x256xi32>
    %386 = arith.cmpi sge, %1, %385 : vector<1x256xi32>
    %387 = arith.andi %384, %386 : vector<1x256xi1>
    %cst_134 = arith.constant 0.000000e+00 : f32
    %388 = vector.shape_cast %387 : vector<1x256xi1> to vector<1x256xi1>
    %389 = vector.broadcast %388 : vector<1x256xi1> to vector<8x256xi1>
    %390 = vector.broadcast %cst_134 : f32 to vector<8x256xf32>
    %391 = arith.select %389, %382, %390 : vector<8x256xi1>, vector<8x256xf32>
    %c49_i32 = arith.constant 49 : i32
    %392 = tpu.dynamic_rotate %89 by %c49_i32 dim 1 : vector<8x256xf32>, i32 -> vector<8x256xf32>
    %c48_i32_135 = arith.constant 48 : i32
    %393 = vector.broadcast %c48_i32_135 : i32 to vector<1x256xi32>
    %394 = arith.cmpi sge, %0, %393 : vector<1x256xi32>
    %c1_i32_136 = arith.constant 1 : i32
    %395 = vector.broadcast %c1_i32_136 : i32 to vector<1x256xi32>
    %396 = arith.cmpi sge, %1, %395 : vector<1x256xi32>
    %397 = arith.andi %394, %396 : vector<1x256xi1>
    %cst_137 = arith.constant 0.000000e+00 : f32
    %398 = vector.shape_cast %397 : vector<1x256xi1> to vector<1x256xi1>
    %399 = vector.broadcast %398 : vector<1x256xi1> to vector<8x256xi1>
    %400 = vector.broadcast %cst_137 : f32 to vector<8x256xf32>
    %401 = arith.select %399, %392, %400 : vector<8x256xi1>, vector<8x256xf32>
    %c48_i32_138 = arith.constant 48 : i32
    %402 = tpu.dynamic_rotate %89 by %c48_i32_138 dim 1 : vector<8x256xf32>, i32 -> vector<8x256xf32>
    %c48_i32_139 = arith.constant 48 : i32
    %403 = vector.broadcast %c48_i32_139 : i32 to vector<1x256xi32>
    %404 = arith.cmpi sge, %0, %403 : vector<1x256xi32>
    %cst_140 = arith.constant 0.000000e+00 : f32
    %405 = vector.shape_cast %404 : vector<1x256xi1> to vector<1x256xi1>
    %406 = vector.broadcast %405 : vector<1x256xi1> to vector<8x256xi1>
    %407 = vector.broadcast %cst_140 : f32 to vector<8x256xf32>
    %408 = arith.select %406, %402, %407 : vector<8x256xi1>, vector<8x256xf32>
    %c47_i32 = arith.constant 47 : i32
    %409 = tpu.dynamic_rotate %89 by %c47_i32 dim 1 : vector<8x256xf32>, i32 -> vector<8x256xf32>
    %c48_i32_141 = arith.constant 48 : i32
    %410 = vector.broadcast %c48_i32_141 : i32 to vector<1x256xi32>
    %411 = arith.cmpi sge, %0, %410 : vector<1x256xi32>
    %c15_i32_142 = arith.constant 15 : i32
    %412 = vector.broadcast %c15_i32_142 : i32 to vector<1x256xi32>
    %413 = arith.cmpi slt, %1, %412 : vector<1x256xi32>
    %414 = arith.andi %411, %413 : vector<1x256xi1>
    %cst_143 = arith.constant 0.000000e+00 : f32
    %415 = vector.shape_cast %414 : vector<1x256xi1> to vector<1x256xi1>
    %416 = vector.broadcast %415 : vector<1x256xi1> to vector<8x256xi1>
    %417 = vector.broadcast %cst_143 : f32 to vector<8x256xf32>
    %418 = arith.select %416, %409, %417 : vector<8x256xi1>, vector<8x256xf32>
    %c46_i32 = arith.constant 46 : i32
    %419 = tpu.dynamic_rotate %89 by %c46_i32 dim 1 : vector<8x256xf32>, i32 -> vector<8x256xf32>
    %c48_i32_144 = arith.constant 48 : i32
    %420 = vector.broadcast %c48_i32_144 : i32 to vector<1x256xi32>
    %421 = arith.cmpi sge, %0, %420 : vector<1x256xi32>
    %c14_i32_145 = arith.constant 14 : i32
    %422 = vector.broadcast %c14_i32_145 : i32 to vector<1x256xi32>
    %423 = arith.cmpi slt, %1, %422 : vector<1x256xi32>
    %424 = arith.andi %421, %423 : vector<1x256xi1>
    %cst_146 = arith.constant 0.000000e+00 : f32
    %425 = vector.shape_cast %424 : vector<1x256xi1> to vector<1x256xi1>
    %426 = vector.broadcast %425 : vector<1x256xi1> to vector<8x256xi1>
    %427 = vector.broadcast %cst_146 : f32 to vector<8x256xf32>
    %428 = arith.select %426, %419, %427 : vector<8x256xi1>, vector<8x256xf32>
    %c45_i32 = arith.constant 45 : i32
    %429 = tpu.dynamic_rotate %89 by %c45_i32 dim 1 : vector<8x256xf32>, i32 -> vector<8x256xf32>
    %c48_i32_147 = arith.constant 48 : i32
    %430 = vector.broadcast %c48_i32_147 : i32 to vector<1x256xi32>
    %431 = arith.cmpi sge, %0, %430 : vector<1x256xi32>
    %c13_i32 = arith.constant 13 : i32
    %432 = vector.broadcast %c13_i32 : i32 to vector<1x256xi32>
    %433 = arith.cmpi slt, %1, %432 : vector<1x256xi32>
    %434 = arith.andi %431, %433 : vector<1x256xi1>
    %cst_148 = arith.constant 0.000000e+00 : f32
    %435 = vector.shape_cast %434 : vector<1x256xi1> to vector<1x256xi1>
    %436 = vector.broadcast %435 : vector<1x256xi1> to vector<8x256xi1>
    %437 = vector.broadcast %cst_148 : f32 to vector<8x256xf32>
    %438 = arith.select %436, %429, %437 : vector<8x256xi1>, vector<8x256xf32>
    %c35_i32 = arith.constant 35 : i32
    %439 = tpu.dynamic_rotate %89 by %c35_i32 dim 1 : vector<8x256xf32>, i32 -> vector<8x256xf32>
    %c32_i32_149 = arith.constant 32 : i32
    %440 = vector.broadcast %c32_i32_149 : i32 to vector<1x256xi32>
    %441 = arith.cmpi sge, %0, %440 : vector<1x256xi32>
    %c3_i32_150 = arith.constant 3 : i32
    %442 = vector.broadcast %c3_i32_150 : i32 to vector<1x256xi32>
    %443 = arith.cmpi sge, %1, %442 : vector<1x256xi32>
    %444 = arith.andi %441, %443 : vector<1x256xi1>
    %cst_151 = arith.constant 0.000000e+00 : f32
    %445 = vector.shape_cast %444 : vector<1x256xi1> to vector<1x256xi1>
    %446 = vector.broadcast %445 : vector<1x256xi1> to vector<8x256xi1>
    %447 = vector.broadcast %cst_151 : f32 to vector<8x256xf32>
    %448 = arith.select %446, %439, %447 : vector<8x256xi1>, vector<8x256xf32>
    %c29_i32 = arith.constant 29 : i32
    %449 = tpu.dynamic_rotate %89 by %c29_i32 dim 1 : vector<8x256xf32>, i32 -> vector<8x256xf32>
    %c32_i32_152 = arith.constant 32 : i32
    %450 = vector.broadcast %c32_i32_152 : i32 to vector<1x256xi32>
    %451 = arith.cmpi sge, %0, %450 : vector<1x256xi32>
    %c13_i32_153 = arith.constant 13 : i32
    %452 = vector.broadcast %c13_i32_153 : i32 to vector<1x256xi32>
    %453 = arith.cmpi slt, %1, %452 : vector<1x256xi32>
    %454 = arith.andi %451, %453 : vector<1x256xi1>
    %cst_154 = arith.constant 0.000000e+00 : f32
    %455 = vector.shape_cast %454 : vector<1x256xi1> to vector<1x256xi1>
    %456 = vector.broadcast %455 : vector<1x256xi1> to vector<8x256xi1>
    %457 = vector.broadcast %cst_154 : f32 to vector<8x256xf32>
    %458 = arith.select %456, %449, %457 : vector<8x256xi1>, vector<8x256xf32>
    %c19_i32 = arith.constant 19 : i32
    %459 = tpu.dynamic_rotate %89 by %c19_i32 dim 1 : vector<8x256xf32>, i32 -> vector<8x256xf32>
    %c16_i32_155 = arith.constant 16 : i32
    %460 = vector.broadcast %c16_i32_155 : i32 to vector<1x256xi32>
    %461 = arith.cmpi sge, %0, %460 : vector<1x256xi32>
    %c3_i32_156 = arith.constant 3 : i32
    %462 = vector.broadcast %c3_i32_156 : i32 to vector<1x256xi32>
    %463 = arith.cmpi sge, %1, %462 : vector<1x256xi32>
    %464 = arith.andi %461, %463 : vector<1x256xi1>
    %cst_157 = arith.constant 0.000000e+00 : f32
    %465 = vector.shape_cast %464 : vector<1x256xi1> to vector<1x256xi1>
    %466 = vector.broadcast %465 : vector<1x256xi1> to vector<8x256xi1>
    %467 = vector.broadcast %cst_157 : f32 to vector<8x256xf32>
    %468 = arith.select %466, %459, %467 : vector<8x256xi1>, vector<8x256xf32>
    %c13_i32_158 = arith.constant 13 : i32
    %469 = tpu.dynamic_rotate %89 by %c13_i32_158 dim 1 : vector<8x256xf32>, i32 -> vector<8x256xf32>
    %c16_i32_159 = arith.constant 16 : i32
    %470 = vector.broadcast %c16_i32_159 : i32 to vector<1x256xi32>
    %471 = arith.cmpi sge, %0, %470 : vector<1x256xi32>
    %c13_i32_160 = arith.constant 13 : i32
    %472 = vector.broadcast %c13_i32_160 : i32 to vector<1x256xi32>
    %473 = arith.cmpi slt, %1, %472 : vector<1x256xi32>
    %474 = arith.andi %471, %473 : vector<1x256xi1>
    %cst_161 = arith.constant 0.000000e+00 : f32
    %475 = vector.shape_cast %474 : vector<1x256xi1> to vector<1x256xi1>
    %476 = vector.broadcast %475 : vector<1x256xi1> to vector<8x256xi1>
    %477 = vector.broadcast %cst_161 : f32 to vector<8x256xf32>
    %478 = arith.select %476, %469, %477 : vector<8x256xi1>, vector<8x256xf32>
    %c3_i32_162 = arith.constant 3 : i32
    %479 = tpu.dynamic_rotate %89 by %c3_i32_162 dim 1 : vector<8x256xf32>, i32 -> vector<8x256xf32>
    %c3_i32_163 = arith.constant 3 : i32
    %480 = vector.broadcast %c3_i32_163 : i32 to vector<1x256xi32>
    %481 = arith.cmpi sge, %1, %480 : vector<1x256xi32>
    %cst_164 = arith.constant 0.000000e+00 : f32
    %482 = vector.shape_cast %481 : vector<1x256xi1> to vector<1x256xi1>
    %483 = vector.broadcast %482 : vector<1x256xi1> to vector<8x256xi1>
    %484 = vector.broadcast %cst_164 : f32 to vector<8x256xf32>
    %485 = arith.select %483, %479, %484 : vector<8x256xi1>, vector<8x256xf32>
    %c253_i32 = arith.constant 253 : i32
    %486 = tpu.dynamic_rotate %89 by %c253_i32 dim 1 : vector<8x256xf32>, i32 -> vector<8x256xf32>
    %c13_i32_165 = arith.constant 13 : i32
    %487 = vector.broadcast %c13_i32_165 : i32 to vector<1x256xi32>
    %488 = arith.cmpi slt, %1, %487 : vector<1x256xi32>
    %cst_166 = arith.constant 0.000000e+00 : f32
    %489 = vector.shape_cast %488 : vector<1x256xi1> to vector<1x256xi1>
    %490 = vector.broadcast %489 : vector<1x256xi1> to vector<8x256xi1>
    %491 = vector.broadcast %cst_166 : f32 to vector<8x256xf32>
    %492 = arith.select %490, %486, %491 : vector<8x256xi1>, vector<8x256xf32>
    %c243_i32 = arith.constant 243 : i32
    %493 = tpu.dynamic_rotate %89 by %c243_i32 dim 1 : vector<8x256xf32>, i32 -> vector<8x256xf32>
    %c240_i32_167 = arith.constant 240 : i32
    %494 = vector.broadcast %c240_i32_167 : i32 to vector<1x256xi32>
    %495 = arith.cmpi slt, %0, %494 : vector<1x256xi32>
    %c3_i32_168 = arith.constant 3 : i32
    %496 = vector.broadcast %c3_i32_168 : i32 to vector<1x256xi32>
    %497 = arith.cmpi sge, %1, %496 : vector<1x256xi32>
    %498 = arith.andi %495, %497 : vector<1x256xi1>
    %cst_169 = arith.constant 0.000000e+00 : f32
    %499 = vector.shape_cast %498 : vector<1x256xi1> to vector<1x256xi1>
    %500 = vector.broadcast %499 : vector<1x256xi1> to vector<8x256xi1>
    %501 = vector.broadcast %cst_169 : f32 to vector<8x256xf32>
    %502 = arith.select %500, %493, %501 : vector<8x256xi1>, vector<8x256xf32>
    %c237_i32 = arith.constant 237 : i32
    %503 = tpu.dynamic_rotate %89 by %c237_i32 dim 1 : vector<8x256xf32>, i32 -> vector<8x256xf32>
    %c240_i32_170 = arith.constant 240 : i32
    %504 = vector.broadcast %c240_i32_170 : i32 to vector<1x256xi32>
    %505 = arith.cmpi slt, %0, %504 : vector<1x256xi32>
    %c13_i32_171 = arith.constant 13 : i32
    %506 = vector.broadcast %c13_i32_171 : i32 to vector<1x256xi32>
    %507 = arith.cmpi slt, %1, %506 : vector<1x256xi32>
    %508 = arith.andi %505, %507 : vector<1x256xi1>
    %cst_172 = arith.constant 0.000000e+00 : f32
    %509 = vector.shape_cast %508 : vector<1x256xi1> to vector<1x256xi1>
    %510 = vector.broadcast %509 : vector<1x256xi1> to vector<8x256xi1>
    %511 = vector.broadcast %cst_172 : f32 to vector<8x256xf32>
    %512 = arith.select %510, %503, %511 : vector<8x256xi1>, vector<8x256xf32>
    %c227_i32 = arith.constant 227 : i32
    %513 = tpu.dynamic_rotate %89 by %c227_i32 dim 1 : vector<8x256xf32>, i32 -> vector<8x256xf32>
    %c224_i32_173 = arith.constant 224 : i32
    %514 = vector.broadcast %c224_i32_173 : i32 to vector<1x256xi32>
    %515 = arith.cmpi slt, %0, %514 : vector<1x256xi32>
    %c3_i32_174 = arith.constant 3 : i32
    %516 = vector.broadcast %c3_i32_174 : i32 to vector<1x256xi32>
    %517 = arith.cmpi sge, %1, %516 : vector<1x256xi32>
    %518 = arith.andi %515, %517 : vector<1x256xi1>
    %cst_175 = arith.constant 0.000000e+00 : f32
    %519 = vector.shape_cast %518 : vector<1x256xi1> to vector<1x256xi1>
    %520 = vector.broadcast %519 : vector<1x256xi1> to vector<8x256xi1>
    %521 = vector.broadcast %cst_175 : f32 to vector<8x256xf32>
    %522 = arith.select %520, %513, %521 : vector<8x256xi1>, vector<8x256xf32>
    %c221_i32 = arith.constant 221 : i32
    %523 = tpu.dynamic_rotate %89 by %c221_i32 dim 1 : vector<8x256xf32>, i32 -> vector<8x256xf32>
    %c224_i32_176 = arith.constant 224 : i32
    %524 = vector.broadcast %c224_i32_176 : i32 to vector<1x256xi32>
    %525 = arith.cmpi slt, %0, %524 : vector<1x256xi32>
    %c13_i32_177 = arith.constant 13 : i32
    %526 = vector.broadcast %c13_i32_177 : i32 to vector<1x256xi32>
    %527 = arith.cmpi slt, %1, %526 : vector<1x256xi32>
    %528 = arith.andi %525, %527 : vector<1x256xi1>
    %cst_178 = arith.constant 0.000000e+00 : f32
    %529 = vector.shape_cast %528 : vector<1x256xi1> to vector<1x256xi1>
    %530 = vector.broadcast %529 : vector<1x256xi1> to vector<8x256xi1>
    %531 = vector.broadcast %cst_178 : f32 to vector<8x256xf32>
    %532 = arith.select %530, %523, %531 : vector<8x256xi1>, vector<8x256xf32>
    %c211_i32 = arith.constant 211 : i32
    %533 = tpu.dynamic_rotate %89 by %c211_i32 dim 1 : vector<8x256xf32>, i32 -> vector<8x256xf32>
    %c208_i32 = arith.constant 208 : i32
    %534 = vector.broadcast %c208_i32 : i32 to vector<1x256xi32>
    %535 = arith.cmpi slt, %0, %534 : vector<1x256xi32>
    %c3_i32_179 = arith.constant 3 : i32
    %536 = vector.broadcast %c3_i32_179 : i32 to vector<1x256xi32>
    %537 = arith.cmpi sge, %1, %536 : vector<1x256xi32>
    %538 = arith.andi %535, %537 : vector<1x256xi1>
    %cst_180 = arith.constant 0.000000e+00 : f32
    %539 = vector.shape_cast %538 : vector<1x256xi1> to vector<1x256xi1>
    %540 = vector.broadcast %539 : vector<1x256xi1> to vector<8x256xi1>
    %541 = vector.broadcast %cst_180 : f32 to vector<8x256xf32>
    %542 = arith.select %540, %533, %541 : vector<8x256xi1>, vector<8x256xf32>
    %c210_i32 = arith.constant 210 : i32
    %543 = tpu.dynamic_rotate %89 by %c210_i32 dim 1 : vector<8x256xf32>, i32 -> vector<8x256xf32>
    %c208_i32_181 = arith.constant 208 : i32
    %544 = vector.broadcast %c208_i32_181 : i32 to vector<1x256xi32>
    %545 = arith.cmpi slt, %0, %544 : vector<1x256xi32>
    %c2_i32_182 = arith.constant 2 : i32
    %546 = vector.broadcast %c2_i32_182 : i32 to vector<1x256xi32>
    %547 = arith.cmpi sge, %1, %546 : vector<1x256xi32>
    %548 = arith.andi %545, %547 : vector<1x256xi1>
    %cst_183 = arith.constant 0.000000e+00 : f32
    %549 = vector.shape_cast %548 : vector<1x256xi1> to vector<1x256xi1>
    %550 = vector.broadcast %549 : vector<1x256xi1> to vector<8x256xi1>
    %551 = vector.broadcast %cst_183 : f32 to vector<8x256xf32>
    %552 = arith.select %550, %543, %551 : vector<8x256xi1>, vector<8x256xf32>
    %c209_i32 = arith.constant 209 : i32
    %553 = tpu.dynamic_rotate %89 by %c209_i32 dim 1 : vector<8x256xf32>, i32 -> vector<8x256xf32>
    %c208_i32_184 = arith.constant 208 : i32
    %554 = vector.broadcast %c208_i32_184 : i32 to vector<1x256xi32>
    %555 = arith.cmpi slt, %0, %554 : vector<1x256xi32>
    %c1_i32_185 = arith.constant 1 : i32
    %556 = vector.broadcast %c1_i32_185 : i32 to vector<1x256xi32>
    %557 = arith.cmpi sge, %1, %556 : vector<1x256xi32>
    %558 = arith.andi %555, %557 : vector<1x256xi1>
    %cst_186 = arith.constant 0.000000e+00 : f32
    %559 = vector.shape_cast %558 : vector<1x256xi1> to vector<1x256xi1>
    %560 = vector.broadcast %559 : vector<1x256xi1> to vector<8x256xi1>
    %561 = vector.broadcast %cst_186 : f32 to vector<8x256xf32>
    %562 = arith.select %560, %553, %561 : vector<8x256xi1>, vector<8x256xf32>
    %c208_i32_187 = arith.constant 208 : i32
    %563 = tpu.dynamic_rotate %89 by %c208_i32_187 dim 1 : vector<8x256xf32>, i32 -> vector<8x256xf32>
    %c208_i32_188 = arith.constant 208 : i32
    %564 = vector.broadcast %c208_i32_188 : i32 to vector<1x256xi32>
    %565 = arith.cmpi slt, %0, %564 : vector<1x256xi32>
    %cst_189 = arith.constant 0.000000e+00 : f32
    %566 = vector.shape_cast %565 : vector<1x256xi1> to vector<1x256xi1>
    %567 = vector.broadcast %566 : vector<1x256xi1> to vector<8x256xi1>
    %568 = vector.broadcast %cst_189 : f32 to vector<8x256xf32>
    %569 = arith.select %567, %563, %568 : vector<8x256xi1>, vector<8x256xf32>
    %c207_i32 = arith.constant 207 : i32
    %570 = tpu.dynamic_rotate %89 by %c207_i32 dim 1 : vector<8x256xf32>, i32 -> vector<8x256xf32>
    %c208_i32_190 = arith.constant 208 : i32
    %571 = vector.broadcast %c208_i32_190 : i32 to vector<1x256xi32>
    %572 = arith.cmpi slt, %0, %571 : vector<1x256xi32>
    %c15_i32_191 = arith.constant 15 : i32
    %573 = vector.broadcast %c15_i32_191 : i32 to vector<1x256xi32>
    %574 = arith.cmpi slt, %1, %573 : vector<1x256xi32>
    %575 = arith.andi %572, %574 : vector<1x256xi1>
    %cst_192 = arith.constant 0.000000e+00 : f32
    %576 = vector.shape_cast %575 : vector<1x256xi1> to vector<1x256xi1>
    %577 = vector.broadcast %576 : vector<1x256xi1> to vector<8x256xi1>
    %578 = vector.broadcast %cst_192 : f32 to vector<8x256xf32>
    %579 = arith.select %577, %570, %578 : vector<8x256xi1>, vector<8x256xf32>
    %c206_i32 = arith.constant 206 : i32
    %580 = tpu.dynamic_rotate %89 by %c206_i32 dim 1 : vector<8x256xf32>, i32 -> vector<8x256xf32>
    %c208_i32_193 = arith.constant 208 : i32
    %581 = vector.broadcast %c208_i32_193 : i32 to vector<1x256xi32>
    %582 = arith.cmpi slt, %0, %581 : vector<1x256xi32>
    %c14_i32_194 = arith.constant 14 : i32
    %583 = vector.broadcast %c14_i32_194 : i32 to vector<1x256xi32>
    %584 = arith.cmpi slt, %1, %583 : vector<1x256xi32>
    %585 = arith.andi %582, %584 : vector<1x256xi1>
    %cst_195 = arith.constant 0.000000e+00 : f32
    %586 = vector.shape_cast %585 : vector<1x256xi1> to vector<1x256xi1>
    %587 = vector.broadcast %586 : vector<1x256xi1> to vector<8x256xi1>
    %588 = vector.broadcast %cst_195 : f32 to vector<8x256xf32>
    %589 = arith.select %587, %580, %588 : vector<8x256xi1>, vector<8x256xf32>
    %c205_i32 = arith.constant 205 : i32
    %590 = tpu.dynamic_rotate %89 by %c205_i32 dim 1 : vector<8x256xf32>, i32 -> vector<8x256xf32>
    %c208_i32_196 = arith.constant 208 : i32
    %591 = vector.broadcast %c208_i32_196 : i32 to vector<1x256xi32>
    %592 = arith.cmpi slt, %0, %591 : vector<1x256xi32>
    %c13_i32_197 = arith.constant 13 : i32
    %593 = vector.broadcast %c13_i32_197 : i32 to vector<1x256xi32>
    %594 = arith.cmpi slt, %1, %593 : vector<1x256xi32>
    %595 = arith.andi %592, %594 : vector<1x256xi1>
    %cst_198 = arith.constant 0.000000e+00 : f32
    %596 = vector.shape_cast %595 : vector<1x256xi1> to vector<1x256xi1>
    %597 = vector.broadcast %596 : vector<1x256xi1> to vector<8x256xi1>
    %598 = vector.broadcast %cst_198 : f32 to vector<8x256xf32>
    %599 = arith.select %597, %590, %598 : vector<8x256xi1>, vector<8x256xf32>
    %600 = tpu.concatenate %381, %391, %401, %408, %418, %428, %438, %448, %248, %253, %258, %263, %268, %458, %468, %273 in 0 : vector<8x256xf32>, vector<8x256xf32>, vector<8x256xf32>, vector<8x256xf32>, vector<8x256xf32>, vector<8x256xf32>, vector<8x256xf32>, vector<8x256xf32>, vector<8x256xf32>, vector<8x256xf32>, vector<8x256xf32>, vector<8x256xf32>, vector<8x256xf32>, vector<8x256xf32>, vector<8x256xf32>, vector<8x256xf32> -> vector<128x256xf32>
    %601 = tpu.concatenate %278, %283, %288, %293, %478, %485, %298, %303, %89, %308, %313, %492, %502, %318, %323, %328 in 0 : vector<8x256xf32>, vector<8x256xf32>, vector<8x256xf32>, vector<8x256xf32>, vector<8x256xf32>, vector<8x256xf32>, vector<8x256xf32>, vector<8x256xf32>, vector<8x256xf32>, vector<8x256xf32>, vector<8x256xf32>, vector<8x256xf32>, vector<8x256xf32>, vector<8x256xf32>, vector<8x256xf32>, vector<8x256xf32> -> vector<128x256xf32>
    %602 = tpu.concatenate %333, %338, %512, %522, %343, %348, %353, %358, %363, %532, %542, %552, %562, %569, %579, %589 in 0 : vector<8x256xf32>, vector<8x256xf32>, vector<8x256xf32>, vector<8x256xf32>, vector<8x256xf32>, vector<8x256xf32>, vector<8x256xf32>, vector<8x256xf32>, vector<8x256xf32>, vector<8x256xf32>, vector<8x256xf32>, vector<8x256xf32>, vector<8x256xf32>, vector<8x256xf32>, vector<8x256xf32>, vector<8x256xf32> -> vector<128x256xf32>
    %603 = tpu.concatenate %599, %7 in 0 : vector<8x256xf32>, vector<8x256xf32> -> vector<16x256xf32>
    %604 = tpu.concatenate %600, %601, %602, %603 in 0 : vector<128x256xf32>, vector<128x256xf32>, vector<128x256xf32>, vector<16x256xf32> -> vector<400x256xf32>
    %cst_199 = arith.constant dense<0.000000e+00> : vector<8x256xf32>
    %605 = tpu.matmul %371, %604, %cst_199 {dimension_numbers = #tpu.dot_dimension_numbers<[1], [0], [0], [1], [0, 0, 1, 1], [], []>} : vector<8x400xf32>, vector<400x256xf32>, vector<8x256xf32> -> vector<8x256xf32>
    %c40 = arith.constant 40 : index
    %c0_200 = arith.constant 0 : index
    %606 = vector.load %arg3[%c40, %c0_200] : memref<136x400xf32, #tpu.memory_space<vmem>>, vector<8x400xf32>
    %c51_i32_201 = arith.constant 51 : i32
    %607 = tpu.dynamic_rotate %370 by %c51_i32_201 dim 1 : vector<8x256xf32>, i32 -> vector<8x256xf32>
    %cst_202 = arith.constant 0.000000e+00 : f32
    %608 = vector.shape_cast %377 : vector<1x256xi1> to vector<1x256xi1>
    %609 = vector.broadcast %608 : vector<1x256xi1> to vector<8x256xi1>
    %610 = vector.broadcast %cst_202 : f32 to vector<8x256xf32>
    %611 = arith.select %609, %607, %610 : vector<8x256xi1>, vector<8x256xf32>
    %c50_i32_203 = arith.constant 50 : i32
    %612 = tpu.dynamic_rotate %370 by %c50_i32_203 dim 1 : vector<8x256xf32>, i32 -> vector<8x256xf32>
    %cst_204 = arith.constant 0.000000e+00 : f32
    %613 = vector.shape_cast %387 : vector<1x256xi1> to vector<1x256xi1>
    %614 = vector.broadcast %613 : vector<1x256xi1> to vector<8x256xi1>
    %615 = vector.broadcast %cst_204 : f32 to vector<8x256xf32>
    %616 = arith.select %614, %612, %615 : vector<8x256xi1>, vector<8x256xf32>
    %c49_i32_205 = arith.constant 49 : i32
    %617 = tpu.dynamic_rotate %370 by %c49_i32_205 dim 1 : vector<8x256xf32>, i32 -> vector<8x256xf32>
    %cst_206 = arith.constant 0.000000e+00 : f32
    %618 = vector.shape_cast %397 : vector<1x256xi1> to vector<1x256xi1>
    %619 = vector.broadcast %618 : vector<1x256xi1> to vector<8x256xi1>
    %620 = vector.broadcast %cst_206 : f32 to vector<8x256xf32>
    %621 = arith.select %619, %617, %620 : vector<8x256xi1>, vector<8x256xf32>
    %c48_i32_207 = arith.constant 48 : i32
    %622 = tpu.dynamic_rotate %370 by %c48_i32_207 dim 1 : vector<8x256xf32>, i32 -> vector<8x256xf32>
    %cst_208 = arith.constant 0.000000e+00 : f32
    %623 = vector.shape_cast %404 : vector<1x256xi1> to vector<1x256xi1>
    %624 = vector.broadcast %623 : vector<1x256xi1> to vector<8x256xi1>
    %625 = vector.broadcast %cst_208 : f32 to vector<8x256xf32>
    %626 = arith.select %624, %622, %625 : vector<8x256xi1>, vector<8x256xf32>
    %c47_i32_209 = arith.constant 47 : i32
    %627 = tpu.dynamic_rotate %370 by %c47_i32_209 dim 1 : vector<8x256xf32>, i32 -> vector<8x256xf32>
    %cst_210 = arith.constant 0.000000e+00 : f32
    %628 = vector.shape_cast %414 : vector<1x256xi1> to vector<1x256xi1>
    %629 = vector.broadcast %628 : vector<1x256xi1> to vector<8x256xi1>
    %630 = vector.broadcast %cst_210 : f32 to vector<8x256xf32>
    %631 = arith.select %629, %627, %630 : vector<8x256xi1>, vector<8x256xf32>
    %c46_i32_211 = arith.constant 46 : i32
    %632 = tpu.dynamic_rotate %370 by %c46_i32_211 dim 1 : vector<8x256xf32>, i32 -> vector<8x256xf32>
    %cst_212 = arith.constant 0.000000e+00 : f32
    %633 = vector.shape_cast %424 : vector<1x256xi1> to vector<1x256xi1>
    %634 = vector.broadcast %633 : vector<1x256xi1> to vector<8x256xi1>
    %635 = vector.broadcast %cst_212 : f32 to vector<8x256xf32>
    %636 = arith.select %634, %632, %635 : vector<8x256xi1>, vector<8x256xf32>
    %c45_i32_213 = arith.constant 45 : i32
    %637 = tpu.dynamic_rotate %370 by %c45_i32_213 dim 1 : vector<8x256xf32>, i32 -> vector<8x256xf32>
    %cst_214 = arith.constant 0.000000e+00 : f32
    %638 = vector.shape_cast %434 : vector<1x256xi1> to vector<1x256xi1>
    %639 = vector.broadcast %638 : vector<1x256xi1> to vector<8x256xi1>
    %640 = vector.broadcast %cst_214 : f32 to vector<8x256xf32>
    %641 = arith.select %639, %637, %640 : vector<8x256xi1>, vector<8x256xf32>
    %c35_i32_215 = arith.constant 35 : i32
    %642 = tpu.dynamic_rotate %370 by %c35_i32_215 dim 1 : vector<8x256xf32>, i32 -> vector<8x256xf32>
    %cst_216 = arith.constant 0.000000e+00 : f32
    %643 = vector.shape_cast %444 : vector<1x256xi1> to vector<1x256xi1>
    %644 = vector.broadcast %643 : vector<1x256xi1> to vector<8x256xi1>
    %645 = vector.broadcast %cst_216 : f32 to vector<8x256xf32>
    %646 = arith.select %644, %642, %645 : vector<8x256xi1>, vector<8x256xf32>
    %c34_i32_217 = arith.constant 34 : i32
    %647 = tpu.dynamic_rotate %370 by %c34_i32_217 dim 1 : vector<8x256xf32>, i32 -> vector<8x256xf32>
    %cst_218 = arith.constant 0.000000e+00 : f32
    %648 = vector.shape_cast %96 : vector<1x256xi1> to vector<1x256xi1>
    %649 = vector.broadcast %648 : vector<1x256xi1> to vector<8x256xi1>
    %650 = vector.broadcast %cst_218 : f32 to vector<8x256xf32>
    %651 = arith.select %649, %647, %650 : vector<8x256xi1>, vector<8x256xf32>
    %c33_i32_219 = arith.constant 33 : i32
    %652 = tpu.dynamic_rotate %370 by %c33_i32_219 dim 1 : vector<8x256xf32>, i32 -> vector<8x256xf32>
    %cst_220 = arith.constant 0.000000e+00 : f32
    %653 = vector.shape_cast %106 : vector<1x256xi1> to vector<1x256xi1>
    %654 = vector.broadcast %653 : vector<1x256xi1> to vector<8x256xi1>
    %655 = vector.broadcast %cst_220 : f32 to vector<8x256xf32>
    %656 = arith.select %654, %652, %655 : vector<8x256xi1>, vector<8x256xf32>
    %c32_i32_221 = arith.constant 32 : i32
    %657 = tpu.dynamic_rotate %370 by %c32_i32_221 dim 1 : vector<8x256xf32>, i32 -> vector<8x256xf32>
    %cst_222 = arith.constant 0.000000e+00 : f32
    %658 = vector.shape_cast %113 : vector<1x256xi1> to vector<1x256xi1>
    %659 = vector.broadcast %658 : vector<1x256xi1> to vector<8x256xi1>
    %660 = vector.broadcast %cst_222 : f32 to vector<8x256xf32>
    %661 = arith.select %659, %657, %660 : vector<8x256xi1>, vector<8x256xf32>
    %c31_i32_223 = arith.constant 31 : i32
    %662 = tpu.dynamic_rotate %370 by %c31_i32_223 dim 1 : vector<8x256xf32>, i32 -> vector<8x256xf32>
    %cst_224 = arith.constant 0.000000e+00 : f32
    %663 = vector.shape_cast %123 : vector<1x256xi1> to vector<1x256xi1>
    %664 = vector.broadcast %663 : vector<1x256xi1> to vector<8x256xi1>
    %665 = vector.broadcast %cst_224 : f32 to vector<8x256xf32>
    %666 = arith.select %664, %662, %665 : vector<8x256xi1>, vector<8x256xf32>
    %c30_i32_225 = arith.constant 30 : i32
    %667 = tpu.dynamic_rotate %370 by %c30_i32_225 dim 1 : vector<8x256xf32>, i32 -> vector<8x256xf32>
    %cst_226 = arith.constant 0.000000e+00 : f32
    %668 = vector.shape_cast %133 : vector<1x256xi1> to vector<1x256xi1>
    %669 = vector.broadcast %668 : vector<1x256xi1> to vector<8x256xi1>
    %670 = vector.broadcast %cst_226 : f32 to vector<8x256xf32>
    %671 = arith.select %669, %667, %670 : vector<8x256xi1>, vector<8x256xf32>
    %c29_i32_227 = arith.constant 29 : i32
    %672 = tpu.dynamic_rotate %370 by %c29_i32_227 dim 1 : vector<8x256xf32>, i32 -> vector<8x256xf32>
    %cst_228 = arith.constant 0.000000e+00 : f32
    %673 = vector.shape_cast %454 : vector<1x256xi1> to vector<1x256xi1>
    %674 = vector.broadcast %673 : vector<1x256xi1> to vector<8x256xi1>
    %675 = vector.broadcast %cst_228 : f32 to vector<8x256xf32>
    %676 = arith.select %674, %672, %675 : vector<8x256xi1>, vector<8x256xf32>
    %c19_i32_229 = arith.constant 19 : i32
    %677 = tpu.dynamic_rotate %370 by %c19_i32_229 dim 1 : vector<8x256xf32>, i32 -> vector<8x256xf32>
    %cst_230 = arith.constant 0.000000e+00 : f32
    %678 = vector.shape_cast %464 : vector<1x256xi1> to vector<1x256xi1>
    %679 = vector.broadcast %678 : vector<1x256xi1> to vector<8x256xi1>
    %680 = vector.broadcast %cst_230 : f32 to vector<8x256xf32>
    %681 = arith.select %679, %677, %680 : vector<8x256xi1>, vector<8x256xf32>
    %c18_i32_231 = arith.constant 18 : i32
    %682 = tpu.dynamic_rotate %370 by %c18_i32_231 dim 1 : vector<8x256xf32>, i32 -> vector<8x256xf32>
    %cst_232 = arith.constant 0.000000e+00 : f32
    %683 = vector.shape_cast %143 : vector<1x256xi1> to vector<1x256xi1>
    %684 = vector.broadcast %683 : vector<1x256xi1> to vector<8x256xi1>
    %685 = vector.broadcast %cst_232 : f32 to vector<8x256xf32>
    %686 = arith.select %684, %682, %685 : vector<8x256xi1>, vector<8x256xf32>
    %c17_i32_233 = arith.constant 17 : i32
    %687 = tpu.dynamic_rotate %370 by %c17_i32_233 dim 1 : vector<8x256xf32>, i32 -> vector<8x256xf32>
    %cst_234 = arith.constant 0.000000e+00 : f32
    %688 = vector.shape_cast %23 : vector<1x256xi1> to vector<1x256xi1>
    %689 = vector.broadcast %688 : vector<1x256xi1> to vector<8x256xi1>
    %690 = vector.broadcast %cst_234 : f32 to vector<8x256xf32>
    %691 = arith.select %689, %687, %690 : vector<8x256xi1>, vector<8x256xf32>
    %c16_i32_235 = arith.constant 16 : i32
    %692 = tpu.dynamic_rotate %370 by %c16_i32_235 dim 1 : vector<8x256xf32>, i32 -> vector<8x256xf32>
    %cst_236 = arith.constant 0.000000e+00 : f32
    %693 = vector.shape_cast %30 : vector<1x256xi1> to vector<1x256xi1>
    %694 = vector.broadcast %693 : vector<1x256xi1> to vector<8x256xi1>
    %695 = vector.broadcast %cst_236 : f32 to vector<8x256xf32>
    %696 = arith.select %694, %692, %695 : vector<8x256xi1>, vector<8x256xf32>
    %c15_i32_237 = arith.constant 15 : i32
    %697 = tpu.dynamic_rotate %370 by %c15_i32_237 dim 1 : vector<8x256xf32>, i32 -> vector<8x256xf32>
    %cst_238 = arith.constant 0.000000e+00 : f32
    %698 = vector.shape_cast %40 : vector<1x256xi1> to vector<1x256xi1>
    %699 = vector.broadcast %698 : vector<1x256xi1> to vector<8x256xi1>
    %700 = vector.broadcast %cst_238 : f32 to vector<8x256xf32>
    %701 = arith.select %699, %697, %700 : vector<8x256xi1>, vector<8x256xf32>
    %c14_i32_239 = arith.constant 14 : i32
    %702 = tpu.dynamic_rotate %370 by %c14_i32_239 dim 1 : vector<8x256xf32>, i32 -> vector<8x256xf32>
    %cst_240 = arith.constant 0.000000e+00 : f32
    %703 = vector.shape_cast %153 : vector<1x256xi1> to vector<1x256xi1>
    %704 = vector.broadcast %703 : vector<1x256xi1> to vector<8x256xi1>
    %705 = vector.broadcast %cst_240 : f32 to vector<8x256xf32>
    %706 = arith.select %704, %702, %705 : vector<8x256xi1>, vector<8x256xf32>
    %c13_i32_241 = arith.constant 13 : i32
    %707 = tpu.dynamic_rotate %370 by %c13_i32_241 dim 1 : vector<8x256xf32>, i32 -> vector<8x256xf32>
    %cst_242 = arith.constant 0.000000e+00 : f32
    %708 = vector.shape_cast %474 : vector<1x256xi1> to vector<1x256xi1>
    %709 = vector.broadcast %708 : vector<1x256xi1> to vector<8x256xi1>
    %710 = vector.broadcast %cst_242 : f32 to vector<8x256xf32>
    %711 = arith.select %709, %707, %710 : vector<8x256xi1>, vector<8x256xf32>
    %c3_i32_243 = arith.constant 3 : i32
    %712 = tpu.dynamic_rotate %370 by %c3_i32_243 dim 1 : vector<8x256xf32>, i32 -> vector<8x256xf32>
    %cst_244 = arith.constant 0.000000e+00 : f32
    %713 = vector.shape_cast %481 : vector<1x256xi1> to vector<1x256xi1>
    %714 = vector.broadcast %713 : vector<1x256xi1> to vector<8x256xi1>
    %715 = vector.broadcast %cst_244 : f32 to vector<8x256xf32>
    %716 = arith.select %714, %712, %715 : vector<8x256xi1>, vector<8x256xf32>
    %c2_i32_245 = arith.constant 2 : i32
    %717 = tpu.dynamic_rotate %370 by %c2_i32_245 dim 1 : vector<8x256xf32>, i32 -> vector<8x256xf32>
    %cst_246 = arith.constant 0.000000e+00 : f32
    %718 = vector.shape_cast %160 : vector<1x256xi1> to vector<1x256xi1>
    %719 = vector.broadcast %718 : vector<1x256xi1> to vector<8x256xi1>
    %720 = vector.broadcast %cst_246 : f32 to vector<8x256xf32>
    %721 = arith.select %719, %717, %720 : vector<8x256xi1>, vector<8x256xf32>
    %c1_i32_247 = arith.constant 1 : i32
    %722 = tpu.dynamic_rotate %370 by %c1_i32_247 dim 1 : vector<8x256xf32>, i32 -> vector<8x256xf32>
    %cst_248 = arith.constant 0.000000e+00 : f32
    %723 = vector.shape_cast %47 : vector<1x256xi1> to vector<1x256xi1>
    %724 = vector.broadcast %723 : vector<1x256xi1> to vector<8x256xi1>
    %725 = vector.broadcast %cst_248 : f32 to vector<8x256xf32>
    %726 = arith.select %724, %722, %725 : vector<8x256xi1>, vector<8x256xf32>
    %c255_i32_249 = arith.constant 255 : i32
    %727 = tpu.dynamic_rotate %370 by %c255_i32_249 dim 1 : vector<8x256xf32>, i32 -> vector<8x256xf32>
    %cst_250 = arith.constant 0.000000e+00 : f32
    %728 = vector.shape_cast %54 : vector<1x256xi1> to vector<1x256xi1>
    %729 = vector.broadcast %728 : vector<1x256xi1> to vector<8x256xi1>
    %730 = vector.broadcast %cst_250 : f32 to vector<8x256xf32>
    %731 = arith.select %729, %727, %730 : vector<8x256xi1>, vector<8x256xf32>
    %c254_i32_251 = arith.constant 254 : i32
    %732 = tpu.dynamic_rotate %370 by %c254_i32_251 dim 1 : vector<8x256xf32>, i32 -> vector<8x256xf32>
    %cst_252 = arith.constant 0.000000e+00 : f32
    %733 = vector.shape_cast %167 : vector<1x256xi1> to vector<1x256xi1>
    %734 = vector.broadcast %733 : vector<1x256xi1> to vector<8x256xi1>
    %735 = vector.broadcast %cst_252 : f32 to vector<8x256xf32>
    %736 = arith.select %734, %732, %735 : vector<8x256xi1>, vector<8x256xf32>
    %c253_i32_253 = arith.constant 253 : i32
    %737 = tpu.dynamic_rotate %370 by %c253_i32_253 dim 1 : vector<8x256xf32>, i32 -> vector<8x256xf32>
    %cst_254 = arith.constant 0.000000e+00 : f32
    %738 = vector.shape_cast %488 : vector<1x256xi1> to vector<1x256xi1>
    %739 = vector.broadcast %738 : vector<1x256xi1> to vector<8x256xi1>
    %740 = vector.broadcast %cst_254 : f32 to vector<8x256xf32>
    %741 = arith.select %739, %737, %740 : vector<8x256xi1>, vector<8x256xf32>
    %c243_i32_255 = arith.constant 243 : i32
    %742 = tpu.dynamic_rotate %370 by %c243_i32_255 dim 1 : vector<8x256xf32>, i32 -> vector<8x256xf32>
    %cst_256 = arith.constant 0.000000e+00 : f32
    %743 = vector.shape_cast %498 : vector<1x256xi1> to vector<1x256xi1>
    %744 = vector.broadcast %743 : vector<1x256xi1> to vector<8x256xi1>
    %745 = vector.broadcast %cst_256 : f32 to vector<8x256xf32>
    %746 = arith.select %744, %742, %745 : vector<8x256xi1>, vector<8x256xf32>
    %c242_i32_257 = arith.constant 242 : i32
    %747 = tpu.dynamic_rotate %370 by %c242_i32_257 dim 1 : vector<8x256xf32>, i32 -> vector<8x256xf32>
    %cst_258 = arith.constant 0.000000e+00 : f32
    %748 = vector.shape_cast %177 : vector<1x256xi1> to vector<1x256xi1>
    %749 = vector.broadcast %748 : vector<1x256xi1> to vector<8x256xi1>
    %750 = vector.broadcast %cst_258 : f32 to vector<8x256xf32>
    %751 = arith.select %749, %747, %750 : vector<8x256xi1>, vector<8x256xf32>
    %c241_i32_259 = arith.constant 241 : i32
    %752 = tpu.dynamic_rotate %370 by %c241_i32_259 dim 1 : vector<8x256xf32>, i32 -> vector<8x256xf32>
    %cst_260 = arith.constant 0.000000e+00 : f32
    %753 = vector.shape_cast %64 : vector<1x256xi1> to vector<1x256xi1>
    %754 = vector.broadcast %753 : vector<1x256xi1> to vector<8x256xi1>
    %755 = vector.broadcast %cst_260 : f32 to vector<8x256xf32>
    %756 = arith.select %754, %752, %755 : vector<8x256xi1>, vector<8x256xf32>
    %c240_i32_261 = arith.constant 240 : i32
    %757 = tpu.dynamic_rotate %370 by %c240_i32_261 dim 1 : vector<8x256xf32>, i32 -> vector<8x256xf32>
    %cst_262 = arith.constant 0.000000e+00 : f32
    %758 = vector.shape_cast %71 : vector<1x256xi1> to vector<1x256xi1>
    %759 = vector.broadcast %758 : vector<1x256xi1> to vector<8x256xi1>
    %760 = vector.broadcast %cst_262 : f32 to vector<8x256xf32>
    %761 = arith.select %759, %757, %760 : vector<8x256xi1>, vector<8x256xf32>
    %c239_i32_263 = arith.constant 239 : i32
    %762 = tpu.dynamic_rotate %370 by %c239_i32_263 dim 1 : vector<8x256xf32>, i32 -> vector<8x256xf32>
    %cst_264 = arith.constant 0.000000e+00 : f32
    %763 = vector.shape_cast %81 : vector<1x256xi1> to vector<1x256xi1>
    %764 = vector.broadcast %763 : vector<1x256xi1> to vector<8x256xi1>
    %765 = vector.broadcast %cst_264 : f32 to vector<8x256xf32>
    %766 = arith.select %764, %762, %765 : vector<8x256xi1>, vector<8x256xf32>
    %c238_i32_265 = arith.constant 238 : i32
    %767 = tpu.dynamic_rotate %370 by %c238_i32_265 dim 1 : vector<8x256xf32>, i32 -> vector<8x256xf32>
    %cst_266 = arith.constant 0.000000e+00 : f32
    %768 = vector.shape_cast %187 : vector<1x256xi1> to vector<1x256xi1>
    %769 = vector.broadcast %768 : vector<1x256xi1> to vector<8x256xi1>
    %770 = vector.broadcast %cst_266 : f32 to vector<8x256xf32>
    %771 = arith.select %769, %767, %770 : vector<8x256xi1>, vector<8x256xf32>
    %c237_i32_267 = arith.constant 237 : i32
    %772 = tpu.dynamic_rotate %370 by %c237_i32_267 dim 1 : vector<8x256xf32>, i32 -> vector<8x256xf32>
    %cst_268 = arith.constant 0.000000e+00 : f32
    %773 = vector.shape_cast %508 : vector<1x256xi1> to vector<1x256xi1>
    %774 = vector.broadcast %773 : vector<1x256xi1> to vector<8x256xi1>
    %775 = vector.broadcast %cst_268 : f32 to vector<8x256xf32>
    %776 = arith.select %774, %772, %775 : vector<8x256xi1>, vector<8x256xf32>
    %c227_i32_269 = arith.constant 227 : i32
    %777 = tpu.dynamic_rotate %370 by %c227_i32_269 dim 1 : vector<8x256xf32>, i32 -> vector<8x256xf32>
    %cst_270 = arith.constant 0.000000e+00 : f32
    %778 = vector.shape_cast %518 : vector<1x256xi1> to vector<1x256xi1>
    %779 = vector.broadcast %778 : vector<1x256xi1> to vector<8x256xi1>
    %780 = vector.broadcast %cst_270 : f32 to vector<8x256xf32>
    %781 = arith.select %779, %777, %780 : vector<8x256xi1>, vector<8x256xf32>
    %c226_i32_271 = arith.constant 226 : i32
    %782 = tpu.dynamic_rotate %370 by %c226_i32_271 dim 1 : vector<8x256xf32>, i32 -> vector<8x256xf32>
    %cst_272 = arith.constant 0.000000e+00 : f32
    %783 = vector.shape_cast %197 : vector<1x256xi1> to vector<1x256xi1>
    %784 = vector.broadcast %783 : vector<1x256xi1> to vector<8x256xi1>
    %785 = vector.broadcast %cst_272 : f32 to vector<8x256xf32>
    %786 = arith.select %784, %782, %785 : vector<8x256xi1>, vector<8x256xf32>
    %c225_i32_273 = arith.constant 225 : i32
    %787 = tpu.dynamic_rotate %370 by %c225_i32_273 dim 1 : vector<8x256xf32>, i32 -> vector<8x256xf32>
    %cst_274 = arith.constant 0.000000e+00 : f32
    %788 = vector.shape_cast %207 : vector<1x256xi1> to vector<1x256xi1>
    %789 = vector.broadcast %788 : vector<1x256xi1> to vector<8x256xi1>
    %790 = vector.broadcast %cst_274 : f32 to vector<8x256xf32>
    %791 = arith.select %789, %787, %790 : vector<8x256xi1>, vector<8x256xf32>
    %c224_i32_275 = arith.constant 224 : i32
    %792 = tpu.dynamic_rotate %370 by %c224_i32_275 dim 1 : vector<8x256xf32>, i32 -> vector<8x256xf32>
    %cst_276 = arith.constant 0.000000e+00 : f32
    %793 = vector.shape_cast %214 : vector<1x256xi1> to vector<1x256xi1>
    %794 = vector.broadcast %793 : vector<1x256xi1> to vector<8x256xi1>
    %795 = vector.broadcast %cst_276 : f32 to vector<8x256xf32>
    %796 = arith.select %794, %792, %795 : vector<8x256xi1>, vector<8x256xf32>
    %c223_i32_277 = arith.constant 223 : i32
    %797 = tpu.dynamic_rotate %370 by %c223_i32_277 dim 1 : vector<8x256xf32>, i32 -> vector<8x256xf32>
    %cst_278 = arith.constant 0.000000e+00 : f32
    %798 = vector.shape_cast %224 : vector<1x256xi1> to vector<1x256xi1>
    %799 = vector.broadcast %798 : vector<1x256xi1> to vector<8x256xi1>
    %800 = vector.broadcast %cst_278 : f32 to vector<8x256xf32>
    %801 = arith.select %799, %797, %800 : vector<8x256xi1>, vector<8x256xf32>
    %c222_i32_279 = arith.constant 222 : i32
    %802 = tpu.dynamic_rotate %370 by %c222_i32_279 dim 1 : vector<8x256xf32>, i32 -> vector<8x256xf32>
    %cst_280 = arith.constant 0.000000e+00 : f32
    %803 = vector.shape_cast %234 : vector<1x256xi1> to vector<1x256xi1>
    %804 = vector.broadcast %803 : vector<1x256xi1> to vector<8x256xi1>
    %805 = vector.broadcast %cst_280 : f32 to vector<8x256xf32>
    %806 = arith.select %804, %802, %805 : vector<8x256xi1>, vector<8x256xf32>
    %c221_i32_281 = arith.constant 221 : i32
    %807 = tpu.dynamic_rotate %370 by %c221_i32_281 dim 1 : vector<8x256xf32>, i32 -> vector<8x256xf32>
    %cst_282 = arith.constant 0.000000e+00 : f32
    %808 = vector.shape_cast %528 : vector<1x256xi1> to vector<1x256xi1>
    %809 = vector.broadcast %808 : vector<1x256xi1> to vector<8x256xi1>
    %810 = vector.broadcast %cst_282 : f32 to vector<8x256xf32>
    %811 = arith.select %809, %807, %810 : vector<8x256xi1>, vector<8x256xf32>
    %c211_i32_283 = arith.constant 211 : i32
    %812 = tpu.dynamic_rotate %370 by %c211_i32_283 dim 1 : vector<8x256xf32>, i32 -> vector<8x256xf32>
    %cst_284 = arith.constant 0.000000e+00 : f32
    %813 = vector.shape_cast %538 : vector<1x256xi1> to vector<1x256xi1>
    %814 = vector.broadcast %813 : vector<1x256xi1> to vector<8x256xi1>
    %815 = vector.broadcast %cst_284 : f32 to vector<8x256xf32>
    %816 = arith.select %814, %812, %815 : vector<8x256xi1>, vector<8x256xf32>
    %c210_i32_285 = arith.constant 210 : i32
    %817 = tpu.dynamic_rotate %370 by %c210_i32_285 dim 1 : vector<8x256xf32>, i32 -> vector<8x256xf32>
    %cst_286 = arith.constant 0.000000e+00 : f32
    %818 = vector.shape_cast %548 : vector<1x256xi1> to vector<1x256xi1>
    %819 = vector.broadcast %818 : vector<1x256xi1> to vector<8x256xi1>
    %820 = vector.broadcast %cst_286 : f32 to vector<8x256xf32>
    %821 = arith.select %819, %817, %820 : vector<8x256xi1>, vector<8x256xf32>
    %c209_i32_287 = arith.constant 209 : i32
    %822 = tpu.dynamic_rotate %370 by %c209_i32_287 dim 1 : vector<8x256xf32>, i32 -> vector<8x256xf32>
    %cst_288 = arith.constant 0.000000e+00 : f32
    %823 = vector.shape_cast %558 : vector<1x256xi1> to vector<1x256xi1>
    %824 = vector.broadcast %823 : vector<1x256xi1> to vector<8x256xi1>
    %825 = vector.broadcast %cst_288 : f32 to vector<8x256xf32>
    %826 = arith.select %824, %822, %825 : vector<8x256xi1>, vector<8x256xf32>
    %c208_i32_289 = arith.constant 208 : i32
    %827 = tpu.dynamic_rotate %370 by %c208_i32_289 dim 1 : vector<8x256xf32>, i32 -> vector<8x256xf32>
    %cst_290 = arith.constant 0.000000e+00 : f32
    %828 = vector.shape_cast %565 : vector<1x256xi1> to vector<1x256xi1>
    %829 = vector.broadcast %828 : vector<1x256xi1> to vector<8x256xi1>
    %830 = vector.broadcast %cst_290 : f32 to vector<8x256xf32>
    %831 = arith.select %829, %827, %830 : vector<8x256xi1>, vector<8x256xf32>
    %c207_i32_291 = arith.constant 207 : i32
    %832 = tpu.dynamic_rotate %370 by %c207_i32_291 dim 1 : vector<8x256xf32>, i32 -> vector<8x256xf32>
    %cst_292 = arith.constant 0.000000e+00 : f32
    %833 = vector.shape_cast %575 : vector<1x256xi1> to vector<1x256xi1>
    %834 = vector.broadcast %833 : vector<1x256xi1> to vector<8x256xi1>
    %835 = vector.broadcast %cst_292 : f32 to vector<8x256xf32>
    %836 = arith.select %834, %832, %835 : vector<8x256xi1>, vector<8x256xf32>
    %c206_i32_293 = arith.constant 206 : i32
    %837 = tpu.dynamic_rotate %370 by %c206_i32_293 dim 1 : vector<8x256xf32>, i32 -> vector<8x256xf32>
    %cst_294 = arith.constant 0.000000e+00 : f32
    %838 = vector.shape_cast %585 : vector<1x256xi1> to vector<1x256xi1>
    %839 = vector.broadcast %838 : vector<1x256xi1> to vector<8x256xi1>
    %840 = vector.broadcast %cst_294 : f32 to vector<8x256xf32>
    %841 = arith.select %839, %837, %840 : vector<8x256xi1>, vector<8x256xf32>
    %c205_i32_295 = arith.constant 205 : i32
    %842 = tpu.dynamic_rotate %370 by %c205_i32_295 dim 1 : vector<8x256xf32>, i32 -> vector<8x256xf32>
    %cst_296 = arith.constant 0.000000e+00 : f32
    %843 = vector.shape_cast %595 : vector<1x256xi1> to vector<1x256xi1>
    %844 = vector.broadcast %843 : vector<1x256xi1> to vector<8x256xi1>
    %845 = vector.broadcast %cst_296 : f32 to vector<8x256xf32>
    %846 = arith.select %844, %842, %845 : vector<8x256xi1>, vector<8x256xf32>
    %847 = tpu.concatenate %611, %616, %621, %626, %631, %636, %641, %646, %651, %656, %661, %666, %671, %676, %681, %686 in 0 : vector<8x256xf32>, vector<8x256xf32>, vector<8x256xf32>, vector<8x256xf32>, vector<8x256xf32>, vector<8x256xf32>, vector<8x256xf32>, vector<8x256xf32>, vector<8x256xf32>, vector<8x256xf32>, vector<8x256xf32>, vector<8x256xf32>, vector<8x256xf32>, vector<8x256xf32>, vector<8x256xf32>, vector<8x256xf32> -> vector<128x256xf32>
    %848 = tpu.concatenate %691, %696, %701, %706, %711, %716, %721, %726, %370, %731, %736, %741, %746, %751, %756, %761 in 0 : vector<8x256xf32>, vector<8x256xf32>, vector<8x256xf32>, vector<8x256xf32>, vector<8x256xf32>, vector<8x256xf32>, vector<8x256xf32>, vector<8x256xf32>, vector<8x256xf32>, vector<8x256xf32>, vector<8x256xf32>, vector<8x256xf32>, vector<8x256xf32>, vector<8x256xf32>, vector<8x256xf32>, vector<8x256xf32> -> vector<128x256xf32>
    %849 = tpu.concatenate %766, %771, %776, %781, %786, %791, %796, %801, %806, %811, %816, %821, %826, %831, %836, %841 in 0 : vector<8x256xf32>, vector<8x256xf32>, vector<8x256xf32>, vector<8x256xf32>, vector<8x256xf32>, vector<8x256xf32>, vector<8x256xf32>, vector<8x256xf32>, vector<8x256xf32>, vector<8x256xf32>, vector<8x256xf32>, vector<8x256xf32>, vector<8x256xf32>, vector<8x256xf32>, vector<8x256xf32>, vector<8x256xf32> -> vector<128x256xf32>
    %850 = tpu.concatenate %846, %7 in 0 : vector<8x256xf32>, vector<8x256xf32> -> vector<16x256xf32>
    %851 = tpu.concatenate %847, %848, %849, %850 in 0 : vector<128x256xf32>, vector<128x256xf32>, vector<128x256xf32>, vector<16x256xf32> -> vector<400x256xf32>
    %cst_297 = arith.constant dense<0.000000e+00> : vector<8x256xf32>
    %852 = tpu.matmul %606, %851, %cst_297 {dimension_numbers = #tpu.dot_dimension_numbers<[1], [0], [0], [1], [0, 0, 1, 1], [], []>} : vector<8x400xf32>, vector<400x256xf32>, vector<8x256xf32> -> vector<8x256xf32>
    %853 = arith.addf %605, %852 : vector<8x256xf32>
    %cst_298 = arith.constant 0.000000e+00 : f32
    %854 = vector.broadcast %cst_298 : f32 to vector<8x256xf32>
    %855 = arith.maximumf %853, %854 : vector<8x256xf32>
    %c48 = arith.constant 48 : index
    %c0_299 = arith.constant 0 : index
    %856 = vector.load %arg3[%c48, %c0_299] : memref<136x400xf32, #tpu.memory_space<vmem>>, vector<16x80xf32>
    %cst_300 = arith.constant dense<0.000000e+00> : vector<16x256xf32>
    %857 = tpu.matmul %856, %86, %cst_300 {dimension_numbers = #tpu.dot_dimension_numbers<[1], [0], [0], [1], [0, 0, 1, 1], [], []>} : vector<16x80xf32>, vector<80x256xf32>, vector<16x256xf32> -> vector<16x256xf32>
    %c64 = arith.constant 64 : index
    %c0_301 = arith.constant 0 : index
    %858 = vector.load %arg3[%c64, %c0_301] : memref<136x400xf32, #tpu.memory_space<vmem>>, vector<16x80xf32>
    %859 = tpu.concatenate %278, %283, %288, %303, %89, %308, %323, %328, %333, %7 in 0 : vector<8x256xf32>, vector<8x256xf32>, vector<8x256xf32>, vector<8x256xf32>, vector<8x256xf32>, vector<8x256xf32>, vector<8x256xf32>, vector<8x256xf32>, vector<8x256xf32>, vector<8x256xf32> -> vector<80x256xf32>
    %cst_302 = arith.constant dense<0.000000e+00> : vector<16x256xf32>
    %860 = tpu.matmul %858, %859, %cst_302 {dimension_numbers = #tpu.dot_dimension_numbers<[1], [0], [0], [1], [0, 0, 1, 1], [], []>} : vector<16x80xf32>, vector<80x256xf32>, vector<16x256xf32> -> vector<16x256xf32>
    %861 = arith.addf %857, %860 : vector<16x256xf32>
    %c80 = arith.constant 80 : index
    %c0_303 = arith.constant 0 : index
    %862 = vector.load %arg3[%c80, %c0_303] : memref<136x400xf32, #tpu.memory_space<vmem>>, vector<16x80xf32>
    %863 = tpu.concatenate %691, %696, %701, %726, %370, %731, %756, %761, %766, %7 in 0 : vector<8x256xf32>, vector<8x256xf32>, vector<8x256xf32>, vector<8x256xf32>, vector<8x256xf32>, vector<8x256xf32>, vector<8x256xf32>, vector<8x256xf32>, vector<8x256xf32>, vector<8x256xf32> -> vector<80x256xf32>
    %cst_304 = arith.constant dense<0.000000e+00> : vector<16x256xf32>
    %864 = tpu.matmul %862, %863, %cst_304 {dimension_numbers = #tpu.dot_dimension_numbers<[1], [0], [0], [1], [0, 0, 1, 1], [], []>} : vector<16x80xf32>, vector<80x256xf32>, vector<16x256xf32> -> vector<16x256xf32>
    %865 = arith.addf %861, %864 : vector<16x256xf32>
    %c96 = arith.constant 96 : index
    %c0_305 = arith.constant 0 : index
    %866 = vector.load %arg3[%c96, %c0_305] : memref<136x400xf32, #tpu.memory_space<vmem>>, vector<16x80xf32>
    %c17_i32_306 = arith.constant 17 : i32
    %867 = tpu.dynamic_rotate %855 by %c17_i32_306 dim 1 : vector<8x256xf32>, i32 -> vector<8x256xf32>
    %cst_307 = arith.constant 0.000000e+00 : f32
    %868 = vector.shape_cast %23 : vector<1x256xi1> to vector<1x256xi1>
    %869 = vector.broadcast %868 : vector<1x256xi1> to vector<8x256xi1>
    %870 = vector.broadcast %cst_307 : f32 to vector<8x256xf32>
    %871 = arith.select %869, %867, %870 : vector<8x256xi1>, vector<8x256xf32>
    %c16_i32_308 = arith.constant 16 : i32
    %872 = tpu.dynamic_rotate %855 by %c16_i32_308 dim 1 : vector<8x256xf32>, i32 -> vector<8x256xf32>
    %cst_309 = arith.constant 0.000000e+00 : f32
    %873 = vector.shape_cast %30 : vector<1x256xi1> to vector<1x256xi1>
    %874 = vector.broadcast %873 : vector<1x256xi1> to vector<8x256xi1>
    %875 = vector.broadcast %cst_309 : f32 to vector<8x256xf32>
    %876 = arith.select %874, %872, %875 : vector<8x256xi1>, vector<8x256xf32>
    %c15_i32_310 = arith.constant 15 : i32
    %877 = tpu.dynamic_rotate %855 by %c15_i32_310 dim 1 : vector<8x256xf32>, i32 -> vector<8x256xf32>
    %cst_311 = arith.constant 0.000000e+00 : f32
    %878 = vector.shape_cast %40 : vector<1x256xi1> to vector<1x256xi1>
    %879 = vector.broadcast %878 : vector<1x256xi1> to vector<8x256xi1>
    %880 = vector.broadcast %cst_311 : f32 to vector<8x256xf32>
    %881 = arith.select %879, %877, %880 : vector<8x256xi1>, vector<8x256xf32>
    %c1_i32_312 = arith.constant 1 : i32
    %882 = tpu.dynamic_rotate %855 by %c1_i32_312 dim 1 : vector<8x256xf32>, i32 -> vector<8x256xf32>
    %cst_313 = arith.constant 0.000000e+00 : f32
    %883 = vector.shape_cast %47 : vector<1x256xi1> to vector<1x256xi1>
    %884 = vector.broadcast %883 : vector<1x256xi1> to vector<8x256xi1>
    %885 = vector.broadcast %cst_313 : f32 to vector<8x256xf32>
    %886 = arith.select %884, %882, %885 : vector<8x256xi1>, vector<8x256xf32>
    %c255_i32_314 = arith.constant 255 : i32
    %887 = tpu.dynamic_rotate %855 by %c255_i32_314 dim 1 : vector<8x256xf32>, i32 -> vector<8x256xf32>
    %cst_315 = arith.constant 0.000000e+00 : f32
    %888 = vector.shape_cast %54 : vector<1x256xi1> to vector<1x256xi1>
    %889 = vector.broadcast %888 : vector<1x256xi1> to vector<8x256xi1>
    %890 = vector.broadcast %cst_315 : f32 to vector<8x256xf32>
    %891 = arith.select %889, %887, %890 : vector<8x256xi1>, vector<8x256xf32>
    %c241_i32_316 = arith.constant 241 : i32
    %892 = tpu.dynamic_rotate %855 by %c241_i32_316 dim 1 : vector<8x256xf32>, i32 -> vector<8x256xf32>
    %cst_317 = arith.constant 0.000000e+00 : f32
    %893 = vector.shape_cast %64 : vector<1x256xi1> to vector<1x256xi1>
    %894 = vector.broadcast %893 : vector<1x256xi1> to vector<8x256xi1>
    %895 = vector.broadcast %cst_317 : f32 to vector<8x256xf32>
    %896 = arith.select %894, %892, %895 : vector<8x256xi1>, vector<8x256xf32>
    %c240_i32_318 = arith.constant 240 : i32
    %897 = tpu.dynamic_rotate %855 by %c240_i32_318 dim 1 : vector<8x256xf32>, i32 -> vector<8x256xf32>
    %cst_319 = arith.constant 0.000000e+00 : f32
    %898 = vector.shape_cast %71 : vector<1x256xi1> to vector<1x256xi1>
    %899 = vector.broadcast %898 : vector<1x256xi1> to vector<8x256xi1>
    %900 = vector.broadcast %cst_319 : f32 to vector<8x256xf32>
    %901 = arith.select %899, %897, %900 : vector<8x256xi1>, vector<8x256xf32>
    %c239_i32_320 = arith.constant 239 : i32
    %902 = tpu.dynamic_rotate %855 by %c239_i32_320 dim 1 : vector<8x256xf32>, i32 -> vector<8x256xf32>
    %cst_321 = arith.constant 0.000000e+00 : f32
    %903 = vector.shape_cast %81 : vector<1x256xi1> to vector<1x256xi1>
    %904 = vector.broadcast %903 : vector<1x256xi1> to vector<8x256xi1>
    %905 = vector.broadcast %cst_321 : f32 to vector<8x256xf32>
    %906 = arith.select %904, %902, %905 : vector<8x256xi1>, vector<8x256xf32>
    %907 = tpu.concatenate %871, %876, %881, %886, %855, %891, %896, %901, %906, %7 in 0 : vector<8x256xf32>, vector<8x256xf32>, vector<8x256xf32>, vector<8x256xf32>, vector<8x256xf32>, vector<8x256xf32>, vector<8x256xf32>, vector<8x256xf32>, vector<8x256xf32>, vector<8x256xf32> -> vector<80x256xf32>
    %cst_322 = arith.constant dense<0.000000e+00> : vector<16x256xf32>
    %908 = tpu.matmul %866, %907, %cst_322 {dimension_numbers = #tpu.dot_dimension_numbers<[1], [0], [0], [1], [0, 0, 1, 1], [], []>} : vector<16x80xf32>, vector<80x256xf32>, vector<16x256xf32> -> vector<16x256xf32>
    %909 = arith.addf %865, %908 : vector<16x256xf32>
    %cst_323 = arith.constant 0.000000e+00 : f32
    %910 = vector.broadcast %cst_323 : f32 to vector<16x256xf32>
    %911 = arith.maximumf %909, %910 : vector<16x256xf32>
    %912 = tpu.concatenate %911, %7 in 0 : vector<16x256xf32>, vector<8x256xf32> -> vector<24x256xf32>
    %c112 = arith.constant 112 : index
    %c0_324 = arith.constant 0 : index
    %913 = vector.load %arg3[%c112, %c0_324] : memref<136x400xf32, #tpu.memory_space<vmem>>, vector<16x24xf32>
    %cst_325 = arith.constant dense<0.000000e+00> : vector<16x256xf32>
    %914 = tpu.matmul %913, %912, %cst_325 {dimension_numbers = #tpu.dot_dimension_numbers<[1], [0], [0], [1], [0, 0, 1, 1], [], []>} : vector<16x24xf32>, vector<24x256xf32>, vector<16x256xf32> -> vector<16x256xf32>
    %915 = vector.extract_strided_slice %914 {offsets = [0, 0], sizes = [12, 256], strides = [1, 1]} : vector<16x256xf32> to vector<12x256xf32>
    %916 = vector.extract_strided_slice %914 {offsets = [12, 0], sizes = [1, 256], strides = [1, 1]} : vector<16x256xf32> to vector<1x256xf32>
    %c128 = arith.constant 128 : index
    %c0_326 = arith.constant 0 : index
    %917 = vector.load %arg3[%c128, %c0_326] : memref<136x400xf32, #tpu.memory_space<vmem>>, vector<1x24xf32>
    %cst_327 = arith.constant dense<0.000000e+00> : vector<256x1xf32>
    %918 = tpu.matmul %912, %917, %cst_327 {dimension_numbers = #tpu.dot_dimension_numbers<[0], [1], [1], [0], [0, 1, 1, 0], [], []>} : vector<24x256xf32>, vector<1x24xf32>, vector<256x1xf32> -> vector<256x1xf32>
    %cst_328 = arith.constant dense<0xFF800000> : vector<1xf32>
    %919 = vector.multi_reduction <maximumf>, %916, %cst_328 [1] : vector<1x256xf32> to vector<1xf32>
    %920 = vector.shape_cast %919 : vector<1xf32> to vector<1x1xf32>
    %cst_329 = arith.constant dense<0x7F800000> : vector<1xf32>
    %921 = vector.multi_reduction <minimumf>, %916, %cst_329 [1] : vector<1x256xf32> to vector<1xf32>
    %922 = vector.shape_cast %921 : vector<1xf32> to vector<1x1xf32>
    %cst_330 = arith.constant 0.000000e+00 : f32
    %923 = vector.broadcast %cst_330 : f32 to vector<256x1xf32>
    %924 = arith.cmpf oge, %918, %923 : vector<256x1xf32>
    %925 = vector.broadcast %920 : vector<1x1xf32> to vector<256x1xf32>
    %926 = arith.mulf %918, %925 : vector<256x1xf32>
    %927 = vector.broadcast %922 : vector<1x1xf32> to vector<256x1xf32>
    %928 = arith.mulf %918, %927 : vector<256x1xf32>
    %929 = arith.select %924, %926, %928 : vector<256x1xi1>, vector<256x1xf32>
    %930 = vector.broadcast %918 : vector<256x1xf32> to vector<256x256xf32>
    %931 = vector.broadcast %916 : vector<1x256xf32> to vector<256x256xf32>
    %932 = arith.mulf %930, %931 : vector<256x256xf32>
    %933 = vector.broadcast %929 : vector<256x1xf32> to vector<256x256xf32>
    %934 = arith.subf %932, %933 : vector<256x256xf32>
    %935 = math.exp %934 : vector<256x256xf32>
    %cst_331 = arith.constant dense<0.000000e+00> : vector<256xf32>
    %936 = vector.multi_reduction <add>, %935, %cst_331 [1] : vector<256x256xf32> to vector<256xf32>
    %937 = vector.shape_cast %936 : vector<256xf32> to vector<256x1xf32>
    %938 = tpu.reciprocal %937 {approx = true} : vector<256x1xf32> -> vector<256x1xf32>
    %939 = vector.broadcast %938 : vector<256x1xf32> to vector<256x256xf32>
    %940 = arith.mulf %935, %939 : vector<256x256xf32>
    %cst_332 = arith.constant dense<0.000000e+00> : vector<256x12xf32>
    %941 = tpu.matmul %940, %915, %cst_332 {dimension_numbers = #tpu.dot_dimension_numbers<[1], [1], [0], [0], [0, 0, 1, 0], [], []>} : vector<256x256xf32>, vector<12x256xf32>, vector<256x12xf32> -> vector<256x12xf32>
    %c0_333 = arith.constant 0 : index
    %c0_334 = arith.constant 0 : index
    %c0_335 = arith.constant 0 : index
    %942 = vector.load %arg4[%c0_333, %c0_334, %c0_335] : memref<1x256x12xf32, #tpu.memory_space<vmem>>, vector<1x256x12xf32>
    %943 = vector.shape_cast %942 : vector<1x256x12xf32> to vector<256x12xf32>
    %944 = vector.shape_cast %941 : vector<256x12xf32> to vector<1x256x12xf32>
    tpu.vector_store %arg4[%c0_333, %c0_334, %c0_335], %944 {strides = array<i32>} : memref<1x256x12xf32, #tpu.memory_space<vmem>>, vector<1x256x12xf32>,
    %945 = vector.extract_strided_slice %911 {offsets = [0, 0], sizes = [12, 256], strides = [1, 1]} : vector<16x256xf32> to vector<12x256xf32>
    %c0_336 = arith.constant 0 : index
    %c0_337 = arith.constant 0 : index
    %c0_338 = arith.constant 0 : index
    %946 = vector.load %arg5[%c0_336, %c0_337, %c0_338] : memref<1x12x256xf32, #tpu.memory_space<vmem>>, vector<1x12x256xf32>
    %947 = vector.shape_cast %946 : vector<1x12x256xf32> to vector<12x256xf32>
    %948 = vector.shape_cast %945 : vector<12x256xf32> to vector<1x12x256xf32>
    tpu.vector_store %arg5[%c0_336, %c0_337, %c0_338], %948 {strides = array<i32>} : memref<1x12x256xf32, #tpu.memory_space<vmem>>, vector<1x12x256xf32>,
    return
  }
  func.func @transform_0(%arg0: i32) -> (i32, i32, i32) {
    %c0_i32 = arith.constant 0 : i32
    %c0_i32_0 = arith.constant 0 : i32
    %c0_i32_1 = arith.constant 0 : i32
    return %arg0, %c0_i32, %c0_i32_0 : i32, i32, i32
  }
  func.func @transform_1(%arg0: i32) -> (i32, i32) {
    %c0_i32 = arith.constant 0 : i32
    %c0_i32_0 = arith.constant 0 : i32
    %c0_i32_1 = arith.constant 0 : i32
    return %c0_i32, %c0_i32_0 : i32, i32
  }
  func.func @transform_2(%arg0: i32) -> (i32, i32) {
    %c0_i32 = arith.constant 0 : i32
    %c0_i32_0 = arith.constant 0 : i32
    %c0_i32_1 = arith.constant 0 : i32
    return %c0_i32, %c0_i32_0 : i32, i32
  }
  func.func @transform_3(%arg0: i32) -> (i32, i32, i32) {
    %c0_i32 = arith.constant 0 : i32
    %c0_i32_0 = arith.constant 0 : i32
    %c0_i32_1 = arith.constant 0 : i32
    return %arg0, %c0_i32, %c0_i32_0 : i32, i32, i32
  }
  func.func @transform_4(%arg0: i32) -> (i32, i32, i32) {
    %c0_i32 = arith.constant 0 : i32
    %c0_i32_0 = arith.constant 0 : i32
    %c0_i32_1 = arith.constant 0 : i32
    return %arg0, %c0_i32, %c0_i32_0 : i32, i32, i32
  }
}

</mosaic_0001>

<bundles_post_ra>
// kernel: dehaze_net_forward.3
= control target key start
LH: loop header
LB: loop body
LE: loop exit
PB: predicated region body
PF: predicated region fallthrough
CT: control target
= control target key end

     0   :  { %v52_v0 = vlaneseq  ;;  %v140_v2 = vmov 1983009808   ;;  %s229_s3 = inlined_call_operand.vmem [shape: f32[2,768], index: 3, kind: input, shape index: {}]   ;;  %s230_s0 = inlined_call_operand.<no memory space> [shape: f32[1,1], index: 0, kind: input, shape index: {}]   ;;  %s231_s1 = inlined_call_operand.vmem [shape: f32[2,3072], index: 1, kind: input, shape index: {}]   ;;  %s232_s2 = inlined_call_operand.vmem [shape: f32[2,3072], index: 2, kind: input, shape index: {}]   ;;  %s233_s4 = inlined_call_operand.vmem [shape: f32[2,3072], index: 4, kind: output, shape index: {}]  }
   0x1   :  { %v44_v1 = vld [vmem:[%s229_s3] sm:$0xff]  ;;  %v50_v3 = vunpack.c.l.s4 %v140_v2  ;;  %v137_v7 = vld.sshfl [vmem:[%s229_s3 + $0x8] sm:$0x33 pattern:$0x76325410]  ;;  %v25_v10 = vstv %s230_s0  ;;  %v21_v13 = vld [vmem:[%s231_s1 + $0x10] sm:$0xff] }
   0x2   :  { %v53_v4 = vshrl.u32 %v52_v0, 7  ;;  %v48_v5 = vcombine.high %v44_v1, %v44_v1  ;;  %v72_v8 = vcombine.high %v137_v7, %v137_v7  ;;  %v19_v9 = vld [vmem:[%s231_s1] sm:$0xff]  ;;  %v20_v12 = vld [vmem:[%s231_s1 + $0x8] sm:$0xff]  ;;  %v22_v14 = vld [vmem:[%s231_s1 + $0x18] sm:$0xff]  ;;  %v28_v26 = vmul.f32 %v25_v10, %v21_v13 }
   0x3   :  { %v51_v6 = vunpack.c.0.s8 %v50_v3  ;;  %v23_v18 = vld [vmem:[%s231_s1 + $0x20] sm:$0xff]  ;;  %v24_v19 = vld [vmem:[%s231_s1 + $0x28] sm:$0xff]  ;;  %v26_v20 = vmul.f32 %v25_v10, %v19_v9  ;;  %v27_v21 = vmul.f32 %v25_v10, %v20_v12  ;;  %v29_v27 = vmul.f32 %v25_v10, %v22_v14  ;;  %v34_v28 = vld [vmem:[%s232_s2 + $0x10] sm:$0xff] }
   0x4   :  { %v90_v17 = vcombine.low %v137_v7, %v72_v8  ;;  %v32_v22 = vld [vmem:[%s232_s2] sm:$0xff]  ;;  %v33_v25 = vld [vmem:[%s232_s2 + $0x8] sm:$0xff]  ;;  %v35_v29 = vld [vmem:[%s232_s2 + $0x18] sm:$0xff]  ;;  %v30_v30 = vmul.f32 %v25_v10, %v23_v18  ;;  %v31_v31 = vmul.f32 %v25_v10, %v24_v19  ;;  %v40_v41 = vadd.f32 %v34_v28, %v28_v26 }
   0x5   :  { %v54_v11 = vsub.s32 %v51_v6, %v53_v4  ;;  %v36_v35 = vld [vmem:[%s232_s2 + $0x20] sm:$0xff]  ;;  %v37_v36 = vld [vmem:[%s232_s2 + $0x28] sm:$0xff]  ;;  %v38_v37 = vadd.f32 %v32_v22, %v26_v20  ;;  %v39_v38 = vadd.f32 %v33_v25, %v27_v21  ;;  %v41_v42 = vadd.f32 %v35_v29, %v29_v27 }
   0x6   :  { %v42_v43 = vadd.f32 %v36_v35, %v30_v30  ;;  %v43_v44 = vadd.f32 %v37_v36, %v31_v31 }
   0x7   :  { %v55_v15 = vrot.slane %v44_v1, %v54_v11  ;;  %v62_v16 = vrot.slane %v48_v5, %v54_v11  ;;  %v97_v34 = vrot.slane %v90_v17, %v54_v11 }
   0x9   :  { %v63_v23 = vcombine.high %v55_v15, %v55_v15  ;;  %v64_v24 = vcombine.high %v62_v16, %v62_v16 }
   0xb   :  { %v73_v32 = vcombine.low %v55_v15, %v63_v23  ;;  %v74_v33 = vcombine.low %v62_v16, %v64_v24 }
   0xd   :  { %v81_v39 = vrot.slane %v73_v32, %v54_v11  ;;  %v88_v40 = vrot.slane %v74_v33, %v54_v11 }
   0xf   :  { %v89_v45 = vcombine.low %v81_v39, %v88_v40  ;;  %v98_v46 = vcombine.low %v97_v34, %v81_v39  ;;  %v99_v47 = vcombine.low %v88_v40, %v97_v34 }
  0x11   :  { %v103_v48 = vmul.f32 %v89_v45, %v38_v37  ;;  %v104_v49 = vmul.f32 %v98_v46, %v39_v38  ;;  %v105_v50 = vmul.f32 %v99_v47, %v40_v41  ;;  %v106_v51 = vmul.f32 %v89_v45, %v41_v42 }
  0x12   :  { %v107_v52 = vmul.f32 %v98_v46, %v42_v43  ;;  %v108_v53 = vmul.f32 %v99_v47, %v43_v44 }
  0x13   :  { %v109_v54 = vsub.f32 %v103_v48, %v38_v37  ;;  %v110_v55 = vsub.f32 %v104_v49, %v39_v38  ;;  %v111_v56 = vsub.f32 %v105_v50, %v40_v41  ;;  %v112_v57 = vsub.f32 %v106_v51, %v41_v42 }
  0x14   :  { %v113_v58 = vsub.f32 %v107_v52, %v42_v43  ;;  %v114_v59 = vsub.f32 %v108_v53, %v43_v44 }
  0x15   :  { %v115_v60 = vadd.f32 1.0, %v109_v54  ;;  %v116_v61 = vadd.f32 1.0, %v110_v55  ;;  %v117_v62 = vadd.f32 1.0, %v111_v56  ;;  %v118_v63 = vadd.f32 1.0, %v112_v57 }
  0x16   :  { %v119_v0 = vadd.f32 1.0, %v113_v58  ;;  %v120_v1 = vadd.f32 1.0, %v114_v59 }
  0x17   :  { %v121_v2 = vmax.f32 %v115_v60, 0.0  ;;  %v122_v3 = vmax.f32 %v116_v61, 0.0  ;;  %v123_v4 = vmax.f32 %v117_v62, 0.0  ;;  %v124_v5 = vmax.f32 %v118_v63, 0.0 }
  0x18   :  { %v125_v6 = vmax.f32 %v119_v0, 0.0  ;;  %v126_v7 = vmax.f32 %v120_v1, 0.0 }
  0x19   :  { %127 = vst [vmem:[%s233_s4] sm:$0xff] %v121_v2  ;;  %128 = vst [vmem:[%s233_s4 + $0x8] sm:$0xff] %v122_v3 }
  0x1a   :  { %129 = vst [vmem:[%s233_s4 + $0x10] sm:$0xff] %v123_v4  ;;  %130 = vst [vmem:[%s233_s4 + $0x18] sm:$0xff] %v124_v5 }
  0x1b   :  { %131 = vst [vmem:[%s233_s4 + $0x20] sm:$0xff] %v125_v6  ;;  %132 = vst [vmem:[%s233_s4 + $0x28] sm:$0xff] %v126_v7 }

// kernel: dehaze_net_forward.2
= control target key start
LH: loop header
LB: loop body
LE: loop exit
PB: predicated region body
PF: predicated region fallthrough
CT: control target
= control target key end

     0   :  { %s6765_s15 = smov 0   ;;  %s10435_s0 = inlined_call_operand.vmem [shape: f32[2,3,256], index: 0, kind: input, shape index: {}]   ;;  %s10436_s1 = inlined_call_operand.vmem [shape: s32[1,256], index: 1, kind: input, shape index: {}]   ;;  %s10437_s2 = inlined_call_operand.vmem [shape: f32[136,400], index: 2, kind: input, shape index: {}]   ;;  %s10438_s3 = inlined_call_operand.vmem [shape: f32[2,256,12], index: 3, kind: output, shape index: {0}]   ;;  %s10439_s4 = inlined_call_operand.vmem [shape: f32[2,12,256], index: 4, kind: output, shape index: {1}]  }
   0x1 LB: > { %s4632_s16 = sadd.s32 4294967295, %s6686_s15   ;;  %p4636_p0 = scmp.ge.s32.totalorder %s6686_s15, 1  ;;  %s6686_s15 = sphi %s6765_s15, %s15_s15  }
   0x2   : > { %p165_p1 = scmp.lt.s32.totalorder %s6686_s15, 3 }
   0x4   : > { %p166_p2 = pnand %p4636_p0, %p165_p1 }
   0x6   : > { %169 = sbr.rel (%p166_p2) target bundleno = 3034 (0xbda), region = 32 }
   0xd   : > { %p196_p3 = scmp.lt.s32.totalorder %s4632_s16, 1  ;;  %v211_v0 = vlaneseq  ;;  %v10486_v1 = vmov 0.0   ;;  %vm223_vm1 = vcmask 1042432   ;;  %v10488_v5 = vmov 1.0   ;;  %v226_v8 = vld [vmem:[%s10437_s2] sm:$0xff]  ;;  %s10636_s23 = smov 15  }
   0xe   : > { %295 = vmatprep.mubr.f32.mxu0 %v10486_v1  ;;  %541 = vmatprep.mubr.f32.mxu1 %v10486_v1  ;;  %vm10440_vm3 = vcmask 130048   ;;  %s10638_s24 = smov 17   ;;  %s10637_s25 = smov 1   ;;  %v6823_v14 = vld [vmem:[%s10436_s1] sm:$0x3]  ;;  %v10494_v16 = vmov 0  }
   0xf   : > { %s11629_s16 = smov (!%p196_p3, %s4632_s16), 1  ;;  %v6777_v2 = vshrl.u32 %v211_v0, 7  ;;  %s10639_s26 = smov 16   ;;  %vm314_vm4 = vcmp.ge.s32.totalorder %v6823_v14, 1  ;;  %vm362_vm5 = vcmp.lt.s32.totalorder %v6823_v14, 15  ;;  %v6837_v20 = vand.u32 127, %v211_v0 }
  0x10   : > { %s5056_s17 = sshll.u32 %s11629_s16, 3  ;;  %s10635_s27 = smov 113   ;;  %v315_v17 = vsel %vm314_vm4, 1, %v10494_v16  ;;  %v363_v22 = vsel %vm362_vm5, 1, %v10494_v16  ;;  %v10762_v55 = vmov 0  ;;  %v10764_v62 = vmov 0 }
  0x11   : > { %10746 = vst [vmem:[#allocation2_spill] sm:$0xff] %v6777_v2  ;;  %s200_s20 = scalar_lea.vmem %s10435_s0, %s5056_s17  ;;  %vm10443_vm0 = vcmp.eq.s32.totalorder %v6777_v2, 0  ;;  %s10634_s28 = smov 127   ;;  %v6827_v15 = vsub.s32 0, %v6777_v2  ;;  %v6831_v18 = vsub.s32 1, %v6777_v2  ;;  %vm10453_vm6 = vcmp.ge.s32.totalorder %v6837_v20, 16 }
  0x12   : > { %v219_v3 = vld [vmem:[%s200_s20] sm:$0x77]  ;;  %vm5143_vm2 = vmpackc.low %vm10443_vm0, %vm223_vm1  ;;  %s10466_s29 = smov 111   ;;  %s10464_s30 = smov 112   ;;  %v6863_v27 = vadd.s32 128, %v6837_v20  ;;  %vm10449_vm13 = vcmp.lt.s32.totalorder %v6837_v20, 15 }
  0x13   : > { %v221_v4 = vcombine.high %v219_v3, %v219_v3  ;;  %v5145_v6 = vpack.c.bf16 %v10488_v5, %v219_v3  ;;  %10747 = vst [vmem:[#allocation3_spill] sm:$0xff] %v6827_v15  ;;  %10748 = vst [vmem:[#allocation4_spill] sm:$0xff] %v6831_v18  ;;  %v6834_v19 = vrot.slane %v315_v17, %v6827_v15  ;;  %vm10448_vm15 = vcmp.lt.s32.totalorder %v6837_v20, 1  ;;  %s6700_s9 = smov 33   ;;  %s6701_s10 = smov 34  }
  0x14   : > { %v6840_v21 = vrot.slane %v315_v17, %v6831_v18  ;;  %v6846_v23 = vrot.slane %v363_v22, %v6827_v15  ;;  %v6850_v24 = vrot.slane %v363_v22, %v6831_v18  ;;  %10753 = vst [vmem:[#allocation9_spill] sm:$0xff] %v6863_v27  ;;  %vm10445_vm14 = vcmp.lt.s32.totalorder %v6863_v27, 240  ;;  %s6702_s11 = smov 31   ;;  %s6703_s12 = smov 32  }
  0x15   : > { %v5142_v7 = vpack.c.bf16 %v10488_v5, %v221_v4  ;;  %10749 = vst [vmem:[#allocation5_spill] sm:$0xff] %v6834_v19  ;;  %vm10441_vm7 = vcmp.ne.s32.totalorder %v6834_v19, 0  ;;  %vm10450_vm1 = vcmp.lt.s32.totalorder %v6837_v20, 17  ;;  %vm10454_vm5 = vcmp.lt.s32.totalorder %v6837_v20, 127  ;;  %s6704_s13 = smov 18   ;;  %s6705_s14 = smov 30  }
  0x16   : > { %10750 = vst [vmem:[#allocation6_spill] sm:$0xff] %v6840_v21  ;;  %10751 = vst [vmem:[#allocation7_spill] sm:$0xff] %v6846_v23  ;;  %vm10442_vm8 = vcmp.ne.s32.totalorder %v6840_v21, 0  ;;  %vm10446_vm10 = vcmp.ne.s32.totalorder %v6846_v23, 0  ;;  %vm10444_vm11 = vcmp.ne.s32.totalorder %v6850_v24, 0  ;;  %v6893_v39 = vsel %vm10441_vm7, 1, %v10494_v16 }
  0x17   : > { %5144 = vmatprep.subr.msk.bf16.mxu0 %vm5143_vm2, %v5142_v7  ;;  %10752 = vst [vmem:[#allocation8_spill] sm:$0xff] %v6850_v24  ;;  %vm326_vm9 = vmand %vm10453_vm6, %vm10441_vm7  ;;  %v329_v25 = vsel %vm10442_vm8, 1, %v10494_v16  ;;  %v377_v30 = vsel %vm10444_vm11, 1, %v10494_v16  ;;  %vm10452_vm0 = vcmp.eq.s32.totalorder %v6834_v19, 1  ;;  %s6706_s17 = smov 14   ;;  %s6707_s18 = smov 2  }
  0x18   : > { %5147 = vmatpush1.bf16.msk.msra.mxu0 %vm5143_vm2, %v5145_v6  ;;  %v328_v26 = vsel %vm326_vm9, 1, %v10494_v16  ;;  %v337_v28 = vrot.slane %v329_v25, %v6827_v15  ;;  %vm374_vm12 = vmand %vm10453_vm6, %vm10446_vm10  ;;  %vm10451_vm2 = vcmp.lt.s32.totalorder %v6837_v20, 16  ;;  %v385_v37 = vrot.slane %v377_v30, %v6827_v15  ;;  %s6708_s19 = smov 126   ;;  %s6709_s20 = smov 114  }
  0x19   : > { %v333_v29 = vrot.slane %v328_v26, %v6827_v15  ;;  %v376_v33 = vsel %vm374_vm12, 1, %v10494_v16  ;;  %vm422_vm12 = vmand %vm10445_vm14, %vm10442_vm8  ;;  %s6710_s21 = smov 98   ;;  %s6711_s22 = smov 110  }
  0x1a   : > { %vm6880_vm4 = vcmp.eq.s32.totalorder %v337_v28, 1  ;;  %v381_v44 = vrot.slane %v376_v33, %v6827_v15  ;;  %vm6905_vm7 = vmand %vm10445_vm14, %vm10444_vm11  ;;  %vm6911_vm8 = vcmp.eq.s32.totalorder %v385_v37, 1  ;;  %v424_v52 = vsel %vm422_vm12, 1, %v10494_v16  ;;  %s10626_s5 = smov 96   ;;  %s10625_s6 = smov 97  }
  0x1b   : > { %4647 = vmatmul.mubr.msk.f32.vlgmr.msra.gmra.mrb[0].mxu0 %vm10440_vm3, %v226_v8  ;;  %vm6886_vm9 = vcmp.eq.s32.totalorder %v333_v29, 1  ;;  %vm10447_vm3 = vcmp.eq.s32.totalorder %v6840_v21, 1  ;;  %vm10455_vm11 = vmmov 1   ;;  %v460_v0 = vsel %vm6905_vm7, 1, %v10494_v16  ;;  %s10609_s7 = smov 94   ;;  %s10608_s8 = smov 95  }
  0x1c   : > { %vm6926_vm14 = vmpackc.low %vm10455_vm11, %vm6880_vm4  ;;  %vm6946_vm10 = vcmp.eq.s32.totalorder %v381_v44, 1  ;;  %v10769_v8 = vmov 0  ;;  %vm409_vm7 = vcmp.eq.s32.totalorder %v6850_v24, 1  ;;  %v432_v22 = vrot.slane %v424_v52, %v6827_v15 }
  0x1d   : > { %v10763_v55 = vsel %vm6926_vm14, 4294967295, %v10762_v55  ;;  %vm6942_vm12 = vmpackc.low %vm10453_vm6, %vm6886_vm9  ;;  %v468_v33 = vrot.slane %v460_v0, %v6827_v15  ;;  %vm10779_vm6 = vcmp.ne.s32.totalorder %v6846_v23, 0 }
  0x1e   : > { %v10765_v62 = vsel %vm6942_vm12, 4294967295, %v10764_v62  ;;  %vm6965_vm9 = vmpackc.low %vm10447_vm3, %vm6911_vm8  ;;  %vm10460_vm3 = vcmp.lt.s32.totalorder %v6837_v20, 113 }
  0x1f   : > { %10766 = vst [vmem:[#allocation10_spill] sm:$0xff] %v10765_v62  ;;  %v10770_v8 = vsel %vm6965_vm9, 4294967295, %v10769_v8 }
  0x20   : > { %10771 = vst [vmem:[#allocation11_spill] sm:$0xff] %v10770_v8 }
  0xee   : > { %v6792_v9 = vpop.f32.mrb[0].mxu0 }
  0xef   : > { %v302_v10 = vmax.f32 %v6792_v9, 0.0  ;;  %v6795_v11 = vpop.f32.mrb[1].mxu0  ;;  %v10787_v9 = vmov 0 }
  0xf0   : > { %v303_v12 = vmax.f32 %v6795_v11, 0.0  ;;  %v10780_v11 = vmov 0 }
  0xf2   : > { %v6802_v13 = vpack.i.bf16 %v303_v12, %v302_v10 }
  0xf4   : > { %5855 = vrot.lane.b32.xlu1 %v6802_v13, %s10636_s23  ;;  %5845 = vrot.lane.b32.xlu0 %v6802_v13, %s10638_s24 }
  0xf8   : > { %5860 = vrot.lane.b32.xlu1 %v6802_v13, %s10637_s25  ;;  %5850 = vrot.lane.b32.xlu0 %v6802_v13, %s10639_s26 }
  0xfc   : > { %5870 = vrot.lane.b32.xlu1 %v6802_v13, %s10635_s27  ;;  %5865 = vrot.lane.b32.xlu0 %v6802_v13, %s10634_s28 }
 0x100   : > { %5880 = vrot.lane.b32.xlu1 %v6802_v13, %s10466_s29  ;;  %5875 = vrot.lane.b32.xlu0 %v6802_v13, %s10464_s30 }
 0x166   : > { %v5856_v31 = vpop.permute.xlu1 %5855  ;;  %v5846_v32 = vpop.permute.xlu0 %5845 }
 0x167   : > { %v5848_v34 = vunpack.i.h.bf16 %v5846_v32  ;;  %v5847_v35 = vunpack.i.l.bf16 %v5846_v32  ;;  %v5858_v40 = vunpack.i.h.bf16 %v5856_v31  ;;  %v5857_v41 = vunpack.i.l.bf16 %v5856_v31 }
 0x168   : > { %v10774_v31 = vmov 0  ;;  %v428_v32 = vrot.slane %v6893_v39, %v6827_v15  ;;  %v459_v39 = vsel %vm10779_vm6, 1, %v10494_v16  ;;  %vm10782_vm6 = vcmp.lt.s32.totalorder %v6863_v27, 240 }
 0x169   : > { %v310_v50 = vsel %vm10450_vm1, %v5847_v35, %v5848_v34  ;;  %v311_v56 = vsel %vm10450_vm1, %v5848_v34, %v5847_v35  ;;  %v6955_v3 = vsel %vm10449_vm13, %v5857_v41, %v5858_v40  ;;  %v6980_v25 = vsel %vm10449_vm13, %v5858_v40, %v5857_v41  ;;  %vm7001_vm1 = vmpackc.low %vm10452_vm0, %vm6946_vm10 }
 0x16a   : > { %v5861_v42 = vpop.permute.xlu1 %5860  ;;  %v5851_v43 = vpop.permute.xlu0 %5850  ;;  %vm408_vm13 = vcmp.eq.s32.totalorder %v6846_v23, 1  ;;  %v10775_v31 = vsel %vm7001_vm1, 4294967295, %v10774_v31  ;;  %v10777_v40 = vmov 0  ;;  %vm434_vm0 = vcmp.eq.s32.totalorder %v432_v22, 1 }
 0x16b   : > { %v5863_v45 = vunpack.i.h.bf16 %v5861_v42  ;;  %v5862_v46 = vunpack.i.l.bf16 %v5861_v42  ;;  %v5853_v47 = vunpack.i.h.bf16 %v5851_v43  ;;  %v5852_v48 = vunpack.i.l.bf16 %v5851_v43  ;;  %10776 = vst [vmem:[#allocation14_spill] sm:$0xff] %v10775_v31 }
 0x16c   : > { %v464_v49 = vrot.slane %v459_v39, %v6827_v15 }
 0x16d   : > { %v6919_v53 = vsel %vm10448_vm15, %v5862_v46, %v5863_v45  ;;  %v347_v54 = vsel %vm10451_vm2, %v5852_v48, %v5853_v47  ;;  %v348_v57 = vsel %vm10451_vm2, %v5853_v47, %v5852_v48  ;;  %v6959_v4 = vsel %vm10448_vm15, %v5863_v45, %v5862_v46  ;;  %vm7011_vm2 = vmpackc.low %vm409_vm7, %vm10455_vm11 }
 0x16e   : > { %v5871_v58 = vpop.permute.xlu1 %5870  ;;  %v5866_v59 = vpop.permute.xlu0 %5865  ;;  %v6934_v60 = vpack.c.bf16 %v347_v54, %v310_v50  ;;  %v6936_v61 = vpack.c.bf16 %v348_v57, %v311_v56  ;;  %v6975_v17 = vpack.c.bf16 %v6919_v53, %v6955_v3  ;;  %vm10457_vm15 = vcmp.lt.s32.totalorder %v6837_v20, 112  ;;  %vm7048_vm7 = vmpackc.low %vm10782_vm6, %vm434_vm0 }
 0x16f   : > { %v5868_v6 = vunpack.i.h.bf16 %v5866_v59  ;;  %v5867_v7 = vunpack.i.l.bf16 %v5866_v59  ;;  %v6995_v30 = vpack.c.bf16 %v6959_v4, %v6980_v25  ;;  %v5873_v34 = vunpack.i.h.bf16 %v5871_v58 }
 0x170   : > { %5150 = vmatprep.subr.msk.bf16.mxu1 %vm6926_vm14, %v6934_v60  ;;  %10772 = vst [vmem:[#allocation12_spill] sm:$0xff] %v6975_v17  ;;  %v5872_v35 = vunpack.i.l.bf16 %v5871_v58  ;;  %v10778_v40 = vsel %vm7011_vm2, 4294967295, %v10777_v40  ;;  %v10783_v47 = vmov 0  ;;  %v10785_v48 = vmov 0 }
 0x171   : > { %v407_v26 = vsel %vm10454_vm5, %v5868_v6, %v5867_v7  ;;  %5153 = vmatpush1.bf16.msk.msra.mxu1 %vm6942_vm12, %v6936_v61  ;;  %10773 = vst [vmem:[#allocation13_spill] sm:$0xff] %v6995_v30  ;;  %v406_v41 = vsel %vm10454_vm5, %v5867_v7, %v5868_v6  ;;  %vm7033_vm5 = vmpackc.low %vm408_vm13, %vm10455_vm11  ;;  %v10784_v47 = vsel %vm7048_vm7, 4294967295, %v10783_v47  ;;  %vm7052_vm13 = vcmp.eq.s32.totalorder %v428_v32, 1 }
 0x172   : > { %v5881_v28 = vpop.permute.xlu1 %5880  ;;  %v5876_v29 = vpop.permute.xlu0 %5875  ;;  %5156 = vmatprep.subr.msk.bf16.mxu1 %vm6965_vm9, %v6975_v17  ;;  %v7019_v42 = vpack.c.bf16 %v407_v26, %v303_v12  ;;  %v10781_v11 = vsel %vm7033_vm5, 4294967295, %v10780_v11  ;;  %v418_v12 = vsel %vm10460_vm3, %v5873_v34, %v5872_v35  ;;  %v7044_v46 = vpack.c.bf16 %v406_v41, %v302_v10  ;;  %v304_v26 = vld [vmem:[%s10437_s2 + $0x20] sm:$0xff] }
 0x173   : > { %v5878_v37 = vunpack.i.h.bf16 %v5876_v29  ;;  %v5877_v38 = vunpack.i.l.bf16 %v5876_v29  ;;  %v5883_v43 = vunpack.i.h.bf16 %v5881_v28  ;;  %v5882_v44 = vunpack.i.l.bf16 %v5881_v28 }
 0x174   : > { %v10786_v48 = vsel %vm7052_vm13, 4294967295, %v10785_v48  ;;  %vm7061_vm11 = vcmp.eq.s32.totalorder %v468_v33, 1  ;;  %vm10789_vm0 = vcmp.lt.s32.totalorder %v6837_v20, 111  ;;  %v417_v54 = vsel %vm10460_vm3, %v5872_v35, %v5873_v34  ;;  %v905_v35 = vld [vmem:[%s10437_s2 + $0x68] sm:$0xff] }
 0x175   : > { %v443_v45 = vsel %vm10457_vm15, %v5878_v37, %v5877_v38  ;;  %5159 = vmatpush1.bf16.msk.msra.mxu1 %vm7001_vm1, %v6995_v30  ;;  %v442_v50 = vsel %vm10457_vm15, %v5877_v38, %v5878_v37  ;;  %v10788_v9 = vsel %vm7061_vm11, 4294967295, %v10787_v9  ;;  %v7067_v10 = vsel %vm10789_vm0, %v5883_v43, %v5882_v44 }
 0x176   : > { %5162 = vmatprep.subr.msk.bf16.mxu1 %vm7011_vm2, %v7019_v42  ;;  %v7059_v52 = vpack.c.bf16 %v443_v45, %v418_v12  ;;  %vm10790_vm6 = vmmov 1   ;;  %v10791_v56 = vmov 0  ;;  %v7084_v57 = vpack.c.bf16 %v442_v50, %v417_v54 }
 0x177   : > { %vm7080_vm15 = vmpackc.low %vm10790_vm6, %vm7052_vm13  ;;  %vm10793_vm0 = vcmp.eq.s32.totalorder %v6777_v2, 0  ;;  %v10794_v58 = vmov 0  ;;  %vm7094_vm3 = vcmp.eq.s32.totalorder %v464_v49, 1  ;;  %v10797_v59 = vmov 0 }
 0x178   : > { %v10792_v56 = vsel %vm7080_vm15, 4294967295, %v10791_v56  ;;  %vm7090_vm1 = vmpackc.low %vm10793_vm0, %vm7061_vm11  ;;  %v10798_v59 = vsel %vm7094_vm3, 4294967295, %v10797_v59  ;;  %vm10799_vm9 = vcmp.lt.s32.totalorder %v6837_v20, 111  ;;  %v7104_v6 = vpack.c.bf16 %v10488_v5, %v7067_v10 }
 0x179   : > { %5165 = vmatpush1.bf16.msk.msra.mxu1 %vm7033_vm5, %v7044_v46  ;;  %v10795_v58 = vsel %vm7090_vm1, 4294967295, %v10794_v58  ;;  %v7100_v0 = vsel %vm10799_vm9, %v5882_v44, %v5883_v43  ;;  %vm7116_vm13 = vmpackc.low %vm10793_vm0, %vm7094_vm3  ;;  %v10801_v7 = vmov 0  ;;  %vm10468_vm9 = vcmask 654336  }
 0x17a   : > { %5168 = vmatprep.subr.msk.bf16.mxu1 %vm7048_vm7, %v7059_v52  ;;  %10796 = vst [vmem:[#allocation15_spill] sm:$0xff] %v10795_v58  ;;  %10800 = vst [vmem:[#allocation16_spill] sm:$0xff] %v7104_v6  ;;  %v10802_v7 = vsel %vm7116_vm13, 4294967295, %v10801_v7  ;;  %v7122_v22 = vpack.c.bf16 %v10488_v5, %v7100_v0  ;;  %4711 = vmatprep.mubr.msk.f32.mxu0 %vm10468_vm9, %v905_v35  ;;  %vm561_vm0 = vcmp.ge.s32.totalorder %v6823_v14, 2  ;;  %vm10808_vm11 = vcmp.ne.s32.totalorder %v6834_v19, 0 }
 0x17b   : > { %10803 = vst [vmem:[#allocation17_spill] sm:$0xff] %v10802_v7  ;;  %v562_v37 = vsel %vm561_vm0, 1, %v10494_v16  ;;  %v10813_v35 = vmov 0 }
 0x17c   : > { %10804 = vst [vmem:[#allocation18_spill] sm:$0xff] %v7122_v22  ;;  %v7230_v38 = vrot.slane %v562_v37, %v6827_v15  ;;  %v7234_v41 = vrot.slane %v562_v37, %v6831_v18 }
 0x17d   : > { %5171 = vmatpush1.bf16.msk.msra.mxu1 %vm7080_vm15, %v7084_v57 }
 0x17e   : > { %5174 = vmatprep.subr.msk.bf16.mxu1 %vm7090_vm1, %v7104_v6  ;;  %10806 = vst [vmem:[#allocation20_spill] sm:$0xff] %v7230_v38  ;;  %10807 = vst [vmem:[#allocation21_spill] sm:$0xff] %v7234_v41  ;;  %vm10485_vm1 = vcmp.ne.s32.totalorder %v7230_v38, 0  ;;  %vm10480_vm3 = vcmp.ne.s32.totalorder %v7234_v41, 0 }
 0x181   : > { %5177 = vmatpush1.bf16.msk.msra.mxu1 %vm7116_vm13, %v7122_v22  ;;  %vm10492_vm13 = vcmp.ge.s32.totalorder %v6837_v20, 32 }
 0x182   : > { %vm596_vm0 = vmand %vm10492_vm13, %vm10808_vm11 }
 0x183   : > { %vm573_vm15 = vmand %vm10492_vm13, %vm10485_vm1  ;;  %v598_v44 = vsel %vm596_vm0, 1, %v10494_v16 }
 0x184   : > { %4664 = vmatmul.mubr.msk.f32.vlgmr.msra.gmra.mrb[0].mxu1 %vm10468_vm9, %v304_v26  ;;  %vm655_vm9 = vcmp.lt.s32.totalorder %v6823_v14, 14  ;;  %v576_v14 = vsel %vm10480_vm3, 1, %v10494_v16  ;;  %v575_v43 = vsel %vm573_vm15, 1, %v10494_v16  ;;  %v603_v54 = vrot.slane %v598_v44, %v6827_v15 }
 0x185   : > { %v656_v39 = vsel %vm655_vm9, 1, %v10494_v16  ;;  %vm10810_vm9 = vcmp.ne.s32.totalorder %v6846_v23, 0  ;;  %v584_v12 = vrot.slane %v576_v14, %v6827_v15  ;;  %v580_v50 = vrot.slane %v575_v43, %v6827_v15 }
 0x186   : > { %vm632_vm7 = vmand %vm10492_vm13, %vm10810_vm9  ;;  %v7261_v45 = vrot.slane %v656_v39, %v6831_v18  ;;  %vm10812_vm9 = vcmp.ge.s32.totalorder %v6837_v20, 16  ;;  %v10836_v43 = vmov 0  }
 0x187   : > { %v634_v49 = vsel %vm632_vm7, 1, %v10494_v16  ;;  %vm690_vm15 = vmand %vm10812_vm9, %vm10485_vm1  ;;  %vm10504_vm7 = vcmp.lt.s32.totalorder %v6837_v20, 33  ;;  %vm7280_vm2 = vcmp.eq.s32.totalorder %v584_v12, 1  ;;  %vm7285_vm9 = vcmp.eq.s32.totalorder %v580_v50, 1 }
 0x188   : > { %10811 = vst [vmem:[#allocation23_spill] sm:$0xff] %v7261_v45  ;;  %vm10497_vm0 = vcmp.ne.s32.totalorder %v7261_v45, 0  ;;  %v639_v26 = vrot.slane %v634_v49, %v6827_v15  ;;  %v10814_v35 = vsel %vm7280_vm2, 4294967295, %v10813_v35  ;;  %v692_v37 = vsel %vm690_vm15, 1, %v10494_v16 }
 0x189   : > { %vm7289_vm1 = vcmp.eq.s32.totalorder %v603_v54, 1  ;;  %v670_v49 = vsel %vm10497_vm0, 1, %v10494_v16  ;;  %v10819_v50 = vmov 0 }
 0x18a   : > { %vm7307_vm5 = vcmp.eq.s32.totalorder %v639_v26, 1 }
 0x257   : > { %v7131_v28 = vpop.f32.mrb[0].mxu1 }
 0x258   : > { %v10491_v29 = vmax.f32 %v7131_v28, 0.0  ;;  %v7134_v32 = vpop.f32.mrb[1].mxu1 }
 0x259   : > { %v10490_v33 = vmax.f32 %v7134_v32, 0.0 }
 0x25b   : > { %v7141_v34 = vpack.i.bf16 %v10490_v33, %v10491_v29 }
 0x25d   : > { %10805 = vst [vmem:[#allocation19_spill] sm:$0xff] %v7141_v34  ;;  %5890 = vrot.lane.b32.xlu1 %v7141_v34, %s6700_s9  ;;  %5885 = vrot.lane.b32.xlu0 %v7141_v34, %s6701_s10 }
 0x261   : > { %5900 = vrot.lane.b32.xlu1 %v7141_v34, %s6702_s11  ;;  %5895 = vrot.lane.b32.xlu0 %v7141_v34, %s6703_s12 }
 0x265   : > { %5910 = vrot.lane.b32.xlu1 %v7141_v34, %s6704_s13  ;;  %5905 = vrot.lane.b32.xlu0 %v7141_v34, %s6705_s14 }
 0x269   : > { %5920 = vrot.lane.b32.xlu1 %v7141_v34, %s10639_s26  ;;  %5915 = vrot.lane.b32.xlu0 %v7141_v34, %s10638_s24 }
 0x26d   : > { %5930 = vrot.lane.b32.xlu1 %v7141_v34, %s6706_s17  ;;  %5925 = vrot.lane.b32.xlu0 %v7141_v34, %s10636_s23 }
 0x271   : > { %5940 = vrot.lane.b32.xlu1 %v7141_v34, %s10637_s25  ;;  %5935 = vrot.lane.b32.xlu0 %v7141_v34, %s6707_s18 }
 0x275   : > { %5950 = vrot.lane.b32.xlu1 %v7141_v34, %s6708_s19  ;;  %5945 = vrot.lane.b32.xlu0 %v7141_v34, %s10634_s28 }
 0x279   : > { %5960 = vrot.lane.b32.xlu1 %v7141_v34, %s10635_s27  ;;  %5955 = vrot.lane.b32.xlu0 %v7141_v34, %s6709_s20 }
 0x27d   : > { %5970 = vrot.lane.b32.xlu1 %v7141_v34, %s10466_s29  ;;  %5965 = vrot.lane.b32.xlu0 %v7141_v34, %s10464_s30  ;;  %s6718_s29 = smov 48   ;;  %s6719_s30 = smov 49  }
 0x281   : > { %5980 = vrot.lane.b32.xlu1 %v7141_v34, %s6710_s21  ;;  %5975 = vrot.lane.b32.xlu0 %v7141_v34, %s6711_s22 }
 0x285   : > { %5990 = vrot.lane.b32.xlu1 %v7141_v34, %s10626_s5  ;;  %5985 = vrot.lane.b32.xlu0 %v7141_v34, %s10625_s6 }
 0x289   : > { %6005 = vrot.lane.b32.xlu1 %v7141_v34, %s10609_s7  ;;  %5995 = vrot.lane.b32.xlu0 %v7141_v34, %s10608_s8 }
 0x28d   : > { %6010 = vrot.lane.b32.xlu1 %v6802_v13, %s6700_s9  ;;  %6000 = vrot.lane.b32.xlu0 %v6802_v13, %s6701_s10 }
 0x291   : > { %6020 = vrot.lane.b32.xlu1 %v6802_v13, %s6702_s11  ;;  %6015 = vrot.lane.b32.xlu0 %v6802_v13, %s6703_s12 }
 0x295   : > { %6030 = vrot.lane.b32.xlu1 %v6802_v13, %s6704_s13  ;;  %6025 = vrot.lane.b32.xlu0 %v6802_v13, %s6705_s14 }
 0x299   : > { %6040 = vrot.lane.b32.xlu1 %v6802_v13, %s6707_s18  ;;  %6035 = vrot.lane.b32.xlu0 %v6802_v13, %s6706_s17 }
 0x29d   : > { %6050 = vrot.lane.b32.xlu1 %v6802_v13, %s6709_s20  ;;  %6045 = vrot.lane.b32.xlu0 %v6802_v13, %s6708_s19 }
 0x2a1   : > { %6060 = vrot.lane.b32.xlu1 %v6802_v13, %s6710_s21  ;;  %6055 = vrot.lane.b32.xlu0 %v6802_v13, %s6711_s22 }
 0x2a5   : > { %6070 = vrot.lane.b32.xlu1 %v6802_v13, %s10626_s5  ;;  %6065 = vrot.lane.b32.xlu0 %v6802_v13, %s10625_s6  ;;  %s10630_s6 = smov 46   ;;  %s10629_s5 = smov 47  }
 0x2a9   : > { %6080 = vrot.lane.b32.xlu1 %v6802_v13, %s10609_s7  ;;  %6075 = vrot.lane.b32.xlu0 %v6802_v13, %s10608_s8  ;;  %v7249_v13 = vrot.slane %v656_v39, %v6827_v15  ;;  %s10627_s7 = smov 50   ;;  %s10628_s8 = smov 51  }
 0x2ab   : > { %10809 = vst [vmem:[#allocation22_spill] sm:$0xff] %v7249_v13  ;;  %vm10493_vm11 = vcmp.ne.s32.totalorder %v7249_v13, 0  ;;  %vm10825_vm0 = vcmp.ne.s32.totalorder %v7249_v13, 0 }
 0x2ac   : > { %vm667_vm3 = vmand %vm10492_vm13, %vm10493_vm11  ;;  %vm10826_vm13 = vcmp.ge.s32.totalorder %v6837_v20, 16 }
 0x2ad   : > { %v669_v12 = vsel %vm667_vm3, 1, %v10494_v16  ;;  %vm7303_vm11 = vmpackc.low %vm6880_vm4, %vm7280_vm2  ;;  %vm10823_vm3 = vcmp.lt.s32.totalorder %v6837_v20, 34 }
 0x2ae   : > { %v10820_v50 = vsel %vm7303_vm11, 4294967295, %v10819_v50  ;;  %vm10824_vm4 = vmmov %vm10823_vm3 }
 0x2af   : > { %vm7324_vm15 = vmand %vm10826_vm13, %vm10825_vm0  ;;  %vm10510_vm0 = vcmp.lt.s32.totalorder %v6837_v20, 30 }
 0x2b0   : > { %v715_v44 = vsel %vm7324_vm15, 1, %v10836_v43  ;;  %vm7368_vm15 = vmpackc.low %vm6911_vm8, %vm10790_vm6 }
 0x2cf   : > { %v5891_v39 = vpop.permute.xlu1 %5890  ;;  %v5886_v14 = vpop.permute.xlu0 %5885 }
 0x2d0   : > { %v5893_v1 = vunpack.i.h.bf16 %v5891_v39  ;;  %v5892_v5 = vunpack.i.l.bf16 %v5891_v39  ;;  %v5888_v33 = vunpack.i.h.bf16 %v5886_v14  ;;  %v5887_v29 = vunpack.i.l.bf16 %v5886_v14 }
 0x2d1   : > { %v697_v39 = vrot.slane %v692_v37, %v6827_v15 }
 0x2d2   : > { %v918_v14 = vsel %vm10504_vm7, %v5892_v5, %v5893_v1  ;;  %v919_v16 = vsel %vm10504_vm7, %v5893_v1, %v5892_v5  ;;  %v910_v23 = vsel %vm10823_vm3, %v5887_v29, %v5888_v33  ;;  %v911_v36 = vsel %vm10824_vm4, %v5888_v33, %v5887_v29  ;;  %vm7336_vm3 = vmpackc.low %vm7289_vm1, %vm7285_vm9 }
 0x2d3   : > { %v7328_v37 = vpack.c.bf16 %v919_v16, %v911_v36  ;;  %v5901_v18 = vpop.permute.xlu1 %5900  ;;  %v5896_v34 = vpop.permute.xlu0 %5895  ;;  %v7330_v22 = vpack.c.bf16 %v918_v14, %v910_v23  ;;  %v10831_v1 = vmov 0  ;;  %v678_v5 = vrot.slane %v670_v49, %v6827_v15 }
 0x2d4   : > { %v10832_v1 = vsel %vm7336_vm3, 4294967295, %v10831_v1  ;;  %v674_v29 = vrot.slane %v669_v12, %v6827_v15  ;;  %v5903_v33 = vunpack.i.h.bf16 %v5901_v18  ;;  %v5902_v6 = vunpack.i.l.bf16 %v5901_v18 }
 0x2d5   : > { %10829 = vst [vmem:[#allocation24_spill] sm:$0xff] %v7328_v37  ;;  %10830 = vst [vmem:[#allocation25_spill] sm:$0xff] %v7330_v22  ;;  %v5898_v16 = vunpack.i.h.bf16 %v5896_v34  ;;  %v5897_v36 = vunpack.i.l.bf16 %v5896_v34  ;;  %5180 = vmatprep.subr.msk.bf16.mxu0 %vm7303_vm11, %v7330_v22  ;;  %vm7347_vm1 = vcmp.eq.s32.totalorder %v697_v39, 1  ;;  %v10833_v23 = vmov 0 }
 0x2d6   : > { %v10834_v23 = vsel %vm7347_vm1, 4294967295, %v10833_v23  ;;  %vm10837_vm9 = vcmp.lt.s32.totalorder %v6837_v20, 31  ;;  %vm10839_vm7 = vcmp.lt.s32.totalorder %v6837_v20, 32  ;;  %5183 = vmatpush1.bf16.msk.msra.mxu0 %vm7336_vm3, %v7328_v37  ;;  %v10841_v39 = vmov 0 }
 0x2d7   : > { %10835 = vst [vmem:[#allocation26_spill] sm:$0xff] %v10834_v23  ;;  %v934_v18 = vsel %vm10837_vm9, %v5902_v6, %v5903_v33  ;;  %vm10838_vm4 = vmmov %vm10837_vm9  ;;  %v926_v49 = vsel %vm10839_vm7, %v5897_v36, %v5898_v16  ;;  %v10842_v39 = vsel %vm7368_vm15, 4294967295, %v10841_v39  ;;  %v5906_v26 = vpop.permute.xlu0 %5905  ;;  %vm7384_vm9 = vcmp.eq.s32.totalorder %v678_v5, 1 }
 0x2d8   : > { %v935_v34 = vsel %vm10838_vm4, %v5903_v33, %v5902_v6  ;;  %vm10840_vm13 = vmmov %vm10839_vm7  ;;  %v5911_v6 = vpop.permute.xlu1 %5910  ;;  %v7374_v33 = vpack.c.bf16 %v934_v18, %v926_v49  ;;  %vm10845_vm7 = vcmp.ge.s32.totalorder %v6837_v20, 32  ;;  %vm7388_vm4 = vcmp.eq.s32.totalorder %v674_v29, 1 }
 0x2d9   : > { %v927_v12 = vsel %vm10840_vm13, %v5898_v16, %v5897_v36  ;;  %vm7380_vm13 = vmpackc.low %vm7307_vm5, %vm10845_vm7  ;;  %v10846_v16 = vmov 0  ;;  %v10848_v36 = vmov 0  ;;  %v10850_v37 = vmov 0 }
 0x2da   : > { %v7372_v14 = vpack.c.bf16 %v935_v34, %v927_v12  ;;  %10844 = vst [vmem:[#allocation28_spill] sm:$0xff] %v7374_v33  ;;  %v10847_v16 = vsel %vm7380_vm13, 4294967295, %v10846_v16  ;;  %v10849_v36 = vsel %vm7384_vm9, 4294967295, %v10848_v36  ;;  %v10851_v37 = vsel %vm7388_vm4, 4294967295, %v10850_v37  ;;  %5186 = vmatprep.subr.msk.bf16.mxu0 %vm7368_vm15, %v7374_v33  ;;  %vm10863_vm3 = vmpackc.low %vm7347_vm1, %vm7388_vm4 }
 0x2db   : > { %10852 = vst [vmem:[#allocation29_spill] sm:$0xff] %v10851_v37  ;;  %v5913_v34 = vunpack.i.h.bf16 %v5911_v6  ;;  %v5912_v12 = vunpack.i.l.bf16 %v5911_v6  ;;  %v5908_v18 = vunpack.i.h.bf16 %v5906_v26  ;;  %v5907_v49 = vunpack.i.l.bf16 %v5906_v26 }
 0x2dc   : > { %10843 = vst [vmem:[#allocation27_spill] sm:$0xff] %v7372_v14  ;;  %vm10853_vm5 = vcmp.lt.s32.totalorder %v6837_v20, 18  ;;  %5189 = vmatpush1.bf16.msk.msra.mxu0 %vm7380_vm13, %v7372_v14 }
 0x2dd   : > { %v7397_v54 = vsel %vm10853_vm5, %v5912_v12, %v5913_v34  ;;  %vm10855_vm7 = vmmov %vm10853_vm5  ;;  %v7405_v29 = vsel %vm10510_vm0, %v5907_v49, %v5908_v18  ;;  %v7409_v6 = vsel %vm10510_vm0, %v5908_v18, %v5907_v49  ;;  %v720_v18 = vrot.slane %v715_v44, %v6827_v15 }
 0x2de   : > { %10854 = vst [vmem:[#allocation30_spill] sm:$0xff] %v7397_v54  ;;  %v7401_v5 = vsel %vm10855_vm7, %v5913_v34, %v5912_v12  ;;  %10857 = vst [vmem:[#allocation32_spill] sm:$0xff] %v7405_v29  ;;  %v5921_v34 = vpop.permute.xlu1 %5920  ;;  %v5916_v12 = vpop.permute.xlu0 %5915  ;;  %v5190_v33 = vpack.c.bf16 %v7397_v54, %v7405_v29  ;;  %vm10859_vm0 = vcmp.lt.s32.totalorder %v6837_v20, 16  ;;  %vm10861_vm7 = vcmp.lt.s32.totalorder %v6837_v20, 17 }
 0x2df   : > { %10856 = vst [vmem:[#allocation31_spill] sm:$0xff] %v7401_v5  ;;  %10858 = vst [vmem:[#allocation33_spill] sm:$0xff] %v7409_v6  ;;  %v5193_v26 = vpack.c.bf16 %v7401_v5, %v7409_v6  ;;  %v5923_v49 = vunpack.i.h.bf16 %v5921_v34  ;;  %v5922_v14 = vunpack.i.l.bf16 %v5921_v34  ;;  %v5918_v22 = vunpack.i.h.bf16 %v5916_v12 }
 0x2e0   : > { %vm10520_vm5 = vmpackc.low %vm7280_vm2, %vm7384_vm9  ;;  %v5917_v30 = vunpack.i.l.bf16 %v5916_v12  ;;  %vm10865_vm2 = vcmp.lt.s32.totalorder %v6863_v27, 240 }
 0x2e1   : > { %5192 = vmatprep.subr.msk.bf16.mxu0 %vm10520_vm5, %v5190_v33  ;;  %v966_v5 = vsel %vm10859_vm0, %v5922_v14, %v5923_v49  ;;  %vm10860_vm13 = vmmov %vm10859_vm0  ;;  %vm10864_vm5 = vcmp.ne.s32.totalorder %v7234_v41, 0 }
 0x2e2   : > { %v967_v54 = vsel %vm10860_vm13, %v5923_v49, %v5922_v14  ;;  %v958_v6 = vsel %vm10861_vm7, %v5917_v30, %v5918_v22  ;;  %vm10862_vm15 = vmmov %vm10861_vm7  ;;  %5195 = vmatpush1.bf16.msk.msra.mxu0 %vm10863_vm3, %v5193_v26  ;;  %vm10527_vm13 = vcmp.lt.s32.totalorder %v6837_v20, 14  ;;  %v5931_v14 = vpop.permute.xlu1 %5930  ;;  %v5926_v34 = vpop.permute.xlu0 %5925 }
 0x2e3   : > { %v959_v44 = vsel %vm10862_vm15, %v5918_v22, %v5917_v30  ;;  %vm759_vm0 = vmand %vm10865_vm2, %vm10864_vm5  ;;  %v7452_v12 = vpack.c.bf16 %v966_v5, %v958_v6  ;;  %vm7454_vm15 = vcmp.eq.s32.totalorder %v720_v18, 1  ;;  %v5933_v22 = vunpack.i.h.bf16 %v5931_v14 }
 0x2e4   : > { %v7449_v33 = vpack.c.bf16 %v967_v54, %v959_v44  ;;  %v5932_v49 = vunpack.i.l.bf16 %v5931_v14  ;;  %v5928_v26 = vunpack.i.h.bf16 %v5926_v34  ;;  %v5927_v29 = vunpack.i.l.bf16 %v5926_v34  ;;  %vm7467_vm3 = vmpackc.low %vm7384_vm9, %vm6911_vm8 }
 0x2e5   : > { %10867 = vst [vmem:[#allocation35_spill] sm:$0xff] %v7452_v12  ;;  %5198 = vmatprep.subr.msk.bf16.mxu0 %vm6926_vm14, %v7452_v12  ;;  %vm10531_vm2 = vcmp.lt.s32.totalorder %v6837_v20, 2  ;;  %v761_v54 = vsel %vm759_vm0, 1, %v10836_v43  ;;  %v10870_v5 = vmov 0  ;;  %vm10872_vm5 = vcmp.lt.s32.totalorder %v6837_v20, 15  ;;  %vm7496_vm8 = vmpackc.low %vm7454_vm15, %vm6946_vm10 }
 0x2e6   : > { %10866 = vst [vmem:[#allocation34_spill] sm:$0xff] %v7449_v33  ;;  %v10871_v5 = vsel %vm7467_vm3, 4294967295, %v10870_v5  ;;  %v982_v6 = vsel %vm10527_vm13, %v5932_v49, %v5933_v22  ;;  %v983_v18 = vsel %vm10527_vm13, %v5933_v22, %v5932_v49  ;;  %v7477_v44 = vsel %vm10872_vm5, %v5927_v29, %v5928_v26  ;;  %vm10874_vm7 = vmmov %vm10872_vm5  ;;  %5201 = vmatpush1.bf16.msk.msra.mxu0 %vm6942_vm12, %v7449_v33  ;;  %v5941_v34 = vpop.permute.xlu1 %5940  ;;  %v5936_v17 = vpop.permute.xlu0 %5935 }
 0x2e7   : > { %10873 = vst [vmem:[#allocation36_spill] sm:$0xff] %v7477_v44  ;;  %v7481_v14 = vsel %vm10874_vm7, %v5928_v26, %v5927_v29  ;;  %v7490_v7 = vpack.c.bf16 %v982_v6, %v7477_v44  ;;  %v10878_v22 = vmov 0  ;;  %vm737_vm0 = vcmp.eq.s32.totalorder %v7234_v41, 1 }
 0x2e8   : > { %10875 = vst [vmem:[#allocation37_spill] sm:$0xff] %v7481_v14  ;;  %v7487_v51 = vpack.c.bf16 %v983_v18, %v7481_v14  ;;  %v10879_v22 = vsel %vm7496_vm8, 4294967295, %v10878_v22  ;;  %vm736_vm5 = vcmp.eq.s32.totalorder %v7230_v38, 1  ;;  %v5943_v29 = vunpack.i.h.bf16 %v5941_v34 }
 0x2e9   : > { %10877 = vst [vmem:[#allocation39_spill] sm:$0xff] %v7490_v7  ;;  %10880 = vst [vmem:[#allocation40_spill] sm:$0xff] %v10879_v22  ;;  %v5942_v49 = vunpack.i.l.bf16 %v5941_v34  ;;  %v5938_v26 = vunpack.i.h.bf16 %v5936_v17  ;;  %v5937_v18 = vunpack.i.l.bf16 %v5936_v17  ;;  %5204 = vmatprep.subr.msk.bf16.mxu0 %vm7467_vm3, %v7490_v7  ;;  %v769_v63 = vrot.slane %v761_v54, %v6827_v15 }
 0x2ea   : > { %10876 = vst [vmem:[#allocation38_spill] sm:$0xff] %v7487_v51  ;;  %vm10881_vm10 = vcmp.ne.s32.totalorder %v7230_v38, 0  ;;  %vm10882_vm7 = vcmp.lt.s32.totalorder %v6837_v20, 1  ;;  %5207 = vmatpush1.bf16.msk.msra.mxu0 %vm7496_vm8, %v7487_v51  ;;  %v10887_v7 = vmov 0  ;;  %v5951_v58 = vpop.permute.xlu1 %5950  ;;  %v10892_v51 = vmov 0 }
 0x2eb   : > { %v760_v30 = vsel %vm10881_vm10, 1, %v10836_v43  ;;  %v7512_v6 = vsel %vm10882_vm7, %v5942_v49, %v5943_v29  ;;  %vm10884_vm13 = vmmov %vm10882_vm7  ;;  %v990_v17 = vsel %vm10531_vm2, %v5937_v18, %v5938_v26  ;;  %v991_v54 = vsel %vm10531_vm2, %v5938_v26, %v5937_v18  ;;  %v5946_v26 = vpop.permute.xlu0 %5945 }
 0x2ec   : > { %10883 = vst [vmem:[#allocation41_spill] sm:$0xff] %v7512_v6  ;;  %v7516_v34 = vsel %vm10884_vm13, %v5943_v29, %v5942_v49  ;;  %vm10886_vm10 = vcmp.eq.s32.totalorder %v6840_v21, 1  ;;  %v7539_v18 = vpack.c.bf16 %v7512_v6, %v990_v17  ;;  %vm10891_vm13 = vcmp.eq.s32.totalorder %v6834_v19, 1 }
 0x2ed   : > { %10885 = vst [vmem:[#allocation42_spill] sm:$0xff] %v7516_v34  ;;  %vm7529_vm7 = vmpackc.low %vm10886_vm10, %vm737_vm0  ;;  %v7536_v49 = vpack.c.bf16 %v7516_v34, %v991_v54  ;;  %v5948_v29 = vunpack.i.h.bf16 %v5946_v26  ;;  %v5947_v14 = vunpack.i.l.bf16 %v5946_v26  ;;  %v765_v54 = vrot.slane %v760_v30, %v6827_v15 }
 0x2ee   : > { %v10888_v7 = vsel %vm7529_vm7, 4294967295, %v10887_v7  ;;  %10890 = vst [vmem:[#allocation44_spill] sm:$0xff] %v7539_v18  ;;  %vm7545_vm2 = vmpackc.low %vm10891_vm13, %vm736_vm5  ;;  %v5953_v34 = vunpack.i.h.bf16 %v5951_v58  ;;  %v5952_v17 = vunpack.i.l.bf16 %v5951_v58  ;;  %5210 = vmatprep.subr.msk.bf16.mxu0 %vm7529_vm7, %v7539_v18  ;;  %vm10894_vm5 = vcmp.ne.s32.totalorder %v7261_v45, 0  ;;  %v5961_v18 = vpop.permute.xlu1 %5960 }
 0x2ef   : > { %10889 = vst [vmem:[#allocation43_spill] sm:$0xff] %v7536_v49  ;;  %v10893_v51 = vsel %vm7545_vm2, 4294967295, %v10892_v51  ;;  %vm10895_vm10 = vcmp.lt.s32.totalorder %v6863_v27, 240  ;;  %vm10898_vm15 = vcmp.lt.s32.totalorder %v6837_v20, 127  ;;  %5213 = vmatpush1.bf16.msk.msra.mxu0 %vm7545_vm2, %v7536_v49  ;;  %vm10900_vm3 = vcmp.ne.s32.totalorder %v7234_v41, 0  ;;  %v5956_v38 = vpop.permute.xlu0 %5955 }
 0x2f0   : > { %vm7560_vm13 = vmand %vm10895_vm10, %vm10894_vm5  ;;  %v1006_v26 = vsel %vm10898_vm15, %v5947_v14, %v5948_v29  ;;  %vm10901_vm5 = vcmp.lt.s32.totalorder %v6863_v27, 224  ;;  %v10902_v58 = vmax.f32 %v7131_v28, 0.0  ;;  %v10906_v49 = vmov 0 }
 0x2f1   : > { %vm10899_vm8 = vmmov %vm10898_vm15  ;;  %v5958_v41 = vunpack.i.h.bf16 %v5956_v38  ;;  %v5957_v8 = vunpack.i.l.bf16 %v5956_v38  ;;  %vm7590_vm7 = vcmp.eq.s32.totalorder %v765_v54, 1  ;;  %v10909_v44 = vmov 0 }
 0x2f2   : > { %v1007_v30 = vsel %vm10899_vm8, %v5948_v29, %v5947_v14  ;;  %vm807_vm10 = vmand %vm10901_vm5, %vm10900_vm3  ;;  %v7579_v31 = vpack.c.bf16 %v1006_v26, %v10902_v58  ;;  %v10904_v14 = vmax.f32 %v7134_v32, 0.0  ;;  %vm7585_vm8 = vcmp.eq.s32.totalorder %v769_v63, 1 }
 0x2f3   : > { %v10907_v49 = vsel %vm7585_vm8, 4294967295, %v10906_v49  ;;  %v10910_v44 = vsel %vm7590_vm7, 4294967295, %v10909_v44  ;;  %v784_v28 = vsel %vm7560_vm13, 1, %v10836_v43  ;;  %vm10912_vm3 = vcmp.lt.s32.totalorder %v6837_v20, 126 }
 0x2f4   : > { %10903 = vst [vmem:[#allocation45_spill] sm:$0xff] %v7579_v31  ;;  %v7583_v29 = vpack.c.bf16 %v1007_v30, %v10904_v14  ;;  %10908 = vst [vmem:[#allocation47_spill] sm:$0xff] %v10907_v49  ;;  %v7599_v32 = vsel %vm10912_vm3, %v5952_v17, %v5953_v34  ;;  %vm10916_vm15 = vnez %v10778_v40  ;;  %vm10917_vm0 = vcmp.ne.s32.totalorder %v7249_v13, 0  ;;  %v5971_v14 = vpop.permute.xlu1 %5970 }
 0x2f5   : > { %10911 = vst [vmem:[#allocation48_spill] sm:$0xff] %v10910_v44  ;;  %10913 = vst [vmem:[#allocation49_spill] sm:$0xff] %v7599_v32  ;;  %v783_v38 = vsel %vm10917_vm0, 1, %v10836_v43  ;;  %v809_v54 = vsel %vm807_vm10, 1, %v10836_v43  ;;  %vm10918_vm13 = vcmp.ne.s32.totalorder %v6840_v21, 0  ;;  %vm10919_vm2 = vcmp.lt.s32.totalorder %v6863_v27, 224  ;;  %v5966_v21 = vpop.permute.xlu0 %5965 }
 0x2f6   : > { %10905 = vst [vmem:[#allocation46_spill] sm:$0xff] %v7583_v29  ;;  %vm10914_vm5 = vmmov %vm10912_vm3  ;;  %5216 = vmatprep.subr.msk.bf16.mxu0 %vm10916_vm15, %v7583_v29  ;;  %vm10926_vm0 = vnez %v10781_v11  ;;  %vm10927_vm10 = vcmp.eq.s32.totalorder %v7261_v45, 1  ;;  %v10928_v58 = vmov 0  ;;  %v792_v49 = vrot.slane %v784_v28, %v6827_v15 }
 0x2f7   : > { %v7603_v63 = vsel %vm10914_vm5, %v5953_v34, %v5952_v17  ;;  %vm7616_vm3 = vmand %vm10919_vm2, %vm10918_vm13  ;;  %v5963_v34 = vunpack.i.h.bf16 %v5961_v18  ;;  %v5962_v17 = vunpack.i.l.bf16 %v5961_v18  ;;  %vm10922_vm5 = vcmp.lt.s32.totalorder %v6837_v20, 114  ;;  %5219 = vmatpush1.bf16.msk.msra.mxu0 %vm10926_vm0, %v7579_v31 }
 0x2f8   : > { %10915 = vst [vmem:[#allocation50_spill] sm:$0xff] %v7603_v63  ;;  %v7622_v26 = vsel %vm10922_vm5, %v5957_v8, %v5958_v41  ;;  %vm10924_vm15 = vmmov %vm10922_vm5  ;;  %v788_v31 = vrot.slane %v783_v38, %v6827_v15  ;;  %v817_v29 = vrot.slane %v809_v54, %v6827_v15  ;;  %vm10933_vm5 = vcmp.ne.s32.totalorder %v6850_v24, 0 }
 0x2f9   : > { %10923 = vst [vmem:[#allocation51_spill] sm:$0xff] %v7622_v26  ;;  %v7626_v30 = vsel %vm10924_vm15, %v5958_v41, %v5957_v8  ;;  %vm7635_vm2 = vmpackc.low %vm7585_vm8, %vm10927_vm10  ;;  %v5223_v18 = vpack.c.bf16 %v7622_v26, %v7599_v32  ;;  %vm10930_vm15 = vcmp.eq.s32.totalorder %v7249_v13, 1  ;;  %v10931_v41 = vmov 0  ;;  %v5976_v24 = vpop.permute.xlu0 %5975 }
 0x2fa   : > { %10925 = vst [vmem:[#allocation52_spill] sm:$0xff] %v7626_v30  ;;  %v10929_v58 = vsel %vm7635_vm2, 4294967295, %v10928_v58  ;;  %v5220_v8 = vpack.c.bf16 %v7626_v30, %v7603_v63  ;;  %vm7647_vm13 = vmpackc.low %vm7590_vm7, %vm10930_vm15  ;;  %v5968_v26 = vunpack.i.h.bf16 %v5966_v21  ;;  %v5967_v32 = vunpack.i.l.bf16 %v5966_v21 }
 0x2fb   : > { %v10932_v41 = vsel %vm7647_vm13, 4294967295, %v10931_v41  ;;  %v832_v30 = vsel %vm7616_vm3, 1, %v10836_v43  ;;  %v5973_v63 = vunpack.i.h.bf16 %v5971_v14  ;;  %v5972_v13 = vunpack.i.l.bf16 %v5971_v14 }
 0x2fc   : > { %5222 = vmatprep.subr.msk.bf16.mxu0 %vm7635_vm2, %v5220_v8  ;;  %vm10934_vm10 = vcmp.lt.s32.totalorder %v6863_v27, 224  ;;  %vm10937_vm0 = vcmp.lt.s32.totalorder %v6837_v20, 113  ;;  %vm10939_vm2 = vcmp.lt.s32.totalorder %v6837_v20, 112  ;;  %v5981_v8 = vpop.permute.xlu1 %5980 }
 0x2fd   : > { %vm7666_vm8 = vmand %vm10934_vm10, %vm10933_vm5  ;;  %v1030_v28 = vsel %vm10937_vm0, %v5962_v17, %v5963_v34  ;;  %v1038_v19 = vsel %vm10939_vm2, %v5967_v32, %v5968_v26  ;;  %5225 = vmatpush1.bf16.msk.msra.mxu0 %vm7647_vm13, %v5223_v18  ;;  %vm10941_vm5 = vcmp.ne.s32.totalorder %v7261_v45, 0  ;;  %v10946_v18 = vmov 0 }
 0x2fe   : > { %vm10938_vm3 = vmmov %vm10937_vm0  ;;  %v7684_v14 = vpack.c.bf16 %v1038_v19, %v1030_v28  ;;  %vm7688_vm0 = vcmp.eq.s32.totalorder %v792_v49, 1  ;;  %v868_v28 = vsel %vm7666_vm8, 1, %v10836_v43  ;;  %v5982_v21 = vunpack.i.l.bf16 %v5981_v8 }
 0x2ff   : > { %v1031_v38 = vsel %vm10938_vm3, %v5963_v34, %v5962_v17  ;;  %vm10940_vm15 = vmmov %vm10939_vm2  ;;  %v5978_v17 = vunpack.i.h.bf16 %v5976_v24  ;;  %vm7693_vm2 = vcmp.eq.s32.totalorder %v788_v31, 1  ;;  %vm10956_vm8 = vcmp.lt.s32.totalorder %v6837_v20, 110 }
 0x300   : > { %v1039_v54 = vsel %vm10940_vm15, %v5968_v26, %v5967_v32  ;;  %vm889_vm12 = vmand %vm10934_vm10, %vm10941_vm5  ;;  %10942 = vst [vmem:[#allocation53_spill] sm:$0xff] %v7684_v14  ;;  %v840_v32 = vrot.slane %v832_v30, %v6827_v15  ;;  %v5977_v26 = vunpack.i.l.bf16 %v5976_v24  ;;  %v10947_v18 = vsel %vm7693_vm2, 4294967295, %v10946_v18 }
 0x301   : > { %v7686_v6 = vpack.c.bf16 %v1039_v54, %v1031_v38  ;;  %10948 = vst [vmem:[#allocation55_spill] sm:$0xff] %v10947_v18  ;;  %vm10949_vm15 = vcmp.lt.s32.totalorder %v6837_v20, 111  ;;  %vm10953_vm5 = vnez %v10784_v47  ;;  %vm7711_vm10 = vcmp.eq.s32.totalorder %v817_v29, 1 }
 0x302   : > { %v7702_v38 = vsel %vm10949_vm15, %v5972_v13, %v5973_v63  ;;  %vm10951_vm3 = vmmov %vm10949_vm15  ;;  %v891_v31 = vsel %vm889_vm12, 1, %v10836_v43  ;;  %v5983_v30 = vunpack.i.h.bf16 %v5981_v8  ;;  %v1054_v19 = vsel %vm10956_vm8, %v5977_v26, %v5978_v17  ;;  %v5986_v8 = vpop.permute.xlu0 %5985 }
 0x303   : > { %10943 = vst [vmem:[#allocation54_spill] sm:$0xff] %v7686_v6  ;;  %10950 = vst [vmem:[#allocation56_spill] sm:$0xff] %v7702_v38  ;;  %v7706_v49 = vsel %vm10951_vm3, %v5973_v63, %v5972_v13  ;;  %5228 = vmatprep.subr.msk.bf16.mxu0 %vm10953_vm5, %v7686_v6  ;;  %vm10958_vm3 = vnez %v10792_v56  ;;  %vm10959_vm5 = vnez %v10788_v9  ;;  %v10960_v13 = vmov 0  ;;  %v5991_v63 = vpop.permute.xlu1 %5990 }
 0x304   : > { %10952 = vst [vmem:[#allocation57_spill] sm:$0xff] %v7706_v49  ;;  %vm10957_vm15 = vmmov %vm10956_vm8  ;;  %5231 = vmatpush1.bf16.msk.msra.mxu0 %vm10958_vm3, %v7684_v14  ;;  %v7732_v29 = vpack.c.bf16 %v1054_v19, %v7702_v38  ;;  %vm10964_vm12 = vnez %v10798_v59  ;;  %v10965_v9 = vmov 0  ;;  %v5987_v19 = vunpack.i.l.bf16 %v5986_v8 }
 0x305   : > { %v1055_v54 = vsel %vm10957_vm15, %v5978_v17, %v5977_v26  ;;  %vm7727_vm13 = vmpackc.low %vm7688_vm0, %vm10959_vm5  ;;  %vm7745_vm0 = vcmp.eq.s32.totalorder %v840_v32, 1  ;;  %v876_v17 = vrot.slane %v868_v28, %v6827_v15  ;;  %v5988_v26 = vunpack.i.h.bf16 %v5986_v8 }
 0x306   : > { %v10961_v13 = vsel %vm7727_vm13, 4294967295, %v10960_v13  ;;  %10962 = vst [vmem:[#allocation58_spill] sm:$0xff] %v7732_v29  ;;  %v7735_v45 = vpack.c.bf16 %v1055_v54, %v7706_v49  ;;  %vm7741_vm8 = vmpackc.low %vm7693_vm2, %vm10964_vm12  ;;  %v5993_v54 = vunpack.i.h.bf16 %v5991_v63  ;;  %v5992_v43 = vunpack.i.l.bf16 %v5991_v63  ;;  %v551_v49 = vld [vmem:[%s10437_s2 + $0x48] sm:$0xff] }
 0x307   : > { %v10966_v9 = vsel %vm7741_vm8, 4294967295, %v10965_v9  ;;  %v899_v38 = vrot.slane %v891_v31, %v6827_v15  ;;  %vm10969_vm3 = vcmp.lt.s32.totalorder %v6837_v20, 98  ;;  %vm10971_vm5 = vcmp.lt.s32.totalorder %v6837_v20, 97  ;;  %vm7771_vm15 = vmpackc.low %vm7745_vm0, %vm7711_vm10 }
 0x308   : > { %10963 = vst [vmem:[#allocation59_spill] sm:$0xff] %v7735_v45  ;;  %5234 = vmatprep.subr.msk.bf16.mxu0 %vm7727_vm13, %v7735_v45  ;;  %v1062_v32 = vsel %vm10969_vm3, %v5982_v21, %v5983_v30  ;;  %vm10970_vm14 = vmmov %vm10969_vm3  ;;  %v1070_v14 = vsel %vm10971_vm5, %v5987_v19, %v5988_v26  ;;  %v10973_v31 = vmov 0  ;;  %v10978_v24 = vmov 0 }
 0x309   : > { %v1063_v28 = vsel %vm10970_vm14, %v5983_v30, %v5982_v21  ;;  %vm10972_vm4 = vmmov %vm10971_vm5  ;;  %5237 = vmatpush1.bf16.msk.msra.mxu0 %vm7741_vm8, %v7732_v29  ;;  %v10974_v31 = vsel %vm7771_vm15, 4294967295, %v10973_v31  ;;  %v7775_v8 = vpack.c.bf16 %v1070_v14, %v1062_v32  ;;  %v6006_v30 = vpop.permute.xlu1 %6005  ;;  %v5996_v21 = vpop.permute.xlu0 %5995  ;;  %vm878_vm10 = vcmp.eq.s32.totalorder %v876_v17, 1 }
 0x30a   : > { %v1071_v63 = vsel %vm10972_vm4, %v5988_v26, %v5987_v19  ;;  %vm10977_vm4 = vnez %v10786_v48  ;;  %v6008_v34 = vunpack.i.h.bf16 %v6006_v30  ;;  %v6007_v26 = vunpack.i.l.bf16 %v6006_v30 }
 0x30b   : > { %10975 = vst [vmem:[#allocation60_spill] sm:$0xff] %v7775_v8  ;;  %v7778_v45 = vpack.c.bf16 %v1071_v63, %v1063_v28  ;;  %vm7784_vm3 = vmpackc.low %vm10977_vm4, %vm7590_vm7  ;;  %v5998_v19 = vunpack.i.h.bf16 %v5996_v21  ;;  %v5997_v14 = vunpack.i.l.bf16 %v5996_v21  ;;  %vm10980_vm0 = vcmp.lt.s32.totalorder %v6837_v20, 96 }
 0x30c   : > { %v10979_v24 = vsel %vm7784_vm3, 4294967295, %v10978_v24  ;;  %v1078_v32 = vsel %vm10980_vm0, %v5992_v43, %v5993_v54  ;;  %vm7793_vm5 = vcmp.eq.s32.totalorder %v899_v38, 1  ;;  %v10981_v28 = vmov 0  ;;  %vm10984_vm4 = vmmov %vm10980_vm0 }
 0x30d   : > { %10976 = vst [vmem:[#allocation61_spill] sm:$0xff] %v7778_v45  ;;  %5240 = vmatprep.subr.msk.bf16.mxu0 %vm7771_vm15, %v7778_v45  ;;  %v10982_v28 = vsel %vm7793_vm5, 4294967295, %v10981_v28  ;;  %v1079_v48 = vsel %vm10984_vm4, %v5993_v54, %v5992_v43  ;;  %vm10985_vm14 = vcmp.lt.s32.totalorder %v6837_v20, 94  ;;  %vm10987_vm7 = vcmp.lt.s32.totalorder %v6837_v20, 95  ;;  %v6011_v45 = vpop.permute.xlu1 %6010 }
 0x30e   : > { %10983 = vst [vmem:[#allocation62_spill] sm:$0xff] %v10982_v28  ;;  %v7801_v17 = vsel %vm10985_vm14, %v6008_v34, %v6007_v26  ;;  %v1086_v63 = vsel %vm10987_vm7, %v5997_v14, %v5998_v19  ;;  %vm10988_vm0 = vmmov %vm10987_vm7  ;;  %5243 = vmatpush1.bf16.msk.msra.mxu0 %vm7784_vm3, %v7775_v8  ;;  %vm10989_vm15 = vcmp.lt.s32.totalorder %v6863_v27, 224  ;;  %v10990_v38 = vmov 0 }
 0x30f   : > { %10986 = vst [vmem:[#allocation63_spill] sm:$0xff] %v7801_v17  ;;  %v1087_v30 = vsel %vm10988_vm0, %v5998_v19, %v5997_v14  ;;  %vm7812_vm8 = vmpackc.low %vm878_vm10, %vm10989_vm15  ;;  %v7822_v21 = vpack.c.bf16 %v1086_v63, %v1078_v32  ;;  %v6001_v19 = vpop.permute.xlu0 %6000  ;;  %v10996_v14 = vmov 0  ;;  %v6013_v8 = vunpack.i.h.bf16 %v6011_v45 }
 0x310   : > { %v10991_v38 = vsel %vm7812_vm8, 4294967295, %v10990_v38  ;;  %vm10992_vm4 = vmmov %vm10985_vm14  ;;  %v7820_v54 = vpack.c.bf16 %v1087_v30, %v1079_v48  ;;  %v6012_v29 = vunpack.i.l.bf16 %v6011_v45  ;;  %v6003_v44 = vunpack.i.h.bf16 %v6001_v19 }
 0x311   : > { %v7818_v43 = vsel %vm10992_vm4, %v6007_v26, %v6008_v34  ;;  %10995 = vst [vmem:[#allocation66_spill] sm:$0xff] %v7822_v21  ;;  %vm7827_vm7 = vmpackc.low %vm10964_vm12, %vm10790_vm6  ;;  %v6002_v27 = vunpack.i.l.bf16 %v6001_v19  ;;  %vm10998_vm15 = vcmp.eq.s32.totalorder %v6777_v2, 0  ;;  %v11001_v26 = vmov 1.0   ;;  %v6021_v19 = vpop.permute.xlu1 %6020 }
 0x312   : > { %10993 = vst [vmem:[#allocation64_spill] sm:$0xff] %v7818_v43  ;;  %10994 = vst [vmem:[#allocation65_spill] sm:$0xff] %v7820_v54  ;;  %v10997_v14 = vsel %vm7827_vm7, 4294967295, %v10996_v14  ;;  %v5250_v32 = vpack.c.bf16 %v11001_v26, %v7801_v17  ;;  %5246 = vmatprep.subr.msk.bf16.mxu0 %vm7812_vm8, %v7820_v54  ;;  %vm11002_vm6 = vcmp.lt.s32.totalorder %v6837_v20, 33  ;;  %vm11003_vm12 = vcmp.lt.s32.totalorder %v6837_v20, 34 }
 0x313   : > { %vm7835_vm14 = vmpackc.low %vm10998_vm15, %vm7793_vm5  ;;  %v594_v59 = vsel %vm11002_vm6, %v6012_v29, %v6013_v8  ;;  %v557_v45 = vsel %vm11003_vm12, %v6002_v27, %v6003_v44  ;;  %5249 = vmatpush1.bf16.msk.msra.mxu0 %vm7827_vm7, %v7822_v21  ;;  %v5253_v48 = vpack.c.bf16 %v11001_v26, %v7818_v43  ;;  %v6016_v17 = vpop.permute.xlu0 %6015  ;;  %v6023_v43 = vunpack.i.h.bf16 %v6021_v19  ;;  %v11063_v21 = vld [vmem:[#allocation11_spill] sm:$0xff] }
 0x314   : > { %vm11004_vm10 = vmmov %vm11002_vm6  ;;  %5252 = vmatprep.subr.msk.bf16.mxu0 %vm7835_vm14, %v5250_v32  ;;  %v6022_v54 = vunpack.i.l.bf16 %v6021_v19  ;;  %v6018_v28 = vunpack.i.h.bf16 %v6016_v17  ;;  %vm11009_vm6 = vcmp.lt.s32.totalorder %v6837_v20, 31  ;;  %v904_v32 = vld [vmem:[%s10437_s2 + $0x60] sm:$0xff]  ;;  %vm11017_vm5 = vcmask 654336  }
 0x315   : > { %v595_v63 = vsel %vm11004_vm10, %v6013_v8, %v6012_v29  ;;  %vm11005_vm0 = vmmov %vm11003_vm12  ;;  %v6017_v29 = vunpack.i.l.bf16 %v6016_v17  ;;  %v5256_v8 = vpack.c.bf16 %v594_v59, %v557_v45  ;;  %vm11010_vm12 = vcmp.lt.s32.totalorder %v6837_v20, 32  ;;  %v6031_v18 = vpop.permute.xlu1 %6030 }
 0x316   : > { %v558_v30 = vsel %vm11005_vm0, %v6003_v44, %v6002_v27  ;;  %vm11006_vm4 = vmmov %vm10998_vm15  ;;  %v630_v27 = vsel %vm11009_vm6, %v6022_v54, %v6023_v43  ;;  %v6033_v17 = vunpack.i.h.bf16 %v6031_v18  ;;  %v6032_v59 = vunpack.i.l.bf16 %v6031_v18 }
 0x317   : > { %vm7863_vm15 = vmpackc.low %vm11006_vm4, %vm7693_vm2  ;;  %v617_v44 = vsel %vm11010_vm12, %v6017_v29, %v6018_v28  ;;  %v5259_v2 = vpack.c.bf16 %v595_v63, %v558_v30  ;;  %v6026_v15 = vpop.permute.xlu0 %6025  ;;  %vm11013_vm4 = vcmp.lt.s32.totalorder %v6837_v20, 18  ;;  %vm11016_vm2 = vnez %v10842_v39 }
 0x318   : > { %5255 = vmatpush1.bf16.msk.msra.mxu0 %vm7863_vm15, %v5253_v48  ;;  %v6028_v45 = vunpack.i.h.bf16 %v6026_v15  ;;  %v6027_v19 = vunpack.i.l.bf16 %v6026_v15  ;;  %vm11011_vm10 = vmmov %vm11009_vm6  ;;  %v5262_v63 = vpack.c.bf16 %v630_v27, %v617_v44  ;;  %v688_v30 = vsel %vm11013_vm4, %v6032_v59, %v6033_v17 }
 0x319   : > { %5258 = vmatprep.subr.msk.bf16.mxu0 %vm7303_vm11, %v5256_v8  ;;  %v631_v48 = vsel %vm11011_vm10, %v6023_v43, %v6022_v54  ;;  %vm11012_vm0 = vmmov %vm11010_vm12  ;;  %vm11014_vm6 = vcmp.lt.s32.totalorder %v6837_v20, 30  ;;  %vm11015_vm12 = vnez %v10832_v1  ;;  %vm11037_vm11 = vnez %v10778_v40 }
 0x31a   : > { %v618_v6 = vsel %vm11012_vm0, %v6018_v28, %v6017_v29  ;;  %v653_v18 = vsel %vm11014_vm6, %v6027_v19, %v6028_v45  ;;  %vm11018_vm10 = vmmov %vm11013_vm4  ;;  %vm11020_vm4 = vnez %v10847_v16  ;;  %v11059_v34 = vmov 0.0  }
 0x31b   : > { %1166 = vmatmul.mubr.f32.vlgmr.msra.gmra.mrb[2].mxu0 %v904_v32  ;;  %v6036_v15 = vpop.permute.xlu0 %6035  ;;  %v5265_v43 = vpack.c.bf16 %v631_v48, %v618_v6  ;;  %v689_v28 = vsel %vm11018_vm10, %v6033_v17, %v6032_v59  ;;  %vm11019_vm0 = vmmov %vm11014_vm6  ;;  %v5268_v29 = vpack.c.bf16 %v688_v30, %v653_v18  ;;  %vm11021_vm6 = vnez %v10814_v35 }
 0x31c   : > { %5261 = vmatpush1.bf16.msk.msra.mxu0 %vm11015_vm12, %v5259_v2  ;;  %4758 = vmatprep.mubr.msk.f32.mxu0 %vm11017_vm5, %v551_v49  ;;  %v654_v54 = vsel %vm11019_vm0, %v6028_v45, %v6027_v19  ;;  %v6038_v8 = vunpack.i.h.bf16 %v6036_v15  ;;  %v6037_v27 = vunpack.i.l.bf16 %v6036_v15  ;;  %v6041_v2 = vpop.permute.xlu1 %6040  ;;  %vm11023_vm5 = vcmp.lt.s32.totalorder %v6837_v20, 14 }
 0x31d   : > { %5264 = vmatprep.subr.msk.bf16.mxu0 %vm11016_vm2, %v5262_v63  ;;  %vm11022_vm2 = vmpackc.low %vm11021_vm6, %vm7384_vm9  ;;  %v5271_v6 = vpack.c.bf16 %v689_v28, %v654_v54  ;;  %v6043_v49 = vunpack.i.h.bf16 %v6041_v2  ;;  %v6042_v44 = vunpack.i.l.bf16 %v6041_v2  ;;  %vm11024_vm10 = vnez %v10851_v37 }
 0x31e   : > { %v711_v32 = vsel %vm11023_vm5, %v6037_v27, %v6038_v8  ;;  %vm11025_vm0 = vmpackc.low %vm7347_vm1, %vm11024_vm10  ;;  %vm11034_vm10 = vcmp.lt.s32.totalorder %v6837_v20, 114  ;;  %vm11036_vm9 = vnez %v10893_v51  ;;  %vm11051_vm6 = vnez %v10966_v9 }
 0x31f   : > { %vm11027_vm12 = vmmov %vm11023_vm5  ;;  %v5280_v59 = vpack.c.bf16 %v711_v32, %v6955_v3  ;;  %v6046_v45 = vpop.permute.xlu0 %6045  ;;  %vm11029_vm5 = vnez %v10765_v62 }
 0x320   : > { %5267 = vmatpush1.bf16.msk.msra.mxu0 %vm11020_vm4, %v5265_v43  ;;  %vm11026_vm4 = vnez %v10763_v55  ;;  %v712_v17 = vsel %vm11027_vm12, %v6038_v8, %v6037_v27  ;;  %v6051_v48 = vpop.permute.xlu1 %6050  ;;  %v6048_v43 = vunpack.i.h.bf16 %v6046_v45  ;;  %v6047_v28 = vunpack.i.l.bf16 %v6046_v45 }
 0x321   : > { %5270 = vmatprep.subr.msk.bf16.mxu0 %vm11022_vm2, %v5268_v29  ;;  %vm11028_vm2 = vcmp.lt.s32.totalorder %v6837_v20, 2  ;;  %v5283_v63 = vpack.c.bf16 %v712_v17, %v6980_v25  ;;  %v6053_v3 = vunpack.i.h.bf16 %v6051_v48  ;;  %v6052_v15 = vunpack.i.l.bf16 %v6051_v48 }
 0x322   : > { %v734_v19 = vsel %vm11028_vm2, %v6042_v44, %v6043_v49  ;;  %vm11031_vm1 = vmmov %vm11028_vm2  ;;  %vm11032_vm12 = vnez %v10879_v22  ;;  %vm11033_vm2 = vnez %v10888_v7 }
 0x323   : > { %v735_v30 = vsel %vm11031_vm1, %v6043_v49, %v6042_v44  ;;  %v5286_v18 = vpack.c.bf16 %v6919_v53, %v734_v19  ;;  %v6056_v54 = vpop.permute.xlu0 %6055  ;;  %v757_v25 = vsel %vm11034_vm10, %v6053_v3, %v6052_v15  ;;  %vm11035_vm1 = vcmp.lt.s32.totalorder %v6837_v20, 126 }
 0x324   : > { %5273 = vmatpush1.bf16.msk.msra.mxu0 %vm11025_vm0, %v5271_v6  ;;  %vm11030_vm0 = vnez %v10871_v5  ;;  %v5289_v29 = vpack.c.bf16 %v6959_v4, %v735_v30  ;;  %v746_v8 = vsel %vm11035_vm1, %v6048_v43, %v6047_v28  ;;  %v6061_v53 = vpop.permute.xlu1 %6060  ;;  %v6058_v49 = vunpack.i.h.bf16 %v6056_v54 }
 0x325   : > { %5276 = vmatprep.subr.msk.bf16.mxu0 %vm11026_vm4, %v6934_v60  ;;  %v5298_v2 = vpack.c.bf16 %v757_v25, %v746_v8  ;;  %v6057_v44 = vunpack.i.l.bf16 %v6056_v54  ;;  %v6062_v30 = vunpack.i.l.bf16 %v6061_v53 }
 0x327   : > { %v6066_v6 = vpop.permute.xlu0 %6065 }
 0x328   : > { %5279 = vmatpush1.bf16.msk.msra.mxu0 %vm11029_vm5, %v6936_v61  ;;  %v6071_v17 = vpop.permute.xlu1 %6070  ;;  %v6068_v45 = vunpack.i.h.bf16 %v6066_v6  ;;  %v6067_v19 = vunpack.i.l.bf16 %v6066_v6 }
 0x329   : > { %5282 = vmatprep.subr.msk.bf16.mxu0 %vm11030_vm0, %v5280_v59 }
 0x32b   : > { %v6076_v48 = vpop.permute.xlu0 %6075 }
 0x32c   : > { %5285 = vmatpush1.bf16.msk.msra.mxu0 %vm11032_vm12, %v5283_v63  ;;  %vm11038_vm12 = vmmov %vm11034_vm10  ;;  %vm11040_vm10 = vnez %v10781_v11  ;;  %v6063_v63 = vunpack.i.h.bf16 %v6061_v53 }
 0x32d   : > { %5288 = vmatprep.subr.msk.bf16.mxu0 %vm11033_vm2, %v5286_v18  ;;  %v756_v27 = vsel %vm11038_vm12, %v6052_v15, %v6053_v3  ;;  %vm11039_vm2 = vmmov %vm11035_vm1  ;;  %vm11041_vm1 = vnez %v10929_v58  ;;  %vm11043_vm12 = vnez %v10932_v41  ;;  %v6078_v15 = vunpack.i.h.bf16 %v6076_v48  ;;  %v6081_v41 = vpop.permute.xlu1 %6080 }
 0x32e   : > { %v745_v4 = vsel %vm11039_vm2, %v6047_v28, %v6048_v43  ;;  %vm11044_vm2 = vnez %v10784_v47  ;;  %v6077_v43 = vunpack.i.l.bf16 %v6076_v48  ;;  %v6083_v53 = vunpack.i.h.bf16 %v6081_v41 }
 0x32f   : > { %v5301_v32 = vpack.c.bf16 %v756_v27, %v745_v4  ;;  %v6082_v27 = vunpack.i.l.bf16 %v6081_v41  ;;  %v11068_v41 = vld [vmem:[#allocation14_spill] sm:$0xff] }
 0x330   : > { %5291 = vmatpush1.bf16.msk.msra.mxu0 %vm11036_vm9, %v5289_v29  ;;  %vm11042_vm9 = vcmp.lt.s32.totalorder %v6837_v20, 110  ;;  %v6073_v29 = vunpack.i.h.bf16 %v6071_v17 }
 0x331   : > { %5294 = vmatprep.subr.msk.bf16.mxu0 %vm11037_vm11, %v7019_v42  ;;  %v780_v59 = vsel %vm11042_vm9, %v6058_v49, %v6057_v44  ;;  %vm11045_vm0 = vmmov %vm11042_vm9  ;;  %vm11047_vm9 = vnez %v10792_v56 }
 0x332   : > { %v779_v58 = vsel %vm11045_vm0, %v6057_v44, %v6058_v49  ;;  %v5310_v18 = vpack.c.bf16 %v780_v59, %v7067_v10  ;;  %v6072_v10 = vunpack.i.l.bf16 %v6071_v17 }
 0x333   : > { %v5313_v54 = vpack.c.bf16 %v779_v58, %v7100_v0  ;;  %v11061_v58 = vld [vmem:[#allocation36_spill] sm:$0xff] }
 0x334   : > { %5297 = vmatpush1.bf16.msk.msra.mxu0 %vm11040_vm10, %v7044_v46 }
 0x335   : > { %5300 = vmatprep.subr.msk.bf16.mxu0 %vm11041_vm1, %v5298_v2  ;;  %vm11046_vm1 = vcmp.lt.s32.totalorder %v6837_v20, 97 }
 0x336   : > { %v828_v3 = vsel %vm11046_vm1, %v6068_v45, %v6067_v19  ;;  %vm11049_vm0 = vmmov %vm11046_vm1  ;;  %vm11050_vm1 = vcmp.lt.s32.totalorder %v6837_v20, 95 }
 0x337   : > { %v827_v25 = vsel %vm11049_vm0, %v6067_v19, %v6068_v45  ;;  %v864_v4 = vsel %vm11050_vm1, %v6078_v15, %v6077_v43  ;;  %vm11055_vm0 = vmmov %vm11050_vm1 }
 0x338   : > { %5303 = vmatpush1.bf16.msk.msra.mxu0 %vm11043_vm12, %v5301_v32  ;;  %vm11048_vm12 = vcmp.lt.s32.totalorder %v6837_v20, 98  ;;  %v863_v49 = vsel %vm11055_vm0, %v6077_v43, %v6078_v15  ;;  %v11066_v15 = vld [vmem:[#allocation37_spill] sm:$0xff] }
 0x339   : > { %5306 = vmatprep.subr.msk.bf16.mxu0 %vm11044_vm2, %v7059_v52  ;;  %v803_v28 = vsel %vm11048_vm12, %v6063_v63, %v6062_v30  ;;  %vm11056_vm2 = vcmp.lt.s32.totalorder %v6837_v20, 94 }
 0x33a   : > { %v5316_v8 = vpack.c.bf16 %v828_v3, %v803_v28  ;;  %v887_v32 = vsel %vm11056_vm2, %v6083_v53, %v6082_v27  ;;  %v11065_v3 = vld [vmem:[#allocation42_spill] sm:$0xff] }
 0x33b   : > { %v5328_v19 = vpack.c.bf16 %v11001_v26, %v887_v32  ;;  %v11067_v43 = vpack.c.bf16 %v11065_v3, %v11066_v15  ;;  %v11070_v28 = vld [vmem:[#allocation46_spill] sm:$0xff]  ;;  %v11102_v15 = vld [vmem:[#allocation20_spill] sm:$0xff] }
 0x33c   : > { %5309 = vmatpush1.bf16.msk.msra.mxu0 %vm11047_vm9, %v7084_v57  ;;  %vm11054_vm9 = vcmp.lt.s32.totalorder %v6837_v20, 96  ;;  %v2471_v32 = vld [vmem:[%s10437_s2 + $0x120] sm:$0xff] }
 0x33d   : > { %5312 = vmatprep.subr.msk.bf16.mxu0 %vm7727_vm13, %v5310_v18  ;;  %vm11052_vm13 = vmmov %vm11048_vm12  ;;  %vm11053_vm12 = vnez %v10974_v31  ;;  %v851_v0 = vsel %vm11054_vm9, %v6073_v29, %v6072_v10 }
 0x33e   : > { %v802_v2 = vsel %vm11052_vm13, %v6062_v30, %v6063_v63  ;;  %v5322_v44 = vpack.c.bf16 %v864_v4, %v851_v0  ;;  %vm11057_vm1 = vmmov %vm11054_vm9  ;;  %v550_v63 = vld [vmem:[%s10437_s2 + $0x40] sm:$0xff]  ;;  %v11060_v30 = vld [vmem:[#allocation41_spill] sm:$0xff]  ;;  %vm11076_vm9 = vnez %v10792_v56 }
 0x33f   : > { %v5319_v6 = vpack.c.bf16 %v827_v25, %v802_v2  ;;  %v850_v17 = vsel %vm11057_vm1, %v6072_v10, %v6073_v29  ;;  %vm11058_vm13 = vmmov %vm11056_vm2  ;;  %v11062_v18 = vpack.c.bf16 %v11060_v30, %v11061_v58  ;;  %v11072_v29 = vld [vmem:[#allocation54_spill] sm:$0xff]  ;;  %vm11073_vm2 = vnez %v10784_v47  ;;  %v11074_v10 = vld [vmem:[#allocation57_spill] sm:$0xff] }
 0x340   : > { %5315 = vmatpush1.bf16.msk.msra.mxu0 %vm11051_vm6, %v5313_v54  ;;  %v5325_v59 = vpack.c.bf16 %v863_v49, %v850_v17  ;;  %v886_v45 = vsel %vm11058_vm13, %v6082_v27, %v6083_v53  ;;  %v11071_v54 = vld [vmem:[#allocation45_spill] sm:$0xff]  ;;  %v5658_v25 = vpack.c.bf16 %v11001_v26, %v11074_v10  ;;  %v11077_v53 = vld [vmem:[#allocation15_spill] sm:$0xff]  ;;  %v11079_v27 = vld [vmem:[#allocation56_spill] sm:$0xff]  ;;  %vm11082_vm13 = vcmask 654336  }
 0x341   : > { %5318 = vmatprep.subr.msk.bf16.mxu0 %vm11053_vm12, %v5316_v8  ;;  %v5331_v48 = vpack.c.bf16 %v11001_v26, %v886_v45  ;;  %v11075_v8 = vld [vmem:[#allocation53_spill] sm:$0xff]  ;;  %vm11078_vm0 = vnez %v11077_v53  ;;  %v5661_v4 = vpack.c.bf16 %v11001_v26, %v11079_v27  ;;  %v2470_v0 = vld [vmem:[%s10437_s2 + $0x100] sm:$0xff]  ;;  %v11098_v30 = vld [vmem:[#allocation3_spill] sm:$0xff] }
 0x342   : > { %v11080_v2 = vld [vmem:[#allocation17_spill] sm:$0xff]  ;;  %v2468_v17 = vld [vmem:[%s10437_s2 + $0xc0] sm:$0xff] }
 0x343   : > { %vm11081_vm1 = vnez %v11080_v2  ;;  %v11084_v49 = vld [vmem:[#allocation13_spill] sm:$0xff]  ;;  %v6679_v45 = vld [vmem:[%s10436_s1] sm:$0x3] }
 0x344   : > { %5321 = vmatpush1.bf16.msk.msra.mxu0 %vm7784_vm3, %v5319_v6  ;;  %v11083_v6 = vld [vmem:[#allocation12_spill] sm:$0xff]  ;;  %vm11103_vm3 = vcmp.ne.s32.totalorder %v11102_v15, 0  ;;  %v11115_v15 = vmov 0 }
 0x345   : > { %5324 = vmatprep.subr.msk.bf16.mxu0 %vm7812_vm8, %v5322_v44 }
 0x348   : > { %5327 = vmatpush1.bf16.msk.msra.mxu0 %vm7827_vm7, %v5325_v59  ;;  %vm11087_vm7 = vmmov %vm11082_vm13  ;;  %v1789_v59 = vld [vmem:[%s10437_s2 + $0xa8] sm:$0xff] }
 0x349   : > { %5330 = vmatprep.subr.msk.bf16.mxu0 %vm7835_vm14, %v5328_v19  ;;  %vm11064_vm14 = vnez %v11063_v21  ;;  %2243 = vmatprep.mubr.f32.mxu1 %v1789_v59  ;;  %v11095_v19 = vld [vmem:[#allocation19_spill] sm:$0xff]  ;;  %v11111_v59 = vld [vmem:[#allocation22_spill] sm:$0xff] }
 0x34c   : > { %5333 = vmatpush1.bf16.msk.msra.mxu0 %vm7863_vm15, %v5331_v48  ;;  %vm11069_vm15 = vnez %v11068_v41  ;;  %v11097_v48 = vmov 0  }
 0x34d   : > { %5636 = vmatprep.subr.msk.bf16.mxu0 %vm11026_vm4, %v7452_v12 }
 0x34f   : > { %1240 = vmatmul.mubr.f32.vlgmr.msra.gmra.mrb[2].mxu0 %v550_v63 }
 0x350   : > { %5639 = vmatpush1.bf16.msk.msra.mxu0 %vm11029_vm5, %v7449_v33  ;;  %2542 = vmatprep.mubr.f32.mxu0 %v11059_v34 }
 0x351   : > { %5642 = vmatprep.subr.msk.bf16.mxu0 %vm11064_vm14, %v11062_v18  ;;  %v11099_v18 = vld [vmem:[#allocation4_spill] sm:$0xff] }
 0x354   : > { %5645 = vmatpush1.bf16.msk.msra.mxu0 %vm11069_vm15, %v11067_v43 }
 0x355   : > { %5648 = vmatprep.subr.msk.bf16.mxu0 %vm11037_vm11, %v11070_v28 }
 0x358   : > { %5651 = vmatpush1.bf16.msk.msra.mxu0 %vm11040_vm10, %v11071_v54 }
 0x359   : > { %5654 = vmatprep.subr.msk.bf16.mxu0 %vm11073_vm2, %v11072_v29 }
 0x35c   : > { %5657 = vmatpush1.bf16.msk.msra.mxu0 %vm11076_vm9, %v11075_v8 }
 0x35d   : > { %5660 = vmatprep.subr.msk.bf16.mxu0 %vm11078_vm0, %v5658_v25 }
 0x360   : > { %5663 = vmatpush1.bf16.msk.msra.mxu0 %vm11081_vm1, %v5661_v4 }
 0x361   : > { %5666 = vmatprep.subr.msk.bf16.mxu0 %vm11026_vm4, %v6934_v60  ;;  %v11085_v60 = vld [vmem:[#allocation16_spill] sm:$0xff] }
 0x363   : > { %4961 = vmatmul.mubr.msk.f32.vlgmr.msra.gmra.mrb[4].mxu0 %vm11082_vm13, %v2470_v0 }
 0x364   : > { %5669 = vmatpush1.bf16.msk.msra.mxu0 %vm11029_vm5, %v6936_v61  ;;  %2548 = vmatprep.mubr.f32.mxu0 %v11059_v34  ;;  %v11086_v61 = vld [vmem:[#allocation18_spill] sm:$0xff] }
 0x365   : > { %5672 = vmatprep.subr.msk.bf16.mxu0 %vm11064_vm14, %v11083_v6  ;;  %v11105_v6 = vld [vmem:[#allocation5_spill] sm:$0xff]  ;;  %vm11168_vm14 = vcmp.ge.s32.totalorder %v6837_v20, 32 }
 0x367   : > { %4962 = vmatmul.mubr.msk.f32.gmra.mrb[6].mxu0 %vm11082_vm13, %v2471_v32  ;;  %vm10650_vm13 = vcmp.ge.s32.totalorder %v6837_v20, 48 }
 0x368   : > { %5675 = vmatpush1.bf16.msk.msra.mxu0 %vm11069_vm15, %v11084_v49  ;;  %2625 = vmatprep.mubr.f32.mxu0 %v11059_v34  ;;  %vm1296_vm12 = vmand %vm10650_vm13, %vm11103_vm3  ;;  %vm11106_vm3 = vcmp.ne.s32.totalorder %v11105_v6, 0 }
 0x369   : > { %5678 = vmatprep.subr.msk.bf16.mxu0 %vm11037_vm11, %v7019_v42  ;;  %v1298_v10 = vsel %vm1296_vm12, 1, %v11097_v48 }
 0x36a   : > { %v1303_v0 = vrot.slane %v1298_v10, %v11098_v30 }
 0x36c   : > { %5681 = vmatpush1.bf16.msk.msra.mxu0 %vm11040_vm10, %v7044_v46 }
 0x36d   : > { %5684 = vmatprep.subr.msk.bf16.mxu0 %vm11073_vm2, %v7059_v52  ;;  %vm11120_vm2 = vcmp.ge.s32.totalorder %v6837_v20, 32 }
 0x370   : > { %5687 = vmatpush1.bf16.msk.msra.mxu0 %vm11076_vm9, %v7084_v57 }
 0x371   : > { %5690 = vmatprep.subr.msk.bf16.mxu0 %vm11078_vm0, %v11085_v60 }
 0x374   : > { %5693 = vmatpush1.bf16.msk.msra.mxu0 %vm11081_vm1, %v11086_v61  ;;  %vm1401_vm1 = vcmp.lt.s32.totalorder %v6679_v45, 13 }
 0x375   : > { %v1402_v25 = vsel %vm1401_vm1, 1, %v11097_v48 }
 0x376   : > { %v8250_v49 = vrot.slane %v1402_v25, %v11099_v18  ;;  %v8253_v60 = vrot.slane %v1402_v25, %v11098_v30 }
 0x377   : > { %4979 = vmatmul.mubr.msk.f32.vlgmr.msra.gmra.mrb[4].mxu0 %vm11087_vm7, %v2468_v17  ;;  %vm1261_vm7 = vcmp.ge.s32.totalorder %v6679_v45, 3 }
 0x378   : > { %2631 = vmatprep.mubr.f32.mxu0 %v11059_v34  ;;  %v1262_v63 = vsel %vm1261_vm7, 1, %v11097_v48  ;;  %vm11167_vm15 = vcmp.ne.s32.totalorder %v8253_v60, 0 }
 0x379   : > { %v8209_v58 = vrot.slane %v1262_v63, %v11098_v30  ;;  %v8216_v3 = vrot.slane %v1262_v63, %v11099_v18  ;;  %vm1459_vm5 = vmand %vm11168_vm14, %vm11167_vm15  ;;  %vm11170_vm15 = vcmp.lt.s32.totalorder %v6837_v20, 33  ;;  %vm11175_vm14 = vcmp.ge.s32.totalorder %v6837_v20, 16 }
 0x37b   : > { %vm10647_vm8 = vcmp.ne.s32.totalorder %v8209_v58, 0  ;;  %vm10646_vm7 = vcmp.ne.s32.totalorder %v8216_v3, 0 }
 0x37c   : > { %vm1273_vm6 = vmand %vm10650_vm13, %vm10647_vm8  ;;  %v1276_v43 = vsel %vm10646_vm7, 1, %v11097_v48 }
 0x37d   : > { %v1275_v27 = vsel %vm1273_vm6, 1, %v11097_v48  ;;  %v1284_v4 = vrot.slane %v1276_v43, %v11098_v30  ;;  %vm1319_vm7 = vmand %vm10650_vm13, %vm11106_vm3  ;;  %vm11112_vm6 = vcmp.ne.s32.totalorder %v11111_v59, 0  ;;  %vm8285_vm3 = vcmp.eq.s32.totalorder %v1303_v0, 1 }
 0x37e   : > { %v1280_v61 = vrot.slane %v1275_v27, %v11098_v30  ;;  %v1321_v17 = vsel %vm1319_vm7, 1, %v11097_v48  ;;  %vm8277_vm9 = vmand %vm10650_vm13, %vm11112_vm6  ;;  %v11117_v43 = vmov 0  ;;  %vm10660_vm6 = vcmp.ne.s32.totalorder %v8253_v60, 0 }
 0x37f   : > { %v11118_v43 = vsel %vm8285_vm3, 4294967295, %v11117_v43  ;;  %v11123_v0 = vmov 0  ;;  %vm11128_vm7 = vcmp.lt.s32.totalorder %v6837_v20, 51 }
 0x380   : > { %vm8305_vm0 = vcmp.eq.s32.totalorder %v1280_v61, 1  ;;  %vm11129_vm8 = vmmov %vm11128_vm7 }
 0x381   : > { %v11124_v0 = vsel %vm8305_vm0, 4294967295, %v11123_v0 }
 0x382   : > { %11125 = vst [vmem:[#allocation41_spill] sm:$0xff] %v11124_v0 }
 0x422   : > { %v8079_v42 = vpop.f32.mrb[2].mxu0 }
 0x423   : > { %v10654_v46 = vmax.f32 %v8079_v42, 0.0  ;;  %v8082_v44 = vpop.f32.mrb[3].mxu0 }
 0x424   : > { %v10653_v52 = vmax.f32 %v8082_v44, 0.0 }
 0x426   : > { %v8089_v57 = vpack.i.bf16 %v10653_v52, %v10654_v46 }
 0x428   : > { %6090 = vrot.lane.b32.xlu1 %v8089_v57, %s10627_s7  ;;  %6085 = vrot.lane.b32.xlu0 %v8089_v57, %s10628_s8  ;;  %s10631_s7 = smov 35   ;;  %s6723_s8 = smov 45  }
 0x42c   : > { %6100 = vrot.lane.b32.xlu1 %v8089_v57, %s6718_s29  ;;  %6095 = vrot.lane.b32.xlu0 %v8089_v57, %s6719_s30 }
 0x430   : > { %6110 = vrot.lane.b32.xlu1 %v8089_v57, %s10630_s6  ;;  %6105 = vrot.lane.b32.xlu0 %v8089_v57, %s10629_s5  ;;  %s11089_s6 = smov 112   ;;  %s11092_s5 = smov 94  }
 0x434   : > { %6120 = vrot.lane.b32.xlu1 %v8089_v57, %s10631_s7  ;;  %6115 = vrot.lane.b32.xlu0 %v8089_v57, %s6723_s8  ;;  %s6724_s7 = smov 29  }
 0x438   : > { %6130 = vrot.lane.b32.xlu1 %v8089_v57, %s6700_s9  ;;  %6125 = vrot.lane.b32.xlu0 %v8089_v57, %s6701_s10  ;;  %s6730_s9 = smov 109   ;;  %s11090_s10 = smov 96  }
 0x43c   : > { %6140 = vrot.lane.b32.xlu1 %v8089_v57, %s6702_s11  ;;  %6135 = vrot.lane.b32.xlu0 %v8089_v57, %s6703_s12  ;;  %s6725_s11 = smov 19   ;;  %s6726_s12 = smov 3  }
 0x440   : > { %6150 = vrot.lane.b32.xlu1 %v8089_v57, %s6724_s7  ;;  %6145 = vrot.lane.b32.xlu0 %v8089_v57, %s6705_s14  ;;  %s6728_s14 = smov 115  }
 0x444   : > { %6160 = vrot.lane.b32.xlu1 %v8089_v57, %s6704_s13  ;;  %6155 = vrot.lane.b32.xlu0 %v8089_v57, %s6725_s11  ;;  %s6727_s13 = smov 13  }
 0x448   : > { %6170 = vrot.lane.b32.xlu1 %v8089_v57, %s10639_s26  ;;  %6165 = vrot.lane.b32.xlu0 %v8089_v57, %s10638_s24  ;;  %s11094_s26 = smov 50   ;;  %s11100_s24 = smov 46  }
 0x44c   : > { %6180 = vrot.lane.b32.xlu1 %v8089_v57, %s6706_s17  ;;  %6175 = vrot.lane.b32.xlu0 %v8089_v57, %s10636_s23  ;;  %s6729_s17 = smov 125   ;;  %s6739_s23 = smov 78  }
 0x450   : > { %6190 = vrot.lane.b32.xlu1 %v8089_v57, %s6726_s12  ;;  %6185 = vrot.lane.b32.xlu0 %v8089_v57, %s6727_s13 }
 0x454   : > { %6200 = vrot.lane.b32.xlu1 %v8089_v57, %s10637_s25  ;;  %6195 = vrot.lane.b32.xlu0 %v8089_v57, %s6707_s18  ;;  %s11091_s18 = smov 97   ;;  %s11101_s25 = smov 47  }
 0x458   : > { %6210 = vrot.lane.b32.xlu1 %v8089_v57, %s6708_s19  ;;  %6205 = vrot.lane.b32.xlu0 %v8089_v57, %s10634_s28  ;;  %s11088_s19 = smov 111   ;;  %s11093_s28 = smov 95  }
 0x45c   : > { %6220 = vrot.lane.b32.xlu1 %v8089_v57, %s6728_s14  ;;  %6215 = vrot.lane.b32.xlu0 %v8089_v57, %s6729_s17 }
 0x460   : > { %6230 = vrot.lane.b32.xlu1 %v8089_v57, %s10635_s27  ;;  %6225 = vrot.lane.b32.xlu0 %v8089_v57, %s6709_s20  ;;  %s6731_s20 = smov 99   ;;  %s6734_s27 = smov 81  }
 0x464   : > { %6240 = vrot.lane.b32.xlu1 %v8089_v57, %s11088_s19  ;;  %6235 = vrot.lane.b32.xlu0 %v8089_v57, %s11089_s6 }
 0x468   : > { %6250 = vrot.lane.b32.xlu1 %v8089_v57, %s6730_s9  ;;  %6245 = vrot.lane.b32.xlu0 %v8089_v57, %s6711_s22  ;;  %s6732_s22 = smov 83  }
 0x46c   : > { %6260 = vrot.lane.b32.xlu1 %v8089_v57, %s6710_s21  ;;  %6255 = vrot.lane.b32.xlu0 %v8089_v57, %s6731_s20  ;;  %s6733_s21 = smov 93  }
 0x470   : > { %6270 = vrot.lane.b32.xlu1 %v8089_v57, %s11090_s10  ;;  %6265 = vrot.lane.b32.xlu0 %v8089_v57, %s11091_s18  ;;  %s6735_s10 = smov 82   ;;  %s10640_s18 = smov 79  }
 0x474   : > { %6280 = vrot.lane.b32.xlu1 %v8089_v57, %s11092_s5  ;;  %6275 = vrot.lane.b32.xlu0 %v8089_v57, %s11093_s28  ;;  %s6737_s28 = smov 80   ;;  %s6738_s5 = smov 77  }
 0x478   : > { %6290 = vrot.lane.b32.xlu1 %v8089_v57, %s6732_s22  ;;  %6285 = vrot.lane.b32.xlu0 %v8089_v57, %s6733_s21 }
 0x47c   : > { %6300 = vrot.lane.b32.xlu1 %v8089_v57, %s6734_s27  ;;  %6295 = vrot.lane.b32.xlu0 %v8089_v57, %s6735_s10 }
 0x480   : > { %6310 = vrot.lane.b32.xlu1 %v8089_v57, %s10640_s18  ;;  %6305 = vrot.lane.b32.xlu0 %v8089_v57, %s6737_s28  ;;  %s11096_s18 = smov 51  }
 0x484   : > { %6325 = vrot.lane.b32.xlu1 %v8089_v57, %s6738_s5  ;;  %6315 = vrot.lane.b32.xlu0 %v8089_v57, %s6739_s23  ;;  %v11107_v57 = vld [vmem:[#allocation7_spill] sm:$0xff] }
 0x485   : > { %vm11108_vm12 = vcmp.ne.s32.totalorder %v11107_v57, 0  ;;  %v1326_v57 = vrot.slane %v1321_v17, %v11098_v30 }
 0x486   : > { %vm8265_vm1 = vmand %vm10650_vm13, %vm11108_vm12  ;;  %vm8281_vm12 = vcmp.eq.s32.totalorder %v1284_v4, 1  ;;  %vm11119_vm13 = vcmp.ne.s32.totalorder %v8209_v58, 0 }
 0x487   : > { %v11116_v15 = vsel %vm8281_vm12, 4294967295, %v11115_v15  ;;  %vm8297_vm10 = vmand %vm11120_vm2, %vm11119_vm13  ;;  %vm11126_vm2 = vcmp.lt.s32.totalorder %v6837_v20, 50 }
 0x488   : > { %6330 = vrot.lane.b32.xlu1 %v11095_v19, %s11094_s26  ;;  %6320 = vrot.lane.b32.xlu0 %v11095_v19, %s11096_s18  ;;  %s11104_s26 = smov 35   ;;  %vm11127_vm13 = vmmov %vm11126_vm2 }
 0x48c   : > { %6340 = vrot.lane.b32.xlu1 %v11095_v19, %s6718_s29  ;;  %6335 = vrot.lane.b32.xlu0 %v11095_v19, %s6719_s30  ;;  %s11571_s29 = smov 127  }
 0x490   : > { %6350 = vrot.lane.b32.xlu1 %v11095_v19, %s11100_s24  ;;  %6345 = vrot.lane.b32.xlu0 %v11095_v19, %s11101_s25  ;;  %s11565_s24 = smov 16   ;;  %s11566_s25 = smov 17  }
 0x494   : > { %6360 = vrot.lane.b32.xlu1 %v11095_v19, %s11104_s26  ;;  %6355 = vrot.lane.b32.xlu0 %v11095_v19, %s6723_s8  ;;  %s11567_s26 = smov 1   ;;  %s11570_s8 = smov 113  }
 0x498   : > { %6370 = vrot.lane.b32.xlu1 %v11095_v19, %s6725_s11  ;;  %6365 = vrot.lane.b32.xlu0 %v11095_v19, %s6724_s7 }
 0x49a   : > { %v6091_v63 = vpop.permute.xlu1 %6090  ;;  %v6086_v18 = vpop.permute.xlu0 %6085 }
 0x49b   : > { %v6093_v10 = vunpack.i.h.bf16 %v6091_v63  ;;  %v6092_v25 = vunpack.i.l.bf16 %v6091_v63  ;;  %v6088_v27 = vunpack.i.h.bf16 %v6086_v18  ;;  %v6087_v6 = vunpack.i.l.bf16 %v6086_v18 }
 0x49c   : > { %6380 = vrot.lane.b32.xlu1 %v11095_v19, %s6726_s12  ;;  %6375 = vrot.lane.b32.xlu0 %v11095_v19, %s6727_s13  ;;  %v1357_v63 = vsel %vm8265_vm1, 1, %v11097_v48  ;;  %v1380_v18 = vsel %vm8277_vm9, 1, %v11097_v48  ;;  %vm11130_vm1 = vcmp.ge.s32.totalorder %v6837_v20, 48  ;;  %vm11133_vm9 = vnez %v10814_v35  ;;  %s5058_s12 = sshll.u32 %s11629_s16, 5 }
 0x49d   : > { %v1804_v52 = vsel %vm11126_vm2, %v6092_v25, %v6093_v10  ;;  %v1805_v46 = vsel %vm11127_vm13, %v6093_v10, %v6092_v25  ;;  %v1796_v61 = vsel %vm11128_vm7, %v6087_v6, %v6088_v27  ;;  %v1797_v17 = vsel %vm11129_vm8, %v6088_v27, %v6087_v6  ;;  %vm8328_vm11 = vmand %vm11130_vm1, %vm10660_vm6 }
 0x49e   : > { %v5334_v45 = vpack.c.bf16 %v1804_v52, %v1796_v61  ;;  %v5337_v34 = vpack.c.bf16 %v1805_v46, %v1797_v17  ;;  %v6101_v8 = vpop.permute.xlu1 %6100  ;;  %v6096_v29 = vpop.permute.xlu0 %6095  ;;  %vm8336_vm7 = vmpackc.low %vm11133_vm9, %vm8281_vm12  ;;  %vm11136_vm8 = vcmp.ne.s32.totalorder %v8250_v49, 0  ;;  %v1438_v27 = vsel %vm8297_vm10, 1, %v11097_v48 }
 0x49f   : > { %v1416_v25 = vsel %vm11136_vm8, 1, %v11097_v48  ;;  %v6103_v52 = vunpack.i.h.bf16 %v6101_v8  ;;  %v6102_v46 = vunpack.i.l.bf16 %v6101_v8  ;;  %v6098_v6 = vunpack.i.h.bf16 %v6096_v29  ;;  %vm10659_vm2 = vmpackc.low %vm8285_vm3, %vm8305_vm0 }
 0x4a0   : > { %v6097_v61 = vunpack.i.l.bf16 %v6096_v29  ;;  %6390 = vrot.lane.b32.xlu1 %v11095_v19, %s6728_s14  ;;  %6385 = vrot.lane.b32.xlu0 %v11095_v19, %s6729_s17  ;;  %vm8354_vm13 = vcmp.eq.s32.totalorder %v1326_v57, 1  ;;  %v1362_v4 = vrot.slane %v1357_v63, %v11098_v30  ;;  %v1385_v8 = vrot.slane %v1380_v18, %v11098_v30  ;;  %s210_s17 = scalar_lea.vmem %s10439_s4, %s5058_s12 }
 0x4a1   : > { %v1415_v29 = vsel %vm8328_vm11, 1, %v11097_v48  ;;  %vm11139_vm10 = vcmp.lt.s32.totalorder %v6837_v20, 48  ;;  %vm11141_vm9 = vcmp.lt.s32.totalorder %v6837_v20, 49  ;;  %5336 = vmatprep.subr.msk.bf16.mxu1 %vm8336_vm7, %v5334_v45  ;;  %v1443_v45 = vrot.slane %v1438_v27, %v11098_v30 }
 0x4a2   : > { %v1820_v17 = vsel %vm11139_vm10, %v6102_v46, %v6103_v52  ;;  %vm11140_vm1 = vmmov %vm11139_vm10  ;;  %v1812_v57 = vsel %vm11141_vm9, %v6097_v61, %v6098_v6  ;;  %5339 = vmatpush1.bf16.msk.msra.mxu1 %vm10659_vm2, %v5337_v34  ;;  %v6111_v32 = vpop.permute.xlu1 %6110  ;;  %v6106_v33 = vpop.permute.xlu0 %6105  ;;  %vm11143_vm10 = vcmp.ge.s32.totalorder %v6837_v20, 48  ;;  %v11146_v34 = vmov 0 }
 0x4a3   : > { %v1821_v54 = vsel %vm11140_vm1, %v6103_v52, %v6102_v46  ;;  %vm11142_vm8 = vmmov %vm11141_vm9  ;;  %v5340_v63 = vpack.c.bf16 %v1820_v17, %v1812_v57  ;;  %v1424_v52 = vrot.slane %v1416_v25, %v11098_v30  ;;  %v6113_v46 = vunpack.i.h.bf16 %v6111_v32 }
 0x4a4   : > { %v1813_v28 = vsel %vm11142_vm8, %v6098_v6, %v6097_v61  ;;  %v6112_v12 = vunpack.i.l.bf16 %v6111_v32  ;;  %v6108_v6 = vunpack.i.h.bf16 %v6106_v33  ;;  %v6107_v61 = vunpack.i.l.bf16 %v6106_v33  ;;  %vm8384_vm1 = vmpackc.low %vm11143_vm10, %vm8354_vm13  ;;  %6400 = vrot.lane.b32.xlu1 %v11095_v19, %s6731_s20  ;;  %6395 = vrot.lane.b32.xlu0 %v11095_v19, %s6730_s9 }
 0x4a5   : > { %v5343_v18 = vpack.c.bf16 %v1821_v54, %v1813_v28  ;;  %v11144_v28 = vmov 0  ;;  %vm8392_vm9 = vcmp.eq.s32.totalorder %v1362_v4, 1  ;;  %vm8396_vm8 = vcmp.eq.s32.totalorder %v1385_v8, 1  ;;  %5342 = vmatprep.subr.msk.bf16.mxu1 %vm11026_vm4, %v5340_v63 }
 0x4a6   : > { %v11145_v28 = vsel %vm8384_vm1, 4294967295, %v11144_v28  ;;  %v11147_v34 = vsel %vm8392_vm9, 4294967295, %v11146_v34  ;;  %v11148_v33 = vmov 0  ;;  %v1420_v54 = vrot.slane %v1415_v29, %v11098_v30  ;;  %v6121_v27 = vpop.permute.xlu1 %6120  ;;  %v6116_v29 = vpop.permute.xlu0 %6115 }
 0x4a7   : > { %v11149_v33 = vsel %vm8396_vm8, 4294967295, %v11148_v33  ;;  %vm11150_vm13 = vcmp.lt.s32.totalorder %v6837_v20, 46  ;;  %vm11152_vm2 = vcmp.lt.s32.totalorder %v6837_v20, 47  ;;  %5345 = vmatpush1.bf16.msk.msra.mxu1 %vm8384_vm1, %v5343_v18  ;;  %vm8415_vm11 = vcmp.eq.s32.totalorder %v1424_v52, 1 }
 0x4a8   : > { %v1836_v25 = vsel %vm11150_vm13, %v6112_v12, %v6113_v46  ;;  %vm11151_vm10 = vmmov %vm11150_vm13  ;;  %v1828_v4 = vsel %vm11152_vm2, %v6107_v61, %v6108_v6  ;;  %v6123_v32 = vunpack.i.h.bf16 %v6121_v27  ;;  %v6118_v0 = vunpack.i.h.bf16 %v6116_v29  ;;  %6410 = vrot.lane.b32.xlu1 %v11095_v19, %s6732_s22  ;;  %6405 = vrot.lane.b32.xlu0 %v11095_v19, %s6733_s21 }
 0x4a9   : > { %v1837_v35 = vsel %vm11151_vm10, %v6113_v46, %v6112_v12  ;;  %vm11153_vm6 = vmmov %vm11152_vm2  ;;  %v5346_v8 = vpack.c.bf16 %v1836_v25, %v1828_v4  ;;  %v11154_v12 = vmov 0  ;;  %v6122_v46 = vunpack.i.l.bf16 %v6121_v27 }
 0x4aa   : > { %v1829_v17 = vsel %vm11153_vm6, %v6108_v6, %v6107_v61  ;;  %v11155_v12 = vsel %vm8415_vm11, 4294967295, %v11154_v12  ;;  %v6117_v6 = vunpack.i.l.bf16 %v6116_v29  ;;  %vm8427_vm2 = vcmp.eq.s32.totalorder %v1420_v54, 1  ;;  %v6131_v4 = vpop.permute.xlu1 %6130 }
 0x4ab   : > { %v5349_v57 = vpack.c.bf16 %v1837_v35, %v1829_v17  ;;  %v11156_v63 = vmov 0  ;;  %vm8431_vm10 = vcmp.eq.s32.totalorder %v1443_v45, 1  ;;  %v11159_v18 = vmov 0  ;;  %v6126_v17 = vpop.permute.xlu0 %6125 }
 0x4ac   : > { %v11157_v63 = vsel %vm8427_vm2, 4294967295, %v11156_v63  ;;  %v11160_v18 = vsel %vm8431_vm10, 4294967295, %v11159_v18  ;;  %vm11162_vm13 = vcmp.lt.s32.totalorder %v6837_v20, 35  ;;  %vm11164_vm6 = vcmp.lt.s32.totalorder %v6837_v20, 45  ;;  %6420 = vrot.lane.b32.xlu1 %v11095_v19, %s6734_s27  ;;  %6415 = vrot.lane.b32.xlu0 %v11095_v19, %s6735_s10  ;;  %s11177_s27 = smov 79  }
 0x4ad   : > { %11158 = vst [vmem:[#allocation36_spill] sm:$0xff] %v11157_v63  ;;  %11161 = vst [vmem:[#allocation42_spill] sm:$0xff] %v11160_v18  ;;  %v1852_v52 = vsel %vm11162_vm13, %v6122_v46, %v6123_v32  ;;  %v1844_v25 = vsel %vm11164_vm6, %v6117_v6, %v6118_v0  ;;  %vm11166_vm3 = vnez %v10871_v5  ;;  %v6128_v27 = vunpack.i.h.bf16 %v6126_v17 }
 0x4ae   : > { %vm11163_vm1 = vmmov %vm11162_vm13  ;;  %5348 = vmatprep.subr.msk.bf16.mxu1 %vm11166_vm3, %v5346_v8  ;;  %v5352_v54 = vpack.c.bf16 %v1852_v52, %v1844_v25  ;;  %v6132_v8 = vunpack.i.l.bf16 %v6131_v4  ;;  %v6127_v29 = vunpack.i.l.bf16 %v6126_v17 }
 0x4af   : > { %v1853_v61 = vsel %vm11163_vm1, %v6123_v32, %v6122_v46  ;;  %vm11165_vm0 = vmmov %vm11164_vm6  ;;  %vm11172_vm6 = vcmp.lt.s32.totalorder %v6837_v20, 34 }
 0x4b0   : > { %v1845_v35 = vsel %vm11165_vm0, %v6118_v0, %v6117_v6  ;;  %vm11169_vm1 = vmpackc.low %vm8396_vm8, %vm8392_vm9  ;;  %v6133_v0 = vunpack.i.h.bf16 %v6131_v4  ;;  %v1860_v6 = vsel %vm11172_vm6, %v6127_v29, %v6128_v27  ;;  %v6136_v4 = vpop.permute.xlu0 %6135  ;;  %6430 = vrot.lane.b32.xlu1 %v11095_v19, %s11177_s27  ;;  %6425 = vrot.lane.b32.xlu0 %v11095_v19, %s6737_s28  ;;  %vm11314_vm8 = vcmp.lt.s32.totalorder %v6837_v20, 98  ;;  %s11568_s27 = smov 15   ;;  %s5057_s28 = sshll.u32 %s11629_s16, 8 }
 0x4b1   : > { %v5355_v45 = vpack.c.bf16 %v1853_v61, %v1845_v35  ;;  %5351 = vmatpush1.bf16.msk.msra.mxu1 %vm11169_vm1, %v5349_v57  ;;  %vm10668_vm0 = vmpackc.low %vm8281_vm12, %vm8415_vm11  ;;  %v1461_v57 = vsel %vm1459_vm5, 1, %v11097_v48  ;;  %vm11174_vm5 = vcmp.ne.s32.totalorder %v8209_v58, 0  ;;  %v6141_v35 = vpop.permute.xlu1 %6140  ;;  %vm11199_vm12 = vcmp.ne.s32.totalorder %v8253_v60, 0 }
 0x4b2   : > { %v1868_v32 = vsel %vm11170_vm15, %v6132_v8, %v6133_v0  ;;  %vm11171_vm13 = vmmov %vm11170_vm15  ;;  %5354 = vmatprep.subr.msk.bf16.mxu1 %vm10668_vm0, %v5352_v54  ;;  %v6143_v17 = vunpack.i.h.bf16 %v6141_v35  ;;  %v1466_v54 = vrot.slane %v1461_v57, %v11098_v30  ;;  %vm11183_vm0 = vnez %v10832_v1 }
 0x4b3   : > { %v1869_v46 = vsel %vm11171_vm13, %v6133_v0, %v6132_v8  ;;  %vm11173_vm1 = vmmov %vm11172_vm6  ;;  %v5358_v61 = vpack.c.bf16 %v1868_v32, %v1860_v6  ;;  %v6142_v0 = vunpack.i.l.bf16 %v6141_v35  ;;  %v6138_v8 = vunpack.i.h.bf16 %v6136_v4 }
 0x4b4   : > { %v1861_v52 = vsel %vm11173_vm1, %v6128_v27, %v6127_v29  ;;  %vm1482_vm15 = vmand %vm11175_vm14, %vm11174_vm5  ;;  %v6137_v27 = vunpack.i.l.bf16 %v6136_v4  ;;  %vm11178_vm14 = vcmp.lt.s32.totalorder %v6837_v20, 31  ;;  %vm11180_vm1 = vcmp.lt.s32.totalorder %v6837_v20, 32  ;;  %v6146_v4 = vpop.permute.xlu0 %6145  ;;  %6440 = vrot.lane.b32.xlu1 %v11095_v19, %s6738_s5  ;;  %6435 = vrot.lane.b32.xlu0 %v11095_v19, %s6739_s23 }
 0x4b5   : > { %v5361_v25 = vpack.c.bf16 %v1869_v46, %v1861_v52  ;;  %vm11176_vm13 = vmpackc.low %vm8431_vm10, %vm8427_vm2  ;;  %v1484_v29 = vsel %vm1482_vm15, 1, %v11097_v48  ;;  %v1884_v32 = vsel %vm11178_vm14, %v6142_v0, %v6143_v17  ;;  %vm10672_vm15 = vcmp.lt.s32.totalorder %v6837_v20, 29  ;;  %v6151_v57 = vpop.permute.xlu1 %6150 }
 0x4b6   : > { %5357 = vmatpush1.bf16.msk.msra.mxu1 %vm11176_vm13, %v5355_v45  ;;  %vm11179_vm6 = vmmov %vm11178_vm14  ;;  %v1876_v46 = vsel %vm11180_vm1, %v6137_v27, %v6138_v8  ;;  %vm11182_vm13 = vnez %v10820_v50  ;;  %v6153_v63 = vunpack.i.h.bf16 %v6151_v57  ;;  %v6147_v18 = vunpack.i.l.bf16 %v6146_v4 }
 0x4b7   : > { %v1885_v45 = vsel %vm11179_vm6, %v6143_v17, %v6142_v0  ;;  %vm11181_vm5 = vmmov %vm11180_vm1  ;;  %5360 = vmatprep.subr.msk.bf16.mxu1 %vm11182_vm13, %v5358_v61  ;;  %v5364_v52 = vpack.c.bf16 %v1884_v32, %v1876_v46  ;;  %v6152_v17 = vunpack.i.l.bf16 %v6151_v57  ;;  %v6148_v0 = vunpack.i.h.bf16 %v6146_v4 }
 0x4b8   : > { %v1877_v6 = vsel %vm11181_vm5, %v6138_v8, %v6137_v27  ;;  %vm8512_vm14 = vcmp.eq.s32.totalorder %v1466_v54, 1  ;;  %v11184_v61 = vmov 0  ;;  %vm11186_vm6 = vcmp.lt.s32.totalorder %v6837_v20, 30 }
 0x4b9   : > { %v5367_v35 = vpack.c.bf16 %v1885_v45, %v1877_v6  ;;  %v11185_v61 = vsel %vm8512_vm14, 4294967295, %v11184_v61  ;;  %v1900_v8 = vsel %vm10672_vm15, %v6152_v17, %v6153_v63  ;;  %v1901_v27 = vsel %vm10672_vm15, %v6153_v63, %v6152_v17  ;;  %vm11187_vm1 = vmmov %vm11186_vm6  ;;  %v6161_v54 = vpop.permute.xlu1 %6160  ;;  %v6156_v63 = vpop.permute.xlu0 %6155 }
 0x4ba   : > { %5363 = vmatpush1.bf16.msk.msra.mxu1 %vm11183_vm0, %v5361_v25  ;;  %v1489_v25 = vrot.slane %v1484_v29, %v11098_v30  ;;  %v1892_v32 = vsel %vm11186_vm6, %v6147_v18, %v6148_v0  ;;  %v1893_v45 = vsel %vm11187_vm1, %v6148_v0, %v6147_v18  ;;  %vm11188_vm5 = vnez %v10842_v39 }
 0x4bb   : > { %5366 = vmatprep.subr.msk.bf16.mxu1 %vm11188_vm5, %v5364_v52  ;;  %vm11189_vm0 = vnez %v10849_v36  ;;  %v5373_v19 = vpack.c.bf16 %v1901_v27, %v1893_v45  ;;  %vm11190_vm2 = vnez %v10847_v16  ;;  %v5370_v29 = vpack.c.bf16 %v1900_v8, %v1892_v32 }
 0x4bc   : > { %vm10675_vm13 = vmpackc.low %vm8415_vm11, %vm11189_vm0  ;;  %v6163_v46 = vunpack.i.h.bf16 %v6161_v54  ;;  %v6162_v6 = vunpack.i.l.bf16 %v6161_v54  ;;  %v6158_v18 = vunpack.i.h.bf16 %v6156_v63  ;;  %v6157_v57 = vunpack.i.l.bf16 %v6156_v63 }
 0x4bd   : > { %vm11191_vm6 = vnez %v10851_v37  ;;  %v11192_v52 = vmov 0  ;;  %vm11195_vm15 = vcmp.lt.s32.totalorder %v6837_v20, 18  ;;  %vm11197_vm10 = vcmp.lt.s32.totalorder %v6837_v20, 19  ;;  %v6171_v8 = vpop.permute.xlu1 %6170  ;;  %v6166_v27 = vpop.permute.xlu0 %6165 }
 0x4be   : > { %5369 = vmatpush1.bf16.msk.msra.mxu1 %vm11190_vm2, %v5367_v35  ;;  %vm8543_vm2 = vcmp.eq.s32.totalorder %v1489_v25, 1  ;;  %v1916_v35 = vsel %vm11195_vm15, %v6162_v6, %v6163_v46  ;;  %vm11196_vm5 = vmmov %vm11195_vm15  ;;  %v1908_v17 = vsel %vm11197_vm10, %v6157_v57, %v6158_v18  ;;  %v6173_v45 = vunpack.i.h.bf16 %v6171_v8 }
 0x4bf   : > { %5372 = vmatprep.subr.msk.bf16.mxu1 %vm10675_vm13, %v5370_v29  ;;  %v11193_v52 = vsel %vm8543_vm2, 4294967295, %v11192_v52  ;;  %v1917_v4 = vsel %vm11196_vm5, %v6163_v46, %v6162_v6  ;;  %vm11198_vm1 = vmmov %vm11197_vm10  ;;  %vm11200_vm13 = vcmp.ge.s32.totalorder %v6837_v20, 16  ;;  %v5376_v32 = vpack.c.bf16 %v1916_v35, %v1908_v17 }
 0x4c0   : > { %11194 = vst [vmem:[#allocation37_spill] sm:$0xff] %v11193_v52  ;;  %v1909_v0 = vsel %vm11198_vm1, %v6158_v18, %v6157_v57  ;;  %vm1505_vm0 = vmand %vm11200_vm13, %vm11199_vm12  ;;  %v6172_v54 = vunpack.i.l.bf16 %v6171_v8  ;;  %v6168_v63 = vunpack.i.h.bf16 %v6166_v27  ;;  %v6167_v29 = vunpack.i.l.bf16 %v6166_v27 }
 0x4c1   : > { %v5379_v25 = vpack.c.bf16 %v1917_v4, %v1909_v0  ;;  %vm11201_vm15 = vmpackc.low %vm8512_vm14, %vm11191_vm6  ;;  %vm11202_vm10 = vnez %v10834_v23  ;;  %v1507_v46 = vsel %vm1505_vm0, 1, %v11097_v48  ;;  %vm11203_vm12 = vcmp.lt.s32.totalorder %v6837_v20, 16  ;;  %v6181_v4 = vpop.permute.xlu1 %6180  ;;  %v6176_v17 = vpop.permute.xlu0 %6175 }
 0x4c2   : > { %5375 = vmatpush1.bf16.msk.msra.mxu1 %vm11201_vm15, %v5373_v19  ;;  %vm10677_vm5 = vmpackc.low %vm11202_vm10, %vm8543_vm2  ;;  %v1932_v19 = vsel %vm11203_vm12, %v6172_v54, %v6173_v45  ;;  %vm11205_vm1 = vcmp.lt.s32.totalorder %v6837_v20, 17  ;;  %v6183_v8 = vunpack.i.h.bf16 %v6181_v4  ;;  %v6182_v27 = vunpack.i.l.bf16 %v6181_v4 }
 0x4c3   : > { %5378 = vmatprep.subr.msk.bf16.mxu1 %vm8336_vm7, %v5376_v32  ;;  %vm11204_vm13 = vmmov %vm11203_vm12  ;;  %v1924_v18 = vsel %vm11205_vm1, %v6167_v29, %v6168_v63  ;;  %v6178_v32 = vunpack.i.h.bf16 %v6176_v17  ;;  %vm11207_vm12 = vcmp.lt.s32.totalorder %v6837_v20, 14  ;;  %vm11230_vm14 = vcmp.lt.s32.totalorder %v6837_v20, 2 }
 0x4c4   : > { %v1933_v6 = vsel %vm11204_vm13, %v6173_v45, %v6172_v54  ;;  %vm11206_vm15 = vmmov %vm11205_vm1  ;;  %v5382_v0 = vpack.c.bf16 %v1932_v19, %v1924_v18  ;;  %v6177_v45 = vunpack.i.l.bf16 %v6176_v17  ;;  %v1512_v54 = vrot.slane %v1507_v46, %v11098_v30 }
 0x4c5   : > { %v1925_v57 = vsel %vm11206_vm15, %v6168_v63, %v6167_v29  ;;  %vm11208_vm13 = vmmov %vm11207_vm12  ;;  %vm11209_vm1 = vcmp.lt.s32.totalorder %v6837_v20, 15  ;;  %v6191_v46 = vpop.permute.xlu1 %6190  ;;  %v6186_v18 = vpop.permute.xlu0 %6185 }
 0x4c6   : > { %v5385_v35 = vpack.c.bf16 %v1933_v6, %v1925_v57  ;;  %5381 = vmatpush1.bf16.msk.msra.mxu1 %vm10677_vm5, %v5379_v25  ;;  %5696 = vmatprep.subr.msk.bf16.mxu0 %vm11026_vm4, %v5382_v0  ;;  %v1948_v25 = vsel %vm11207_vm12, %v6182_v27, %v6183_v8  ;;  %v1949_v63 = vsel %vm11208_vm13, %v6183_v8, %v6182_v27  ;;  %vm11210_vm15 = vmmov %vm11209_vm1  ;;  %vm1529_vm12 = vcmp.eq.s32.totalorder %v8216_v3, 1 }
 0x4c7   : > { %5384 = vmatprep.subr.msk.bf16.mxu1 %vm11026_vm4, %v5382_v0  ;;  %v1940_v29 = vsel %vm11209_vm1, %v6177_v45, %v6178_v32  ;;  %v1941_v19 = vsel %vm11210_vm15, %v6178_v32, %v6177_v45  ;;  %vm11211_vm5 = vnez %v10765_v62  ;;  %v6193_v4 = vunpack.i.h.bf16 %v6191_v46  ;;  %vm8621_vm10 = vmpackc.low %vm1529_vm12, %vm8415_vm11 }
 0x4c8   : > { %5699 = vmatpush1.bf16.msk.msra.mxu0 %vm11211_vm5, %v5385_v35  ;;  %v5391_v6 = vpack.c.bf16 %v1949_v63, %v1941_v19  ;;  %v5388_v57 = vpack.c.bf16 %v1948_v25, %v1940_v29  ;;  %v6192_v17 = vunpack.i.l.bf16 %v6191_v46  ;;  %v6188_v0 = vunpack.i.h.bf16 %v6186_v18 }
 0x4c9   : > { %v6187_v8 = vunpack.i.l.bf16 %v6186_v18  ;;  %vm8606_vm13 = vcmp.eq.s32.totalorder %v1512_v54, 1  ;;  %vm11214_vm15 = vcmp.lt.s32.totalorder %v6837_v20, 3  ;;  %v11218_v54 = vmov 0  ;;  %v6201_v46 = vpop.permute.xlu1 %6200  ;;  %v6196_v18 = vpop.permute.xlu0 %6195 }
 0x4ca   : > { %5387 = vmatpush1.bf16.msk.msra.mxu1 %vm11211_vm5, %v5385_v35  ;;  %v1964_v35 = vsel %vm11214_vm15, %v6192_v17, %v6193_v4  ;;  %vm11215_vm0 = vmmov %vm11214_vm15  ;;  %vm11216_vm5 = vcmp.lt.s32.totalorder %v6837_v20, 13  ;;  %v11219_v54 = vsel %vm8621_vm10, 4294967295, %v11218_v54  ;;  %vm11221_vm1 = vnez %v10879_v22 }
 0x4cb   : > { %5390 = vmatprep.subr.msk.bf16.mxu1 %vm11166_vm3, %v5388_v57  ;;  %v1965_v32 = vsel %vm11215_vm0, %v6193_v4, %v6192_v17  ;;  %v1956_v45 = vsel %vm11216_vm5, %v6187_v8, %v6188_v0  ;;  %vm11217_vm2 = vmmov %vm11216_vm5  ;;  %11220 = vst [vmem:[#allocation57_spill] sm:$0xff] %v11219_v54  ;;  %v6203_v4 = vunpack.i.h.bf16 %v6201_v46  ;;  %v6202_v17 = vunpack.i.l.bf16 %v6201_v46 }
 0x4cc   : > { %v1957_v25 = vsel %vm11217_vm2, %v6188_v0, %v6187_v8  ;;  %v5394_v57 = vpack.c.bf16 %v1964_v35, %v1956_v45  ;;  %v6198_v62 = vunpack.i.h.bf16 %v6196_v18  ;;  %v6197_v52 = vunpack.i.l.bf16 %v6196_v18  ;;  %vm11315_vm3 = vmmov %vm11314_vm8 }
 0x4cd   : > { %v5397_v63 = vpack.c.bf16 %v1965_v32, %v1957_v25  ;;  %vm11222_vm2 = vcmp.eq.s32.totalorder %v8209_v58, 1  ;;  %v11223_v0 = vmov 0  ;;  %vm11225_vm0 = vcmp.ne.s32.totalorder %v8216_v3, 0  ;;  %v6211_v46 = vpop.permute.xlu1 %6210  ;;  %v6206_v18 = vpop.permute.xlu0 %6205 }
 0x4ce   : > { %5393 = vmatpush1.bf16.msk.msra.mxu1 %vm11221_vm1, %v5391_v6  ;;  %vm8631_vm5 = vmpackc.low %vm11222_vm2, %vm8606_vm13  ;;  %v11226_v6 = vld [vmem:[#allocation9_spill] sm:$0xff]  ;;  %vm11228_vm1 = vcmp.lt.s32.totalorder %v6837_v20, 1  ;;  %v1972_v35 = vsel %vm11230_vm14, %v6197_v52, %v6198_v62  ;;  %v6208_v22 = vunpack.i.h.bf16 %v6206_v18  ;;  %v6207_v23 = vunpack.i.l.bf16 %v6206_v18 }
 0x4cf   : > { %v11224_v0 = vsel %vm8631_vm5, 4294967295, %v11223_v0  ;;  %5396 = vmatprep.subr.msk.bf16.mxu1 %vm8621_vm10, %v5394_v57  ;;  %vm11227_vm12 = vcmp.lt.s32.totalorder %v11226_v6, 240  ;;  %v1980_v8 = vsel %vm11228_vm1, %v6202_v17, %v6203_v4  ;;  %vm11229_vm6 = vmmov %vm11228_vm1  ;;  %vm11234_vm2 = vcmp.lt.s32.totalorder %v6837_v20, 127 }
 0x4d0   : > { %vm1551_vm15 = vmand %vm11227_vm12, %vm11225_vm0  ;;  %v1981_v27 = vsel %vm11229_vm6, %v6203_v4, %v6202_v17  ;;  %v5400_v57 = vpack.c.bf16 %v1980_v8, %v1972_v35  ;;  %v5700_v54 = vpack.c.bf16 %v1980_v8, %v1940_v29  ;;  %v6213_v4 = vunpack.i.h.bf16 %v6211_v46 }
 0x4d1   : > { %vm11231_vm13 = vmmov %vm11230_vm14  ;;  %v5703_v45 = vpack.c.bf16 %v1981_v27, %v1941_v19  ;;  %v1553_v37 = vsel %vm1551_vm15, 1, %v11097_v48  ;;  %v6212_v17 = vunpack.i.l.bf16 %v6211_v46  ;;  %vm11232_vm14 = vnez %v10888_v7  ;;  %v6216_v8 = vpop.permute.xlu0 %6215 }
 0x4d2   : > { %v1973_v32 = vsel %vm11231_vm13, %v6198_v62, %v6197_v52  ;;  %5399 = vmatpush1.bf16.msk.msra.mxu1 %vm8631_vm5, %v5397_v63  ;;  %vm11233_vm6 = vnez %v11063_v21  ;;  %v1988_v62 = vsel %vm11234_vm2, %v6207_v23, %v6208_v22  ;;  %vm11235_vm0 = vmmov %vm11234_vm2  ;;  %vm11236_vm12 = vnez %v11068_v41  ;;  %v6221_v63 = vpop.permute.xlu1 %6220 }
 0x4d3   : > { %v5403_v25 = vpack.c.bf16 %v1981_v27, %v1973_v32  ;;  %5402 = vmatprep.subr.msk.bf16.mxu1 %vm11232_vm14, %v5400_v57  ;;  %5702 = vmatprep.subr.msk.bf16.mxu0 %vm11233_vm6, %v5700_v54  ;;  %v1989_v52 = vsel %vm11235_vm0, %v6208_v22, %v6207_v23  ;;  %vm11237_vm13 = vcmp.ne.s32.totalorder %v8209_v58, 0  ;;  %v11238_v19 = vmax.f32 %v8079_v42, 0.0 }
 0x4d4   : > { %5705 = vmatpush1.bf16.msk.msra.mxu0 %vm11236_vm12, %v5703_v45  ;;  %v1552_v29 = vsel %vm11237_vm13, 1, %v11097_v48  ;;  %vm11239_vm1 = vnez %v10893_v51  ;;  %v11240_v27 = vmax.f32 %v8082_v44, 0.0  ;;  %v1561_v22 = vrot.slane %v1553_v37, %v11098_v30  ;;  %v11244_v44 = vld [vmem:[#allocation23_spill] sm:$0xff] }
 0x4d5   : > { %v5409_v54 = vpack.c.bf16 %v1988_v62, %v11238_v19  ;;  %v6218_v35 = vunpack.i.h.bf16 %v6216_v8  ;;  %v6217_v32 = vunpack.i.l.bf16 %v6216_v8  ;;  %vm11241_vm0 = vcmp.lt.s32.totalorder %v6837_v20, 126 }
 0x4d6   : > { %5405 = vmatpush1.bf16.msk.msra.mxu1 %vm11239_vm1, %v5403_v25  ;;  %v5406_v23 = vpack.c.bf16 %v1989_v52, %v11240_v27  ;;  %v1996_v58 = vsel %vm11241_vm0, %v6212_v17, %v6213_v4  ;;  %vm11242_vm13 = vmmov %vm11241_vm0  ;;  %vm11243_vm15 = vnez %v10778_v40  ;;  %vm11245_vm12 = vcmp.eq.s32.totalorder %v11244_v44, 1  ;;  %v6231_v62 = vpop.permute.xlu1 %6230  ;;  %v6226_v52 = vpop.permute.xlu0 %6225 }
 0x4d7   : > { %v1997_v42 = vsel %vm11242_vm13, %v6213_v4, %v6212_v17  ;;  %vm11246_vm2 = vcmp.eq.s32.totalorder %v8250_v49, 1  ;;  %v11247_v37 = vmov 0  ;;  %v1557_v45 = vrot.slane %v1552_v29, %v11098_v30 }
 0x4d8   : > { %5408 = vmatprep.subr.msk.bf16.mxu1 %vm11243_vm15, %v5406_v23  ;;  %5708 = vmatprep.subr.msk.bf16.mxu0 %vm11243_vm15, %v5406_v23  ;;  %vm8687_vm6 = vmpackc.low %vm11246_vm2, %vm11245_vm12  ;;  %v6223_v25 = vunpack.i.h.bf16 %v6221_v63  ;;  %v6222_v46 = vunpack.i.l.bf16 %v6221_v63  ;;  %vm11249_vm0 = vcmp.lt.s32.totalorder %v6837_v20, 125  ;;  %vm11251_vm15 = vnez %v10781_v11 }
 0x4d9   : > { %v11248_v37 = vsel %vm8687_vm6, 4294967295, %v11247_v37  ;;  %v2004_v18 = vsel %vm11249_vm0, %v6217_v32, %v6218_v35  ;;  %vm11250_vm13 = vmmov %vm11249_vm0  ;;  %5711 = vmatpush1.bf16.msk.msra.mxu0 %vm11251_vm15, %v5409_v54  ;;  %vm11252_vm1 = vcmp.eq.s32.totalorder %v11111_v59, 1  ;;  %vm11253_vm12 = vcmp.eq.s32.totalorder %v8253_v60, 1 }
 0x4da   : > { %v2005_v57 = vsel %vm11250_vm13, %v6218_v35, %v6217_v32  ;;  %vm8702_vm2 = vmpackc.low %vm11253_vm12, %vm11252_vm1  ;;  %v11254_v4 = vmov 0  ;;  %v5415_v17 = vpack.c.bf16 %v2004_v18, %v1996_v58  ;;  %5411 = vmatpush1.bf16.msk.msra.mxu1 %vm11251_vm15, %v5409_v54  ;;  %vm8709_vm0 = vcmp.eq.s32.totalorder %v1561_v22, 1  ;;  %v11274_v18 = vld [vmem:[#allocation47_spill] sm:$0xff] }
 0x4db   : > { %v11255_v4 = vsel %vm8702_vm2, 4294967295, %v11254_v4  ;;  %v5412_v29 = vpack.c.bf16 %v2005_v57, %v1997_v42  ;;  %v11257_v19 = vmov 0  ;;  %vm11260_vm13 = vcmp.ne.s32.totalorder %v8250_v49, 0  ;;  %v6241_v57 = vpop.permute.xlu1 %6240 }
 0x4dc   : > { %11256 = vst [vmem:[#allocation56_spill] sm:$0xff] %v11255_v4  ;;  %v11258_v19 = vsel %vm8709_vm0, 4294967295, %v11257_v19  ;;  %vm11261_vm1 = vcmp.lt.s32.totalorder %v11226_v6, 240  ;;  %v6228_v63 = vunpack.i.h.bf16 %v6226_v52  ;;  %v6227_v8 = vunpack.i.l.bf16 %v6226_v52 }
 0x4dd   : > { %11259 = vst [vmem:[#allocation12_spill] sm:$0xff] %v11258_v19  ;;  %vm8717_vm12 = vmand %vm11261_vm1, %vm11260_vm13  ;;  %vm11264_vm14 = vcmp.ne.s32.totalorder %v8216_v3, 0  ;;  %vm11265_vm15 = vcmp.lt.s32.totalorder %v11226_v6, 224  ;;  %v6233_v27 = vunpack.i.h.bf16 %v6231_v62  ;;  %v6232_v23 = vunpack.i.l.bf16 %v6231_v62  ;;  %5414 = vmatprep.subr.msk.bf16.mxu1 %vm8687_vm6, %v5412_v29  ;;  %v6236_v62 = vpop.permute.xlu0 %6235 }
 0x4de   : > { %vm8725_vm5 = vmand %vm11265_vm15, %vm11264_vm14  ;;  %vm8731_vm10 = vcmp.eq.s32.totalorder %v1557_v45, 1  ;;  %v11268_v22 = vmov 0  ;;  %vm11270_vm13 = vcmp.lt.s32.totalorder %v6837_v20, 115  ;;  %vm11272_vm14 = vcmp.lt.s32.totalorder %v6837_v20, 114  ;;  %5417 = vmatpush1.bf16.msk.msra.mxu1 %vm8702_vm2, %v5415_v17 }
 0x4df   : > { %v11269_v22 = vsel %vm8731_vm10, 4294967295, %v11268_v22  ;;  %v2012_v35 = vsel %vm11270_vm13, %v6222_v46, %v6223_v25  ;;  %vm11271_vm1 = vmmov %vm11270_vm13  ;;  %v2020_v58 = vsel %vm11272_vm14, %v6227_v8, %v6228_v63  ;;  %vm11275_vm6 = vnez %v11274_v18 }
 0x4e0   : > { %v2013_v32 = vsel %vm11271_vm1, %v6223_v25, %v6222_v46  ;;  %vm11273_vm15 = vmmov %vm11272_vm14  ;;  %v5421_v45 = vpack.c.bf16 %v2020_v58, %v2012_v35  ;;  %v1576_v25 = vsel %vm8717_vm12, 1, %v11097_v48  ;;  %v1599_v46 = vsel %vm8725_vm5, 1, %v11097_v48  ;;  %v11276_v35 = vld [vmem:[#allocation48_spill] sm:$0xff] }
 0x4e1   : > { %v2021_v42 = vsel %vm11273_vm15, %v6228_v63, %v6227_v8  ;;  %vm10702_vm11 = vmpackc.low %vm11275_vm6, %vm8709_vm0  ;;  %v6243_v29 = vunpack.i.h.bf16 %v6241_v57  ;;  %v6242_v63 = vunpack.i.l.bf16 %v6241_v57  ;;  %v6238_v8 = vunpack.i.h.bf16 %v6236_v62 }
 0x4e2   : > { %v5418_v52 = vpack.c.bf16 %v2021_v42, %v2013_v32  ;;  %v6237_v41 = vunpack.i.l.bf16 %v6236_v62  ;;  %vm11277_vm13 = vnez %v11276_v35  ;;  %vm11280_vm14 = vcmp.lt.s32.totalorder %v6837_v20, 113  ;;  %v6246_v35 = vpop.permute.xlu0 %6245 }
 0x4e3   : > { %vm8759_vm1 = vmpackc.low %vm11277_vm13, %vm8731_vm10  ;;  %v2028_v59 = vsel %vm11280_vm14, %v6232_v23, %v6233_v27  ;;  %vm11281_vm5 = vcmp.ne.s32.totalorder %v8253_v60, 0  ;;  %vm11283_vm15 = vcmp.lt.s32.totalorder %v6837_v20, 111  ;;  %vm11284_vm13 = vcmp.lt.s32.totalorder %v6837_v20, 112 }
 0x4e4   : > { %5420 = vmatprep.subr.msk.bf16.mxu1 %vm10702_vm11, %v5418_v52  ;;  %v1575_v54 = vsel %vm11281_vm5, 1, %v11097_v48  ;;  %vm11282_vm12 = vmmov %vm11280_vm14  ;;  %v2045_v58 = vsel %vm11283_vm15, %v6243_v29, %v6242_v63  ;;  %v2036_v42 = vsel %vm11284_vm13, %v6237_v41, %v6238_v8  ;;  %v6251_v52 = vpop.permute.xlu1 %6250  ;;  %v1584_v21 = vrot.slane %v1576_v25, %v11098_v30 }
 0x4e5   : > { %v2029_v32 = vsel %vm11282_vm12, %v6233_v27, %v6232_v23  ;;  %vm11285_vm14 = vmmov %vm11284_vm13  ;;  %v5427_v62 = vpack.c.bf16 %v2036_v42, %v2028_v59  ;;  %5423 = vmatpush1.bf16.msk.msra.mxu1 %vm8759_vm1, %v5421_v45  ;;  %v1607_v27 = vrot.slane %v1599_v46, %v11098_v30  ;;  %v6248_v23 = vunpack.i.h.bf16 %v6246_v35  ;;  %v1788_v42 = vld [vmem:[%s10437_s2 + $0xa0] sm:$0xff] }
 0x4e6   : > { %v2037_v57 = vsel %vm11285_vm14, %v6238_v8, %v6237_v41  ;;  %v6247_v19 = vunpack.i.l.bf16 %v6246_v35  ;;  %v1580_v18 = vrot.slane %v1575_v54, %v11098_v30  ;;  %vm11286_vm5 = vmmov %vm11283_vm15  ;;  %vm11287_vm15 = vnez %v10784_v47  ;;  %v6256_v54 = vpop.permute.xlu0 %6255 }
 0x4e7   : > { %v5424_v60 = vpack.c.bf16 %v2037_v57, %v2029_v32  ;;  %v2044_v4 = vsel %vm11286_vm5, %v6242_v63, %v6243_v29  ;;  %v5718_v41 = vpack.c.bf16 %v11001_v26, %v2045_v58  ;;  %vm11288_vm14 = vcmp.ne.s32.totalorder %v8250_v49, 0 }
 0x4e8   : > { %vm11289_vm11 = vcmp.lt.s32.totalorder %v11226_v6, 224  ;;  %v6253_v25 = vunpack.i.h.bf16 %v6251_v52  ;;  %v6252_v46 = vunpack.i.l.bf16 %v6251_v52  ;;  %vm11292_vm5 = vcmp.lt.s32.totalorder %v6837_v20, 110  ;;  %v6261_v59 = vpop.permute.xlu1 %6260 }
 0x4e9   : > { %5426 = vmatprep.subr.msk.bf16.mxu1 %vm11287_vm15, %v5424_v60  ;;  %5714 = vmatprep.subr.msk.bf16.mxu0 %vm11287_vm15, %v5424_v60  ;;  %vm8799_vm0 = vmand %vm11289_vm11, %vm11288_vm14  ;;  %v2052_v29 = vsel %vm11292_vm5, %v6247_v19, %v6248_v23  ;;  %vm11294_vm13 = vnez %v10792_v56  ;;  %vm11295_vm11 = vnez %v11077_v53  ;;  %vm8816_vm14 = vcmp.eq.s32.totalorder %v1584_v21, 1 }
 0x4ea   : > { %vm11293_vm12 = vmmov %vm11292_vm5  ;;  %5717 = vmatpush1.bf16.msk.msra.mxu0 %vm11294_vm13, %v5427_v62  ;;  %v5433_v8 = vpack.c.bf16 %v2052_v29, %v2044_v4  ;;  %5429 = vmatpush1.bf16.msk.msra.mxu1 %vm11294_vm13, %v5427_v62  ;;  %v11296_v57 = vmov 0  ;;  %v6258_v52 = vunpack.i.h.bf16 %v6256_v54  ;;  %v6257_v62 = vunpack.i.l.bf16 %v6256_v54 }
 0x4eb   : > { %v2053_v63 = vsel %vm11293_vm12, %v6248_v23, %v6247_v19  ;;  %5720 = vmatprep.subr.msk.bf16.mxu0 %vm11295_vm11, %v5718_v41  ;;  %v11297_v57 = vsel %vm8816_vm14, 4294967295, %v11296_v57  ;;  %vm8820_vm12 = vcmp.eq.s32.totalorder %v1607_v27, 1  ;;  %v11298_v19 = vmov 0 }
 0x4ec   : > { %v5430_v32 = vpack.c.bf16 %v2053_v63, %v2045_v58  ;;  %v11299_v19 = vsel %vm8820_vm12, 4294967295, %v11298_v19  ;;  %vm8824_vm5 = vcmp.eq.s32.totalorder %v1580_v18, 1  ;;  %v1622_v58 = vsel %vm8799_vm0, 1, %v11097_v48  ;;  %v1791_v18 = vld [vmem:[%s10437_s2 + $0xb8] sm:$0xff] }
 0x4ed   : > { %v5721_v60 = vpack.c.bf16 %v11001_v26, %v2044_v4  ;;  %v6263_v21 = vunpack.i.h.bf16 %v6261_v59  ;;  %v6262_v23 = vunpack.i.l.bf16 %v6261_v59  ;;  %vm11302_vm11 = vnez %v10961_v13  ;;  %2244 = vmatmul.mubr.f32.vlgmr.msra.gmra.mrb[2].mxu1 %v1788_v42 }
 0x4ee   : > { %5432 = vmatprep.subr.msk.bf16.mxu1 %vm11302_vm11, %v5430_v32  ;;  %vm11303_vm6 = vcmp.lt.s32.totalorder %v6837_v20, 109  ;;  %vm11305_vm0 = vcmp.lt.s32.totalorder %v6837_v20, 99  ;;  %vm11307_vm11 = vnez %v10966_v9  ;;  %v1630_v59 = vrot.slane %v1622_v58, %v11098_v30 }
 0x4ef   : > { %v2060_v27 = vsel %vm11303_vm6, %v6252_v46, %v6253_v25  ;;  %vm11304_vm2 = vmmov %vm11303_vm6  ;;  %v2068_v4 = vsel %vm11305_vm0, %v6257_v62, %v6258_v52  ;;  %5435 = vmatpush1.bf16.msk.msra.mxu1 %vm11307_vm11, %v5433_v8  ;;  %vm11308_vm6 = vnez %v11080_v2  ;;  %v2076_v42 = vsel %vm11314_vm8, %v6262_v23, %v6263_v21 }
 0x4f0   : > { %v2061_v41 = vsel %vm11304_vm2, %v6253_v25, %v6252_v46  ;;  %vm11306_vm9 = vmmov %vm11305_vm0  ;;  %v5439_v29 = vpack.c.bf16 %v2068_v4, %v2060_v27  ;;  %5723 = vmatpush1.bf16.msk.msra.mxu0 %vm11308_vm6, %v5721_v60  ;;  %v6271_v25 = vpop.permute.xlu1 %6270  ;;  %v6266_v46 = vpop.permute.xlu0 %6265  ;;  %vm11309_vm2 = vcmp.ne.s32.totalorder %v8216_v3, 0  ;;  %vm11310_vm0 = vcmp.lt.s32.totalorder %v11226_v6, 208  ;;  %v11317_v3 = vld [vmem:[#allocation21_spill] sm:$0xff] }
 0x4f1   : > { %v2069_v45 = vsel %vm11306_vm9, %v6258_v52, %v6257_v62  ;;  %v6268_v54 = vunpack.i.h.bf16 %v6266_v46  ;;  %v6267_v32 = vunpack.i.l.bf16 %v6266_v46  ;;  %vm8863_vm15 = vmand %vm11310_vm0, %vm11309_vm2  ;;  %vm11313_vm6 = vcmask 130048  }
 0x4f2   : > { %v5436_v63 = vpack.c.bf16 %v2069_v45, %v2061_v41  ;;  %4851 = vmatprep.mubr.msk.f32.mxu1 %vm11313_vm6, %v1791_v18  ;;  %v2077_v52 = vsel %vm11315_vm3, %v6263_v21, %v6262_v23  ;;  %vm11316_vm9 = vmpackc.low %vm8820_vm12, %vm8816_vm14  ;;  %vm11318_vm4 = vcmp.ne.s32.totalorder %v11317_v3, 0  ;;  %v6273_v58 = vunpack.i.h.bf16 %v6271_v25  ;;  %v11324_v23 = vld [vmem:[#allocation6_spill] sm:$0xff] }
 0x4f3   : > { %vm11319_vm2 = vmmov %vm11310_vm0  ;;  %v6272_v60 = vunpack.i.l.bf16 %v6271_v25  ;;  %vm11322_vm8 = vcmp.lt.s32.totalorder %v6837_v20, 97  ;;  %vm11325_vm6 = vcmp.ne.s32.totalorder %v11324_v23, 0  ;;  %v11330_v46 = vmov 0 }
 0x4f4   : > { %5438 = vmatprep.subr.msk.bf16.mxu1 %vm11316_vm9, %v5436_v63  ;;  %vm8881_vm0 = vmand %vm11319_vm2, %vm11318_vm4  ;;  %v2084_v18 = vsel %vm11322_vm8, %v6267_v32, %v6268_v54  ;;  %v6281_v4 = vpop.permute.xlu1 %6280  ;;  %v6276_v45 = vpop.permute.xlu0 %6275  ;;  %v11563_v9 = vmov 0.0  }
 0x4f5   : > { %vm11323_vm3 = vmmov %vm11322_vm8  ;;  %v5445_v41 = vpack.c.bf16 %v2084_v18, %v2076_v42  ;;  %vm8903_vm8 = vcmp.eq.s32.totalorder %v1630_v59, 1  ;;  %v6278_v63 = vunpack.i.h.bf16 %v6276_v45  ;;  %v1670_v42 = vsel %vm8881_vm0, 1, %v11097_v48 }
 0x4f6   : > { %v2085_v21 = vsel %vm11323_vm3, %v6268_v54, %v6267_v32  ;;  %vm11326_vm9 = vmmov %vm11319_vm2  ;;  %v11331_v46 = vsel %vm8903_vm8, 4294967295, %v11330_v46  ;;  %v6277_v54 = vunpack.i.l.bf16 %v6276_v45  ;;  %v1647_v32 = vsel %vm8863_vm15, 1, %v11097_v48  ;;  %v11338_v45 = vld [vmem:[#allocation62_spill] sm:$0xff] }
 0x4f7   : > { %vm8893_vm14 = vmand %vm11326_vm9, %vm11325_vm6  ;;  %v5442_v25 = vpack.c.bf16 %v2085_v21, %v2077_v52  ;;  %v6282_v3 = vunpack.i.l.bf16 %v6281_v4  ;;  %vm11332_vm3 = vnez %v10974_v31  ;;  %vm11333_vm9 = vcmp.lt.s32.totalorder %v6837_v20, 96 }
 0x4f8   : > { %vm11329_vm4 = vmpackc.low %vm8731_vm10, %vm8824_vm5  ;;  %v1693_v59 = vsel %vm8893_vm14, 1, %v11097_v48  ;;  %v2092_v52 = vsel %vm11333_vm9, %v6272_v60, %v6273_v58  ;;  %vm11337_vm2 = vnez %v10979_v24  ;;  %v6291_v23 = vpop.permute.xlu1 %6290  ;;  %vm11339_vm14 = vnez %v11338_v45 }
 0x4f9   : > { %5441 = vmatpush1.bf16.msk.msra.mxu1 %vm11329_vm4, %v5439_v29  ;;  %v6283_v29 = vunpack.i.h.bf16 %v6281_v4  ;;  %vm11334_vm15 = vmmov %vm11333_vm9  ;;  %vm11335_vm4 = vcmp.lt.s32.totalorder %v6837_v20, 95  ;;  %v6286_v4 = vpop.permute.xlu0 %6285  ;;  %vm11342_vm6 = vcmp.lt.s32.totalorder %v11226_v6, 208  ;;  %vm11345_vm9 = vcmp.lt.s32.totalorder %v6837_v20, 94 }
 0x4fa   : > { %5444 = vmatprep.subr.msk.bf16.mxu1 %vm11332_vm3, %v5442_v25  ;;  %v2093_v8 = vsel %vm11334_vm15, %v6273_v58, %v6272_v60  ;;  %v2100_v62 = vsel %vm11335_vm4, %v6277_v54, %v6278_v63  ;;  %vm11336_vm0 = vmmov %vm11335_vm4  ;;  %v1655_v58 = vrot.slane %v1647_v32, %v11098_v30  ;;  %v1678_v60 = vrot.slane %v1670_v42, %v11098_v30 }
 0x4fb   : > { %v2101_v18 = vsel %vm11336_vm0, %v6278_v63, %v6277_v54  ;;  %v5451_v21 = vpack.c.bf16 %v2100_v62, %v2092_v52  ;;  %v6288_v25 = vunpack.i.h.bf16 %v6286_v4  ;;  %v6287_v2 = vunpack.i.l.bf16 %v6286_v4  ;;  %v11340_v63 = vld [vmem:[#allocation8_spill] sm:$0xff]  ;;  %vm11346_vm3 = vmmov %vm11345_vm9 }
 0x4fc   : > { %v5448_v27 = vpack.c.bf16 %v2101_v18, %v2093_v8  ;;  %vm11341_vm0 = vcmp.ne.s32.totalorder %v11340_v63, 0  ;;  %v2108_v54 = vsel %vm11345_vm9, %v6282_v3, %v6283_v29  ;;  %v2109_v32 = vsel %vm11346_vm3, %v6283_v29, %v6282_v3  ;;  %v6301_v18 = vpop.permute.xlu1 %6300  ;;  %v11362_v63 = vld [vmem:[#allocation55_spill] sm:$0xff] }
 0x4fd   : > { %5447 = vmatpush1.bf16.msk.msra.mxu1 %vm11337_vm2, %v5445_v41  ;;  %vm8941_vm2 = vmand %vm11342_vm6, %vm11341_vm0  ;;  %vm11347_vm10 = vnez %v10991_v38  ;;  %v1701_v42 = vrot.slane %v1693_v59, %v11098_v30  ;;  %vm11348_vm4 = vcmp.ne.s32.totalorder %v11244_v44, 0  ;;  %v6293_v8 = vunpack.i.h.bf16 %v6291_v23 }
 0x4fe   : > { %5450 = vmatprep.subr.msk.bf16.mxu1 %vm11347_vm10, %v5448_v27  ;;  %vm8957_vm0 = vmand %vm11342_vm6, %vm11348_vm4  ;;  %v6292_v62 = vunpack.i.l.bf16 %v6291_v23  ;;  %vm11351_vm9 = vcmp.lt.s32.totalorder %v6837_v20, 93  ;;  %vm11353_vm15 = vcmp.ne.s32.totalorder %v8250_v49, 0  ;;  %vm11357_vm4 = vnez %v10997_v14  ;;  %v6296_v23 = vpop.permute.xlu0 %6295 }
 0x4ff   : > { %v2116_v29 = vsel %vm11351_vm9, %v6287_v2, %v6288_v25  ;;  %vm11352_vm3 = vmmov %vm11351_vm9  ;;  %v11358_v27 = vmov 0  ;;  %vm8979_vm9 = vcmp.eq.s32.totalorder %v1678_v60, 1  ;;  %v6298_v49 = vunpack.i.h.bf16 %v6296_v23 }
 0x500   : > { %v2117_v3 = vsel %vm11352_vm3, %v6288_v25, %v6287_v2  ;;  %vm11354_vm10 = vmmov %vm11342_vm6  ;;  %v5457_v59 = vpack.c.bf16 %v2116_v29, %v2108_v54  ;;  %vm8975_vm6 = vcmp.eq.s32.totalorder %v1655_v58, 1  ;;  %v11360_v2 = vmov 0  ;;  %v6311_v44 = vpop.permute.xlu1 %6310 }
 0x501   : > { %vm8969_vm12 = vmand %vm11354_vm10, %vm11353_vm15  ;;  %5453 = vmatpush1.bf16.msk.msra.mxu1 %vm11357_vm4, %v5451_v21  ;;  %v5454_v4 = vpack.c.bf16 %v2117_v3, %v2109_v32  ;;  %v11359_v27 = vsel %vm8975_vm6, 4294967295, %v11358_v27  ;;  %v11361_v2 = vsel %vm8979_vm9, 4294967295, %v11360_v2  ;;  %v6297_v25 = vunpack.i.l.bf16 %v6296_v23 }
 0x502   : > { %vm11363_vm10 = vnez %v11362_v63  ;;  %v1729_v21 = vsel %vm8941_vm2, 1, %v11097_v48  ;;  %v1752_v58 = vsel %vm8957_vm0, 1, %v11097_v48  ;;  %v6303_v54 = vunpack.i.h.bf16 %v6301_v18  ;;  %vm11364_vm3 = vmpackc.low %vm8903_vm8, %vm11339_vm14 }
 0x503   : > { %v6302_v60 = vunpack.i.l.bf16 %v6301_v18  ;;  %5456 = vmatprep.subr.msk.bf16.mxu1 %vm11364_vm3, %v5454_v4  ;;  %vm8998_vm4 = vcmp.eq.s32.totalorder %v1701_v42, 1  ;;  %v1775_v41 = vsel %vm8969_vm12, 1, %v11097_v48  ;;  %vm11367_vm2 = vcmp.lt.s32.totalorder %v6837_v20, 83  ;;  %vm10716_vm3 = vmpackc.low %vm8979_vm9, %vm8975_vm6 }
 0x504   : > { %v2124_v52 = vsel %vm11367_vm2, %v6292_v62, %v6293_v8  ;;  %vm11368_vm0 = vmmov %vm11367_vm2  ;;  %vm11369_vm15 = vcmp.lt.s32.totalorder %v6837_v20, 82  ;;  %v1737_v23 = vrot.slane %v1729_v21, %v11098_v30  ;;  %v1760_v4 = vrot.slane %v1752_v58, %v11098_v30 }
 0x505   : > { %v2125_v29 = vsel %vm11368_vm0, %v6293_v8, %v6292_v62  ;;  %v2132_v3 = vsel %vm11369_vm15, %v6297_v25, %v6298_v49  ;;  %vm11370_vm14 = vmmov %vm11369_vm15  ;;  %v6306_v8 = vpop.permute.xlu0 %6305  ;;  %vm11372_vm2 = vcmp.lt.s32.totalorder %v6837_v20, 81  ;;  %v6313_v21 = vunpack.i.h.bf16 %v6311_v44 }
 0x506   : > { %v2133_v18 = vsel %vm11370_vm14, %v6298_v49, %v6297_v25  ;;  %v5463_v42 = vpack.c.bf16 %v2132_v3, %v2124_v52  ;;  %vm11371_vm12 = vmpackc.low %vm8824_vm5, %vm11363_vm10  ;;  %v6308_v49 = vunpack.i.h.bf16 %v6306_v8  ;;  %v6307_v25 = vunpack.i.l.bf16 %v6306_v8 }
 0x507   : > { %5459 = vmatpush1.bf16.msk.msra.mxu1 %vm11371_vm12, %v5457_v59  ;;  %v5460_v62 = vpack.c.bf16 %v2133_v18, %v2125_v29  ;;  %v2140_v52 = vsel %vm11372_vm2, %v6302_v60, %v6303_v54  ;;  %vm11373_vm0 = vmmov %vm11372_vm2  ;;  %vm10720_vm12 = vcmp.lt.s32.totalorder %v6837_v20, 78  ;;  %v1783_v59 = vrot.slane %v1775_v41, %v11098_v30  ;;  %v6326_v30 = vpop.permute.xlu1 %6325 }
 0x508   : > { %v2141_v3 = vsel %vm11373_vm0, %v6303_v54, %v6302_v60  ;;  %v6312_v58 = vunpack.i.l.bf16 %v6311_v44  ;;  %vm11374_vm15 = vcmp.lt.s32.totalorder %v6837_v20, 80  ;;  %vm11376_vm0 = vcmp.lt.s32.totalorder %v11226_v6, 208 }
 0x509   : > { %5462 = vmatprep.subr.msk.bf16.mxu1 %vm10716_vm3, %v5460_v62  ;;  %v2148_v29 = vsel %vm11374_vm15, %v6307_v25, %v6308_v49  ;;  %vm11375_vm2 = vmmov %vm11374_vm15  ;;  %v11377_v54 = vmov 0  ;;  %v6316_v41 = vpop.permute.xlu0 %6315  ;;  %vm9051_vm3 = vcmp.eq.s32.totalorder %v1737_v23, 1  ;;  %v11379_v8 = vmov 0 }
 0x50a   : > { %v2149_v18 = vsel %vm11375_vm2, %v6308_v49, %v6307_v25  ;;  %vm9045_vm14 = vmpackc.low %vm11376_vm0, %vm8998_vm4  ;;  %v5469_v60 = vpack.c.bf16 %v2148_v29, %v2140_v52  ;;  %v11380_v8 = vsel %vm9051_vm3, 4294967295, %v11379_v8  ;;  %vm9055_vm15 = vcmp.eq.s32.totalorder %v1760_v4, 1 }
 0x50b   : > { %v11378_v54 = vsel %vm9045_vm14, 4294967295, %v11377_v54  ;;  %5465 = vmatpush1.bf16.msk.msra.mxu1 %vm8759_vm1, %v5463_v42  ;;  %v5466_v44 = vpack.c.bf16 %v2149_v18, %v2141_v3  ;;  %v11381_v62 = vmov 0  ;;  %v6328_v6 = vunpack.i.h.bf16 %v6326_v30  ;;  %v6331_v18 = vpop.permute.xlu1 %6330 }
 0x50c   : > { %v11382_v62 = vsel %vm9055_vm15, 4294967295, %v11381_v62  ;;  %v6327_v32 = vunpack.i.l.bf16 %v6326_v30  ;;  %v6318_v49 = vunpack.i.h.bf16 %v6316_v41  ;;  %v6317_v25 = vunpack.i.l.bf16 %v6316_v41 }
 0x50d   : > { %5468 = vmatprep.subr.msk.bf16.mxu1 %vm9045_vm14, %v5466_v44  ;;  %vm9061_vm4 = vcmp.eq.s32.totalorder %v1783_v59, 1  ;;  %vm11385_vm2 = vcmp.lt.s32.totalorder %v6837_v20, 79  ;;  %vm10723_vm14 = vmpackc.low %vm9055_vm15, %vm9051_vm3  ;;  %vm11387_vm6 = vcmp.lt.s32.totalorder %v6837_v20, 77  ;;  %v6333_v30 = vunpack.i.h.bf16 %v6331_v18 }
 0x50e   : > { %v2156_v23 = vsel %vm11385_vm2, %v6312_v58, %v6313_v21  ;;  %vm11386_vm0 = vmmov %vm11385_vm2  ;;  %v2164_v52 = vsel %vm10720_vm12, %v6317_v25, %v6318_v49  ;;  %v2165_v3 = vsel %vm10720_vm12, %v6318_v49, %v6317_v25  ;;  %v2173_v59 = vsel %vm11387_vm6, %v6328_v6, %v6327_v32  ;;  %v11388_v49 = vld [vmem:[#allocation2_spill] sm:$0xff] }
 0x50f   : > { %v2157_v4 = vsel %vm11386_vm0, %v6313_v21, %v6312_v58  ;;  %v5475_v29 = vpack.c.bf16 %v2164_v52, %v2156_v23  ;;  %5471 = vmatpush1.bf16.msk.msra.mxu1 %vm11294_vm13, %v5469_v60  ;;  %v6321_v21 = vpop.permute.xlu0 %6320  ;;  %v6332_v41 = vunpack.i.l.bf16 %v6331_v18  ;;  %vm11389_vm6 = vcmp.eq.s32.totalorder %v11388_v49, 0  ;;  %v6341_v42 = vpop.permute.xlu1 %6340 }
 0x510   : > { %v5472_v58 = vpack.c.bf16 %v2165_v3, %v2157_v4  ;;  %v6323_v44 = vunpack.i.h.bf16 %v6321_v21  ;;  %v6322_v48 = vunpack.i.l.bf16 %v6321_v21  ;;  %vm9090_vm2 = vmpackc.low %vm11389_vm6, %vm9061_vm4  ;;  %v11390_v25 = vmov 0 }
 0x511   : > { %v11391_v25 = vsel %vm9090_vm2, 4294967295, %v11390_v25  ;;  %vm11393_vm0 = vcmp.lt.s32.totalorder %v6837_v20, 77  ;;  %v5478_v23 = vpack.c.bf16 %v11001_v26, %v2173_v59  ;;  %vm11394_vm12 = vcmp.lt.s32.totalorder %v6837_v20, 50  ;;  %vm11396_vm4 = vmmov %vm11389_vm6 }
 0x512   : > { %5474 = vmatprep.subr.msk.bf16.mxu1 %vm10723_vm14, %v5472_v58  ;;  %11392 = vst [vmem:[#allocation13_spill] sm:$0xff] %v11391_v25  ;;  %v2172_v60 = vsel %vm11393_vm0, %v6327_v32, %v6328_v6  ;;  %v1294_v4 = vsel %vm11394_vm12, %v6332_v41, %v6333_v30  ;;  %vm11395_vm9 = vcmp.lt.s32.totalorder %v6837_v20, 51  ;;  %v6343_v18 = vunpack.i.h.bf16 %v6341_v42  ;;  %vm9109_vm12 = vmpackc.low %vm11396_vm4, %vm8824_vm5 }
 0x513   : > { %v1257_v52 = vsel %vm11395_vm9, %v6322_v48, %v6323_v44  ;;  %5477 = vmatpush1.bf16.msk.msra.mxu1 %vm11307_vm11, %v5475_v29  ;;  %v6336_v3 = vpop.permute.xlu0 %6335  ;;  %v6342_v21 = vunpack.i.l.bf16 %v6341_v42  ;;  %v11397_v6 = vmov 0  ;;  %v5481_v32 = vpack.c.bf16 %v11001_v26, %v2172_v60  ;;  %v6351_v49 = vpop.permute.xlu1 %6350  ;;  %v1790_v60 = vld [vmem:[%s10437_s2 + $0xb0] sm:$0xff] }
 0x514   : > { %v6338_v58 = vunpack.i.h.bf16 %v6336_v3  ;;  %v6337_v53 = vunpack.i.l.bf16 %v6336_v3  ;;  %5480 = vmatprep.subr.msk.bf16.mxu1 %vm9090_vm2, %v5478_v23  ;;  %v11398_v6 = vsel %vm9109_vm12, 4294967295, %v11397_v6  ;;  %vm11400_vm9 = vcmp.lt.s32.totalorder %v6837_v20, 50 }
 0x515   : > { %11399 = vst [vmem:[#allocation16_spill] sm:$0xff] %v11398_v6  ;;  %v1295_v59 = vsel %vm11400_vm9, %v6333_v30, %v6332_v41  ;;  %vm11401_vm6 = vcmp.lt.s32.totalorder %v6837_v20, 51  ;;  %v5484_v42 = vpack.c.bf16 %v1294_v4, %v1257_v52  ;;  %vm11402_vm0 = vcmp.lt.s32.totalorder %v6837_v20, 48 }
 0x516   : > { %v1258_v29 = vsel %vm11401_vm6, %v6323_v44, %v6322_v48  ;;  %v1340_v23 = vsel %vm11402_vm0, %v6342_v21, %v6343_v18  ;;  %vm11403_vm14 = vcmp.lt.s32.totalorder %v6837_v20, 49  ;;  %v6353_v30 = vunpack.i.h.bf16 %v6351_v49  ;;  %v1249_v44 = vld [vmem:[%s10437_s2 + $0x88] sm:$0xff] }
 0x517   : > { %v1317_v3 = vsel %vm11403_vm14, %v6337_v53, %v6338_v58  ;;  %5483 = vmatpush1.bf16.msk.msra.mxu1 %vm9109_vm12, %v5481_v32  ;;  %v6346_v25 = vpop.permute.xlu0 %6345  ;;  %v6352_v41 = vunpack.i.l.bf16 %v6351_v49  ;;  %v5487_v4 = vpack.c.bf16 %v1295_v59, %v1258_v29  ;;  %vm11404_vm14 = vmmov %vm11402_vm0  ;;  %vm11405_vm4 = vcmp.lt.s32.totalorder %v6837_v20, 49  ;;  %v6361_v59 = vpop.permute.xlu1 %6360 }
 0x518   : > { %v6348_v26 = vunpack.i.h.bf16 %v6346_v25  ;;  %v6347_v48 = vunpack.i.l.bf16 %v6346_v25  ;;  %5486 = vmatprep.subr.msk.bf16.mxu1 %vm8336_vm7, %v5484_v42  ;;  %v1341_v52 = vsel %vm11404_vm14, %v6343_v18, %v6342_v21  ;;  %v1318_v32 = vsel %vm11405_vm4, %v6338_v58, %v6337_v53  ;;  %v11409_v42 = vld [vmem:[#allocation41_spill] sm:$0xff] }
 0x519   : > { %v5490_v6 = vpack.c.bf16 %v1340_v23, %v1317_v3  ;;  %vm11406_vm9 = vcmp.lt.s32.totalorder %v6837_v20, 46  ;;  %vm11407_vm6 = vcmp.lt.s32.totalorder %v6837_v20, 47  ;;  %vm11408_vm0 = vnez %v11118_v43 }
 0x51a   : > { %2315 = vmatmul.mubr.f32.vlgmr.msra.gmra.mrb[2].mxu1 %v1790_v60  ;;  %v1376_v49 = vsel %vm11406_vm9, %v6352_v41, %v6353_v30  ;;  %v1353_v25 = vsel %vm11407_vm6, %v6347_v48, %v6348_v26  ;;  %vm11410_vm12 = vnez %v11409_v42  ;;  %v6363_v18 = vunpack.i.h.bf16 %v6361_v59  ;;  %vm11413_vm4 = vmmov %vm11406_vm9 }
 0x51b   : > { %vm11411_vm2 = vmpackc.low %vm11408_vm0, %vm11410_vm12  ;;  %v6356_v29 = vpop.permute.xlu0 %6355  ;;  %2388 = vmatprep.mubr.f32.mxu1 %v1249_v44  ;;  %v6362_v21 = vunpack.i.l.bf16 %v6361_v59  ;;  %vm11412_vm14 = vnez %v10763_v55  ;;  %v5493_v23 = vpack.c.bf16 %v1341_v52, %v1318_v32  ;;  %v1377_v3 = vsel %vm11413_vm4, %v6353_v30, %v6352_v41  ;;  %v6371_v42 = vpop.permute.xlu1 %6370 }
 0x51c   : > { %5489 = vmatpush1.bf16.msk.msra.mxu1 %vm11411_vm2, %v5487_v4  ;;  %v6358_v53 = vunpack.i.h.bf16 %v6356_v29  ;;  %v6357_v58 = vunpack.i.l.bf16 %v6356_v29  ;;  %vm11414_vm9 = vmmov %vm11407_vm6  ;;  %v5496_v60 = vpack.c.bf16 %v1376_v49, %v1353_v25  ;;  %vm11415_vm2 = vcmp.lt.s32.totalorder %v6837_v20, 35  ;;  %v11427_v25 = vld [vmem:[#allocation42_spill] sm:$0xff] }
 0x51d   : > { %5492 = vmatprep.subr.msk.bf16.mxu1 %vm11412_vm14, %v5490_v6  ;;  %v1354_v43 = vsel %vm11414_vm9, %v6348_v26, %v6347_v48  ;;  %v1434_v4 = vsel %vm11415_vm2, %v6362_v21, %v6363_v18  ;;  %vm11416_vm12 = vcmp.lt.s32.totalorder %v6837_v20, 45  ;;  %vm11417_vm6 = vnez %v11145_v28  ;;  %vm11419_vm4 = vmmov %vm11415_vm2 }
 0x51e   : > { %v1399_v44 = vsel %vm11416_vm12, %v6357_v58, %v6358_v53  ;;  %vm11418_vm0 = vnez %v10871_v5  ;;  %v5499_v6 = vpack.c.bf16 %v1377_v3, %v1354_v43  ;;  %v1435_v30 = vsel %vm11419_vm4, %v6363_v18, %v6362_v21  ;;  %vm11420_vm9 = vmmov %vm11416_vm12  ;;  %v11432_v18 = vld [vmem:[#allocation25_spill] sm:$0xff] }
 0x51f   : > { %v6366_v59 = vpop.permute.xlu0 %6365  ;;  %v1400_v26 = vsel %vm11420_vm9, %v6358_v53, %v6357_v58  ;;  %v5502_v41 = vpack.c.bf16 %v1434_v4, %v1399_v44  ;;  %vm11421_vm2 = vnez %v11149_v33  ;;  %vm11422_vm12 = vnez %v11147_v34  ;;  %v9168_v28 = vpop.permute.xlu1 %6380  ;;  %v11429_v33 = vld [vmem:[#allocation36_spill] sm:$0xff] }
 0x520   : > { %5495 = vmatpush1.bf16.msk.msra.mxu1 %vm11417_vm6, %v5493_v23  ;;  %vm11423_vm3 = vmpackc.low %vm11421_vm2, %vm11422_vm12  ;;  %vm11424_vm6 = vnez %v11116_v15  ;;  %vm11425_vm15 = vnez %v11155_v12  ;;  %v5505_v52 = vpack.c.bf16 %v1435_v30, %v1400_v26  ;;  %v6368_v32 = vunpack.i.h.bf16 %v6366_v59  ;;  %v11435_v58 = vld [vmem:[#allocation24_spill] sm:$0xff] }
 0x521   : > { %5498 = vmatprep.subr.msk.bf16.mxu1 %vm11418_vm0, %v5496_v60  ;;  %vm11426_vm10 = vmpackc.low %vm11424_vm6, %vm11425_vm15  ;;  %v6367_v49 = vunpack.i.l.bf16 %v6366_v59  ;;  %vm11428_vm4 = vnez %v11427_v25  ;;  %vm11430_vm9 = vnez %v11429_v33  ;;  %vm11434_vm2 = vcmp.lt.s32.totalorder %v6837_v20, 29  ;;  %v11437_v59 = vld [vmem:[#allocation28_spill] sm:$0xff] }
 0x522   : > { %vm11431_vm8 = vmpackc.low %vm11428_vm4, %vm11430_vm9  ;;  %v6373_v21 = vunpack.i.h.bf16 %v6371_v42  ;;  %v6372_v53 = vunpack.i.l.bf16 %v6371_v42  ;;  %vm11441_vm6 = vcmp.lt.s32.totalorder %v6837_v20, 99  ;;  %vm11443_vm9 = vcmp.lt.s32.totalorder %v6837_v20, 109 }
 0x523   : > { %v9170_v48 = vpop.permute.xlu0 %6375  ;;  %v9182_v34 = vpop.permute.xlu1 %6390  ;;  %v1457_v15 = vsel %vm11434_vm2, %v6367_v49, %v6368_v32  ;;  %vm11439_vm12 = vmmov %vm11434_vm2  ;;  %vm11445_vm2 = vcmp.lt.s32.totalorder %v6837_v20, 19 }
 0x524   : > { %5501 = vmatpush1.bf16.msk.msra.mxu1 %vm11423_vm3, %v5499_v6  ;;  %vm11433_vm3 = vnez %v10820_v50  ;;  %v1458_v50 = vsel %vm11439_vm12, %v6368_v32, %v6367_v49  ;;  %v11440_v6 = vld [vmem:[#allocation32_spill] sm:$0xff]  ;;  %vm11442_vm4 = vmmov %vm11441_vm6  ;;  %v11446_v32 = vld [vmem:[#allocation27_spill] sm:$0xff]  ;;  %vm11449_vm12 = vnez %v10849_v36  ;;  %v6383_v36 = vunpack.i.h.bf16 %v9168_v28 }
 0x525   : > { %5504 = vmatprep.subr.msk.bf16.mxu1 %vm11426_vm10, %v5502_v41  ;;  %vm11436_vm10 = vnez %v10832_v1  ;;  %v5520_v30 = vpack.c.bf16 %v1457_v15, %v11440_v6  ;;  %v1480_v41 = vsel %vm11445_vm2, %v6372_v53, %v6373_v21  ;;  %v11451_v15 = vld [vmem:[#allocation33_spill] sm:$0xff]  ;;  %v6378_v6 = vunpack.i.h.bf16 %v9170_v48 }
 0x527   : > { %v9184_v29 = vpop.permute.xlu0 %6385  ;;  %v6401_v23 = vpop.permute.xlu1 %6400 }
 0x528   : > { %5507 = vmatpush1.bf16.msk.msra.mxu1 %vm11431_vm8, %v5505_v52  ;;  %v6403_v43 = vunpack.i.h.bf16 %v6401_v23  ;;  %v6402_v60 = vunpack.i.l.bf16 %v6401_v23  ;;  %vm11438_vm8 = vnez %v10842_v39  ;;  %v11477_v52 = vld [vmem:[#allocation39_spill] sm:$0xff] }
 0x529   : > { %5510 = vmatprep.subr.msk.bf16.mxu1 %vm11433_vm3, %v11432_v18  ;;  %vm11444_vm3 = vmmov %vm11443_vm9 }
 0x52a   : > { %v9202_v42 = vsel %vm11441_vm6, %v6402_v60, %v6403_v43  ;;  %v9206_v1 = vsel %vm11442_vm4, %v6403_v43, %v6402_v60  ;;  %vm11450_vm6 = vmpackc.low %vm11425_vm15, %vm11449_vm12  ;;  %v11453_v60 = vld [vmem:[#allocation31_spill] sm:$0xff]  ;;  %vm11454_vm4 = vnez %v11185_v61  ;;  %vm11458_vm15 = vcmp.lt.s32.totalorder %v6837_v20, 83 }
 0x52b   : > { %v6396_v3 = vpop.permute.xlu0 %6395  ;;  %v6411_v49 = vpop.permute.xlu1 %6410 }
 0x52c   : > { %5513 = vmatpush1.bf16.msk.msra.mxu1 %vm11436_vm10, %v11435_v58  ;;  %v6398_v4 = vunpack.i.h.bf16 %v6396_v3  ;;  %v6397_v44 = vunpack.i.l.bf16 %v6396_v3  ;;  %vm11447_vm10 = vnez %v10847_v16  ;;  %v5523_v58 = vpack.c.bf16 %v1458_v50, %v11451_v15  ;;  %v11452_v3 = vld [vmem:[#allocation30_spill] sm:$0xff]  ;;  %v11464_v15 = vld [vmem:[#allocation37_spill] sm:$0xff] }
 0x52d   : > { %5516 = vmatprep.subr.msk.bf16.mxu1 %vm11438_vm8, %v11437_v59  ;;  %vm11448_vm8 = vmmov %vm11445_vm2  ;;  %v6413_v23 = vunpack.i.h.bf16 %v6411_v49  ;;  %v6412_v16 = vunpack.i.l.bf16 %v6411_v49  ;;  %v5526_v43 = vpack.c.bf16 %v11452_v3, %v1480_v41  ;;  %vm11465_vm12 = vnez %v11464_v15 }
 0x52e   : > { %v9210_v26 = vsel %vm11443_vm9, %v6397_v44, %v6398_v4  ;;  %v9214_v39 = vsel %vm11444_vm3, %v6398_v4, %v6397_v44  ;;  %v1481_v18 = vsel %vm11448_vm8, %v6373_v21, %v6372_v53  ;;  %v11455_v44 = vld [vmem:[#allocation29_spill] sm:$0xff]  ;;  %v6382_v53 = vunpack.i.l.bf16 %v9168_v28  ;;  %vm11459_vm2 = vmmov %vm11458_vm15 }
 0x52f   : > { %v9223_v25 = vpop.permute.xlu0 %6405  ;;  %v5586_v33 = vpack.c.bf16 %v9206_v1, %v9214_v39  ;;  %v5529_v4 = vpack.c.bf16 %v11453_v60, %v1481_v18  ;;  %vm11456_vm9 = vnez %v11455_v44  ;;  %v6421_v21 = vpop.permute.xlu1 %6420  ;;  %v9254_v49 = vsel %vm11459_vm2, %v6413_v23, %v6412_v16  ;;  %v11462_v18 = vld [vmem:[#allocation26_spill] sm:$0xff]  ;;  %v11467_v60 = vld [vmem:[#allocation35_spill] sm:$0xff]  ;;  %v11527_v1 = vld [vmem:[#allocation61_spill] sm:$0xff] }
 0x530   : > { %5519 = vmatpush1.bf16.msk.msra.mxu1 %vm11447_vm10, %v11446_v32  ;;  %vm11457_vm3 = vmpackc.low %vm11454_vm4, %vm11456_vm9  ;;  %v6423_v61 = vunpack.i.h.bf16 %v6421_v21  ;;  %v6422_v41 = vunpack.i.l.bf16 %v6421_v21  ;;  %v9250_v32 = vsel %vm11458_vm15, %v6412_v16, %v6413_v23  ;;  %vm11460_vm10 = vcmp.lt.s32.totalorder %v6837_v20, 82  ;;  %v11532_v39 = vld [vmem:[#allocation65_spill] sm:$0xff] }
 0x531   : > { %5522 = vmatprep.subr.msk.bf16.mxu1 %vm11450_vm6, %v5520_v30  ;;  %v6377_v30 = vunpack.i.l.bf16 %v9170_v48  ;;  %vm11463_vm8 = vnez %v11462_v18  ;;  %vm11468_vm4 = vcmp.lt.s32.totalorder %v6837_v20, 3  ;;  %vm11469_vm9 = vcmp.lt.s32.totalorder %v6837_v20, 13  ;;  %v11475_v48 = vld [vmem:[#allocation10_spill] sm:$0xff] }
 0x532   : > { %vm11466_vm6 = vmpackc.low %vm11463_vm8, %vm11465_vm12  ;;  %v1526_v44 = vsel %vm11468_vm4, %v6382_v53, %v6383_v36  ;;  %vm11472_vm2 = vcmp.lt.s32.totalorder %v6837_v20, 80 }
 0x533   : > { %v6416_v12 = vpop.permute.xlu0 %6415  ;;  %v1503_v21 = vsel %vm11469_vm9, %v6377_v30, %v6378_v6  ;;  %vm11478_vm8 = vmmov %vm11468_vm4 }
 0x534   : > { %5525 = vmatpush1.bf16.msk.msra.mxu1 %vm11457_vm3, %v5523_v58  ;;  %v6418_v59 = vunpack.i.h.bf16 %v6416_v12  ;;  %v6417_v50 = vunpack.i.l.bf16 %v6416_v12  ;;  %v6431_v58 = vpop.permute.xlu1 %6430  ;;  %vm11470_vm3 = vcmp.lt.s32.totalorder %v6837_v20, 81  ;;  %vm11479_vm12 = vmmov %vm11469_vm9  ;;  %vm11482_vm9 = vcmp.lt.s32.totalorder %v6837_v20, 78 }
 0x535   : > { %5528 = vmatprep.subr.msk.bf16.mxu1 %vm8336_vm7, %v5526_v43  ;;  %vm11461_vm7 = vmmov %vm11460_vm10 }
 0x536   : > { %v9258_v28 = vsel %vm11460_vm10, %v6417_v50, %v6418_v59  ;;  %v9262_v10 = vsel %vm11461_vm7, %v6418_v59, %v6417_v50  ;;  %vm11471_vm15 = vmmov %vm11470_vm3  ;;  %v6433_v59 = vunpack.i.h.bf16 %v6431_v58  ;;  %v6432_v50 = vunpack.i.l.bf16 %v6431_v58 }
 0x537   : > { %v6426_v23 = vpop.permute.xlu0 %6425  ;;  %v9286_v12 = vsel %vm11471_vm15, %v6423_v61, %v6422_v41  ;;  %vm11473_vm10 = vmmov %vm11472_vm2  ;;  %vm11476_vm7 = vnez %v11475_v48 }
 0x538   : > { %5531 = vmatpush1.bf16.msk.msra.mxu1 %vm11466_vm6, %v5529_v4  ;;  %v6428_v3 = vunpack.i.h.bf16 %v6426_v23  ;;  %v6427_v43 = vunpack.i.l.bf16 %v6426_v23  ;;  %v9282_v4 = vsel %vm11470_vm3, %v6422_v41, %v6423_v61  ;;  %v5544_v23 = vpack.c.bf16 %v1526_v44, %v1503_v21  ;;  %vm11483_vm3 = vmmov %vm11482_vm9 }
 0x539   : > { %5534 = vmatprep.subr.msk.bf16.mxu1 %vm11412_vm14, %v11467_v60  ;;  %v11474_v60 = vld [vmem:[#allocation34_spill] sm:$0xff]  ;;  %vm11480_vm6 = vcmp.lt.s32.totalorder %v6837_v20, 79  ;;  %v6388_v21 = vunpack.i.h.bf16 %v9184_v29 }
 0x53a   : > { %v9290_v18 = vsel %vm11472_vm2, %v6427_v43, %v6428_v3  ;;  %v9294_v15 = vsel %vm11473_vm10, %v6428_v3, %v6427_v43  ;;  %v1527_v3 = vsel %vm11478_vm8, %v6383_v36, %v6382_v53  ;;  %v1504_v43 = vsel %vm11479_vm12, %v6378_v6, %v6377_v30  ;;  %vm11481_vm4 = vmmov %vm11480_vm6  ;;  %v11484_v36 = vld [vmem:[#allocation38_spill] sm:$0xff]  ;;  %v11485_v53 = vld [vmem:[#allocation40_spill] sm:$0xff] }
 0x53b   : > { %v6436_v16 = vpop.permute.xlu0 %6435  ;;  %v1725_v61 = vsel %vm11481_vm4, %v6433_v59, %v6432_v50  ;;  %v11487_v30 = vld [vmem:[#allocation57_spill] sm:$0xff]  ;;  %v5547_v44 = vpack.c.bf16 %v1527_v3, %v1504_v43  ;;  %vm11489_vm2 = vnez %v11224_v0  ;;  %vm11491_vm10 = vnez %v10888_v7  ;;  %v11495_v3 = vld [vmem:[#allocation46_spill] sm:$0xff] }
 0x53c   : > { %5537 = vmatpush1.bf16.msk.msra.mxu1 %vm11476_vm7, %v11474_v60  ;;  %v6438_v41 = vunpack.i.h.bf16 %v6436_v16  ;;  %v6437_v58 = vunpack.i.l.bf16 %v6436_v16  ;;  %v9312_v60 = vsel %vm11480_vm6, %v6432_v50, %v6433_v59  ;;  %vm11488_vm15 = vnez %v11487_v30  ;;  %v11490_v50 = vld [vmem:[#allocation44_spill] sm:$0xff]  ;;  %v11498_v7 = vld [vmem:[#allocation50_spill] sm:$0xff]  ;;  %v11508_v30 = vld [vmem:[#allocation47_spill] sm:$0xff] }
 0x53d   : > { %5540 = vmatprep.subr.msk.bf16.mxu1 %vm11418_vm0, %v11477_v52  ;;  %vm11486_vm0 = vnez %v11485_v53  ;;  %v6387_v59 = vunpack.i.l.bf16 %v9184_v29  ;;  %vm11492_vm8 = vcmp.lt.s32.totalorder %v6837_v20, 125  ;;  %vm11494_vm12 = vnez %v10893_v51  ;;  %v11503_v51 = vld [vmem:[#allocation49_spill] sm:$0xff]  ;;  %v11506_v53 = vld [vmem:[#allocation56_spill] sm:$0xff] }
 0x53e   : > { %v1747_v16 = vsel %vm11482_vm9, %v6437_v58, %v6438_v41  ;;  %v1748_v5 = vsel %vm11483_vm3, %v6438_v41, %v6437_v58  ;;  %v6393_v41 = vunpack.i.h.bf16 %v9182_v34  ;;  %v6392_v58 = vunpack.i.l.bf16 %v9182_v34  ;;  %vm11497_vm4 = vmmov %vm11492_vm8  ;;  %v11500_v34 = vld [vmem:[#allocation45_spill] sm:$0xff] }
 0x53f   : > { %v5625_v52 = vpack.c.bf16 %v1747_v16, %v9312_v60  ;;  %v5622_v6 = vpack.c.bf16 %v1748_v5, %v1725_v61  ;;  %v1538_v61 = vsel %vm11492_vm8, %v6388_v21, %v6387_v59  ;;  %vm11496_vm6 = vnez %v10778_v40  ;;  %v11505_v5 = vld [vmem:[#allocation52_spill] sm:$0xff] }
 0x540   : > { %5543 = vmatpush1.bf16.msk.msra.mxu1 %vm11486_vm0, %v11484_v36  ;;  %v1537_v0 = vsel %vm11497_vm4, %v6387_v59, %v6388_v21  ;;  %v5562_v29 = vpack.c.bf16 %v1538_v61, %v11498_v7  ;;  %vm11499_vm9 = vcmp.lt.s32.totalorder %v6837_v20, 115  ;;  %vm11501_vm3 = vnez %v10781_v11  ;;  %v11513_v21 = vld [vmem:[#allocation51_spill] sm:$0xff]  ;;  %v1251_v61 = vld [vmem:[%s10437_s2 + $0x98] sm:$0xff] }
 0x541   : > { %5546 = vmatprep.subr.msk.bf16.mxu1 %vm11488_vm15, %v5544_v23  ;;  %v11493_v23 = vld [vmem:[#allocation43_spill] sm:$0xff]  ;;  %v1549_v43 = vsel %vm11499_vm9, %v6393_v41, %v6392_v58  ;;  %vm11502_vm0 = vnez %v11248_v37  ;;  %v5565_v60 = vpack.c.bf16 %v1537_v0, %v11503_v51  ;;  %vm11504_vm15 = vmmov %vm11499_vm9  ;;  %v11514_v37 = vld [vmem:[#allocation54_spill] sm:$0xff]  ;;  %vm11515_vm4 = vnez %v10784_v47 }
 0x542   : > { %v1548_v16 = vsel %vm11504_vm15, %v6392_v58, %v6393_v41  ;;  %v5568_v36 = vpack.c.bf16 %v11505_v5, %v1549_v43  ;;  %v1248_v41 = vld [vmem:[%s10437_s2 + $0x80] sm:$0xff]  ;;  %v11517_v58 = vld [vmem:[#allocation59_spill] sm:$0xff]  ;;  %vm11518_vm9 = vnez %v10961_v13  ;;  %vm11521_vm15 = vnez %v11299_v19  ;;  %v11530_v19 = vld [vmem:[#allocation60_spill] sm:$0xff] }
 0x543   : > { %v5571_v59 = vpack.c.bf16 %v11513_v21, %v1548_v16  ;;  %v6408_v13 = vunpack.i.h.bf16 %v9223_v25  ;;  %v11524_v0 = vpack.c.bf16 %v9202_v42, %v9210_v26  ;;  %v11535_v42 = vld [vmem:[#allocation63_spill] sm:$0xff]  ;;  %v11549_v35 = vpack.c.bf16 %v9294_v15, %v9286_v12 }
 0x544   : > { %5549 = vmatpush1.bf16.msk.msra.mxu1 %vm11489_vm2, %v5547_v44  ;;  %vm11507_vm2 = vnez %v11506_v53  ;;  %v11510_v44 = vld [vmem:[#allocation12_spill] sm:$0xff] }
 0x545   : > { %5552 = vmatprep.subr.msk.bf16.mxu1 %vm11491_vm10, %v11490_v50  ;;  %vm11509_vm10 = vnez %v11508_v30  ;;  %vm11511_vm8 = vnez %v11510_v44  ;;  %v11516_v50 = vld [vmem:[#allocation53_spill] sm:$0xff] }
 0x548   : > { %5555 = vmatpush1.bf16.msk.msra.mxu1 %vm11494_vm12, %v11493_v23  ;;  %vm11512_vm12 = vmpackc.low %vm11509_vm10, %vm11511_vm8  ;;  %v11519_v23 = vld [vmem:[#allocation58_spill] sm:$0xff]  ;;  %vm11525_vm8 = vnez %v11269_v22 }
 0x549   : > { %5558 = vmatprep.subr.msk.bf16.mxu1 %vm11496_vm6, %v11495_v3  ;;  %v6407_v3 = vunpack.i.l.bf16 %v9223_v25  ;;  %v11536_v25 = vld [vmem:[#allocation66_spill] sm:$0xff] }
 0x54c   : > { %5561 = vmatpush1.bf16.msk.msra.mxu1 %vm11501_vm3, %v11500_v34 }
 0x54d   : > { %5564 = vmatprep.subr.msk.bf16.mxu1 %vm11502_vm0, %v5562_v29  ;;  %vm11520_vm0 = vcmask 130048  }
 0x550   : > { %5567 = vmatpush1.bf16.msk.msra.mxu1 %vm11507_vm2, %v5565_v60  ;;  %vm11522_vm2 = vnez %v11297_v57 }
 0x551   : > { %5570 = vmatprep.subr.msk.bf16.mxu1 %vm11512_vm12, %v5568_v36  ;;  %vm11523_vm10 = vmpackc.low %vm11521_vm15, %vm11522_vm2  ;;  %vm11531_vm15 = vnez %v10979_v24  ;;  %vm11533_vm2 = vnez %v10991_v38  ;;  %v6441_v38 = vpop.permute.xlu1 %6440 }
 0x552   : > { %vm11526_vm12 = vmpackc.low %vm11525_vm8, %vm8824_vm5  ;;  %vm11537_vm8 = vnez %v10997_v14  ;;  %v6443_v14 = vunpack.i.h.bf16 %v6441_v38 }
 0x554   : > { %5573 = vmatpush1.bf16.msk.msra.mxu1 %vm8759_vm1, %v5571_v59 }
 0x555   : > { %5576 = vmatprep.subr.msk.bf16.mxu1 %vm11515_vm4, %v11514_v37 }
 0x558   : > { %5579 = vmatpush1.bf16.msk.msra.mxu1 %vm11294_vm13, %v11516_v50 }
 0x559   : > { %5582 = vmatprep.subr.msk.bf16.mxu1 %vm11518_vm9, %v11517_v58  ;;  %vm11528_vm9 = vnez %v10974_v31  ;;  %v11541_v31 = vld [vmem:[#allocation64_spill] sm:$0xff] }
 0x55b   : > { %2389 = vmatmul.mubr.f32.vlgmr.msra.gmra.mrb[2].mxu1 %v1248_v41 }
 0x55c   : > { %5585 = vmatpush1.bf16.msk.msra.mxu1 %vm11307_vm11, %v11519_v23  ;;  %4944 = vmatprep.mubr.msk.f32.mxu1 %vm11520_vm0, %v1251_v61  ;;  %vm11529_vm0 = vcmp.lt.s32.totalorder %v6837_v20, 93 }
 0x55d   : > { %5588 = vmatprep.subr.msk.bf16.mxu1 %vm11523_vm10, %v5586_v33  ;;  %v1618_v57 = vsel %vm11529_vm0, %v6408_v13, %v6407_v3  ;;  %vm11534_vm10 = vmmov %vm11529_vm0  ;;  %v11544_v33 = vpack.c.bf16 %v9262_v10, %v9254_v49 }
 0x55e   : > { %v1617_v22 = vsel %vm11534_vm10, %v6407_v3, %v6408_v13  ;;  %v5604_v26 = vpack.c.bf16 %v1618_v57, %v11535_v42  ;;  %vm11545_vm10 = vnez %v11361_v2 }
 0x55f   : > { %v5607_v24 = vpack.c.bf16 %v1617_v22, %v11541_v31 }
 0x560   : > { %5591 = vmatpush1.bf16.msk.msra.mxu1 %vm11526_vm12, %v11524_v0  ;;  %vm11538_vm12 = vnez %v11331_v46  ;;  %v6442_v46 = vunpack.i.l.bf16 %v6441_v38 }
 0x561   : > { %5594 = vmatprep.subr.msk.bf16.mxu1 %vm11528_vm9, %v11527_v1  ;;  %vm11539_vm9 = vnez %v11338_v45  ;;  %v11548_v45 = vpack.c.bf16 %v9258_v28, %v9250_v32  ;;  %v11558_v32 = vld [vmem:[#allocation13_spill] sm:$0xff]  ;;  %v11560_v28 = vld [vmem:[#allocation16_spill] sm:$0xff] }
 0x562   : > { %vm11540_vm0 = vmpackc.low %vm11538_vm12, %vm11539_vm9  ;;  %vm11551_vm12 = vcmp.lt.s32.totalorder %v6837_v20, 77  ;;  %vm11554_vm9 = vnez %v11380_v8  ;;  %v1250_v8 = vld [vmem:[%s10437_s2 + $0x90] sm:$0xff] }
 0x563   : > { %v1771_v2 = vsel %vm11551_vm12, %v6443_v14, %v6442_v46 }
 0x564   : > { %5597 = vmatpush1.bf16.msk.msra.mxu1 %vm11531_vm15, %v11530_v19  ;;  %vm11542_vm15 = vnez %v11362_v63  ;;  %v11557_v63 = vmov 1.0  }
 0x565   : > { %5600 = vmatprep.subr.msk.bf16.mxu1 %vm11533_vm2, %v11532_v39  ;;  %vm11543_vm2 = vmpackc.low %vm8824_vm5, %vm11542_vm15  ;;  %vm11550_vm5 = vnez %v11378_v54  ;;  %v5628_v54 = vpack.c.bf16 %v11557_v63, %v1771_v2  ;;  %vm11559_vm15 = vnez %v11558_v32 }
 0x568   : > { %5603 = vmatpush1.bf16.msk.msra.mxu1 %vm11537_vm8, %v11536_v25  ;;  %vm11546_vm8 = vnez %v11359_v27  ;;  %v11552_v27 = vpack.c.bf16 %v9290_v18, %v9282_v4  ;;  %v2638_v4 = vld [vmem:[%s10437_s2 + $0x140] sm:$0xff] }
 0x569   : > { %5606 = vmatprep.subr.msk.bf16.mxu1 %vm11540_vm0, %v5604_v26  ;;  %vm11547_vm4 = vmpackc.low %vm11545_vm10, %vm11546_vm8  ;;  %vm11562_vm10 = vcmask 654336   ;;  %v11580_v26 = vld [vmem:[#allocation11_spill] sm:$0xff] }
 0x56a   : > { %vm11556_vm0 = vmmov %vm11551_vm12 }
 0x56b   : > { %v1770_v17 = vsel %vm11556_vm0, %v6442_v46, %v6443_v14  ;;  %vm11569_vm8 = vmmov %vm11562_vm10 }
 0x56c   : > { %5609 = vmatpush1.bf16.msk.msra.mxu1 %vm11543_vm2, %v5607_v24  ;;  %v5631_v49 = vpack.c.bf16 %v11557_v63, %v1770_v17  ;;  %vm11561_vm2 = vnez %v11560_v28  ;;  %v11584_v24 = vld [vmem:[#allocation14_spill] sm:$0xff] }
 0x56d   : > { %5612 = vmatprep.subr.msk.bf16.mxu1 %vm11547_vm4, %v11544_v33  ;;  %vm11553_vm4 = vnez %v11382_v62  ;;  %v2469_v62 = vld [vmem:[%s10437_s2 + $0xe0] sm:$0xff] }
 0x56e   : > { %4980 = vmatmul.mubr.msk.f32.gmra.mrb[6].mxu0 %vm11562_vm10, %v2469_v62 }
 0x56f   : > { %2710 = vmatprep.mubr.f32.mxu0 %v11563_v9 }
 0x570   : > { %5615 = vmatpush1.bf16.msk.msra.mxu1 %vm8759_vm1, %v11548_v45  ;;  %vm11555_vm1 = vmpackc.low %vm11553_vm4, %vm11554_vm9  ;;  %vm11574_vm4 = vcmp.lt.s32.totalorder %v6837_v20, 17 }
 0x571   : > { %5618 = vmatprep.subr.msk.bf16.mxu1 %vm11550_vm5, %v11549_v35  ;;  %vm11572_vm5 = vcmp.lt.s32.totalorder %v6837_v20, 16  ;;  %vm11575_vm9 = vmmov %vm11574_vm4 }
 0x572   : > { %vm11573_vm12 = vmmov %vm11572_vm5 }
 0x574   : > { %5621 = vmatpush1.bf16.msk.msra.mxu1 %vm11294_vm13, %v11552_v27 }
 0x575   : > { %5624 = vmatprep.subr.msk.bf16.mxu1 %vm11555_vm1, %v5622_v6  ;;  %v2639_v6 = vld [vmem:[%s10437_s2 + $0x160] sm:$0xff]  ;;  %vm11576_vm1 = vcmp.lt.s32.totalorder %v6837_v20, 1 }
 0x576   : > { %vm11577_vm0 = vmmov %vm11576_vm1 }
 0x578   : > { %5627 = vmatpush1.bf16.msk.msra.mxu1 %vm11307_vm11, %v5625_v52  ;;  %vm11564_vm11 = vmmov %vm11562_vm10  ;;  %vm11582_vm10 = vcmp.lt.s32.totalorder %v6837_v20, 127 }
 0x579   : > { %5630 = vmatprep.subr.msk.bf16.mxu1 %vm11559_vm15, %v5628_v54  ;;  %4997 = vmatmul.mubr.msk.f32.vlgmr.msra.gmra.mrb[4].mxu0 %vm11564_vm11, %v2638_v4  ;;  %vm11578_vm15 = vcmp.lt.s32.totalorder %v6837_v20, 15  ;;  %vm11583_vm11 = vmmov %vm11582_vm10  ;;  %v11595_v4 = vld [vmem:[#allocation17_spill] sm:$0xff] }
 0x57a   : > { %2716 = vmatprep.mubr.f32.mxu0 %v11563_v9 }
 0x57c   : > { %5633 = vmatpush1.bf16.msk.msra.mxu1 %vm11561_vm2, %v5631_v49  ;;  %vm11579_vm2 = vmmov %vm11578_vm15 }
 0x57d   : > { %4998 = vmatmul.mubr.msk.f32.gmra.mrb[6].mxu0 %vm11569_vm8, %v2639_v6  ;;  %vm11585_vm8 = vnez %v11584_v24 }
 0x57e   : > { %2863 = vmatprep.mubr.f32.mxu0 %v11563_v9 }
 0x57f   : > { %2460 = vmatmul.mubr.f32.vlgmr.msra.gmra.mrb[2].mxu1 %v1250_v8 }
 0x652   : > { %v2461_v10 = vpop.f32.mrb[2].mxu1 }
 0x653   : > { %v2466_v12 = vmax.f32 %v2461_v10, 0.0  ;;  %v2463_v18 = vpop.f32.mrb[3].mxu1  ;;  %v11593_v10 = vld [vmem:[#allocation15_spill] sm:$0xff] }
 0x654   : > { %v2467_v15 = vmax.f32 %v2463_v18, 0.0 }
 0x656   : > { %v6449_v52 = vpack.i.bf16 %v2467_v15, %v2466_v12 }
 0x658   : > { %6450 = vrot.lane.b32.xlu1 %v6449_v52, %s11565_s24  ;;  %6445 = vrot.lane.b32.xlu0 %v6449_v52, %s11566_s25  ;;  %s10366_s25 = scalar_lea.vmem %s10438_s3, %s5057_s28 }
 0x65c   : > { %6460 = vrot.lane.b32.xlu1 %v6449_v52, %s11567_s26  ;;  %6455 = vrot.lane.b32.xlu0 %v6449_v52, %s11568_s27 }
 0x660   : > { %6470 = vrot.lane.b32.xlu1 %v6449_v52, %s11570_s8  ;;  %6465 = vrot.lane.b32.xlu0 %v6449_v52, %s11571_s29 }
 0x664   : > { %6480 = vrot.lane.b32.xlu1 %v6449_v52, %s11088_s19  ;;  %6475 = vrot.lane.b32.xlu0 %v6449_v52, %s11089_s6 }
 0x6ca   : > { %v6451_v7 = vpop.permute.xlu1 %6450  ;;  %v6446_v29 = vpop.permute.xlu0 %6445 }
 0x6cb   : > { %v6453_v43 = vunpack.i.h.bf16 %v6451_v7  ;;  %v6452_v34 = vunpack.i.l.bf16 %v6451_v7  ;;  %v6448_v51 = vunpack.i.h.bf16 %v6446_v29  ;;  %v6447_v60 = vunpack.i.l.bf16 %v6446_v29 }
 0x6cd   : > { %v2741_v16 = vsel %vm11572_vm5, %v6452_v34, %v6453_v43  ;;  %v2742_v5 = vsel %vm11573_vm12, %v6453_v43, %v6452_v34  ;;  %v2733_v36 = vsel %vm11574_vm4, %v6447_v60, %v6448_v51  ;;  %v2734_v53 = vsel %vm11575_vm9, %v6448_v51, %v6447_v60  ;;  %v11599_v51 = vld [vmem:[#allocation2_spill] sm:$0xff] }
 0x6ce   : > { %v5727_v30 = vpack.c.bf16 %v2742_v5, %v2734_v53  ;;  %v6461_v44 = vpop.permute.xlu1 %6460  ;;  %v6456_v21 = vpop.permute.xlu0 %6455  ;;  %v5724_v59 = vpack.c.bf16 %v2741_v16, %v2733_v36  ;;  %vm11588_vm12 = vcmp.lt.s32.totalorder %v6837_v20, 111  ;;  %vm11589_vm4 = vcmp.lt.s32.totalorder %v6837_v20, 112  ;;  %v2884_v16 = vld [vmem:[%s10437_s2 + $0x1c0] sm:$0xff] }
 0x6cf   : > { %v6463_v37 = vunpack.i.h.bf16 %v6461_v44  ;;  %v6462_v50 = vunpack.i.l.bf16 %v6461_v44  ;;  %v6458_v41 = vunpack.i.h.bf16 %v6456_v21  ;;  %v6457_v58 = vunpack.i.l.bf16 %v6456_v21  ;;  %vm11590_vm9 = vmmov %vm11589_vm4  ;;  %v2970_v5 = vld [vmem:[%s10437_s2 + $0x200] ss:$0 sm:$0xff] }
 0x6d0   : > { %5726 = vmatprep.subr.msk.bf16.mxu0 %vm11412_vm14, %v5724_v59  ;;  %vm11581_vm14 = vnez %v11580_v26  ;;  %v2885_v36 = vld [vmem:[%s10437_s2 + $0x1e0] sm:$0xff]  ;;  %v11603_v53 = vmov 0  }
 0x6d1   : > { %v2757_v61 = vsel %vm11576_vm1, %v6462_v50, %v6463_v37  ;;  %v2758_v23 = vsel %vm11577_vm0, %v6463_v37, %v6462_v50  ;;  %v2749_v13 = vsel %vm11578_vm15, %v6457_v58, %v6458_v41  ;;  %v2750_v3 = vsel %vm11579_vm2, %v6458_v41, %v6457_v58  ;;  %5729 = vmatpush1.bf16.msk.msra.mxu0 %vm11476_vm7, %v5727_v30 }
 0x6d2   : > { %v5733_v0 = vpack.c.bf16 %v2758_v23, %v2750_v3  ;;  %v6471_v1 = vpop.permute.xlu1 %6470  ;;  %v6466_v57 = vpop.permute.xlu0 %6465  ;;  %v5730_v55 = vpack.c.bf16 %v2757_v61, %v2749_v13  ;;  %vm11586_vm7 = vcmp.lt.s32.totalorder %v6837_v20, 113  ;;  %vm11592_vm1 = vnez %v10784_v47  ;;  %v2727_v20 = vld [vmem:[%s10437_s2 + $0x180] sm:$0xff] }
 0x6d3   : > { %v6468_v19 = vunpack.i.h.bf16 %v6466_v57  ;;  %v6467_v39 = vunpack.i.l.bf16 %v6466_v57  ;;  %v6473_v22 = vunpack.i.h.bf16 %v6471_v1  ;;  %v6472_v42 = vunpack.i.l.bf16 %v6471_v1  ;;  %vm11587_vm5 = vmmov %vm11586_vm7  ;;  %v2728_v47 = vld [vmem:[%s10437_s2 + $0x1a0] sm:$0xff] }
 0x6d4   : > { %5732 = vmatprep.subr.msk.bf16.mxu0 %vm11581_vm14, %v5730_v55  ;;  %vm11594_vm0 = vnez %v11593_v10  ;;  %vm11597_vm15 = vcmask 654336   ;;  %vm11600_vm2 = vcmp.eq.s32.totalorder %v11599_v51, 0 }
 0x6d5   : > { %v2765_v25 = vsel %vm11582_vm10, %v6467_v39, %v6468_v19  ;;  %v2766_v31 = vsel %vm11583_vm11, %v6468_v19, %v6467_v39  ;;  %5735 = vmatpush1.bf16.msk.msra.mxu0 %vm11585_vm8, %v5733_v0  ;;  %v2773_v27 = vsel %vm11586_vm7, %v6472_v42, %v6473_v22  ;;  %v2774_v17 = vsel %vm11587_vm5, %v6473_v22, %v6472_v42  ;;  %vm11601_vm14 = vmmov %vm11600_vm2 }
 0x6d6   : > { %v5739_v48 = vpack.c.bf16 %v2765_v25, %v2466_v12  ;;  %v6481_v38 = vpop.permute.xlu1 %6480  ;;  %v6476_v33 = vpop.permute.xlu0 %6475  ;;  %v5736_v14 = vpack.c.bf16 %v2766_v31, %v2467_v15  ;;  %v218_v60 = vsel %vm11600_vm2, 1.0, %v11563_v9  ;;  %vm2886_vm10 = vcmask 195584   ;;  %vm11602_vm11 = vmmov %vm11600_vm2 }
 0x6d7   : > { %v6483_v46 = vunpack.i.h.bf16 %v6481_v38  ;;  %v6482_v45 = vunpack.i.l.bf16 %v6481_v38  ;;  %v6478_v35 = vunpack.i.h.bf16 %v6476_v33  ;;  %v6477_v2 = vunpack.i.l.bf16 %v6476_v33 }
 0x6d8   : > { %5738 = vmatprep.subr.msk.bf16.mxu0 %vm11496_vm6, %v5736_v14  ;;  %vm11591_vm6 = vmmov %vm11588_vm12  ;;  %vm3359_vm8 = vcmask 1044484  }
 0x6d9   : > { %v2790_v54 = vsel %vm11588_vm12, %v6483_v46, %v6482_v45  ;;  %v2781_v32 = vsel %vm11589_vm4, %v6477_v2, %v6478_v35  ;;  %v2782_v49 = vsel %vm11590_vm9, %v6478_v35, %v6477_v2  ;;  %5741 = vmatpush1.bf16.msk.msra.mxu0 %vm11501_vm3, %v5739_v48  ;;  %v2789_v40 = vsel %vm11591_vm6, %v6482_v45, %v6483_v46 }
 0x6da   : > { %v5745_v28 = vpack.c.bf16 %v2781_v32, %v2773_v27  ;;  %v5742_v8 = vpack.c.bf16 %v2782_v49, %v2774_v17  ;;  %v5748_v62 = vpack.c.bf16 %v11557_v63, %v2790_v54  ;;  %v5751_v11 = vpack.c.bf16 %v11557_v63, %v2789_v40 }
 0x6db   : > { %vm11596_vm3 = vnez %v11595_v4 }
 0x6dc   : > { %5744 = vmatprep.subr.msk.bf16.mxu0 %vm11592_vm1, %v5742_v8 }
 0x6dd   : > { %5747 = vmatpush1.bf16.msk.msra.mxu0 %vm11294_vm13, %v5745_v28  ;;  %vm11598_vm13 = vmmov %vm11597_vm15 }
 0x6de   : > { %5750 = vmatprep.subr.msk.bf16.mxu0 %vm11594_vm0, %v5748_v62 }
 0x6e1   : > { %5753 = vmatpush1.bf16.msk.msra.mxu0 %vm11596_vm3, %v5751_v11 }
 0x6e4   : > { %5015 = vmatmul.mubr.msk.f32.vlgmr.msra.gmra.mrb[4].mxu0 %vm11597_vm15, %v2727_v20 }
 0x6e5   : > { %2869 = vmatprep.mubr.f32.mxu0 %v11563_v9 }
 0x6e8   : > { %5016 = vmatmul.mubr.msk.f32.gmra.mrb[6].mxu0 %vm11598_vm13, %v2728_v47 }
 0x6e9   : > { %2957 = vmatprep.mubr.f32.mxu0 %v11563_v9 }
 0x7b7   : > { %v2865_v56 = vpop.f32.mrb[4].mxu0 }
 0x7b8   : > { %v2880_v12 = vmax.f32 %v2865_v56, 0.0  ;;  %v2867_v18 = vpop.f32.mrb[5].mxu0 }
 0x7b9   : > { %v2881_v15 = vmax.f32 %v2867_v18, 0.0 }
 0x7ba   : > { %4540 = vst [vmem:[%s210_s17] sm:$0xff] %v2880_v12  ;;  %2971 = vxpose.xlu0.b32.start [1/3] (short) %v2880_v12, 128 }
 0x7bb   : > { %4541 = vst [vmem:[%s210_s17 + $0x8] sm:$0xff] %v2881_v15  ;;  %3003 = vxpose.xlu1.b32.start [1/3] (short) %v2881_v15, 128  ;;  %v2871_v52 = vpop.f32.mrb[6].mxu0 }
 0x7bc   : > { %v2882_v6 = vmax.f32 %v2871_v52, 0.0  ;;  %v2873_v7 = vpop.f32.mrb[7].mxu0 }
 0x7bd   : > { %v2883_v29 = vmax.f32 %v2873_v7, 0.0 }
 0x7be   : > { %v5756_v43 = vpack.c.bf16 %v2882_v6, %v2880_v12  ;;  %4542 = vst [vmem:[%s210_s17 + $0x10] sm:$0xf] %v2882_v6  ;;  %2972 = vxpose.xlu0.b32.cont [2/3] (short) %v2882_v6, 128 }
 0x7bf   : > { %4543 = vst [vmem:[%s210_s17 + $0x18] sm:$0xf] %v2883_v29  ;;  %3004 = vxpose.xlu1.b32.cont [2/3] (short) %v2883_v29, 128  ;;  %v5754_v34 = vpack.c.bf16 %v2883_v29, %v2881_v15 }
 0x7c1   : > { %5755 = vmatprep.subr.bf16.mxu0 %v5754_v34 }
 0x7c2   : > { %2973 = vxpose.xlu0.b32.end [3/3] (short) %v218_v60, 128  ;;  %5757 = vmatpush1.bf16.msra.mxu0 %v5756_v43 }
 0x7c3   : > { %5017 = vmatprep.subr.msk.mxu0 %vm11601_vm14, %v11557_v63  ;;  %3005 = vxpose.xlu1.b32.end [3/3] (short) %v218_v60, 128 }
 0x7c6   : > { %5018 = vmatpush1.msk.msra.mxu0 %vm11602_vm11, %v11557_v63 }
 0x7c7   : > { %5019 = vmatmul.mubr.msk.f32.vlgmr.msra.gmra.mrb[8].mxu0 %vm2886_vm10, %v2884_v16  ;;  %5092 = vmatprep.subr.msk.mxu0 %vm2886_vm10, %v2970_v5 }
 0x7c8   : > { %2963 = vmatprep.mubr.f32.mxu0 %v11563_v9 }
 0x7cb   : > { %5020 = vmatmul.mubr.msk.f32.gmra.mrb[10].mxu0 %vm2886_vm10, %v2885_v36 }
 0x7cd   : > { %5093 = vmatpush3.xpose.msk.msra.mxu0 %vm2886_vm10, %v2970_v5 }
 0x7e1   : > { %6485 = vset.pattern.permute.xlu1 %v11603_v53 }
 0x7eb   : > { %6484 = vset.pattern.permute.xlu0 %v11603_v53 }
 0x83a   : > { %v2987_v30 = vpop.trf.xlu0 }
 0x83b   : > { %5094 = vmatprep.mubr.msk.f32.mxu0 %vm2886_vm10, %v2987_v30  ;;  %v3019_v63 = vpop.trf.xlu1 }
 0x83e   : > { %v2988_v44 = vpop.trf.xlu0 }
 0x83f   : > { %5095 = vmatmul.mubr.msk.f32.vlgmr.msra.gmra.mrb[12].mxu0 %vm2886_vm10, %v2988_v44  ;;  %v3020_v9 = vpop.trf.xlu1  ;;  %v9689_v44 = vsub.s32 4, %v11599_v51 }
 0x842   : > { %v2989_v21 = vpop.trf.xlu0 }
 0x843   : > { %5097 = vmatprep.mubr.msk.f32.mxu0 %vm2886_vm10, %v2989_v21  ;;  %v3021_v37 = vpop.trf.xlu1 }
 0x846   : > { %v2990_v59 = vpop.trf.xlu0 }
 0x847   : > { %5098 = vmatmul.mubr.msk.f32.gmra.mrb[14].mxu0 %vm2886_vm10, %v2990_v59  ;;  %v3022_v41 = vpop.trf.xlu1 }
 0x84a   : > { %v2991_v50 = vpop.trf.xlu0 }
 0x84b   : > { %5100 = vmatprep.mubr.msk.f32.mxu0 %vm2886_vm10, %v2991_v50  ;;  %v3023_v23 = vpop.trf.xlu1 }
 0x84e   : > { %v2992_v58 = vpop.trf.xlu0 }
 0x84f   : > { %5101 = vmatmul.mubr.msk.f32.gmra.mrb[16].mxu0 %vm2886_vm10, %v2992_v58  ;;  %v3024_v3 = vpop.trf.xlu1 }
 0x852   : > { %v2993_v61 = vpop.trf.xlu0 }
 0x853   : > { %5103 = vmatprep.mubr.msk.f32.mxu0 %vm2886_vm10, %v2993_v61  ;;  %v3025_v57 = vpop.trf.xlu1 }
 0x856   : > { %v2994_v13 = vpop.trf.xlu0 }
 0x857   : > { %5104 = vmatmul.mubr.msk.f32.gmra.mrb[18].mxu0 %vm2886_vm10, %v2994_v13  ;;  %v3026_v19 = vpop.trf.xlu1 }
 0x85a   : > { %v2995_v0 = vpop.trf.xlu0 }
 0x85b   : > { %5106 = vmatprep.mubr.msk.f32.mxu0 %vm2886_vm10, %v2995_v0  ;;  %v3027_v42 = vpop.trf.xlu1 }
 0x85e   : > { %v2996_v1 = vpop.trf.xlu0 }
 0x85f   : > { %5107 = vmatmul.mubr.msk.f32.gmra.mrb[20].mxu0 %vm2886_vm10, %v2996_v1  ;;  %v3028_v25 = vpop.trf.xlu1 }
 0x862   : > { %v2997_v55 = vpop.trf.xlu0 }
 0x863   : > { %5109 = vmatprep.mubr.msk.f32.mxu0 %vm2886_vm10, %v2997_v55  ;;  %v3029_v48 = vpop.trf.xlu1 }
 0x866   : > { %v2998_v39 = vpop.trf.xlu0 }
 0x867   : > { %5110 = vmatmul.mubr.msk.f32.gmra.mrb[22].mxu0 %vm2886_vm10, %v2998_v39  ;;  %v3030_v38 = vpop.trf.xlu1 }
 0x86a   : > { %v2999_v22 = vpop.trf.xlu0 }
 0x86b   : > { %5112 = vmatprep.mubr.msk.f32.mxu0 %vm2886_vm10, %v2999_v22  ;;  %v3031_v33 = vpop.trf.xlu1 }
 0x86e   : > { %v3000_v26 = vpop.trf.xlu0 }
 0x86f   : > { %5113 = vmatmul.mubr.msk.f32.gmra.mrb[24].mxu0 %vm2886_vm10, %v3000_v26  ;;  %v3032_v14 = vpop.trf.xlu1 }
 0x872   : > { %v3001_v31 = vpop.trf.xlu0 }
 0x873   : > { %5115 = vmatprep.mubr.msk.f32.mxu0 %vm2886_vm10, %v3001_v31  ;;  %v3033_v46 = vpop.trf.xlu1 }
 0x876   : > { %v3002_v24 = vpop.trf.xlu0 }
 0x877   : > { %5116 = vmatmul.mubr.msk.f32.gmra.mrb[26].mxu0 %vm2886_vm10, %v3002_v24  ;;  %v3034_v45 = vpop.trf.xlu1 }
 0x878   : > { %5118 = vmatprep.mubr.msk.f32.mxu0 %vm2886_vm10, %v3019_v63 }
 0x87b   : > { %5119 = vmatmul.mubr.msk.f32.gmra.mrb[28].mxu0 %vm2886_vm10, %v3020_v9 }
 0x87c   : > { %5121 = vmatprep.mubr.msk.f32.mxu0 %vm2886_vm10, %v3021_v37 }
 0x87f   : > { %5122 = vmatmul.mubr.msk.f32.gmra.mrb[30].mxu0 %vm2886_vm10, %v3022_v41 }
 0x880   : > { %5124 = vmatprep.mubr.msk.f32.mxu0 %vm2886_vm10, %v3023_v23 }
 0x883   : > { %5125 = vmatmul.mubr.msk.f32.gmra.mrb[32].mxu0 %vm2886_vm10, %v3024_v3 }
 0x884   : > { %5127 = vmatprep.mubr.msk.f32.mxu0 %vm2886_vm10, %v3025_v57 }
 0x887   : > { %5128 = vmatmul.mubr.msk.f32.gmra.mrb[34].mxu0 %vm2886_vm10, %v3026_v19 }
 0x888   : > { %5130 = vmatprep.mubr.msk.f32.mxu0 %vm2886_vm10, %v3027_v42 }
 0x88b   : > { %5131 = vmatmul.mubr.msk.f32.gmra.mrb[36].mxu0 %vm2886_vm10, %v3028_v25 }
 0x88c   : > { %5133 = vmatprep.mubr.msk.f32.mxu0 %vm2886_vm10, %v3029_v48 }
 0x88f   : > { %5134 = vmatmul.mubr.msk.f32.gmra.mrb[38].mxu0 %vm2886_vm10, %v3030_v38 }
 0x890   : > { %5136 = vmatprep.mubr.msk.f32.mxu0 %vm2886_vm10, %v3031_v33 }
 0x893   : > { %5137 = vmatmul.mubr.msk.f32.gmra.mrb[40].mxu0 %vm2886_vm10, %v3032_v14 }
 0x894   : > { %5139 = vmatprep.mubr.msk.f32.mxu0 %vm2886_vm10, %v3033_v46 }
 0x897   : > { %5140 = vmatmul.mubr.msk.f32.gmra.mrb[42].mxu0 %vm2886_vm10, %v3034_v45 }
 0x89a   : > { %v2959_v35 = vpop.f32.mrb[8].mxu0 }
 0x89b   : > { %v2961_v2 = vpop.f32.mrb[9].mxu0 }
 0x89e   : > { %v9623_v27 = vpop.f32.mrb[10].mxu0 }
 0x89f   : > { %v5760_v17 = vpack.c.bf16 %v9623_v27, %v2959_v35  ;;  %v9626_v54 = vpop.f32.mrb[11].mxu0  ;;  %v3365_v32 = vsel %vm3359_vm8, %v9623_v27, inf  ;;  %v3360_v49 = vsel %vm3359_vm8, %v9623_v27, -inf }
 0x8a0   : > { %v3366_v28 = vsel %vm3359_vm8, %v9626_v54, inf  ;;  %v3361_v8 = vsel %vm3359_vm8, %v9626_v54, -inf  ;;  %v5758_v40 = vpack.c.bf16 %v9626_v54, %v2961_v2 }
 0x8a1   : > { %v3367_v62 = vmin.f32 %v3365_v32, %v3366_v28  ;;  %v3362_v10 = vmax.f32 %v3360_v49, %v3361_v8 }
 0x8a2   : > { %5759 = vmatprep.subr.bf16.mxu0 %v5758_v40  ;;  %5762 = vmatprep.subr.bf16.mxu1 %v5758_v40 }
 0x8a3   : > { %3368 = vmin.xlane.f32.xlu1 %v3367_v62  ;;  %3363 = vmax.xlane.f32.xlu0 %v3362_v10 }
 0x8a4   : > { %5761 = vmatpush1.bf16.xpose.msra.mxu0 %v5760_v17  ;;  %5763 = vmatpush1.bf16.xpose.msra.mxu1 %v5760_v17 }
 0x912   : > { %v9633_v11 = vpop.f32.mrb[12].mxu0 }
 0x913   : > { %3513 = vperm.xlu0 %6484, %v9633_v11   ;;  %v9636_v4 = vpop.f32.mrb[13].mxu0  ;;  %vm3371_vm3 = vcmp.ge.f32.partialorder %v9633_v11, 0.0 }
 0x914   : > { %vm3370_vm6 = vcmp.ge.f32.partialorder %v9636_v4, 0.0 }
 0x917   : > { %3508 = vperm.xlu0 %6484, %v9636_v4  }
 0x91a   : > { %v9639_v20 = vpop.f32.mrb[14].mxu0 }
 0x91b   : > { %3523 = vperm.xlu0 %6484, %v9639_v20   ;;  %v9642_v47 = vpop.f32.mrb[15].mxu0  ;;  %vm3373_vm11 = vcmp.ge.f32.partialorder %v9639_v20, 0.0 }
 0x91c   : > { %vm3372_vm2 = vcmp.ge.f32.partialorder %v9642_v47, 0.0 }
 0x91f   : > { %3518 = vperm.xlu0 %6484, %v9642_v47  }
 0x922   : > { %v9645_v56 = vpop.f32.mrb[16].mxu0 }
 0x923   : > { %3533 = vperm.xlu0 %6484, %v9645_v56   ;;  %v9648_v12 = vpop.f32.mrb[17].mxu0 }
 0x924   : > { %vm3374_vm8 = vcmp.ge.f32.partialorder %v9648_v12, 0.0 }
 0x927   : > { %3528 = vperm.xlu0 %6484, %v9648_v12  }
 0x92a   : > { %v9651_v18 = vpop.f32.mrb[18].mxu0 }
 0x92b   : > { %3543 = vperm.xlu0 %6484, %v9651_v18   ;;  %v9654_v15 = vpop.f32.mrb[19].mxu0 }
 0x92f   : > { %3538 = vperm.xlu0 %6484, %v9654_v15  }
 0x930   : > { %v3369_v53 = vpop.xlane.xlu1 %3368  ;;  %v3364_v30 = vpop.xlane.xlu0 %3363 }
 0x931   : > { %v9695_v21 = vrot.slane %v3369_v53, %v9689_v44  ;;  %v9698_v59 = vrot.slane %v3364_v30, %v9689_v44 }
 0x932   : > { %v9657_v52 = vpop.f32.mrb[20].mxu0 }
 0x933   : > { %3553 = vperm.xlu0 %6484, %v9657_v52   ;;  %v9660_v6 = vpop.f32.mrb[21].mxu0  ;;  %v3442_v55 = vmul.f32 %v9695_v21, %v9636_v4  ;;  %v3406_v19 = vmul.f32 %v9698_v59, %v9636_v4  ;;  %v3443_v38 = vmul.f32 %v9633_v11, %v9695_v21  ;;  %v3407_v33 = vmul.f32 %v9633_v11, %v9698_v59 }
 0x934   : > { %v3444_v8 = vmul.f32 %v9695_v21, %v9642_v47  ;;  %v3408_v40 = vmul.f32 %v9698_v59, %v9642_v47 }
 0x935   : > { %v3474_v14 = vsel %vm3370_vm6, %v3406_v19, %v3442_v55  ;;  %v3475_v62 = vsel %vm3371_vm3, %v3407_v33, %v3443_v38  ;;  %v3447_v38 = vmul.f32 %v9645_v56, %v9695_v21  ;;  %vm3378_vm6 = vcmp.ge.f32.partialorder %v9660_v6, 0.0 }
 0x937   : > { %3548 = vperm.xlu0 %6484, %v9660_v6  }
 0x93a   : > { %v9663_v7 = vpop.f32.mrb[22].mxu0 }
 0x93b   : > { %3563 = vperm.xlu0 %6484, %v9663_v7   ;;  %v9666_v29 = vpop.f32.mrb[23].mxu0 }
 0x93f   : > { %3558 = vperm.xlu0 %6484, %v9666_v29  }
 0x942   : > { %v9669_v43 = vpop.f32.mrb[24].mxu0 }
 0x943   : > { %3573 = vperm.xlu1 %6485, %v9669_v43   ;;  %v9672_v34 = vpop.f32.mrb[25].mxu0 }
 0x947   : > { %3568 = vperm.xlu1 %6485, %v9672_v34  }
 0x94a   : > { %v9675_v60 = vpop.f32.mrb[26].mxu0 }
 0x94b   : > { %3583 = vperm.xlu0 %6484, %v9675_v60   ;;  %v9678_v16 = vpop.f32.mrb[27].mxu0 }
 0x94c   : > { %3578 = vperm.xlu1 %6485, %v9678_v16   ;;  %vm3384_vm3 = vcmp.ge.f32.partialorder %v9678_v16, 0.0 }
 0x94e   : > { %v9681_v5 = vpop.f32.mrb[28].mxu0 }
 0x94f   : > { %3593 = vperm.xlu0 %6484, %v9681_v5   ;;  %v9684_v36 = vpop.f32.mrb[29].mxu0 }
 0x952   : > { %v9686_v63 = vpop.f32.mrb[30].mxu0 }
 0x953   : > { %3588 = vperm.xlu0 %6484, %v9684_v36   ;;  %v9692_v9 = vpop.f32.mrb[31].mxu0 }
 0x956   : > { %v5126_v37 = vpop.f32.mrb[32].mxu0 }
 0x957   : > { %v3427_v50 = vmul.f32 %v5126_v37, %v9698_v59  ;;  %v3463_v41 = vmul.f32 %v5126_v37, %v9695_v21  ;;  %3603 = vperm.xlu0 %6484, %v9686_v63   ;;  %3613 = vperm.xlu1 %6485, %v5126_v37   ;;  %v9703_v51 = vpop.f32.mrb[33].mxu0  ;;  %vm3391_vm7 = vcmp.ge.f32.partialorder %v5126_v37, 0.0 }
 0x959   : > { %v9705_v58 = vsel %vm3391_vm7, %v3427_v50, %v3463_v41  ;;  %vm3375_vm7 = vcmp.ge.f32.partialorder %v9645_v56, 0.0 }
 0x95a   : > { %v5129_v61 = vpop.f32.mrb[34].mxu0 }
 0x95b   : > { %v3429_v23 = vmul.f32 %v5129_v61, %v9698_v59  ;;  %v3465_v13 = vmul.f32 %v5129_v61, %v9695_v21  ;;  %3598 = vperm.xlu0 %6484, %v9692_v9   ;;  %3623 = vperm.xlu1 %6485, %v5129_v61   ;;  %v3310_v3 = vpop.f32.mrb[35].mxu0  ;;  %vm3393_vm5 = vcmp.ge.f32.partialorder %v5129_v61, 0.0  ;;  %v3445_v61 = vmul.f32 %v9639_v20, %v9695_v21 }
 0x95c   : > { %v3428_v0 = vmul.f32 %v9698_v59, %v3310_v3  ;;  %v3464_v1 = vmul.f32 %v9695_v21, %v3310_v3  ;;  %vm3392_vm12 = vcmp.ge.f32.partialorder %v3310_v3, 0.0 }
 0x95d   : > { %v9712_v57 = vsel %vm3393_vm5, %v3429_v23, %v3465_v13  ;;  %v3409_v23 = vmul.f32 %v9639_v20, %v9698_v59  ;;  %v3476_v13 = vsel %vm3372_vm2, %v3408_v40, %v3444_v8  ;;  %v3411_v20 = vmul.f32 %v9645_v56, %v9698_v59 }
 0x95e   : > { %v5132_v39 = vpop.f32.mrb[36].mxu0  ;;  %v9718_v22 = vsel %vm3392_vm12, %v3428_v0, %v3464_v1  ;;  %vm3381_vm5 = vcmp.ge.f32.partialorder %v9663_v7, 0.0  ;;  %v3413_v56 = vmul.f32 %v9651_v18, %v9698_v59  ;;  %vm3376_vm12 = vcmp.ge.f32.partialorder %v9654_v15, 0.0 }
 0x95f   : > { %3608 = vperm.xlu0 %6484, %v9703_v51   ;;  %3618 = vperm.xlu1 %6485, %v3310_v3   ;;  %v3431_v42 = vmul.f32 %v5132_v39, %v9698_v59  ;;  %v3467_v26 = vmul.f32 %v5132_v39, %v9695_v21  ;;  %v3320_v25 = vpop.f32.mrb[37].mxu0  ;;  %vm3395_vm4 = vcmp.ge.f32.partialorder %v5132_v39, 0.0  ;;  %vm3386_vm2 = vcmp.ge.f32.partialorder %v9684_v36, 0.0 }
 0x960   : > { %v3430_v31 = vmul.f32 %v9698_v59, %v3320_v25  ;;  %v3466_v24 = vmul.f32 %v9695_v21, %v3320_v25  ;;  %vm3394_vm9 = vcmp.ge.f32.partialorder %v3320_v25, 0.0 }
 0x961   : > { %v9726_v48 = vsel %vm3395_vm4, %v3431_v42, %v3467_v26  ;;  %v3446_v26 = vmul.f32 %v9695_v21, %v9648_v12  ;;  %vm3382_vm4 = vcmp.ge.f32.partialorder %v9672_v34, 0.0 }
 0x962   : > { %v5135_v46 = vpop.f32.mrb[38].mxu0  ;;  %v9732_v45 = vsel %vm3394_vm9, %v3430_v31, %v3466_v24  ;;  %v3477_v31 = vsel %vm3373_vm11, %v3409_v23, %v3445_v61  ;;  %vm3377_vm9 = vcmp.ge.f32.partialorder %v9651_v18, 0.0  ;;  %v3421_v23 = vmul.f32 %v9675_v60, %v9698_v59 }
 0x963   : > { %3740 = vperm.xlu0 %6484, %v3474_v14   ;;  %3633 = vperm.xlu1 %6485, %v5132_v39   ;;  %v3433_v35 = vmul.f32 %v5135_v46, %v9698_v59  ;;  %v3469_v2 = vmul.f32 %v5135_v46, %v9695_v21  ;;  %v3330_v17 = vpop.f32.mrb[39].mxu0  ;;  %vm3397_vm1 = vcmp.ge.f32.partialorder %v5135_v46, 0.0  ;;  %v3448_v14 = vmul.f32 %v9695_v21, %v9654_v15 }
 0x964   : > { %v3432_v32 = vmul.f32 %v9698_v59, %v3330_v17  ;;  %v3468_v49 = vmul.f32 %v9695_v21, %v3330_v17  ;;  %vm3396_vm0 = vcmp.ge.f32.partialorder %v3330_v17, 0.0  ;;  %vm3389_vm11 = vcmp.ge.f32.partialorder %v9686_v63, 0.0 }
 0x965   : > { %v9739_v28 = vsel %vm3397_vm1, %v3433_v35, %v3469_v2  ;;  %v3453_v35 = vmul.f32 %v9663_v7, %v9695_v21  ;;  %v3479_v2 = vsel %vm3375_vm7, %v3411_v20, %v3447_v38  ;;  %vm3383_vm1 = vcmp.ge.f32.partialorder %v9669_v43, 0.0 }
 0x966   : > { %v5138_v10 = vpop.f32.mrb[40].mxu0  ;;  %v9745_v4 = vsel %vm3396_vm0, %v3432_v32, %v3468_v49  ;;  %v3418_v32 = vmul.f32 %v9698_v59, %v9672_v34  ;;  %v3454_v49 = vmul.f32 %v9695_v21, %v9672_v34  ;;  %v3415_v34 = vmul.f32 %v9657_v52, %v9698_v59 }
 0x967   : > { %3745 = vperm.xlu0 %6484, %v3475_v62   ;;  %3628 = vperm.xlu1 %6485, %v3320_v25   ;;  %v3435_v53 = vmul.f32 %v5138_v10, %v9698_v59  ;;  %v3471_v30 = vmul.f32 %v5138_v10, %v9695_v21  ;;  %v3340_v37 = vpop.f32.mrb[41].mxu0  ;;  %vm3399_vm15 = vcmp.ge.f32.partialorder %v5138_v10, 0.0  ;;  %v3410_v25 = vmul.f32 %v9698_v59, %v9648_v12 }
 0x968   : > { %v3434_v11 = vmul.f32 %v9698_v59, %v3340_v37  ;;  %v3470_v50 = vmul.f32 %v9695_v21, %v3340_v37  ;;  %vm3398_vm13 = vcmp.ge.f32.partialorder %v3340_v37, 0.0  ;;  %v3417_v12 = vmul.f32 %v9663_v7, %v9698_v59 }
 0x969   : > { %v9752_v41 = vsel %vm3399_vm15, %v3435_v53, %v3471_v30  ;;  %v3478_v33 = vsel %vm3374_vm8, %v3410_v25, %v3446_v26  ;;  %v3414_v7 = vmul.f32 %v9698_v59, %v9660_v6  ;;  %v3450_v62 = vmul.f32 %v9695_v21, %v9660_v6 }
 0x96a   : > { %v9758_v3 = vpop.f32.mrb[42].mxu0  ;;  %v9760_v0 = vsel %vm3398_vm13, %v3434_v11, %v3470_v50  ;;  %v3485_v40 = vsel %vm3381_vm5, %v3417_v12, %v3453_v35  ;;  %v3486_v30 = vsel %vm3382_vm4, %v3418_v32, %v3454_v49  ;;  %v3456_v11 = vmul.f32 %v9695_v21, %v9678_v16 }
 0x96b   : > { %3750 = vperm.xlu0 %6484, %v3476_v13   ;;  %3643 = vperm.xlu1 %6485, %v5135_v46   ;;  %v3437_v1 = vmul.f32 %v9758_v3, %v9698_v59  ;;  %v3473_v47 = vmul.f32 %v9758_v3, %v9695_v21  ;;  %v9766_v55 = vpop.f32.mrb[43].mxu0  ;;  %vm3401_vm14 = vcmp.ge.f32.partialorder %v9758_v3, 0.0  ;;  %v3412_v46 = vmul.f32 %v9698_v59, %v9654_v15 }
 0x96c   : > { %v3436_v19 = vmul.f32 %v9698_v59, %v9766_v55  ;;  %v3472_v39 = vmul.f32 %v9695_v21, %v9766_v55  ;;  %vm3400_vm10 = vcmp.ge.f32.partialorder %v9766_v55, 0.0  ;;  %v3419_v15 = vmul.f32 %v9669_v43, %v9698_v59 }
 0x96d   : > { %v9775_v42 = vsel %vm3401_vm14, %v3437_v1, %v3473_v47  ;;  %v3480_v8 = vsel %vm3376_vm12, %v3412_v46, %v3448_v14  ;;  %v3482_v50 = vsel %vm3378_vm6, %v3414_v7, %v3450_v62  ;;  %vm3379_vm0 = vcmp.ge.f32.partialorder %v9657_v52, 0.0 }
 0x96e   : > { %v9781_v24 = vsel %vm3400_vm10, %v3436_v19, %v3472_v39  ;;  %v3416_v6 = vmul.f32 %v9698_v59, %v9666_v29  ;;  %v3457_v13 = vmul.f32 %v9675_v60, %v9695_v21  ;;  %vm3380_vm15 = vcmp.ge.f32.partialorder %v9666_v29, 0.0 }
 0x96f   : > { %3755 = vperm.xlu0 %6484, %v3477_v31   ;;  %3638 = vperm.xlu1 %6485, %v3330_v17   ;;  %v3449_v17 = vmul.f32 %v9651_v18, %v9695_v21  ;;  %v3451_v18 = vmul.f32 %v9657_v52, %v9695_v21  ;;  %vm3385_vm13 = vcmp.ge.f32.partialorder %v9675_v60, 0.0  ;;  %v3422_v52 = vmul.f32 %v9698_v59, %v9684_v36 }
 0x970   : > { %v3489_v39 = vsel %vm3385_vm13, %v3421_v23, %v3457_v13  ;;  %v3423_v26 = vmul.f32 %v9681_v5, %v9698_v59  ;;  %vm3387_vm14 = vcmp.ge.f32.partialorder %v9681_v5, 0.0  ;;  %v3424_v60 = vmul.f32 %v9698_v59, %v9692_v9 }
 0x971   : > { %v3481_v53 = vsel %vm3377_vm9, %v3413_v56, %v3449_v17  ;;  %v3483_v1 = vsel %vm3379_vm0, %v3415_v34, %v3451_v18  ;;  %v3460_v31 = vmul.f32 %v9695_v21, %v9692_v9  ;;  %vm3388_vm10 = vcmp.ge.f32.partialorder %v9692_v9, 0.0 }
 0x972   : > { %v3425_v20 = vmul.f32 %v9686_v63, %v9698_v59  ;;  %v3462_v46 = vmul.f32 %v9695_v21, %v9703_v51  ;;  %vm3390_vm8 = vcmp.ge.f32.partialorder %v9703_v51, 0.0  ;;  %vm4507_vm7 = vcmask 97280  }
 0x973   : > { %3760 = vperm.xlu0 %6484, %v3478_v33   ;;  %3653 = vperm.xlu1 %6485, %v5138_v10   ;;  %v3455_v10 = vmul.f32 %v9669_v43, %v9695_v21  ;;  %v3452_v43 = vmul.f32 %v9695_v21, %v9666_v29  ;;  %v3459_v29 = vmul.f32 %v9681_v5, %v9695_v21 }
 0x974   : > { %v3461_v33 = vmul.f32 %v9686_v63, %v9695_v21  ;;  %v3492_v14 = vsel %vm3388_vm10, %v3424_v60, %v3460_v31  ;;  %v3426_v5 = vmul.f32 %v9698_v59, %v9703_v51 }
 0x975   : > { %v3487_v61 = vsel %vm3383_vm1, %v3419_v15, %v3455_v10  ;;  %v3484_v19 = vsel %vm3380_vm15, %v3416_v6, %v3452_v43  ;;  %v3491_v38 = vsel %vm3387_vm14, %v3423_v26, %v3459_v29  ;;  %v9925_v10 = vrot.slane %v9623_v27, %v9689_v44 }
 0x976   : > { %v3493_v9 = vsel %vm3389_vm11, %v3425_v20, %v3461_v33  ;;  %v3494_v35 = vsel %vm3390_vm8, %v3426_v5, %v3462_v46 }
 0x977   : > { %3765 = vperm.xlu0 %6484, %v3479_v2   ;;  %3648 = vperm.xlu1 %6485, %v3340_v37   ;;  %v3420_v37 = vmul.f32 %v9698_v59, %v9678_v16  ;;  %v3458_v16 = vmul.f32 %v9695_v21, %v9684_v36 }
 0x979   : > { %v3488_v47 = vsel %vm3384_vm3, %v3420_v37, %v3456_v11  ;;  %v3490_v25 = vsel %vm3386_vm2, %v3422_v52, %v3458_v16 }
 0x97b   : > { %3770 = vperm.xlu0 %6484, %v3480_v8   ;;  %3795 = vperm.xlu1 %6485, %v3485_v40  }
 0x97f   : > { %3775 = vperm.xlu0 %6484, %v3481_v53   ;;  %3800 = vperm.xlu1 %6485, %v3486_v30   ;;  %v9929_v53 = vrot.slane %v9626_v54, %v9689_v44 }
 0x983   : > { %3780 = vperm.xlu0 %6484, %v3482_v50   ;;  %3805 = vperm.xlu1 %6485, %v3487_v61  }
 0x987   : > { %3785 = vperm.xlu0 %6484, %v3483_v1   ;;  %3810 = vperm.xlu1 %6485, %v3488_v47  }
 0x98b   : > { %3790 = vperm.xlu0 %6484, %v3484_v19   ;;  %3815 = vperm.xlu1 %6485, %v3489_v39  }
 0x98f   : > { %3820 = vperm.xlu1 %6485, %v3490_v25  }
 0x992   : > { %v9854_v36 = vpop.permute.xlu0 %3513 }
 0x993   : > { %3825 = vperm.xlu1 %6485, %v3491_v38  }
 0x996   : > { %v9865_v12 = vpop.permute.xlu0 %3508 }
 0x997   : > { %3830 = vperm.xlu1 %6485, %v3492_v14  }
 0x99a   : > { %v9868_v2 = vpop.permute.xlu0 %3523 }
 0x99b   : > { %3835 = vperm.xlu1 %6485, %v3493_v9  }
 0x99e   : > { %v9871_v17 = vpop.permute.xlu0 %3518 }
 0x99f   : > { %3840 = vperm.xlu1 %6485, %v3494_v35  }
 0x9a2   : > { %v9875_v63 = vpop.permute.xlu0 %3533 }
 0x9a3   : > { %3845 = vperm.xlu1 %6485, %v9705_v58  }
 0x9a6   : > { %v9878_v21 = vpop.permute.xlu0 %3528 }
 0x9a7   : > { %3850 = vperm.xlu1 %6485, %v9718_v22  }
 0x9aa   : > { %v9882_v59 = vpop.permute.xlu0 %3543 }
 0x9ab   : > { %3855 = vperm.xlu1 %6485, %v9712_v57  }
 0x9ae   : > { %v9885_v51 = vpop.permute.xlu0 %3538 }
 0x9af   : > { %3860 = vperm.xlu1 %6485, %v9732_v45  }
 0x9b2   : > { %v9889_v58 = vpop.permute.xlu0 %3553 }
 0x9b3   : > { %3865 = vperm.xlu1 %6485, %v9726_v48  }
 0x9b6   : > { %v9892_v22 = vpop.permute.xlu0 %3548 }
 0x9b7   : > { %3870 = vperm.xlu1 %6485, %v9745_v4  }
 0x9ba   : > { %v3564_v45 = vpop.permute.xlu0 %3563 }
 0x9bb   : > { %3875 = vperm.xlu1 %6485, %v9739_v28   ;;  %v3696_v34 = vmul.f32 %v9925_v10, %v3564_v45  ;;  %v3697_v18 = vmul.f32 %v9929_v53, %v3564_v45 }
 0x9be   : > { %v9897_v4 = vpop.permute.xlu0 %3558 }
 0x9bf   : > { %3885 = vperm.xlu1 %6485, %v9752_v41  }
 0x9c2   : > { %v3574_v57 = vpop.permute.xlu1 %3573 }
 0x9c3   : > { %3880 = vperm.xlu1 %6485, %v9760_v0   ;;  %v3700_v1 = vmul.f32 %v9925_v10, %v3574_v57  ;;  %v3701_v52 = vmul.f32 %v9929_v53, %v3574_v57 }
 0x9c6   : > { %v3569_v48 = vpop.permute.xlu1 %3568 }
 0x9c7   : > { %3663 = vperm.xlu1 %6485, %v9758_v3   ;;  %v3698_v61 = vmul.f32 %v9925_v10, %v3569_v48  ;;  %v3699_v43 = vmul.f32 %v9929_v53, %v3569_v48 }
 0x9ca   : > { %v3584_v0 = vpop.permute.xlu0 %3583 }
 0x9cb   : > { %3658 = vperm.xlu1 %6485, %v9766_v55   ;;  %v3579_v28 = vpop.permute.xlu1 %3578  ;;  %v3704_v5 = vmul.f32 %v9925_v10, %v3584_v0  ;;  %v3705_v9 = vmul.f32 %v9929_v53, %v3584_v0 }
 0x9cc   : > { %v3702_v25 = vmul.f32 %v9925_v10, %v3579_v28  ;;  %v3703_v31 = vmul.f32 %v9929_v53, %v3579_v28 }
 0x9ce   : > { %v9905_v3 = vpop.permute.xlu0 %3593 }
 0x9cf   : > { %3895 = vperm.xlu1 %6485, %v9775_v42  }
 0x9d2   : > { %v3589_v55 = vpop.permute.xlu0 %3588 }
 0x9d3   : > { %3890 = vperm.xlu1 %6485, %v9781_v24   ;;  %v3707_v0 = vmul.f32 %v9929_v53, %v3589_v55 }
 0x9d6   : > { %v9899_v41 = vpop.permute.xlu1 %3613  ;;  %v9913_v40 = vpop.permute.xlu0 %3603 }
 0x9da   : > { %v9901_v56 = vpop.permute.xlu1 %3623  ;;  %v9917_v7 = vpop.permute.xlu0 %3598 }
 0x9de   : > { %v9903_v32 = vpop.permute.xlu1 %3618  ;;  %v9931_v30 = vpop.permute.xlu0 %3608 }
 0x9e2   : > { %v9907_v49 = vpop.permute.xlu1 %3633  ;;  %v9937_v27 = vpop.permute.xlu0 %3740 }
 0x9e6   : > { %v9909_v8 = vpop.permute.xlu1 %3628  ;;  %v9941_v26 = vpop.permute.xlu0 %3745 }
 0x9ea   : > { %v9911_v42 = vpop.permute.xlu1 %3643  ;;  %v9947_v35 = vpop.permute.xlu0 %3750 }
 0x9ee   : > { %v9915_v24 = vpop.permute.xlu1 %3638 }
 0x9f2   : > { %v9919_v62 = vpop.permute.xlu1 %3653 }
 0x9f6   : > { %v9921_v15 = vpop.permute.xlu1 %3648 }
 0x9fa   : > { %v3796_v37 = vpop.permute.xlu1 %3795 }
 0x9fb   : > { %v3920_v11 = vsub.f32 %v3696_v34, %v3796_v37  ;;  %v3921_v50 = vsub.f32 %v3697_v18, %v3796_v37  ;;  %v3674_v18 = vmul.f32 %v9925_v10, %v9865_v12  ;;  %v3675_v37 = vmul.f32 %v9929_v53, %v9865_v12 }
 0x9fd   : > { %v4006_v6 = vmul.f32 1.442695, %v3920_v11  ;;  %v4008_v23 = vmul.f32 1.442695, %v3921_v50  ;;  %v3706_v50 = vmul.f32 %v9925_v10, %v3589_v55  ;;  %v3708_v55 = vmul.f32 %v9925_v10, %v9905_v3 }
 0x9fe   : > { %v3801_v13 = vpop.permute.xlu1 %3800 }
 0x9ff   : > { %v3922_v54 = vsub.f32 %v3698_v61, %v3801_v13  ;;  %v3923_v44 = vsub.f32 %v3699_v43, %v3801_v13  ;;  %6487 = vpow2.f32 %v4006_v6  ;;  %v3898_v6 = vsub.f32 %v3674_v18, %v9937_v27 }
 0xa00   : > { %6489 = vpow2.f32 %v4008_v23 }
 0xa01   : > { %v4010_v47 = vmul.f32 1.442695, %v3922_v54  ;;  %v4012_v16 = vmul.f32 1.442695, %v3923_v44 }
 0xa02   : > { %v3806_v19 = vpop.permute.xlu1 %3805 }
 0xa03   : > { %v3924_v39 = vsub.f32 %v3700_v1, %v3806_v19  ;;  %v3925_v29 = vsub.f32 %v3701_v52, %v3806_v19  ;;  %6491 = vpow2.f32 %v4010_v47  ;;  %v3676_v47 = vmul.f32 %v9925_v10, %v9854_v36  ;;  %v9973_v19 = vpop.permute.xlu0 %3755 }
 0xa04   : > { %6493 = vpow2.f32 %v4012_v16  ;;  %v3709_v52 = vmul.f32 %v9929_v53, %v9905_v3  ;;  %v3899_v16 = vsub.f32 %v3675_v37, %v9937_v27 }
 0xa05   : > { %v4014_v60 = vmul.f32 1.442695, %v3924_v39  ;;  %v4016_v38 = vmul.f32 1.442695, %v3925_v29 }
 0xa06   : > { %v3811_v20 = vpop.permute.xlu1 %3810 }
 0xa07   : > { %v3926_v33 = vsub.f32 %v3702_v25, %v3811_v20  ;;  %v3927_v14 = vsub.f32 %v3703_v31, %v3811_v20  ;;  %6495 = vpow2.f32 %v4014_v60  ;;  %v3962_v60 = vmul.f32 1.442695, %v3898_v6 }
 0xa08   : > { %6497 = vpow2.f32 %v4016_v38  ;;  %v3900_v31 = vsub.f32 %v3676_v47, %v9941_v26  ;;  %v10009_v47 = vmul.f32 %v9929_v53, %v9868_v2 }
 0xa09   : > { %v4018_v46 = vmul.f32 1.442695, %v3926_v33  ;;  %v4020_v57 = vmul.f32 1.442695, %v3927_v14  ;;  %v9949_v45 = vpop.eup %6487  ;;  %v3677_v14 = vmul.f32 %v9929_v53, %v9854_v36 }
 0xa0a   : > { %v3816_v48 = vpop.permute.xlu1 %3815  ;;  %v9951_v28 = vpop.eup %6489  ;;  %v3966_v37 = vmul.f32 1.442695, %v3900_v31  ;;  %v3714_v31 = vmul.f32 %v9925_v10, %v9931_v30 }
 0xa0b   : > { %v3928_v34 = vsub.f32 %v3704_v5, %v3816_v48  ;;  %v3929_v11 = vsub.f32 %v3705_v9, %v3816_v48  ;;  %6499 = vpow2.f32 %v4018_v46  ;;  %v4123_v23 = vadd.f32 %v9951_v28, %v9949_v45 }
 0xa0c   : > { %6501 = vpow2.f32 %v4020_v57  ;;  %v3710_v5 = vmul.f32 %v9925_v10, %v9917_v7  ;;  %v3711_v46 = vmul.f32 %v9929_v53, %v9917_v7  ;;  %v3964_v9 = vmul.f32 1.442695, %v3899_v16 }
 0xa0d   : > { %v4022_v61 = vmul.f32 1.442695, %v3928_v34  ;;  %v4024_v43 = vmul.f32 1.442695, %v3929_v11  ;;  %v9962_v54 = vpop.eup %6491  ;;  %4124 = vadd.xlane.f32.xlu0 %v4123_v23  ;;  %v3901_v18 = vsub.f32 %v3677_v14, %v9941_v26  ;;  %v9991_v11 = vpop.permute.xlu0 %3760  ;;  %v3712_v26 = vmul.f32 %v9925_v10, %v9913_v40 }
 0xa0e   : > { %v3821_v13 = vpop.permute.xlu1 %3820  ;;  %v9964_v12 = vpop.eup %6493  ;;  %v3713_v23 = vmul.f32 %v9929_v53, %v9913_v40  ;;  %v3679_v40 = vmul.f32 %v9929_v53, %v9871_v17 }
 0xa0f   : > { %v3930_v44 = vsub.f32 %v3706_v50, %v3821_v13  ;;  %v3931_v1 = vsub.f32 %v3707_v0, %v3821_v13  ;;  %6503 = vpow2.f32 %v4022_v61  ;;  %v4126_v25 = vadd.f32 %v9964_v12, %v9962_v54 }
 0xa10   : > { %6505 = vpow2.f32 %v4024_v43  ;;  %v3680_v0 = vmul.f32 %v9925_v10, %v9868_v2  ;;  %v3678_v43 = vmul.f32 %v9925_v10, %v9871_v17  ;;  %v10020_v2 = vmul.f32 %v9925_v10, %v9875_v63 }
 0xa11   : > { %v4026_v39 = vmul.f32 1.442695, %v3930_v44  ;;  %v4028_v29 = vmul.f32 1.442695, %v3931_v1  ;;  %v9978_v20 = vpop.eup %6495  ;;  %4127 = vadd.xlane.f32.xlu1 %v4126_v25 }
 0xa12   : > { %v3826_v38 = vpop.permute.xlu1 %3825  ;;  %v9980_v33 = vpop.eup %6497 }
 0xa13   : > { %6507 = vpow2.f32 %v4026_v39  ;;  %v3932_v3 = vsub.f32 %v3708_v55, %v3826_v38  ;;  %v3933_v27 = vsub.f32 %v3709_v52, %v3826_v38  ;;  %v4129_v34 = vadd.f32 %v9980_v33, %v9978_v20 }
 0xa14   : > { %6509 = vpow2.f32 %v4028_v29  ;;  %v3968_v55 = vmul.f32 1.442695, %v3901_v18  ;;  %v3902_v52 = vsub.f32 %v3678_v43, %v9947_v35  ;;  %v3715_v38 = vmul.f32 %v9929_v53, %v9931_v30 }
 0xa15   : > { %v4030_v57 = vmul.f32 1.442695, %v3932_v3  ;;  %v4032_v48 = vmul.f32 1.442695, %v3933_v27  ;;  %6511 = vpow2.f32 %v3962_v60  ;;  %v9993_v50 = vpop.eup %6499  ;;  %4130 = vadd.xlane.f32.xlu0 %v4129_v34  ;;  %v10026_v3 = vpop.permute.xlu0 %3765  ;;  %v3903_v27 = vsub.f32 %v3679_v40, %v9947_v35 }
 0xa16   : > { %v3831_v36 = vpop.permute.xlu1 %3830  ;;  %v9997_v6 = vpop.eup %6501  ;;  %v3970_v30 = vmul.f32 1.442695, %v3902_v52 }
 0xa17   : > { %6513 = vpow2.f32 %v4030_v57  ;;  %v3934_v7 = vsub.f32 %v3710_v5, %v3831_v36  ;;  %v3935_v61 = vsub.f32 %v3711_v46, %v3831_v36  ;;  %v4132_v1 = vadd.f32 %v9997_v6, %v9993_v50 }
 0xa18   : > { %6515 = vpow2.f32 %v4032_v48  ;;  %v10037_v57 = vmul.f32 %v9929_v53, %v9875_v63  ;;  %v3904_v48 = vsub.f32 %v3680_v0, %v9973_v19  ;;  %v3716_v63 = vmul.f32 %v9925_v10, %v9899_v41 }
 0xa19   : > { %6517 = vpow2.f32 %v3964_v9  ;;  %v4034_v13 = vmul.f32 1.442695, %v3934_v7  ;;  %v4036_v44 = vmul.f32 1.442695, %v3935_v61  ;;  %v10012_v39 = vpop.eup %6503  ;;  %4133 = vadd.xlane.f32.xlu0 %v4132_v1  ;;  %v3682_v7 = vmul.f32 %v9925_v10, %v9878_v21 }
 0xa1a   : > { %6519 = vpow2.f32 %v3966_v37  ;;  %v3836_v16 = vpop.permute.xlu1 %3835  ;;  %v10016_v60 = vpop.eup %6505  ;;  %v3717_v61 = vmul.f32 %v9929_v53, %v9899_v41  ;;  %v3972_v43 = vmul.f32 1.442695, %v3903_v27  ;;  %v3683_v1 = vmul.f32 %v9929_v53, %v9878_v21 }
 0xa1b   : > { %6521 = vpow2.f32 %v4034_v13  ;;  %v3936_v29 = vsub.f32 %v3712_v26, %v3836_v16  ;;  %v3937_v25 = vsub.f32 %v3713_v23, %v3836_v16  ;;  %v4135_v46 = vadd.f32 %v10016_v60, %v10012_v39  ;;  %v10059_v41 = vpop.permute.xlu0 %3770 }
 0xa1c   : > { %6523 = vpow2.f32 %v4036_v44  ;;  %v3905_v26 = vsub.f32 %v10009_v47, %v9973_v19  ;;  %v3906_v52 = vsub.f32 %v3682_v7, %v9991_v11  ;;  %v10069_v21 = vmul.f32 %v9925_v10, %v9882_v59 }
 0xa1d   : > { %v10028_v17 = vpop.eup %6507  ;;  %v4038_v14 = vmul.f32 1.442695, %v3936_v29  ;;  %v4040_v5 = vmul.f32 1.442695, %v3937_v25  ;;  %6525 = vpow2.f32 %v3968_v55  ;;  %4136 = vadd.xlane.f32.xlu1 %v4135_v46  ;;  %v3974_v55 = vmul.f32 1.442695, %v3904_v48 }
 0xa1e   : > { %v10033_v9 = vpop.eup %6509  ;;  %v3841_v34 = vpop.permute.xlu1 %3840  ;;  %v10081_v48 = vmul.f32 %v9929_v53, %v9882_v59  ;;  %v3720_v59 = vmul.f32 %v9925_v10, %v9901_v56 }
 0xa1f   : > { %6527 = vpow2.f32 %v4038_v14  ;;  %v3938_v18 = vsub.f32 %v3714_v31, %v3841_v34  ;;  %v3939_v35 = vsub.f32 %v3715_v38, %v3841_v34  ;;  %v4138_v37 = vadd.f32 %v10033_v9, %v10028_v17  ;;  %v10042_v36 = vpop.eup %6511 }
 0xa20   : > { %6529 = vpow2.f32 %v4040_v5  ;;  %v3718_v31 = vmul.f32 %v9925_v10, %v9903_v32  ;;  %v3719_v38 = vmul.f32 %v9929_v53, %v9903_v32  ;;  %v3976_v14 = vmul.f32 1.442695, %v3905_v26 }
 0xa21   : > { %v10050_v0 = vpop.eup %6513  ;;  %v4042_v23 = vmul.f32 1.442695, %v3938_v18  ;;  %v4044_v13 = vmul.f32 1.442695, %v3939_v35  ;;  %4139 = vadd.xlane.f32.xlu0 %v4138_v37  ;;  %6531 = vpow2.f32 %v3970_v30  ;;  %v3907_v34 = vsub.f32 %v3683_v1, %v9991_v11  ;;  %v10094_v11 = vpop.permute.xlu0 %3775 }
 0xa22   : > { %v10054_v44 = vpop.eup %6515  ;;  %v3846_v16 = vpop.permute.xlu1 %3845  ;;  %v3978_v18 = vmul.f32 1.442695, %v3906_v52  ;;  %v3687_v52 = vmul.f32 %v9929_v53, %v9885_v51 }
 0xa23   : > { %v10061_v40 = vpop.eup %6517  ;;  %6533 = vpow2.f32 %v4042_v23  ;;  %v3940_v29 = vsub.f32 %v3716_v63, %v3846_v16  ;;  %v3941_v19 = vsub.f32 %v3717_v61, %v3846_v16  ;;  %v4141_v47 = vadd.f32 %v10054_v44, %v10050_v0 }
 0xa24   : > { %v10065_v25 = vpop.eup %6519  ;;  %6535 = vpow2.f32 %v4044_v13  ;;  %v3686_v61 = vmul.f32 %v9925_v10, %v9885_v51  ;;  %v3908_v23 = vsub.f32 %v10020_v2, %v10026_v3  ;;  %v3980_v16 = vmul.f32 1.442695, %v3907_v34 }
 0xa25   : > { %v10075_v27 = vpop.eup %6521  ;;  %6537 = vpow2.f32 %v3972_v43  ;;  %v4046_v5 = vmul.f32 1.442695, %v3940_v29  ;;  %v4048_v46 = vmul.f32 1.442695, %v3941_v19  ;;  %4142 = vadd.xlane.f32.xlu1 %v4141_v47  ;;  %v3721_v43 = vmul.f32 %v9929_v53, %v9901_v56 }
 0xa26   : > { %v10077_v30 = vpop.eup %6523  ;;  %6539 = vpow2.f32 %v3974_v55  ;;  %v3851_v35 = vpop.permute.xlu1 %3850  ;;  %v3909_v56 = vsub.f32 %v10037_v57, %v10026_v3  ;;  %v3722_v51 = vmul.f32 %v9925_v10, %v9909_v8  ;;  %v3982_v57 = vmul.f32 1.442695, %v3908_v23 }
 0xa27   : > { %6541 = vpow2.f32 %v4046_v5  ;;  %v3942_v32 = vsub.f32 %v3718_v31, %v3851_v35  ;;  %v3943_v37 = vsub.f32 %v3719_v38, %v3851_v35  ;;  %v4144_v7 = vadd.f32 %v10077_v30, %v10075_v27  ;;  %v10086_v63 = vpop.eup %6525 }
 0xa28   : > { %6543 = vpow2.f32 %v4048_v46  ;;  %v10112_v38 = vmul.f32 %v9925_v10, %v9889_v58  ;;  %v3910_v5 = vsub.f32 %v3686_v61, %v10059_v41  ;;  %v3984_v35 = vmul.f32 1.442695, %v3909_v56 }
 0xa29   : > { %v10096_v26 = vpop.eup %6527  ;;  %6545 = vpow2.f32 %v3976_v14  ;;  %v4050_v13 = vmul.f32 1.442695, %v3942_v32  ;;  %v4052_v1 = vmul.f32 1.442695, %v3943_v37  ;;  %4145 = vadd.xlane.f32.xlu0 %v4144_v7  ;;  %v3723_v14 = vmul.f32 %v9929_v53, %v9909_v8  ;;  %v10124_v37 = vpop.permute.xlu0 %3780 }
 0xa2a   : > { %v10100_v55 = vpop.eup %6529  ;;  %6547 = vpow2.f32 %v3978_v18  ;;  %v3856_v29 = vpop.permute.xlu1 %3855  ;;  %v3911_v32 = vsub.f32 %v3687_v52, %v10059_v41  ;;  %v4090_v8 = vadd.f32 %v10061_v40, %v10042_v36  ;;  %v3724_v41 = vmul.f32 %v9925_v10, %v9907_v49 }
 0xa2b   : > { %6549 = vpow2.f32 %v4050_v13  ;;  %v3944_v19 = vsub.f32 %v3720_v59, %v3856_v29  ;;  %v3945_v47 = vsub.f32 %v3721_v43, %v3856_v29  ;;  %v4147_v2 = vadd.f32 %v10100_v55, %v10096_v26  ;;  %v10108_v31 = vpop.eup %6531 }
 0xa2c   : > { %6551 = vpow2.f32 %v4052_v1  ;;  %v10136_v1 = vmul.f32 %v9929_v53, %v9889_v58  ;;  %v3725_v52 = vmul.f32 %v9929_v53, %v9907_v49  ;;  %v3986_v56 = vmul.f32 1.442695, %v3910_v5 }
 0xa2d   : > { %v10118_v3 = vpop.eup %6533  ;;  %v4054_v46 = vmul.f32 1.442695, %v3944_v19  ;;  %v4056_v34 = vmul.f32 1.442695, %v3945_v47  ;;  %4148 = vadd.xlane.f32.xlu1 %v4147_v2  ;;  %6553 = vpow2.f32 %v3980_v16  ;;  %v3988_v58 = vmul.f32 1.442695, %v3911_v32 }
 0xa2e   : > { %v10121_v18 = vpop.eup %6535  ;;  %v3861_v7 = vpop.permute.xlu1 %3860  ;;  %v3912_v2 = vsub.f32 %v10069_v21, %v10094_v11  ;;  %v4093_v49 = vadd.f32 %v10086_v63, %v10065_v25  ;;  %v3691_v21 = vmul.f32 %v9929_v53, %v9892_v22  ;;  %v3726_v32 = vmul.f32 %v9925_v10, %v9915_v24 }
 0xa2f   : > { %v10128_v59 = vpop.eup %6537  ;;  %6555 = vpow2.f32 %v4054_v46  ;;  %v3946_v43 = vsub.f32 %v3722_v51, %v3861_v7  ;;  %v3947_v61 = vsub.f32 %v3723_v14, %v3861_v7  ;;  %v4150_v23 = vadd.f32 %v10121_v18, %v10118_v3  ;;  %v10162_v7 = vpop.permute.xlu0 %3785 }
 0xa30   : > { %v10132_v13 = vpop.eup %6539  ;;  %6557 = vpow2.f32 %v4056_v34 }
 0xa31   : > { %11604 = vst [vmem:[#allocation18_spill] sm:$0xff] %v10132_v13  ;;  %v10142_v16 = vpop.eup %6541  ;;  %6559 = vpow2.f32 %v3982_v57  ;;  %v4058_v29 = vmul.f32 1.442695, %v3946_v43  ;;  %v4060_v19 = vmul.f32 1.442695, %v3947_v61  ;;  %4151 = vadd.xlane.f32.xlu0 %v4150_v23  ;;  %4091 = vadd.xlane.f32.xlu1 %v4090_v8  ;;  %v3727_v43 = vmul.f32 %v9929_v53, %v9915_v24 }
 0xa32   : > { %11605 = vst [vmem:[#allocation19_spill] sm:$0xff] %v10142_v16  ;;  %v10144_v47 = vpop.eup %6543  ;;  %6561 = vpow2.f32 %v3984_v35  ;;  %v3866_v51 = vpop.permute.xlu1 %3865  ;;  %v3690_v35 = vmul.f32 %v9925_v10, %v9892_v22  ;;  %v3913_v22 = vsub.f32 %v10081_v48, %v10094_v11  ;;  %v3729_v48 = vmul.f32 %v9929_v53, %v9911_v42 }
 0xa33   : > { %v10150_v14 = vpop.eup %6545  ;;  %6563 = vpow2.f32 %v4058_v29  ;;  %v3948_v57 = vsub.f32 %v3724_v41, %v3866_v51  ;;  %v3949_v5 = vsub.f32 %v3725_v52, %v3866_v51  ;;  %v4153_v46 = vadd.f32 %v10144_v47, %v10142_v16 }
 0xa34   : > { %v10154_v34 = vpop.eup %6547  ;;  %6565 = vpow2.f32 %v4060_v19  ;;  %v3990_v52 = vmul.f32 1.442695, %v3912_v2  ;;  %v4096_v19 = vadd.f32 %v10128_v59, %v10108_v31  ;;  %v3914_v2 = vsub.f32 %v3690_v35, %v10124_v37 }
 0xa35   : > { %v10164_v8 = vpop.eup %6549  ;;  %6567 = vpow2.f32 %v3986_v56  ;;  %v4062_v61 = vmul.f32 1.442695, %v3948_v57  ;;  %v4064_v23 = vmul.f32 1.442695, %v3949_v5  ;;  %4154 = vadd.xlane.f32.xlu0 %v4153_v46  ;;  %4094 = vadd.xlane.f32.xlu1 %v4093_v49  ;;  %v3694_v49 = vmul.f32 %v9925_v10, %v9897_v4 }
 0xa36   : > { %11606 = vst [vmem:[#allocation3_spill] sm:$0xff] %v10164_v8  ;;  %v10168_v41 = vpop.eup %6551  ;;  %6569 = vpow2.f32 %v3988_v58  ;;  %v3871_v29 = vpop.permute.xlu1 %3870  ;;  %v3728_v58 = vmul.f32 %v9925_v10, %v9911_v42  ;;  %v4099_v46 = vadd.f32 %v10150_v14, %v10132_v13  ;;  %v3916_v42 = vsub.f32 %v10112_v38, %v10162_v7 }
 0xa37   : > { %6571 = vpow2.f32 %v4062_v61  ;;  %v3950_v51 = vsub.f32 %v3726_v32, %v3871_v29  ;;  %v3951_v16 = vsub.f32 %v3727_v43, %v3871_v29  ;;  %v4156_v24 = vadd.f32 %v10168_v41, %v10164_v8  ;;  %v10176_v56 = vpop.eup %6553 }
 0xa38   : > { %6573 = vpow2.f32 %v4064_v23  ;;  %v3992_v43 = vmul.f32 1.442695, %v3913_v22  ;;  %v3915_v61 = vsub.f32 %v3691_v21, %v10124_v37  ;;  %v3791_v23 = vpop.permute.xlu0 %3790  ;;  %v3695_v22 = vmul.f32 %v9929_v53, %v9897_v4 }
 0xa39   : > { %v10184_v11 = vpop.eup %6555  ;;  %v4066_v57 = vmul.f32 1.442695, %v3950_v51  ;;  %v4068_v5 = vmul.f32 1.442695, %v3951_v16  ;;  %4157 = vadd.xlane.f32.xlu0 %v4156_v24  ;;  %4097 = vadd.xlane.f32.xlu1 %v4096_v19  ;;  %6575 = vpow2.f32 %v3990_v52  ;;  %v3917_v37 = vsub.f32 %v10136_v1, %v10162_v7 }
 0xa3a   : > { %11607 = vst [vmem:[#allocation4_spill] sm:$0xff] %v10184_v11  ;;  %v10189_v32 = vpop.eup %6557  ;;  %v3876_v29 = vpop.permute.xlu1 %3875  ;;  %v3994_v21 = vmul.f32 1.442695, %v3914_v2  ;;  %v3918_v52 = vsub.f32 %v3694_v49, %v3791_v23  ;;  %v3919_v4 = vsub.f32 %v3695_v22, %v3791_v23  ;;  %v3998_v1 = vmul.f32 1.442695, %v3916_v42 }
 0xa3b   : > { %v10194_v8 = vpop.eup %6559  ;;  %6577 = vpow2.f32 %v4066_v57  ;;  %v3952_v16 = vsub.f32 %v3728_v58, %v3876_v29  ;;  %v3953_v35 = vsub.f32 %v3729_v48, %v3876_v29  ;;  %v4159_v19 = vadd.f32 %v10189_v32, %v10184_v11 }
 0xa3c   : > { %v10198_v51 = vpop.eup %6561  ;;  %6579 = vpow2.f32 %v4068_v5  ;;  %v3732_v48 = vmul.f32 %v9925_v10, %v9919_v62  ;;  %v3996_v29 = vmul.f32 1.442695, %v3915_v61  ;;  %v4102_v49 = vadd.f32 %v10176_v56, %v10154_v34 }
 0xa3d   : > { %v10204_v38 = vpop.eup %6563  ;;  %v4070_v24 = vmul.f32 1.442695, %v3952_v16  ;;  %v4072_v57 = vmul.f32 1.442695, %v3953_v35  ;;  %4160 = vadd.xlane.f32.xlu0 %v4159_v19  ;;  %4100 = vadd.xlane.f32.xlu1 %v4099_v46  ;;  %6581 = vpow2.f32 %v3992_v43  ;;  %v3733_v5 = vmul.f32 %v9929_v53, %v9919_v62 }
 0xa3e   : > { %v10206_v58 = vpop.eup %6565  ;;  %v3886_v11 = vpop.permute.xlu1 %3885  ;;  %v3730_v46 = vmul.f32 %v9925_v10, %v9921_v15  ;;  %v4000_v43 = vmul.f32 1.442695, %v3917_v37  ;;  %v3731_v42 = vmul.f32 %v9929_v53, %v9921_v15  ;;  %v4002_v23 = vmul.f32 1.442695, %v3918_v52 }
 0xa3f   : > { %v10210_v13 = vpop.eup %6567  ;;  %6583 = vpow2.f32 %v4070_v24  ;;  %v4162_v7 = vadd.f32 %v10206_v58, %v10204_v38  ;;  %v3956_v16 = vsub.f32 %v3732_v48, %v3886_v11  ;;  %v4004_v19 = vmul.f32 1.442695, %v3919_v4 }
 0xa40   : > { %11608 = vst [vmem:[#allocation20_spill] sm:$0xff] %v10210_v13  ;;  %v10216_v2 = vpop.eup %6569  ;;  %6585 = vpow2.f32 %v4072_v57  ;;  %v3957_v62 = vsub.f32 %v3733_v5, %v3886_v11  ;;  %v4105_v37 = vadd.f32 %v10198_v51, %v10194_v8 }
 0xa41   : > { %v10222_v61 = vpop.eup %6571  ;;  %6587 = vpow2.f32 %v3994_v21  ;;  %4163 = vadd.xlane.f32.xlu0 %v4162_v7  ;;  %4103 = vadd.xlane.f32.xlu1 %v4102_v49  ;;  %v4078_v48 = vmul.f32 1.442695, %v3956_v16  ;;  %v4108_v5 = vadd.f32 %v10216_v2, %v10210_v13 }
 0xa42   : > { %v10226_v35 = vpop.eup %6573  ;;  %6589 = vpow2.f32 %v3996_v29  ;;  %v3881_v22 = vpop.permute.xlu1 %3880 }
 0xa43   : > { %6591 = vpow2.f32 %v3998_v1  ;;  %v3954_v24 = vsub.f32 %v3730_v46, %v3881_v22  ;;  %v3955_v57 = vsub.f32 %v3731_v42, %v3881_v22  ;;  %v4165_v15 = vadd.f32 %v10226_v35, %v10222_v61  ;;  %v10232_v21 = vpop.eup %6575 }
 0xa44   : > { %11609 = vst [vmem:[#allocation5_spill] sm:$0xff] %v10232_v21  ;;  %6593 = vpow2.f32 %v4000_v43  ;;  %v4080_v1 = vmul.f32 1.442695, %v3957_v62 }
 0xa45   : > { %v10234_v52 = vpop.eup %6577  ;;  %6595 = vpow2.f32 %v4002_v23  ;;  %v4074_v29 = vmul.f32 1.442695, %v3954_v24  ;;  %v4076_v4 = vmul.f32 1.442695, %v3955_v57  ;;  %4166 = vadd.xlane.f32.xlu0 %v4165_v15  ;;  %4106 = vadd.xlane.f32.xlu1 %v4105_v37 }
 0xa46   : > { %11610 = vst [vmem:[#allocation7_spill] sm:$0xff] %v10234_v52  ;;  %v10236_v11 = vpop.eup %6579  ;;  %6597 = vpow2.f32 %v4004_v19  ;;  %v3664_v7 = vpop.permute.xlu1 %3663 }
 0xa47   : > { %6599 = vpow2.f32 %v4074_v29  ;;  %v4168_v49 = vadd.f32 %v10236_v11, %v10234_v52  ;;  %v10242_v46 = vpop.eup %6581 }
 0xa48   : > { %11611 = vst [vmem:[#allocation22_spill] sm:$0xff] %v10242_v46  ;;  %6601 = vpow2.f32 %v4076_v4  ;;  %v4111_v62 = vadd.f32 %v10242_v46, %v10232_v21 }
 0xa49   : > { %v10244_v43 = vpop.eup %6583  ;;  %6603 = vpow2.f32 %v4078_v48  ;;  %4169 = vadd.xlane.f32.xlu0 %v4168_v49  ;;  %4109 = vadd.xlane.f32.xlu1 %v4108_v5  ;;  %v3736_v48 = vmul.f32 %v9925_v10, %v3664_v7 }
 0xa4a   : > { %11612 = vst [vmem:[#allocation9_spill] sm:$0xff] %v10244_v43  ;;  %v10246_v42 = vpop.eup %6585  ;;  %6605 = vpow2.f32 %v4080_v1  ;;  %v3659_v23 = vpop.permute.xlu1 %3658  ;;  %v3737_v1 = vmul.f32 %v9929_v53, %v3664_v7 }
 0xa4b   : > { %11613 = vst [vmem:[#allocation23_spill] sm:$0xff] %v10246_v42  ;;  %v10248_v16 = vpop.eup %6587  ;;  %v4171_v19 = vadd.f32 %v10246_v42, %v10244_v43  ;;  %v3734_v5 = vmul.f32 %v9925_v10, %v3659_v23 }
 0xa4c   : > { %11614 = vst [vmem:[#allocation48_spill] sm:$0xff] %v10248_v16  ;;  %v10254_v22 = vpop.eup %6589 }
 0xa4d   : > { %11615 = vst [vmem:[#allocation21_spill] sm:$0xff] %v10254_v22  ;;  %v10256_v37 = vpop.eup %6591  ;;  %4172 = vadd.xlane.f32.xlu0 %v4171_v19  ;;  %4112 = vadd.xlane.f32.xlu1 %v4111_v62  ;;  %v4114_v29 = vadd.f32 %v10254_v22, %v10248_v16  ;;  %v3735_v19 = vmul.f32 %v9929_v53, %v3659_v23 }
 0xa4e   : > { %v10258_v24 = vpop.eup %6593  ;;  %v3896_v57 = vpop.permute.xlu1 %3895 }
 0xa4f   : > { %v10260_v15 = vpop.eup %6595  ;;  %v3960_v62 = vsub.f32 %v3736_v48, %v3896_v57  ;;  %v3961_v21 = vsub.f32 %v3737_v1, %v3896_v57  ;;  %v4117_v7 = vadd.f32 %v10258_v24, %v10256_v37 }
 0xa50   : > { %v10265_v4 = vpop.eup %6597 }
 0xa51   : > { %v10268_v49 = vpop.eup %6599  ;;  %4115 = vadd.xlane.f32.xlu1 %v4114_v29  ;;  %v4086_v10 = vmul.f32 1.442695, %v3960_v62  ;;  %v4088_v48 = vmul.f32 1.442695, %v3961_v21 }
 0xa52   : > { %v10272_v43 = vpop.eup %6601  ;;  %v3891_v46 = vpop.permute.xlu1 %3890 }
 0xa53   : > { %v10274_v42 = vpop.eup %6603  ;;  %v3958_v52 = vsub.f32 %v3734_v5, %v3891_v46  ;;  %v3959_v16 = vsub.f32 %v3735_v19, %v3891_v46  ;;  %v4174_v22 = vadd.f32 %v10272_v43, %v10268_v49  ;;  %v4120_v46 = vadd.f32 %v10265_v4, %v10260_v15 }
 0xa54   : > { %v10280_v13 = vpop.eup %6605 }
 0xa55   : > { %v4082_v53 = vmul.f32 1.442695, %v3958_v52  ;;  %v4084_v23 = vmul.f32 1.442695, %v3959_v16  ;;  %4175 = vadd.xlane.f32.xlu0 %v4174_v22  ;;  %4118 = vadd.xlane.f32.xlu1 %v4117_v7  ;;  %v4177_v57 = vadd.f32 %v10280_v13, %v10274_v42 }
 0xa57   : > { %6607 = vpow2.f32 %v4082_v53 }
 0xa58   : > { %6609 = vpow2.f32 %v4084_v23 }
 0xa59   : > { %6611 = vpow2.f32 %v4086_v10  ;;  %4178 = vadd.xlane.f32.xlu0 %v4177_v57  ;;  %4121 = vadd.xlane.f32.xlu1 %v4120_v46 }
 0xa5a   : > { %6613 = vpow2.f32 %v4088_v48 }
 0xa61   : > { %v10286_v29 = vpop.eup %6607 }
 0xa62   : > { %v10288_v1 = vpop.eup %6609 }
 0xa63   : > { %v10290_v52 = vpop.eup %6611  ;;  %v4180_v21 = vadd.f32 %v10288_v1, %v10286_v29 }
 0xa64   : > { %v10294_v16 = vpop.eup %6613 }
 0xa65   : > { %4181 = vadd.xlane.f32.xlu0 %v4180_v21  ;;  %v4183_v22 = vadd.f32 %v10294_v16, %v10290_v52 }
 0xa69   : > { %4184 = vadd.xlane.f32.xlu0 %v4183_v22 }
 0xa9a   : > { %v4125_v5 = vpop.xlane.xlu0 %4124 }
 0xa9b   : > { %6615 = vrcp.f32 %v4125_v5 }
 0xa9e   : > { %v4128_v19 = vpop.xlane.xlu1 %4127 }
 0xa9f   : > { %6617 = vrcp.f32 %v4128_v19 }
 0xaa2   : > { %v4131_v62 = vpop.xlane.xlu0 %4130 }
 0xaa3   : > { %6619 = vrcp.f32 %v4131_v62 }
 0xaa5   : > { %v6616_v7 = vpop.eup %6615 }
 0xaa6   : > { %v4134_v10 = vpop.xlane.xlu0 %4133  ;;  %v4241_v53 = vmul.f32 %v6616_v7, %v9951_v28  ;;  %v4240_v23 = vmul.f32 %v6616_v7, %v9949_v45 }
 0xaa7   : > { %6621 = vrcp.f32 %v4134_v10 }
 0xaa8   : > { %4401 = vmatprep.mubr.f32.mxu1 %v4241_v53 }
 0xaa9   : > { %v6618_v48 = vpop.eup %6617  ;;  %4402 = vmatmul.mubr.f32.vlgmr.msra.gmra.mrb[4].mxu1 %v4240_v23 }
 0xaaa   : > { %v4137_v57 = vpop.xlane.xlu1 %4136  ;;  %v4243_v46 = vmul.f32 %v6618_v48, %v9964_v12  ;;  %v4242_v21 = vmul.f32 %v6618_v48, %v9962_v54 }
 0xaab   : > { %6623 = vrcp.f32 %v4137_v57 }
 0xaac   : > { %4406 = vmatprep.mubr.f32.mxu1 %v4243_v46 }
 0xaad   : > { %v6620_v5 = vpop.eup %6619  ;;  %4407 = vmatmul.mubr.f32.gmra.mrb[6].mxu1 %v4242_v21 }
 0xaae   : > { %v4140_v22 = vpop.xlane.xlu0 %4139  ;;  %v4245_v19 = vmul.f32 %v6620_v5, %v9980_v33  ;;  %v4244_v28 = vmul.f32 %v6620_v5, %v9978_v20 }
 0xaaf   : > { %6625 = vrcp.f32 %v4140_v22 }
 0xab0   : > { %4411 = vmatprep.mubr.f32.mxu1 %v4245_v19 }
 0xab1   : > { %v6622_v62 = vpop.eup %6621  ;;  %4412 = vmatmul.mubr.f32.gmra.mrb[8].mxu1 %v4244_v28 }
 0xab2   : > { %v4143_v45 = vpop.xlane.xlu1 %4142  ;;  %v4247_v7 = vmul.f32 %v6622_v62, %v9997_v6  ;;  %v4246_v12 = vmul.f32 %v6622_v62, %v9993_v50 }
 0xab3   : > { %6627 = vrcp.f32 %v4143_v45 }
 0xab4   : > { %4416 = vmatprep.mubr.f32.mxu1 %v4247_v7 }
 0xab5   : > { %v6624_v10 = vpop.eup %6623  ;;  %4417 = vmatmul.mubr.f32.gmra.mrb[10].mxu1 %v4246_v12 }
 0xab6   : > { %v4146_v54 = vpop.xlane.xlu0 %4145  ;;  %v4249_v53 = vmul.f32 %v6624_v10, %v10016_v60  ;;  %v4248_v33 = vmul.f32 %v6624_v10, %v10012_v39 }
 0xab7   : > { %6629 = vrcp.f32 %v4146_v54 }
 0xab8   : > { %4421 = vmatprep.mubr.f32.mxu1 %v4249_v53 }
 0xab9   : > { %v6626_v23 = vpop.eup %6625  ;;  %4422 = vmatmul.mubr.f32.gmra.mrb[12].mxu1 %v4248_v33 }
 0xaba   : > { %v4149_v20 = vpop.xlane.xlu1 %4148  ;;  %v4251_v48 = vmul.f32 %v6626_v23, %v10033_v9  ;;  %v4250_v6 = vmul.f32 %v6626_v23, %v10028_v17 }
 0xabb   : > { %6631 = vrcp.f32 %v4149_v20 }
 0xabc   : > { %4426 = vmatprep.mubr.f32.mxu1 %v4251_v48 }
 0xabd   : > { %v6628_v57 = vpop.eup %6627  ;;  %4427 = vmatmul.mubr.f32.gmra.mrb[14].mxu1 %v4250_v6 }
 0xabe   : > { %v4152_v50 = vpop.xlane.xlu0 %4151  ;;  %v4092_v46 = vpop.xlane.xlu1 %4091  ;;  %v4253_v21 = vmul.f32 %v6628_v57, %v10054_v44  ;;  %v4252_v39 = vmul.f32 %v6628_v57, %v10050_v0 }
 0xabf   : > { %6633 = vrcp.f32 %v4152_v50 }
 0xac0   : > { %6635 = vrcp.f32 %v4092_v46  ;;  %4431 = vmatprep.mubr.f32.mxu1 %v4253_v21 }
 0xac1   : > { %v6630_v60 = vpop.eup %6629  ;;  %4432 = vmatmul.mubr.f32.gmra.mrb[16].mxu1 %v4252_v39 }
 0xac2   : > { %v4155_v22 = vpop.xlane.xlu0 %4154  ;;  %v4095_v5 = vpop.xlane.xlu1 %4094  ;;  %v4255_v9 = vmul.f32 %v6630_v60, %v10077_v30  ;;  %v4254_v17 = vmul.f32 %v6630_v60, %v10075_v27 }
 0xac3   : > { %6637 = vrcp.f32 %v4155_v22 }
 0xac4   : > { %6639 = vrcp.f32 %v4095_v5  ;;  %4436 = vmatprep.mubr.f32.mxu1 %v4255_v9 }
 0xac5   : > { %v6632_v19 = vpop.eup %6631  ;;  %4437 = vmatmul.mubr.f32.gmra.mrb[18].mxu1 %v4254_v17  ;;  %v11618_v17 = vld [vmem:[#allocation18_spill] sm:$0xff] }
 0xac6   : > { %v4158_v28 = vpop.xlane.xlu0 %4157  ;;  %v4098_v44 = vpop.xlane.xlu1 %4097  ;;  %v4257_v45 = vmul.f32 %v6632_v19, %v10100_v55  ;;  %v4256_v0 = vmul.f32 %v6632_v19, %v10096_v26 }
 0xac7   : > { %6641 = vrcp.f32 %v4158_v28 }
 0xac8   : > { %6643 = vrcp.f32 %v4098_v44  ;;  %4441 = vmatprep.mubr.f32.mxu1 %v4257_v45 }
 0xac9   : > { %v6634_v62 = vpop.eup %6633  ;;  %4442 = vmatmul.mubr.f32.gmra.mrb[20].mxu1 %v4256_v0 }
 0xaca   : > { %v6636_v7 = vpop.eup %6635  ;;  %v4161_v30 = vpop.xlane.xlu0 %4160  ;;  %v4259_v54 = vmul.f32 %v6634_v62, %v10121_v18  ;;  %v4258_v55 = vmul.f32 %v6634_v62, %v10118_v3 }
 0xacb   : > { %v4101_v12 = vpop.xlane.xlu1 %4100  ;;  %v4218_v27 = vmul.f32 %v6636_v7, %v10042_v36  ;;  %6645 = vrcp.f32 %v4161_v30  ;;  %v4219_v10 = vmul.f32 %v6636_v7, %v10061_v40  ;;  %v11616_v40 = vld [vmem:[#allocation19_spill] sm:$0xff] }
 0xacc   : > { %6647 = vrcp.f32 %v4101_v12  ;;  %4446 = vmatprep.mubr.f32.mxu1 %v4259_v54 }
 0xacd   : > { %v6638_v53 = vpop.eup %6637  ;;  %4346 = vmatprep.mubr.f32.mxu0 %v4219_v10  ;;  %4447 = vmatmul.mubr.f32.gmra.mrb[22].mxu1 %v4258_v55 }
 0xace   : > { %v6640_v26 = vpop.eup %6639  ;;  %4347 = vmatmul.mubr.f32.vlgmr.msra.gmra.mrb[44].mxu0 %v4218_v27  ;;  %v4164_v33 = vpop.xlane.xlu0 %4163  ;;  %v4261_v20 = vmul.f32 %v6638_v53, %v10144_v47  ;;  %v4260_v48 = vmul.f32 %v6638_v53, %v11616_v40  ;;  %v11622_v40 = vld [vmem:[#allocation23_spill] sm:$0xff] }
 0xacf   : > { %v4104_v23 = vpop.xlane.xlu1 %4103  ;;  %6649 = vrcp.f32 %v4164_v33  ;;  %v4221_v18 = vmul.f32 %v6640_v26, %v10086_v63  ;;  %v4220_v36 = vmul.f32 %v6640_v26, %v10065_v25  ;;  %v11617_v25 = vld [vmem:[#allocation3_spill] sm:$0xff]  ;;  %v11620_v33 = vld [vmem:[#allocation20_spill] sm:$0xff] }
 0xad0   : > { %6651 = vrcp.f32 %v4104_v23  ;;  %4451 = vmatprep.mubr.f32.mxu1 %v4261_v20 }
 0xad1   : > { %v6642_v6 = vpop.eup %6641  ;;  %4351 = vmatprep.mubr.f32.mxu0 %v4221_v18  ;;  %4452 = vmatmul.mubr.f32.gmra.mrb[24].mxu1 %v4260_v48 }
 0xad2   : > { %v6644_v3 = vpop.eup %6643  ;;  %4352 = vmatmul.mubr.f32.gmra.mrb[46].mxu0 %v4220_v36  ;;  %v4167_v57 = vpop.xlane.xlu0 %4166  ;;  %v4263_v46 = vmul.f32 %v6642_v6, %v10168_v41  ;;  %v4262_v21 = vmul.f32 %v6642_v6, %v11617_v25  ;;  %v11627_v25 = vld [vmem:[#allocation48_spill] sm:$0xff] }
 0xad3   : > { %v4107_v50 = vpop.xlane.xlu1 %4106  ;;  %6653 = vrcp.f32 %v4167_v57  ;;  %v4223_v47 = vmul.f32 %v6644_v3, %v10128_v59  ;;  %v4222_v63 = vmul.f32 %v6644_v3, %v10108_v31  ;;  %v11619_v31 = vld [vmem:[#allocation4_spill] sm:$0xff]  ;;  %v11624_v3 = vld [vmem:[#allocation5_spill] sm:$0xff] }
 0xad4   : > { %6655 = vrcp.f32 %v4107_v50  ;;  %4456 = vmatprep.mubr.f32.mxu1 %v4263_v46  ;;  %v11625_v57 = vld [vmem:[#allocation9_spill] sm:$0xff] }
 0xad5   : > { %v6646_v39 = vpop.eup %6645  ;;  %4356 = vmatprep.mubr.f32.mxu0 %v4223_v47  ;;  %4457 = vmatmul.mubr.f32.gmra.mrb[26].mxu1 %v4262_v21  ;;  %v11626_v47 = vld [vmem:[#allocation21_spill] sm:$0xff] }
 0xad6   : > { %v6648_v60 = vpop.eup %6647  ;;  %4357 = vmatmul.mubr.f32.gmra.mrb[48].mxu0 %v4222_v63  ;;  %v4170_v22 = vpop.xlane.xlu0 %4169  ;;  %v4265_v9 = vmul.f32 %v6646_v39, %v10189_v32  ;;  %v4264_v19 = vmul.f32 %v6646_v39, %v11619_v31 }
 0xad7   : > { %v4110_v5 = vpop.xlane.xlu1 %4109  ;;  %6657 = vrcp.f32 %v4170_v22  ;;  %v4225_v41 = vmul.f32 %v6648_v60, %v10150_v14  ;;  %v4224_v59 = vmul.f32 %v6648_v60, %v11618_v17 }
 0xad8   : > { %6659 = vrcp.f32 %v4110_v5  ;;  %4461 = vmatprep.mubr.f32.mxu1 %v4265_v9 }
 0xad9   : > { %v6650_v28 = vpop.eup %6649  ;;  %4361 = vmatprep.mubr.f32.mxu0 %v4225_v41  ;;  %4462 = vmatmul.mubr.f32.gmra.mrb[28].mxu1 %v4264_v19 }
 0xada   : > { %v6652_v44 = vpop.eup %6651  ;;  %4362 = vmatmul.mubr.f32.gmra.mrb[50].mxu0 %v4224_v59  ;;  %v4173_v45 = vpop.xlane.xlu0 %4172  ;;  %v4267_v62 = vmul.f32 %v6650_v28, %v10206_v58  ;;  %v4266_v7 = vmul.f32 %v6650_v28, %v10204_v38 }
 0xadb   : > { %v4113_v0 = vpop.xlane.xlu1 %4112  ;;  %6661 = vrcp.f32 %v4173_v45  ;;  %v4227_v32 = vmul.f32 %v6652_v44, %v10176_v56  ;;  %v4226_v14 = vmul.f32 %v6652_v44, %v10154_v34 }
 0xadc   : > { %6663 = vrcp.f32 %v4113_v0  ;;  %4466 = vmatprep.mubr.f32.mxu1 %v4267_v62 }
 0xadd   : > { %v6654_v30 = vpop.eup %6653  ;;  %4366 = vmatprep.mubr.f32.mxu0 %v4227_v32  ;;  %4467 = vmatmul.mubr.f32.gmra.mrb[30].mxu1 %v4266_v7 }
 0xade   : > { %v6656_v12 = vpop.eup %6655  ;;  %4367 = vmatmul.mubr.f32.gmra.mrb[52].mxu0 %v4226_v14  ;;  %v4269_v27 = vmul.f32 %v6654_v30, %v10226_v35  ;;  %v4268_v34 = vmul.f32 %v6654_v30, %v10222_v61 }
 0xadf   : > { %v4116_v54 = vpop.xlane.xlu1 %4115  ;;  %v4229_v58 = vmul.f32 %v6656_v12, %v10198_v51  ;;  %v4228_v10 = vmul.f32 %v6656_v12, %v10194_v8  ;;  %v11621_v8 = vld [vmem:[#allocation7_spill] sm:$0xff] }
 0xae0   : > { %6665 = vrcp.f32 %v4116_v54  ;;  %4471 = vmatprep.mubr.f32.mxu1 %v4269_v27 }
 0xae1   : > { %v6658_v56 = vpop.eup %6657  ;;  %4371 = vmatprep.mubr.f32.mxu0 %v4229_v58  ;;  %4472 = vmatmul.mubr.f32.gmra.mrb[32].mxu1 %v4268_v34 }
 0xae2   : > { %v6660_v38 = vpop.eup %6659  ;;  %4372 = vmatmul.mubr.f32.gmra.mrb[54].mxu0 %v4228_v10  ;;  %v4176_v55 = vpop.xlane.xlu0 %4175  ;;  %v4271_v26 = vmul.f32 %v6658_v56, %v10236_v11  ;;  %v4270_v51 = vmul.f32 %v6658_v56, %v11621_v8  ;;  %v11623_v11 = vld [vmem:[#allocation22_spill] sm:$0xff] }
 0xae3   : > { %v4119_v53 = vpop.xlane.xlu1 %4118  ;;  %6667 = vrcp.f32 %v4176_v55  ;;  %v4231_v35 = vmul.f32 %v6660_v38, %v10216_v2  ;;  %v4230_v23 = vmul.f32 %v6660_v38, %v11620_v33 }
 0xae4   : > { %6669 = vrcp.f32 %v4119_v53  ;;  %4476 = vmatprep.mubr.f32.mxu1 %v4271_v26 }
 0xae5   : > { %v6662_v20 = vpop.eup %6661  ;;  %4376 = vmatprep.mubr.f32.mxu0 %v4231_v35  ;;  %4477 = vmatmul.mubr.f32.gmra.mrb[34].mxu1 %v4270_v51 }
 0xae6   : > { %v6664_v61 = vpop.eup %6663  ;;  %4377 = vmatmul.mubr.f32.gmra.mrb[56].mxu0 %v4230_v23  ;;  %v4179_v18 = vpop.xlane.xlu0 %4178  ;;  %v4273_v48 = vmul.f32 %v6662_v20, %v11622_v40  ;;  %v4272_v50 = vmul.f32 %v6662_v20, %v11625_v57 }
 0xae7   : > { %v4122_v36 = vpop.xlane.xlu1 %4121  ;;  %6671 = vrcp.f32 %v4179_v18  ;;  %v4233_v6 = vmul.f32 %v6664_v61, %v11623_v11  ;;  %v4232_v2 = vmul.f32 %v6664_v61, %v11624_v3 }
 0xae8   : > { %6673 = vrcp.f32 %v4122_v36  ;;  %4481 = vmatprep.mubr.f32.mxu1 %v4273_v48 }
 0xae9   : > { %4381 = vmatprep.mubr.f32.mxu0 %v4233_v6  ;;  %4482 = vmatmul.mubr.f32.gmra.mrb[36].mxu1 %v4272_v50 }
 0xaea   : > { %v6666_v46 = vpop.eup %6665  ;;  %4382 = vmatmul.mubr.f32.gmra.mrb[58].mxu0 %v4232_v2 }
 0xaeb   : > { %v4235_v63 = vmul.f32 %v6666_v46, %v11626_v47  ;;  %v4234_v21 = vmul.f32 %v6666_v46, %v11627_v25 }
 0xaed   : > { %4386 = vmatprep.mubr.f32.mxu0 %v4235_v63  ;;  %v6668_v39 = vpop.eup %6667 }
 0xaee   : > { %v6670_v60 = vpop.eup %6669  ;;  %4387 = vmatmul.mubr.f32.gmra.mrb[60].mxu0 %v4234_v21  ;;  %v4275_v22 = vmul.f32 %v6668_v39, %v10272_v43  ;;  %v4274_v5 = vmul.f32 %v6668_v39, %v10268_v49 }
 0xaef   : > { %v4237_v9 = vmul.f32 %v6670_v60, %v10258_v24  ;;  %v4236_v41 = vmul.f32 %v6670_v60, %v10256_v37 }
 0xaf0   : > { %4486 = vmatprep.mubr.f32.mxu1 %v4275_v22 }
 0xaf1   : > { %v6672_v17 = vpop.eup %6671  ;;  %4391 = vmatprep.mubr.f32.mxu0 %v4237_v9  ;;  %4487 = vmatmul.mubr.f32.gmra.mrb[38].mxu1 %v4274_v5 }
 0xaf2   : > { %v6674_v59 = vpop.eup %6673  ;;  %4392 = vmatmul.mubr.f32.gmra.mrb[62].mxu0 %v4236_v41  ;;  %v4182_v31 = vpop.xlane.xlu0 %4181  ;;  %v4277_v19 = vmul.f32 %v6672_v17, %v10280_v13  ;;  %v4276_v28 = vmul.f32 %v6672_v17, %v10274_v42 }
 0xaf3   : > { %6675 = vrcp.f32 %v4182_v31  ;;  %v4239_v43 = vmul.f32 %v6674_v59, %v10265_v4  ;;  %v4238_v49 = vmul.f32 %v6674_v59, %v10260_v15 }
 0xaf4   : > { %4491 = vmatprep.mubr.f32.mxu1 %v4277_v19 }
 0xaf5   : > { %4396 = vmatprep.mubr.f32.mxu0 %v4239_v43  ;;  %4492 = vmatmul.mubr.f32.gmra.mrb[40].mxu1 %v4276_v28 }
 0xaf6   : > { %4397 = vmatmul.mubr.f32.gmra.mrb[64].mxu0 %v4238_v49  ;;  %v4185_v37 = vpop.xlane.xlu0 %4184 }
 0xaf7   : > { %6677 = vrcp.f32 %v4185_v37 }
 0xafd   : > { %v6676_v24 = vpop.eup %6675 }
 0xafe   : > { %v4279_v44 = vmul.f32 %v6676_v24, %v10288_v1  ;;  %v4278_v45 = vmul.f32 %v6676_v24, %v10286_v29 }
 0xb00   : > { %4496 = vmatprep.mubr.f32.mxu1 %v4279_v44 }
 0xb01   : > { %v6678_v13 = vpop.eup %6677  ;;  %4497 = vmatmul.mubr.f32.gmra.mrb[42].mxu1 %v4278_v45 }
 0xb02   : > { %v4281_v42 = vmul.f32 %v6678_v13, %v10294_v16  ;;  %v4280_v4 = vmul.f32 %v6678_v13, %v10290_v52 }
 0xb04   : > { %4501 = vmatprep.mubr.f32.mxu1 %v4281_v42 }
 0xb05   : > { %4502 = vmatmul.mubr.f32.gmra.mrb[44].mxu1 %v4280_v4 }
 0xb7c   : > { %v4403_v15 = vpop.f32.mrb[4].mxu1 }
 0xb7d   : > { %4519 = vst.msk [vmem:[%s10366_s25 + $0x58] sm:$0xff] %vm4507_vm7, %v4403_v15  ;;  %v4405_v29 = vpop.f32.mrb[5].mxu1 }
 0xb80   : > { %v4408_v1 = vpop.f32.mrb[6].mxu1 }
 0xb81   : > { %4520 = vst.msk [vmem:[%s10366_s25 + $0x60] sm:$0xff] %vm4507_vm7, %v4408_v1  ;;  %v4410_v52 = vpop.f32.mrb[7].mxu1 }
 0xb84   : > { %v4413_v16 = vpop.f32.mrb[8].mxu1 }
 0xb85   : > { %4521 = vst.msk [vmem:[%s10366_s25 + $0x68] sm:$0xff] %vm4507_vm7, %v4413_v16  ;;  %v4415_v0 = vpop.f32.mrb[9].mxu1 }
 0xb88   : > { %v4418_v62 = vpop.f32.mrb[10].mxu1 }
 0xb89   : > { %4522 = vst.msk [vmem:[%s10366_s25 + $0x70] sm:$0xff] %vm4507_vm7, %v4418_v62  ;;  %v4420_v32 = vpop.f32.mrb[11].mxu1 }
 0xb8c   : > { %v4423_v14 = vpop.f32.mrb[12].mxu1 }
 0xb8d   : > { %4523 = vst.msk [vmem:[%s10366_s25 + $0x78] sm:$0xff] %vm4507_vm7, %v4423_v14  ;;  %v4425_v7 = vpop.f32.mrb[13].mxu1 }
 0xb90   : > { %v4428_v30 = vpop.f32.mrb[14].mxu1 }
 0xb91   : > { %4524 = vst.msk [vmem:[%s10366_s25 + $0x80] sm:$0xff] %vm4507_vm7, %v4428_v30  ;;  %v4430_v12 = vpop.f32.mrb[15].mxu1 }
 0xb94   : > { %v4433_v54 = vpop.f32.mrb[16].mxu1 }
 0xb95   : > { %4525 = vst.msk [vmem:[%s10366_s25 + $0x88] sm:$0xff] %vm4507_vm7, %v4433_v54  ;;  %v4435_v27 = vpop.f32.mrb[17].mxu1 }
 0xb98   : > { %v4438_v58 = vpop.f32.mrb[18].mxu1 }
 0xb99   : > { %4526 = vst.msk [vmem:[%s10366_s25 + $0x90] sm:$0xff] %vm4507_vm7, %v4438_v58  ;;  %v4440_v10 = vpop.f32.mrb[19].mxu1 }
 0xb9c   : > { %v4443_v34 = vpop.f32.mrb[20].mxu1 }
 0xb9d   : > { %4527 = vst.msk [vmem:[%s10366_s25 + $0x98] sm:$0xff] %vm4507_vm7, %v4443_v34  ;;  %v4445_v56 = vpop.f32.mrb[21].mxu1 }
 0xba0   : > { %v4448_v53 = vpop.f32.mrb[22].mxu1 }
 0xba1   : > { %v4348_v38 = vpop.f32.mrb[44].mxu0  ;;  %4528 = vst.msk [vmem:[%s10366_s25 + $0xa0] sm:$0xff] %vm4507_vm7, %v4448_v53  ;;  %v4450_v26 = vpop.f32.mrb[23].mxu1 }
 0xba2   : > { %4508 = vst.msk [vmem:[%s10366_s25] sm:$0xff] %vm4507_vm7, %v4348_v38  ;;  %v4350_v55 = vpop.f32.mrb[45].mxu0 }
 0xba4   : > { %v4453_v23 = vpop.f32.mrb[24].mxu1 }
 0xba5   : > { %v4353_v35 = vpop.f32.mrb[46].mxu0  ;;  %4529 = vst.msk [vmem:[%s10366_s25 + $0xa8] sm:$0xff] %vm4507_vm7, %v4453_v23  ;;  %v4455_v8 = vpop.f32.mrb[25].mxu1 }
 0xba6   : > { %4509 = vst.msk [vmem:[%s10366_s25 + $0x8] sm:$0xff] %vm4507_vm7, %v4353_v35  ;;  %v4355_v33 = vpop.f32.mrb[47].mxu0 }
 0xba8   : > { %v4458_v61 = vpop.f32.mrb[26].mxu1 }
 0xba9   : > { %v4358_v51 = vpop.f32.mrb[48].mxu0  ;;  %4530 = vst.msk [vmem:[%s10366_s25 + $0xb0] sm:$0xff] %vm4507_vm7, %v4458_v61  ;;  %v4460_v18 = vpop.f32.mrb[27].mxu1 }
 0xbaa   : > { %4510 = vst.msk [vmem:[%s10366_s25 + $0x10] sm:$0xff] %vm4507_vm7, %v4358_v51  ;;  %v4360_v20 = vpop.f32.mrb[49].mxu0 }
 0xbac   : > { %v4463_v48 = vpop.f32.mrb[28].mxu1 }
 0xbad   : > { %v4363_v36 = vpop.f32.mrb[50].mxu0  ;;  %4531 = vst.msk [vmem:[%s10366_s25 + $0xb8] sm:$0xff] %vm4507_vm7, %v4463_v48  ;;  %v4465_v11 = vpop.f32.mrb[29].mxu1 }
 0xbae   : > { %4511 = vst.msk [vmem:[%s10366_s25 + $0x18] sm:$0xff] %vm4507_vm7, %v4363_v36  ;;  %v4365_v40 = vpop.f32.mrb[51].mxu0 }
 0xbb0   : > { %v4468_v2 = vpop.f32.mrb[30].mxu1 }
 0xbb1   : > { %v4368_v6 = vpop.f32.mrb[52].mxu0  ;;  %4532 = vst.msk [vmem:[%s10366_s25 + $0xc0] sm:$0xff] %vm4507_vm7, %v4468_v2  ;;  %v4470_v57 = vpop.f32.mrb[31].mxu1 }
 0xbb2   : > { %4512 = vst.msk [vmem:[%s10366_s25 + $0x20] sm:$0xff] %vm4507_vm7, %v4368_v6  ;;  %v4370_v3 = vpop.f32.mrb[53].mxu0 }
 0xbb4   : > { %v4473_v47 = vpop.f32.mrb[32].mxu1 }
 0xbb5   : > { %v4373_v50 = vpop.f32.mrb[54].mxu0  ;;  %4533 = vst.msk [vmem:[%s10366_s25 + $0xc8] sm:$0xff] %vm4507_vm7, %v4473_v47  ;;  %v4475_v63 = vpop.f32.mrb[33].mxu1 }
 0xbb6   : > { %4513 = vst.msk [vmem:[%s10366_s25 + $0x28] sm:$0xff] %vm4507_vm7, %v4373_v50  ;;  %v4375_v46 = vpop.f32.mrb[55].mxu0 }
 0xbb8   : > { %v4478_v39 = vpop.f32.mrb[34].mxu1 }
 0xbb9   : > { %v4378_v25 = vpop.f32.mrb[56].mxu0  ;;  %4534 = vst.msk [vmem:[%s10366_s25 + $0xd0] sm:$0xff] %vm4507_vm7, %v4478_v39  ;;  %v4480_v60 = vpop.f32.mrb[35].mxu1 }
 0xbba   : > { %4514 = vst.msk [vmem:[%s10366_s25 + $0x30] sm:$0xff] %vm4507_vm7, %v4378_v25  ;;  %v4380_v21 = vpop.f32.mrb[57].mxu0 }
 0xbbc   : > { %v4483_v9 = vpop.f32.mrb[36].mxu1 }
 0xbbd   : > { %v4383_v22 = vpop.f32.mrb[58].mxu0  ;;  %4535 = vst.msk [vmem:[%s10366_s25 + $0xd8] sm:$0xff] %vm4507_vm7, %v4483_v9  ;;  %v4485_v41 = vpop.f32.mrb[37].mxu1 }
 0xbbe   : > { %4515 = vst.msk [vmem:[%s10366_s25 + $0x38] sm:$0xff] %vm4507_vm7, %v4383_v22  ;;  %v4385_v5 = vpop.f32.mrb[59].mxu0 }
 0xbc1   : > { %v4388_v17 = vpop.f32.mrb[60].mxu0 }
 0xbc2   : > { %4516 = vst.msk [vmem:[%s10366_s25 + $0x40] sm:$0xff] %vm4507_vm7, %v4388_v17  ;;  %v4390_v59 = vpop.f32.mrb[61].mxu0 }
 0xbc4   : > { %v4488_v31 = vpop.f32.mrb[38].mxu1 }
 0xbc5   : > { %v4393_v19 = vpop.f32.mrb[62].mxu0  ;;  %4536 = vst.msk [vmem:[%s10366_s25 + $0xe0] sm:$0xff] %vm4507_vm7, %v4488_v31  ;;  %v4490_v28 = vpop.f32.mrb[39].mxu1 }
 0xbc6   : > { %4517 = vst.msk [vmem:[%s10366_s25 + $0x48] sm:$0xff] %vm4507_vm7, %v4393_v19  ;;  %v4395_v43 = vpop.f32.mrb[63].mxu0 }
 0xbc8   : > { %v4493_v49 = vpop.f32.mrb[40].mxu1 }
 0xbc9   : > { %v4398_v37 = vpop.f32.mrb[64].mxu0  ;;  %4537 = vst.msk [vmem:[%s10366_s25 + $0xe8] sm:$0xff] %vm4507_vm7, %v4493_v49  ;;  %v4495_v24 = vpop.f32.mrb[41].mxu1 }
 0xbca   : > { %4518 = vst.msk [vmem:[%s10366_s25 + $0x50] sm:$0xff] %vm4507_vm7, %v4398_v37  ;;  %v4400_v44 = vpop.f32.mrb[65].mxu0 }
 0xbd4   : > { %v4498_v45 = vpop.f32.mrb[42].mxu1 }
 0xbd5   : > { %4538 = vst.msk [vmem:[%s10366_s25 + $0xf0] sm:$0xff] %vm4507_vm7, %v4498_v45  ;;  %v4500_v13 = vpop.f32.mrb[43].mxu1 }
 0xbd8   : > { %v4503_v42 = vpop.f32.mrb[44].mxu1 }
 0xbd9   : > { %4539 = vst.msk [vmem:[%s10366_s25 + $0xf8] sm:$0xff] %vm4507_vm7, %v4503_v42  ;;  %v4505_v4 = vpop.f32.mrb[45].mxu1 }
 0xbda PF: > { %s15_s15 = sadd.s32 1, %s6686_s15  }
 0xbdb   : > { %p12_p4 = scmp.ge.s32.totalorder %s15_s15, 4  }
 0xbdd   :  { %14 = sbr.rel (!%p12_p4) target bundleno = 1 (0x1), region = 74 }

</bundles_post_ra>
